<compile_context>
chip_gen: v5e
topology: v5e:2x2
jax: 0.10.0
libtpu: 0.0.40
codegen_flags: <defaults>
</compile_context>

<pallas_src>
import math

import jax
import jax.numpy as jnp
from jax.experimental import pallas as pl
from jax.experimental.pallas import tpu as pltpu


# ----------------------------------------------------------------------------------
# Pallas kernels
# ----------------------------------------------------------------------------------

def _make_matmul_kernel(relu: bool, mode: str):
    """out = act(W @ P + bias [+ Wd @ Pd | + residual]) in the swapped layout.

    W: (Cout, K) bf16 (BN scale pre-folded), P: (K, Mblk) bf16, bias: (Cout, 1) f32,
    out: (Cout, Mblk).  f32 accumulation on the MXU; ReLU / residual / fused
    downsample handled in the epilogue so each BasicBlock tail is ONE kernel.
    """
    def _finish(acc, o_ref):
        if relu:
            acc = jnp.maximum(acc, 0.0)
        o_ref[...] = acc.astype(o_ref.dtype)

    if mode == "down":
        def kernel(w_ref, p_ref, b_ref, wd_ref, pd_ref, o_ref):
            acc = jnp.dot(w_ref[...], p_ref[...], preferred_element_type=jnp.float32)
            acc = acc + jnp.dot(wd_ref[...], pd_ref[...],
                                preferred_element_type=jnp.float32)
            _finish(acc + b_ref[...], o_ref)
    elif mode == "residual":
        def kernel(w_ref, p_ref, b_ref, r_ref, o_ref):
            acc = jnp.dot(w_ref[...], p_ref[...], preferred_element_type=jnp.float32)
            _finish(acc + b_ref[...] + r_ref[...].astype(jnp.float32), o_ref)
    else:
        def kernel(w_ref, p_ref, b_ref, o_ref):
            acc = jnp.dot(w_ref[...], p_ref[...], preferred_element_type=jnp.float32)
            _finish(acc + b_ref[...], o_ref)
    return kernel


def _maxpool_kernel(ph_ref, o_ref):
    """3x3 / stride-2 max pool from a 2x2 stride-phase decomposition.

    ph_ref: (4*Hh, Wh, C, N) -- four stride-2 phases of the (-inf padded) input,
            concatenated along the leading (untiled) dim so every window slice is
            on untiled dims (no sublane/lane relayouts).
    o_ref : (OH, OW, C, N).
    """
    oh, ow = o_ref.shape[0], o_ref.shape[1]
    hh = ph_ref.shape[0] // 4
    result = None
    for i in range(3):
        for j in range(3):
            p = (i % 2) * 2 + (j % 2)          # which phase this tap lives in
            oi, oj = i // 2, j // 2            # offset inside the phase
            tap = ph_ref[p * hh + oi:p * hh + oi + oh, oj:oj + ow, :, :]
            result = tap if result is None else jnp.maximum(result, tap)
    o_ref[...] = result.astype(o_ref.dtype)


# ----------------------------------------------------------------------------------
# Pallas wrappers
# ----------------------------------------------------------------------------------

def matmul_bias_act(w, p, bias, *, residual=None, down=None, relu=False,
                    out_dtype=jnp.bfloat16):
    """Swapped fused matmul: w (Cout, K) bf16, p (K, M) bf16, bias (Cout, 1) f32.

    down     : optional (wd (Cout, Kd), pd (Kd, M)) second matmul (fused downsample).
    residual : optional (Cout, M) added before the activation.
    Returns (Cout, M) in out_dtype.
    """
    assert not (residual is not None and down is not None)
    cout, k = w.shape
    _, m = p.shape

    # Adaptive lane tile: never pad tiny M (late layers / FC) up to 128.
    if m >= 512 and m % 256 == 0:
        block_n = 256            # 256-wide tiles feed the v6e/v7x MXU fully
    elif m >= 128:
        block_n = 128
    else:
        block_n = m              # full (small) block, no padding at all
    mp = ((m + block_n - 1) // block_n) * block_n
    if mp != m:
        p = jnp.pad(p, ((0, 0), (0, mp - m)))
        if residual is not None:
            residual = jnp.pad(residual, ((0, 0), (0, mp - m)))
        if down is not None:
            wd, pd = down
            down = (wd, jnp.pad(pd, ((0, 0), (0, mp - m))))

    in_specs = [
        pl.BlockSpec((cout, k), lambda i: (0, 0)),
        pl.BlockSpec((k, block_n), lambda i: (0, i)),
        pl.BlockSpec((cout, 1), lambda i: (0, 0)),
    ]
    args = [w, p, bias]
    mode = "plain"
    if down is not None:
        wd, pd = down
        kd = wd.shape[1]
        in_specs += [pl.BlockSpec((cout, kd), lambda i: (0, 0)),
                     pl.BlockSpec((kd, block_n), lambda i: (0, i))]
        args += [wd, pd]
        mode = "down"
    elif residual is not None:
        in_specs.append(pl.BlockSpec((cout, block_n), lambda i: (0, i)))
        args.append(residual)
        mode = "residual"

    out = pl.pallas_call(
        _make_matmul_kernel(relu, mode),
        out_shape=jax.ShapeDtypeStruct((cout, mp), out_dtype),
        grid=(mp // block_n,),
        in_specs=in_specs,
        out_specs=pl.BlockSpec((cout, block_n), lambda i: (0, i)),
        compiler_params=pltpu.CompilerParams(dimension_semantics=("parallel",)),
    )(*args)
    return out[:, :m] if mp != m else out


def _im2col_t(x, kh, kw, stride, padding):
    """x: (C, N, H, W) channels-major -> transposed patches (kh*kw*C, N*OH*OW), bf16."""
    x = x.astype(jnp.bfloat16)
    if padding > 0:
        x = jnp.pad(x, ((0, 0), (0, 0), (padding, padding), (padding, padding)))
    c, n, h, w = x.shape
    oh = (h - kh) // stride + 1
    ow = (w - kw) // stride + 1
    taps = [x[:, :, i:i + stride * oh:stride, j:j + stride * ow:stride]
            for i in range(kh) for j in range(kw)]          # each (C, N, OH, OW)
    pt = jnp.concatenate(taps, axis=0).reshape(kh * kw * c, n * oh * ow)
    return pt, (n, oh, ow)


def conv_bn_act(x, w, bias, *, stride, padding, kh, kw, relu,
                residual=None, down=None, out_dtype=jnp.bfloat16):
    """Conv2d(no bias) + folded BN [+ fused downsample | + residual] [+ ReLU].

    x: (Cin, N, H, W) channels-major; returns (Cout, N, OH, OW)."""
    pt, (n, oh, ow) = _im2col_t(x, kh, kw, stride, padding)
    cout = w.shape[0]
    res_flat = (residual.reshape(residual.shape[0], -1)
                if residual is not None else None)
    out = matmul_bias_act(w, pt, bias, residual=res_flat, down=down,
                          relu=relu, out_dtype=out_dtype)
    return out.reshape(cout, n, oh, ow)


def maxpool_3x3_s2_p1(x):
    """nn.MaxPool2d(kernel_size=3, stride=2, padding=1) on (C, N, H, W).

    The padded activation is split into its four stride-2 phases (same total size,
    no 9x tap stack through HBM) and the 3x3 window max is taken in-kernel.  At
    ImageNet scale this would additionally be tiled over C via the grid."""
    c, n, h, w = x.shape
    oh = (h + 2 - 3) // 2 + 1
    ow = (w + 2 - 3) // 2 + 1
    neg = float("-inf")
    xp = jnp.pad(x, ((0, 0), (0, 0), (1, 1), (1, 1)), constant_values=neg)
    hp, wp = h + 2, w + 2
    xp = jnp.pad(xp, ((0, 0), (0, 0), (0, hp % 2), (0, wp % 2)), constant_values=neg)
    hp, wp = hp + hp % 2, wp + wp % 2
    hh, wh = hp // 2, wp // 2
    # (4*Hh, Wh, C, N): window offsets land on untiled leading dims only.
    phases = jnp.concatenate(
        [xp[:, :, a::2, b::2].transpose(2, 3, 0, 1) for a in (0, 1) for b in (0, 1)],
        axis=0)
    out = pl.pallas_call(
        _maxpool_kernel,
        out_shape=jax.ShapeDtypeStruct((oh, ow, c, n), x.dtype),
        grid=(1,),
        in_specs=[pl.BlockSpec((4 * hh, wh, c, n), lambda i: (0, 0, 0, 0))],
        out_specs=pl.BlockSpec((oh, ow, c, n), lambda i: (0, 0, 0, 0)),
    )(phases)
    return out.transpose(2, 3, 0, 1)                         # -> (C, N, OH, OW)


# ----------------------------------------------------------------------------------
# ResNet (BasicBlock) forward built from the fused kernels
# ----------------------------------------------------------------------------------

def basic_block(x, p):
    """torchvision BasicBlock (skips=True, last_bn_off=False), channels-major layout."""
    s = p["stride"]
    out = conv_bn_act(x, p["w1"], p["b1"], stride=s, padding=1, kh=3, kw=3, relu=True)
    if "wd" in p:
        # conv2 + bn2 + downsample(1x1 conv + bn) + add + relu: ONE kernel.
        cin = x.shape[0]
        pd = x[:, :, ::s, ::s].astype(jnp.bfloat16).reshape(cin, -1)
        out = conv_bn_act(out, p["w2"], p["b2"] + p["bd"], stride=1, padding=1,
                          kh=3, kw=3, relu=True, down=(p["wd"], pd))
    else:
        # conv2 + bn2 + identity add + relu: ONE kernel.
        out = conv_bn_act(out, p["w2"], p["b2"], stride=1, padding=1,
                          kh=3, kw=3, relu=True, residual=x.astype(jnp.bfloat16))
    return out


def resnet_forward(x_nchw, params):
    # NCHW (PyTorch) -> channels-major CNHW so conv outputs (Cout, N*OH*OW) are
    # lane-dense even for Cout = 16..128.
    x = jnp.transpose(x_nchw, (1, 0, 2, 3))
    x = conv_bn_act(x, params["conv1_w"], params["bn1_b"],
                    stride=2, padding=3, kh=7, kw=7, relu=True)
    x = maxpool_3x3_s2_p1(x)
    for layer_name in ("layer1", "layer2", "layer3", "layer4"):
        for blk in params[layer_name]:
            x = basic_block(x, blk)
    # AdaptiveAvgPool2d((1,1)) + flatten: plain jnp (a kernel here is pure overhead).
    pooled = jnp.mean(x.astype(jnp.float32), axis=(2, 3))            # (C, N)
    # FC in the same swapped layout: logits^T = W_fc @ pooled + b  -- no padding.
    logits_t = matmul_bias_act(params["fc_w"], pooled.astype(jnp.bfloat16),
                               params["fc_b"], relu=False, out_dtype=jnp.float32)
    return logits_t.T                                                # (N, num_classes)


# ----------------------------------------------------------------------------------
# Deterministic parameter construction (matches the module's __init__ shapes/inits)
# ----------------------------------------------------------------------------------

def make_params(key, layers=(1, 1, 1, 1), width_scale=0.25, num_classes=10):
    eps = 1e-5
    keys = iter(jax.random.split(key, 256))

    def folded_conv_w(cout, cin, kh, kw):
        # kaiming_normal_(mode='fan_out', nonlinearity='relu'): std = sqrt(2/(cout*kh*kw))
        std = math.sqrt(2.0 / (cout * kh * kw))
        w = jax.random.normal(next(keys), (cout, cin, kh, kw), jnp.float32) * std
        # Fold BN (gamma=1, running_var=1): per-channel scale 1/sqrt(1+eps).
        scale = jnp.full((cout, 1, 1, 1), 1.0 / math.sqrt(1.0 + eps), jnp.float32)
        w = w * scale
        # (Cout, Cin, KH, KW) -> (Cout, KH*KW*Cin), tap-major to match _im2col_t rows.
        return (jnp.transpose(w, (0, 2, 3, 1))
                .reshape(cout, kh * kw * cin).astype(jnp.bfloat16))

    def bn_bias(c):
        # beta - running_mean * scale = 0 under the deterministic init; kept general.
        return jnp.zeros((c, 1), jnp.float32)

    inplanes = int(64 * width_scale)
    params = {
        "conv1_w": folded_conv_w(inplanes, 3, 7, 7),
        "bn1_b": bn_bias(inplanes),
    }

    layer_cfg = [
        (int(64 * width_scale), 1, layers[0]),
        (int(128 * width_scale), 2, layers[1]),
        (int(256 * width_scale), 2, layers[2]),
        (int(512 * width_scale), 2, layers[3]),
    ]
    for li, (planes, stride, nblocks) in enumerate(layer_cfg, start=1):
        blocks = []
        for b in range(nblocks):
            s = stride if b == 0 else 1
            blk = {
                "stride": s,
                "w1": folded_conv_w(planes, inplanes, 3, 3),
                "b1": bn_bias(planes),
                "w2": folded_conv_w(planes, planes, 3, 3),
                "b2": bn_bias(planes),
            }
            if s != 1 or inplanes != planes:      # BasicBlock.expansion == 1
                blk["wd"] = folded_conv_w(planes, inplanes, 1, 1)
                blk["bd"] = bn_bias(planes)
            blocks.append(blk)
            inplanes = planes
        params[f"layer{li}"] = blocks

    # nn.Linear default init: U(-1/sqrt(fan_in), 1/sqrt(fan_in)) for weight and bias.
    fc_in = inplanes                               # = int(512*width_scale) * expansion
    bound = 1.0 / math.sqrt(fc_in)
    params["fc_w"] = jax.random.uniform(next(keys), (num_classes, fc_in), jnp.float32,
                                        minval=-bound, maxval=bound).astype(jnp.bfloat16)
    params["fc_b"] = jax.random.uniform(next(keys), (num_classes, 1), jnp.float32,
                                        minval=-bound, maxval=bound)
    return params


# ----------------------------------------------------------------------------------

if __name__ == "__main__":
    key = jax.random.PRNGKey(0)
    pkey, xkey = jax.random.split(key)

    # ResNet(BasicBlock, layers=[1,1,1,1], width_scale=0.25, num_classes=10)
    params = make_params(pkey, layers=(1, 1, 1, 1), width_scale=0.25, num_classes=10)

    # Small NCHW input (PyTorch convention): batch=2, 3 channels, 32x32.
    x = jax.random.normal(xkey, (2, 3, 32, 32), jnp.float32)

    fwd = jax.jit(lambda inp: resnet_forward(inp, params))
    logits = fwd(x)
    jax.block_until_ready(logits)
    assert logits.shape == (2, 10), logits.shape
    assert bool(jnp.all(jnp.isfinite(logits)))
    print("KERNEL_OK")
</pallas_src>

<mosaic_0001>
module attributes {stable_mosaic.version = 11 : i64} {
  func.func @kernel(%arg0: i32, %arg1: memref<16x147xbf16, #tpu.memory_space<vmem>>, %arg2: memref<147x256xbf16, #tpu.memory_space<vmem>>, %arg3: memref<16x1xf32, #tpu.memory_space<vmem>>, %arg4: memref<16x256xbf16, #tpu.memory_space<vmem>>) attributes {dimension_semantics = [#tpu.dimension_semantics<parallel>], iteration_bounds = array<i64: 2>, scalar_prefetch = 0 : i64, scratch_operands = 0 : i64, tpu.core_type = #tpu.core_type<tc>, window_params = [{pipeline_mode = #tpu.pipeline_mode<synchronous>, transform_indices = @transform_0, window_bounds = array<i64: 16, 147>}, {transform_indices = @transform_1, window_bounds = array<i64: 147, 256>}, {pipeline_mode = #tpu.pipeline_mode<synchronous>, transform_indices = @transform_2, window_bounds = array<i64: 16, 1>}, {transform_indices = @transform_3, window_bounds = array<i64: 16, 256>}]} {
    %c0 = arith.constant 0 : index
    %c0_0 = arith.constant 0 : index
    %0 = vector.load %arg1[%c0, %c0_0] : memref<16x147xbf16, #tpu.memory_space<vmem>>, vector<16x147xbf16>
    %c0_1 = arith.constant 0 : index
    %c0_2 = arith.constant 0 : index
    %1 = vector.load %arg2[%c0_1, %c0_2] : memref<147x256xbf16, #tpu.memory_space<vmem>>, vector<147x256xbf16>
    %cst = arith.constant dense<0.000000e+00> : vector<16x256xf32>
    %2 = tpu.matmul %0, %1, %cst {dimension_numbers = #tpu.dot_dimension_numbers<[1], [0], [0], [1], [0, 0, 1, 1], [], []>} : vector<16x147xbf16>, vector<147x256xbf16>, vector<16x256xf32> -> vector<16x256xf32>
    %c0_3 = arith.constant 0 : index
    %c0_4 = arith.constant 0 : index
    %3 = vector.load %arg3[%c0_3, %c0_4] : memref<16x1xf32, #tpu.memory_space<vmem>>, vector<16x1xf32>
    %4 = vector.broadcast %3 : vector<16x1xf32> to vector<16x256xf32>
    %5 = arith.addf %2, %4 : vector<16x256xf32>
    %cst_5 = arith.constant 0.000000e+00 : f32
    %6 = vector.broadcast %cst_5 : f32 to vector<16x256xf32>
    %7 = arith.maximumf %5, %6 : vector<16x256xf32>
    %8 = arith.truncf %7 : vector<16x256xf32> to vector<16x256xbf16>
    %c0_6 = arith.constant 0 : index
    %c0_7 = arith.constant 0 : index
    %9 = vector.load %arg4[%c0_6, %c0_7] : memref<16x256xbf16, #tpu.memory_space<vmem>>, vector<16x256xbf16>
    tpu.vector_store %arg4[%c0_6, %c0_7], %8 {strides = array<i32>} : memref<16x256xbf16, #tpu.memory_space<vmem>>, vector<16x256xbf16>,
    return
  }
  func.func @transform_0(%arg0: i32) -> (i32, i32) {
    %c0_i32 = arith.constant 0 : i32
    %c0_i32_0 = arith.constant 0 : i32
    %c0_i32_1 = arith.constant 0 : i32
    return %c0_i32, %c0_i32_0 : i32, i32
  }
  func.func @transform_1(%arg0: i32) -> (i32, i32) {
    %c0_i32 = arith.constant 0 : i32
    %c0_i32_0 = arith.constant 0 : i32
    return %c0_i32, %arg0 : i32, i32
  }
  func.func @transform_2(%arg0: i32) -> (i32, i32) {
    %c0_i32 = arith.constant 0 : i32
    %c0_i32_0 = arith.constant 0 : i32
    %c0_i32_1 = arith.constant 0 : i32
    return %c0_i32, %c0_i32_0 : i32, i32
  }
  func.func @transform_3(%arg0: i32) -> (i32, i32) {
    %c0_i32 = arith.constant 0 : i32
    %c0_i32_0 = arith.constant 0 : i32
    return %c0_i32, %arg0 : i32, i32
  }
}

module attributes {stable_mosaic.version = 11 : i64} {
  func.func @_maxpool_kernel(%arg0: i32, %arg1: memref<36x9x16x2xbf16, #tpu.memory_space<vmem>>, %arg2: memref<8x8x16x2xbf16, #tpu.memory_space<vmem>>) attributes {dimension_semantics = [#tpu.dimension_semantics<arbitrary>], iteration_bounds = array<i64: 1>, scalar_prefetch = 0 : i64, scratch_operands = 0 : i64, tpu.core_type = #tpu.core_type<tc>, window_params = [{pipeline_mode = #tpu.pipeline_mode<synchronous>, transform_indices = @transform_0, window_bounds = array<i64: 36, 9, 16, 2>}, {pipeline_mode = #tpu.pipeline_mode<synchronous>, transform_indices = @transform_1, window_bounds = array<i64: 8, 8, 16, 2>}]} {
    %c0 = arith.constant 0 : index
    %c0_0 = arith.constant 0 : index
    %c0_1 = arith.constant 0 : index
    %c0_2 = arith.constant 0 : index
    %0 = vector.load %arg1[%c0, %c0_0, %c0_1, %c0_2] : memref<36x9x16x2xbf16, #tpu.memory_space<vmem>>, vector<8x8x16x2xbf16>
    %c9 = arith.constant 9 : index
    %c0_3 = arith.constant 0 : index
    %c0_4 = arith.constant 0 : index
    %c0_5 = arith.constant 0 : index
    %1 = vector.load %arg1[%c9, %c0_3, %c0_4, %c0_5] : memref<36x9x16x2xbf16, #tpu.memory_space<vmem>>, vector<8x8x16x2xbf16>
    %2 = arith.maximumf %0, %1 : vector<8x8x16x2xbf16>
    %c0_6 = arith.constant 0 : index
    %c1 = arith.constant 1 : index
    %c0_7 = arith.constant 0 : index
    %c0_8 = arith.constant 0 : index
    %3 = vector.load %arg1[%c0_6, %c1, %c0_7, %c0_8] : memref<36x9x16x2xbf16, #tpu.memory_space<vmem>>, vector<8x8x16x2xbf16>
    %4 = arith.maximumf %2, %3 : vector<8x8x16x2xbf16>
    %c18 = arith.constant 18 : index
    %c0_9 = arith.constant 0 : index
    %c0_10 = arith.constant 0 : index
    %c0_11 = arith.constant 0 : index
    %5 = vector.load %arg1[%c18, %c0_9, %c0_10, %c0_11] : memref<36x9x16x2xbf16, #tpu.memory_space<vmem>>, vector<8x8x16x2xbf16>
    %6 = arith.maximumf %4, %5 : vector<8x8x16x2xbf16>
    %c27 = arith.constant 27 : index
    %c0_12 = arith.constant 0 : index
    %c0_13 = arith.constant 0 : index
    %c0_14 = arith.constant 0 : index
    %7 = vector.load %arg1[%c27, %c0_12, %c0_13, %c0_14] : memref<36x9x16x2xbf16, #tpu.memory_space<vmem>>, vector<8x8x16x2xbf16>
    %8 = arith.maximumf %6, %7 : vector<8x8x16x2xbf16>
    %c18_15 = arith.constant 18 : index
    %c1_16 = arith.constant 1 : index
    %c0_17 = arith.constant 0 : index
    %c0_18 = arith.constant 0 : index
    %9 = vector.load %arg1[%c18_15, %c1_16, %c0_17, %c0_18] : memref<36x9x16x2xbf16, #tpu.memory_space<vmem>>, vector<8x8x16x2xbf16>
    %10 = arith.maximumf %8, %9 : vector<8x8x16x2xbf16>
    %c1_19 = arith.constant 1 : index
    %c0_20 = arith.constant 0 : index
    %c0_21 = arith.constant 0 : index
    %c0_22 = arith.constant 0 : index
    %11 = vector.load %arg1[%c1_19, %c0_20, %c0_21, %c0_22] : memref<36x9x16x2xbf16, #tpu.memory_space<vmem>>, vector<8x8x16x2xbf16>
    %12 = arith.maximumf %10, %11 : vector<8x8x16x2xbf16>
    %c10 = arith.constant 10 : index
    %c0_23 = arith.constant 0 : index
    %c0_24 = arith.constant 0 : index
    %c0_25 = arith.constant 0 : index
    %13 = vector.load %arg1[%c10, %c0_23, %c0_24, %c0_25] : memref<36x9x16x2xbf16, #tpu.memory_space<vmem>>, vector<8x8x16x2xbf16>
    %14 = arith.maximumf %12, %13 : vector<8x8x16x2xbf16>
    %c1_26 = arith.constant 1 : index
    %c1_27 = arith.constant 1 : index
    %c0_28 = arith.constant 0 : index
    %c0_29 = arith.constant 0 : index
    %15 = vector.load %arg1[%c1_26, %c1_27, %c0_28, %c0_29] : memref<36x9x16x2xbf16, #tpu.memory_space<vmem>>, vector<8x8x16x2xbf16>
    %16 = arith.maximumf %14, %15 : vector<8x8x16x2xbf16>
    %c0_30 = arith.constant 0 : index
    %c0_31 = arith.constant 0 : index
    %c0_32 = arith.constant 0 : index
    %c0_33 = arith.constant 0 : index
    %17 = vector.load %arg2[%c0_30, %c0_31, %c0_32, %c0_33] : memref<8x8x16x2xbf16, #tpu.memory_space<vmem>>, vector<8x8x16x2xbf16>
    tpu.vector_store %arg2[%c0_30, %c0_31, %c0_32, %c0_33], %16 {strides = array<i32>} : memref<8x8x16x2xbf16, #tpu.memory_space<vmem>>, vector<8x8x16x2xbf16>,
    return
  }
  func.func @transform_0(%arg0: i32) -> (i32, i32, i32, i32) {
    %c0_i32 = arith.constant 0 : i32
    %c0_i32_0 = arith.constant 0 : i32
    %c0_i32_1 = arith.constant 0 : i32
    %c0_i32_2 = arith.constant 0 : i32
    %c0_i32_3 = arith.constant 0 : i32
    return %c0_i32, %c0_i32_0, %c0_i32_1, %c0_i32_2 : i32, i32, i32, i32
  }
  func.func @transform_1(%arg0: i32) -> (i32, i32, i32, i32) {
    %c0_i32 = arith.constant 0 : i32
    %c0_i32_0 = arith.constant 0 : i32
    %c0_i32_1 = arith.constant 0 : i32
    %c0_i32_2 = arith.constant 0 : i32
    %c0_i32_3 = arith.constant 0 : i32
    return %c0_i32, %c0_i32_0, %c0_i32_1, %c0_i32_2 : i32, i32, i32, i32
  }
}

module attributes {stable_mosaic.version = 11 : i64} {
  func.func @kernel(%arg0: i32, %arg1: memref<16x144xbf16, #tpu.memory_space<vmem>>, %arg2: memref<144x128xbf16, #tpu.memory_space<vmem>>, %arg3: memref<16x1xf32, #tpu.memory_space<vmem>>, %arg4: memref<16x128xbf16, #tpu.memory_space<vmem>>) attributes {dimension_semantics = [#tpu.dimension_semantics<parallel>], iteration_bounds = array<i64: 1>, scalar_prefetch = 0 : i64, scratch_operands = 0 : i64, tpu.core_type = #tpu.core_type<tc>, window_params = [{pipeline_mode = #tpu.pipeline_mode<synchronous>, transform_indices = @transform_0, window_bounds = array<i64: 16, 144>}, {transform_indices = @transform_1, window_bounds = array<i64: 144, 128>}, {pipeline_mode = #tpu.pipeline_mode<synchronous>, transform_indices = @transform_2, window_bounds = array<i64: 16, 1>}, {transform_indices = @transform_3, window_bounds = array<i64: 16, 128>}]} {
    %c0 = arith.constant 0 : index
    %c0_0 = arith.constant 0 : index
    %0 = vector.load %arg1[%c0, %c0_0] : memref<16x144xbf16, #tpu.memory_space<vmem>>, vector<16x144xbf16>
    %c0_1 = arith.constant 0 : index
    %c0_2 = arith.constant 0 : index
    %1 = vector.load %arg2[%c0_1, %c0_2] : memref<144x128xbf16, #tpu.memory_space<vmem>>, vector<144x128xbf16>
    %cst = arith.constant dense<0.000000e+00> : vector<16x128xf32>
    %2 = tpu.matmul %0, %1, %cst {dimension_numbers = #tpu.dot_dimension_numbers<[1], [0], [0], [1], [0, 0, 1, 1], [], []>} : vector<16x144xbf16>, vector<144x128xbf16>, vector<16x128xf32> -> vector<16x128xf32>
    %c0_3 = arith.constant 0 : index
    %c0_4 = arith.constant 0 : index
    %3 = vector.load %arg3[%c0_3, %c0_4] : memref<16x1xf32, #tpu.memory_space<vmem>>, vector<16x1xf32>
    %4 = vector.broadcast %3 : vector<16x1xf32> to vector<16x128xf32>
    %5 = arith.addf %2, %4 : vector<16x128xf32>
    %cst_5 = arith.constant 0.000000e+00 : f32
    %6 = vector.broadcast %cst_5 : f32 to vector<16x128xf32>
    %7 = arith.maximumf %5, %6 : vector<16x128xf32>
    %8 = arith.truncf %7 : vector<16x128xf32> to vector<16x128xbf16>
    %c0_6 = arith.constant 0 : index
    %c0_7 = arith.constant 0 : index
    %9 = vector.load %arg4[%c0_6, %c0_7] : memref<16x128xbf16, #tpu.memory_space<vmem>>, vector<16x128xbf16>
    tpu.vector_store %arg4[%c0_6, %c0_7], %8 {strides = array<i32>} : memref<16x128xbf16, #tpu.memory_space<vmem>>, vector<16x128xbf16>,
    return
  }
  func.func @transform_0(%arg0: i32) -> (i32, i32) {
    %c0_i32 = arith.constant 0 : i32
    %c0_i32_0 = arith.constant 0 : i32
    %c0_i32_1 = arith.constant 0 : i32
    return %c0_i32, %c0_i32_0 : i32, i32
  }
  func.func @transform_1(%arg0: i32) -> (i32, i32) {
    %c0_i32 = arith.constant 0 : i32
    %c0_i32_0 = arith.constant 0 : i32
    return %c0_i32, %arg0 : i32, i32
  }
  func.func @transform_2(%arg0: i32) -> (i32, i32) {
    %c0_i32 = arith.constant 0 : i32
    %c0_i32_0 = arith.constant 0 : i32
    %c0_i32_1 = arith.constant 0 : i32
    return %c0_i32, %c0_i32_0 : i32, i32
  }
  func.func @transform_3(%arg0: i32) -> (i32, i32) {
    %c0_i32 = arith.constant 0 : i32
    %c0_i32_0 = arith.constant 0 : i32
    return %c0_i32, %arg0 : i32, i32
  }
}

module attributes {stable_mosaic.version = 11 : i64} {
  func.func @kernel(%arg0: i32, %arg1: memref<16x144xbf16, #tpu.memory_space<vmem>>, %arg2: memref<144x128xbf16, #tpu.memory_space<vmem>>, %arg3: memref<16x1xf32, #tpu.memory_space<vmem>>, %arg4: memref<16x128xbf16, #tpu.memory_space<vmem>>, %arg5: memref<16x128xbf16, #tpu.memory_space<vmem>>) attributes {dimension_semantics = [#tpu.dimension_semantics<parallel>], iteration_bounds = array<i64: 1>, scalar_prefetch = 0 : i64, scratch_operands = 0 : i64, tpu.core_type = #tpu.core_type<tc>, window_params = [{pipeline_mode = #tpu.pipeline_mode<synchronous>, transform_indices = @transform_0, window_bounds = array<i64: 16, 144>}, {transform_indices = @transform_1, window_bounds = array<i64: 144, 128>}, {pipeline_mode = #tpu.pipeline_mode<synchronous>, transform_indices = @transform_2, window_bounds = array<i64: 16, 1>}, {transform_indices = @transform_3, window_bounds = array<i64: 16, 128>}, {transform_indices = @transform_4, window_bounds = array<i64: 16, 128>}]} {
    %c0 = arith.constant 0 : index
    %c0_0 = arith.constant 0 : index
    %0 = vector.load %arg1[%c0, %c0_0] : memref<16x144xbf16, #tpu.memory_space<vmem>>, vector<16x144xbf16>
    %c0_1 = arith.constant 0 : index
    %c0_2 = arith.constant 0 : index
    %1 = vector.load %arg2[%c0_1, %c0_2] : memref<144x128xbf16, #tpu.memory_space<vmem>>, vector<144x128xbf16>
    %cst = arith.constant dense<0.000000e+00> : vector<16x128xf32>
    %2 = tpu.matmul %0, %1, %cst {dimension_numbers = #tpu.dot_dimension_numbers<[1], [0], [0], [1], [0, 0, 1, 1], [], []>} : vector<16x144xbf16>, vector<144x128xbf16>, vector<16x128xf32> -> vector<16x128xf32>
    %c0_3 = arith.constant 0 : index
    %c0_4 = arith.constant 0 : index
    %3 = vector.load %arg3[%c0_3, %c0_4] : memref<16x1xf32, #tpu.memory_space<vmem>>, vector<16x1xf32>
    %4 = vector.broadcast %3 : vector<16x1xf32> to vector<16x128xf32>
    %5 = arith.addf %2, %4 : vector<16x128xf32>
    %c0_5 = arith.constant 0 : index
    %c0_6 = arith.constant 0 : index
    %6 = vector.load %arg4[%c0_5, %c0_6] : memref<16x128xbf16, #tpu.memory_space<vmem>>, vector<16x128xbf16>
    %7 = arith.extf %6 : vector<16x128xbf16> to vector<16x128xf32>
    %8 = arith.addf %5, %7 : vector<16x128xf32>
    %cst_7 = arith.constant 0.000000e+00 : f32
    %9 = vector.broadcast %cst_7 : f32 to vector<16x128xf32>
    %10 = arith.maximumf %8, %9 : vector<16x128xf32>
    %11 = arith.truncf %10 : vector<16x128xf32> to vector<16x128xbf16>
    %c0_8 = arith.constant 0 : index
    %c0_9 = arith.constant 0 : index
    %12 = vector.load %arg5[%c0_8, %c0_9] : memref<16x128xbf16, #tpu.memory_space<vmem>>, vector<16x128xbf16>
    tpu.vector_store %arg5[%c0_8, %c0_9], %11 {strides = array<i32>} : memref<16x128xbf16, #tpu.memory_space<vmem>>, vector<16x128xbf16>,
    return
  }
  func.func @transform_0(%arg0: i32) -> (i32, i32) {
    %c0_i32 = arith.constant 0 : i32
    %c0_i32_0 = arith.constant 0 : i32
    %c0_i32_1 = arith.constant 0 : i32
    return %c0_i32, %c0_i32_0 : i32, i32
  }
  func.func @transform_1(%arg0: i32) -> (i32, i32) {
    %c0_i32 = arith.constant 0 : i32
    %c0_i32_0 = arith.constant 0 : i32
    return %c0_i32, %arg0 : i32, i32
  }
  func.func @transform_2(%arg0: i32) -> (i32, i32) {
    %c0_i32 = arith.constant 0 : i32
    %c0_i32_0 = arith.constant 0 : i32
    %c0_i32_1 = arith.constant 0 : i32
    return %c0_i32, %c0_i32_0 : i32, i32
  }
  func.func @transform_3(%arg0: i32) -> (i32, i32) {
    %c0_i32 = arith.constant 0 : i32
    %c0_i32_0 = arith.constant 0 : i32
    return %c0_i32, %arg0 : i32, i32
  }
  func.func @transform_4(%arg0: i32) -> (i32, i32) {
    %c0_i32 = arith.constant 0 : i32
    %c0_i32_0 = arith.constant 0 : i32
    return %c0_i32, %arg0 : i32, i32
  }
}

module attributes {stable_mosaic.version = 11 : i64} {
  func.func @kernel(%arg0: i32, %arg1: memref<32x144xbf16, #tpu.memory_space<vmem>>, %arg2: memref<144x32xbf16, #tpu.memory_space<vmem>>, %arg3: memref<32x1xf32, #tpu.memory_space<vmem>>, %arg4: memref<32x32xbf16, #tpu.memory_space<vmem>>) attributes {dimension_semantics = [#tpu.dimension_semantics<parallel>], iteration_bounds = array<i64: 1>, scalar_prefetch = 0 : i64, scratch_operands = 0 : i64, tpu.core_type = #tpu.core_type<tc>, window_params = [{pipeline_mode = #tpu.pipeline_mode<synchronous>, transform_indices = @transform_0, window_bounds = array<i64: 32, 144>}, {transform_indices = @transform_1, window_bounds = array<i64: 144, 32>}, {pipeline_mode = #tpu.pipeline_mode<synchronous>, transform_indices = @transform_2, window_bounds = array<i64: 32, 1>}, {transform_indices = @transform_3, window_bounds = array<i64: 32, 32>}]} {
    %c0 = arith.constant 0 : index
    %c0_0 = arith.constant 0 : index
    %0 = vector.load %arg1[%c0, %c0_0] : memref<32x144xbf16, #tpu.memory_space<vmem>>, vector<32x144xbf16>
    %c0_1 = arith.constant 0 : index
    %c0_2 = arith.constant 0 : index
    %1 = vector.load %arg2[%c0_1, %c0_2] : memref<144x32xbf16, #tpu.memory_space<vmem>>, vector<144x32xbf16>
    %cst = arith.constant dense<0.000000e+00> : vector<32x32xf32>
    %2 = tpu.matmul %0, %1, %cst {dimension_numbers = #tpu.dot_dimension_numbers<[1], [0], [0], [1], [0, 0, 1, 1], [], []>} : vector<32x144xbf16>, vector<144x32xbf16>, vector<32x32xf32> -> vector<32x32xf32>
    %c0_3 = arith.constant 0 : index
    %c0_4 = arith.constant 0 : index
    %3 = vector.load %arg3[%c0_3, %c0_4] : memref<32x1xf32, #tpu.memory_space<vmem>>, vector<32x1xf32>
    %4 = vector.broadcast %3 : vector<32x1xf32> to vector<32x32xf32>
    %5 = arith.addf %2, %4 : vector<32x32xf32>
    %cst_5 = arith.constant 0.000000e+00 : f32
    %6 = vector.broadcast %cst_5 : f32 to vector<32x32xf32>
    %7 = arith.maximumf %5, %6 : vector<32x32xf32>
    %8 = arith.truncf %7 : vector<32x32xf32> to vector<32x32xbf16>
    %c0_6 = arith.constant 0 : index
    %c0_7 = arith.constant 0 : index
    %9 = vector.load %arg4[%c0_6, %c0_7] : memref<32x32xbf16, #tpu.memory_space<vmem>>, vector<32x32xbf16>
    tpu.vector_store %arg4[%c0_6, %c0_7], %8 {strides = array<i32>} : memref<32x32xbf16, #tpu.memory_space<vmem>>, vector<32x32xbf16>,
    return
  }
  func.func @transform_0(%arg0: i32) -> (i32, i32) {
    %c0_i32 = arith.constant 0 : i32
    %c0_i32_0 = arith.constant 0 : i32
    %c0_i32_1 = arith.constant 0 : i32
    return %c0_i32, %c0_i32_0 : i32, i32
  }
  func.func @transform_1(%arg0: i32) -> (i32, i32) {
    %c0_i32 = arith.constant 0 : i32
    %c0_i32_0 = arith.constant 0 : i32
    return %c0_i32, %arg0 : i32, i32
  }
  func.func @transform_2(%arg0: i32) -> (i32, i32) {
    %c0_i32 = arith.constant 0 : i32
    %c0_i32_0 = arith.constant 0 : i32
    %c0_i32_1 = arith.constant 0 : i32
    return %c0_i32, %c0_i32_0 : i32, i32
  }
  func.func @transform_3(%arg0: i32) -> (i32, i32) {
    %c0_i32 = arith.constant 0 : i32
    %c0_i32_0 = arith.constant 0 : i32
    return %c0_i32, %arg0 : i32, i32
  }
}

module attributes {stable_mosaic.version = 11 : i64} {
  func.func @kernel(%arg0: i32, %arg1: memref<32x288xbf16, #tpu.memory_space<vmem>>, %arg2: memref<288x32xbf16, #tpu.memory_space<vmem>>, %arg3: memref<32x1xf32, #tpu.memory_space<vmem>>, %arg4: memref<32x16xbf16, #tpu.memory_space<vmem>>, %arg5: memref<16x32xbf16, #tpu.memory_space<vmem>>, %arg6: memref<32x32xbf16, #tpu.memory_space<vmem>>) attributes {dimension_semantics = [#tpu.dimension_semantics<parallel>], iteration_bounds = array<i64: 1>, scalar_prefetch = 0 : i64, scratch_operands = 0 : i64, tpu.core_type = #tpu.core_type<tc>, window_params = [{pipeline_mode = #tpu.pipeline_mode<synchronous>, transform_indices = @transform_0, window_bounds = array<i64: 32, 288>}, {transform_indices = @transform_1, window_bounds = array<i64: 288, 32>}, {pipeline_mode = #tpu.pipeline_mode<synchronous>, transform_indices = @transform_2, window_bounds = array<i64: 32, 1>}, {pipeline_mode = #tpu.pipeline_mode<synchronous>, transform_indices = @transform_3, window_bounds = array<i64: 32, 16>}, {transform_indices = @transform_4, window_bounds = array<i64: 16, 32>}, {transform_indices = @transform_5, window_bounds = array<i64: 32, 32>}]} {
    %c0 = arith.constant 0 : index
    %c0_0 = arith.constant 0 : index
    %0 = vector.load %arg1[%c0, %c0_0] : memref<32x288xbf16, #tpu.memory_space<vmem>>, vector<32x288xbf16>
    %c0_1 = arith.constant 0 : index
    %c0_2 = arith.constant 0 : index
    %1 = vector.load %arg2[%c0_1, %c0_2] : memref<288x32xbf16, #tpu.memory_space<vmem>>, vector<288x32xbf16>
    %cst = arith.constant dense<0.000000e+00> : vector<32x32xf32>
    %2 = tpu.matmul %0, %1, %cst {dimension_numbers = #tpu.dot_dimension_numbers<[1], [0], [0], [1], [0, 0, 1, 1], [], []>} : vector<32x288xbf16>, vector<288x32xbf16>, vector<32x32xf32> -> vector<32x32xf32>
    %c0_3 = arith.constant 0 : index
    %c0_4 = arith.constant 0 : index
    %3 = vector.load %arg4[%c0_3, %c0_4] : memref<32x16xbf16, #tpu.memory_space<vmem>>, vector<32x16xbf16>
    %c0_5 = arith.constant 0 : index
    %c0_6 = arith.constant 0 : index
    %4 = vector.load %arg5[%c0_5, %c0_6] : memref<16x32xbf16, #tpu.memory_space<vmem>>, vector<16x32xbf16>
    %cst_7 = arith.constant dense<0.000000e+00> : vector<32x32xf32>
    %5 = tpu.matmul %3, %4, %cst_7 {dimension_numbers = #tpu.dot_dimension_numbers<[1], [0], [0], [1], [0, 0, 1, 1], [], []>} : vector<32x16xbf16>, vector<16x32xbf16>, vector<32x32xf32> -> vector<32x32xf32>
    %6 = arith.addf %2, %5 : vector<32x32xf32>
    %c0_8 = arith.constant 0 : index
    %c0_9 = arith.constant 0 : index
    %7 = vector.load %arg3[%c0_8, %c0_9] : memref<32x1xf32, #tpu.memory_space<vmem>>, vector<32x1xf32>
    %8 = vector.broadcast %7 : vector<32x1xf32> to vector<32x32xf32>
    %9 = arith.addf %6, %8 : vector<32x32xf32>
    %cst_10 = arith.constant 0.000000e+00 : f32
    %10 = vector.broadcast %cst_10 : f32 to vector<32x32xf32>
    %11 = arith.maximumf %9, %10 : vector<32x32xf32>
    %12 = arith.truncf %11 : vector<32x32xf32> to vector<32x32xbf16>
    %c0_11 = arith.constant 0 : index
    %c0_12 = arith.constant 0 : index
    %13 = vector.load %arg6[%c0_11, %c0_12] : memref<32x32xbf16, #tpu.memory_space<vmem>>, vector<32x32xbf16>
    tpu.vector_store %arg6[%c0_11, %c0_12], %12 {strides = array<i32>} : memref<32x32xbf16, #tpu.memory_space<vmem>>, vector<32x32xbf16>,
    return
  }
  func.func @transform_0(%arg0: i32) -> (i32, i32) {
    %c0_i32 = arith.constant 0 : i32
    %c0_i32_0 = arith.constant 0 : i32
    %c0_i32_1 = arith.constant 0 : i32
    return %c0_i32, %c0_i32_0 : i32, i32
  }
  func.func @transform_1(%arg0: i32) -> (i32, i32) {
    %c0_i32 = arith.constant 0 : i32
    %c0_i32_0 = arith.constant 0 : i32
    return %c0_i32, %arg0 : i32, i32
  }
  func.func @transform_2(%arg0: i32) -> (i32, i32) {
    %c0_i32 = arith.constant 0 : i32
    %c0_i32_0 = arith.constant 0 : i32
    %c0_i32_1 = arith.constant 0 : i32
    return %c0_i32, %c0_i32_0 : i32, i32
  }
  func.func @transform_3(%arg0: i32) -> (i32, i32) {
    %c0_i32 = arith.constant 0 : i32
    %c0_i32_0 = arith.constant 0 : i32
    %c0_i32_1 = arith.constant 0 : i32
    return %c0_i32, %c0_i32_0 : i32, i32
  }
  func.func @transform_4(%arg0: i32) -> (i32, i32) {
    %c0_i32 = arith.constant 0 : i32
    %c0_i32_0 = arith.constant 0 : i32
    return %c0_i32, %arg0 : i32, i32
  }
  func.func @transform_5(%arg0: i32) -> (i32, i32) {
    %c0_i32 = arith.constant 0 : i32
    %c0_i32_0 = arith.constant 0 : i32
    return %c0_i32, %arg0 : i32, i32
  }
}

module attributes {stable_mosaic.version = 11 : i64} {
  func.func @kernel(%arg0: i32, %arg1: memref<64x288xbf16, #tpu.memory_space<vmem>>, %arg2: memref<288x8xbf16, #tpu.memory_space<vmem>>, %arg3: memref<64x1xf32, #tpu.memory_space<vmem>>, %arg4: memref<64x8xbf16, #tpu.memory_space<vmem>>) attributes {dimension_semantics = [#tpu.dimension_semantics<parallel>], iteration_bounds = array<i64: 1>, scalar_prefetch = 0 : i64, scratch_operands = 0 : i64, tpu.core_type = #tpu.core_type<tc>, window_params = [{pipeline_mode = #tpu.pipeline_mode<synchronous>, transform_indices = @transform_0, window_bounds = array<i64: 64, 288>}, {transform_indices = @transform_1, window_bounds = array<i64: 288, 8>}, {pipeline_mode = #tpu.pipeline_mode<synchronous>, transform_indices = @transform_2, window_bounds = array<i64: 64, 1>}, {transform_indices = @transform_3, window_bounds = array<i64: 64, 8>}]} {
    %c0 = arith.constant 0 : index
    %c0_0 = arith.constant 0 : index
    %0 = vector.load %arg1[%c0, %c0_0] : memref<64x288xbf16, #tpu.memory_space<vmem>>, vector<64x288xbf16>
    %c0_1 = arith.constant 0 : index
    %c0_2 = arith.constant 0 : index
    %1 = vector.load %arg2[%c0_1, %c0_2] : memref<288x8xbf16, #tpu.memory_space<vmem>>, vector<288x8xbf16>
    %cst = arith.constant dense<0.000000e+00> : vector<64x8xf32>
    %2 = tpu.matmul %0, %1, %cst {dimension_numbers = #tpu.dot_dimension_numbers<[1], [0], [0], [1], [0, 0, 1, 1], [], []>} : vector<64x288xbf16>, vector<288x8xbf16>, vector<64x8xf32> -> vector<64x8xf32>
    %c0_3 = arith.constant 0 : index
    %c0_4 = arith.constant 0 : index
    %3 = vector.load %arg3[%c0_3, %c0_4] : memref<64x1xf32, #tpu.memory_space<vmem>>, vector<64x1xf32>
    %4 = vector.broadcast %3 : vector<64x1xf32> to vector<64x8xf32>
    %5 = arith.addf %2, %4 : vector<64x8xf32>
    %cst_5 = arith.constant 0.000000e+00 : f32
    %6 = vector.broadcast %cst_5 : f32 to vector<64x8xf32>
    %7 = arith.maximumf %5, %6 : vector<64x8xf32>
    %8 = arith.truncf %7 : vector<64x8xf32> to vector<64x8xbf16>
    %c0_6 = arith.constant 0 : index
    %c0_7 = arith.constant 0 : index
    %9 = vector.load %arg4[%c0_6, %c0_7] : memref<64x8xbf16, #tpu.memory_space<vmem>>, vector<64x8xbf16>
    tpu.vector_store %arg4[%c0_6, %c0_7], %8 {strides = array<i32>} : memref<64x8xbf16, #tpu.memory_space<vmem>>, vector<64x8xbf16>,
    return
  }
  func.func @transform_0(%arg0: i32) -> (i32, i32) {
    %c0_i32 = arith.constant 0 : i32
    %c0_i32_0 = arith.constant 0 : i32
    %c0_i32_1 = arith.constant 0 : i32
    return %c0_i32, %c0_i32_0 : i32, i32
  }
  func.func @transform_1(%arg0: i32) -> (i32, i32) {
    %c0_i32 = arith.constant 0 : i32
    %c0_i32_0 = arith.constant 0 : i32
    return %c0_i32, %arg0 : i32, i32
  }
  func.func @transform_2(%arg0: i32) -> (i32, i32) {
    %c0_i32 = arith.constant 0 : i32
    %c0_i32_0 = arith.constant 0 : i32
    %c0_i32_1 = arith.constant 0 : i32
    return %c0_i32, %c0_i32_0 : i32, i32
  }
  func.func @transform_3(%arg0: i32) -> (i32, i32) {
    %c0_i32 = arith.constant 0 : i32
    %c0_i32_0 = arith.constant 0 : i32
    return %c0_i32, %arg0 : i32, i32
  }
}

module attributes {stable_mosaic.version = 11 : i64} {
  func.func @kernel(%arg0: i32, %arg1: memref<64x576xbf16, #tpu.memory_space<vmem>>, %arg2: memref<576x8xbf16, #tpu.memory_space<vmem>>, %arg3: memref<64x1xf32, #tpu.memory_space<vmem>>, %arg4: memref<64x32xbf16, #tpu.memory_space<vmem>>, %arg5: memref<32x8xbf16, #tpu.memory_space<vmem>>, %arg6: memref<64x8xbf16, #tpu.memory_space<vmem>>) attributes {dimension_semantics = [#tpu.dimension_semantics<parallel>], iteration_bounds = array<i64: 1>, scalar_prefetch = 0 : i64, scratch_operands = 0 : i64, tpu.core_type = #tpu.core_type<tc>, window_params = [{pipeline_mode = #tpu.pipeline_mode<synchronous>, transform_indices = @transform_0, window_bounds = array<i64: 64, 576>}, {transform_indices = @transform_1, window_bounds = array<i64: 576, 8>}, {pipeline_mode = #tpu.pipeline_mode<synchronous>, transform_indices = @transform_2, window_bounds = array<i64: 64, 1>}, {pipeline_mode = #tpu.pipeline_mode<synchronous>, transform_indices = @transform_3, window_bounds = array<i64: 64, 32>}, {transform_indices = @transform_4, window_bounds = array<i64: 32, 8>}, {transform_indices = @transform_5, window_bounds = array<i64: 64, 8>}]} {
    %c0 = arith.constant 0 : index
    %c0_0 = arith.constant 0 : index
    %0 = vector.load %arg1[%c0, %c0_0] : memref<64x576xbf16, #tpu.memory_space<vmem>>, vector<64x576xbf16>
    %c0_1 = arith.constant 0 : index
    %c0_2 = arith.constant 0 : index
    %1 = vector.load %arg2[%c0_1, %c0_2] : memref<576x8xbf16, #tpu.memory_space<vmem>>, vector<576x8xbf16>
    %cst = arith.constant dense<0.000000e+00> : vector<64x8xf32>
    %2 = tpu.matmul %0, %1, %cst {dimension_numbers = #tpu.dot_dimension_numbers<[1], [0], [0], [1], [0, 0, 1, 1], [], []>} : vector<64x576xbf16>, vector<576x8xbf16>, vector<64x8xf32> -> vector<64x8xf32>
    %c0_3 = arith.constant 0 : index
    %c0_4 = arith.constant 0 : index
    %3 = vector.load %arg4[%c0_3, %c0_4] : memref<64x32xbf16, #tpu.memory_space<vmem>>, vector<64x32xbf16>
    %c0_5 = arith.constant 0 : index
    %c0_6 = arith.constant 0 : index
    %4 = vector.load %arg5[%c0_5, %c0_6] : memref<32x8xbf16, #tpu.memory_space<vmem>>, vector<32x8xbf16>
    %cst_7 = arith.constant dense<0.000000e+00> : vector<64x8xf32>
    %5 = tpu.matmul %3, %4, %cst_7 {dimension_numbers = #tpu.dot_dimension_numbers<[1], [0], [0], [1], [0, 0, 1, 1], [], []>} : vector<64x32xbf16>, vector<32x8xbf16>, vector<64x8xf32> -> vector<64x8xf32>
    %6 = arith.addf %2, %5 : vector<64x8xf32>
    %c0_8 = arith.constant 0 : index
    %c0_9 = arith.constant 0 : index
    %7 = vector.load %arg3[%c0_8, %c0_9] : memref<64x1xf32, #tpu.memory_space<vmem>>, vector<64x1xf32>
    %8 = vector.broadcast %7 : vector<64x1xf32> to vector<64x8xf32>
    %9 = arith.addf %6, %8 : vector<64x8xf32>
    %cst_10 = arith.constant 0.000000e+00 : f32
    %10 = vector.broadcast %cst_10 : f32 to vector<64x8xf32>
    %11 = arith.maximumf %9, %10 : vector<64x8xf32>
    %12 = arith.truncf %11 : vector<64x8xf32> to vector<64x8xbf16>
    %c0_11 = arith.constant 0 : index
    %c0_12 = arith.constant 0 : index
    %13 = vector.load %arg6[%c0_11, %c0_12] : memref<64x8xbf16, #tpu.memory_space<vmem>>, vector<64x8xbf16>
    tpu.vector_store %arg6[%c0_11, %c0_12], %12 {strides = array<i32>} : memref<64x8xbf16, #tpu.memory_space<vmem>>, vector<64x8xbf16>,
    return
  }
  func.func @transform_0(%arg0: i32) -> (i32, i32) {
    %c0_i32 = arith.constant 0 : i32
    %c0_i32_0 = arith.constant 0 : i32
    %c0_i32_1 = arith.constant 0 : i32
    return %c0_i32, %c0_i32_0 : i32, i32
  }
  func.func @transform_1(%arg0: i32) -> (i32, i32) {
    %c0_i32 = arith.constant 0 : i32
    %c0_i32_0 = arith.constant 0 : i32
    return %c0_i32, %arg0 : i32, i32
  }
  func.func @transform_2(%arg0: i32) -> (i32, i32) {
    %c0_i32 = arith.constant 0 : i32
    %c0_i32_0 = arith.constant 0 : i32
    %c0_i32_1 = arith.constant 0 : i32
    return %c0_i32, %c0_i32_0 : i32, i32
  }
  func.func @transform_3(%arg0: i32) -> (i32, i32) {
    %c0_i32 = arith.constant 0 : i32
    %c0_i32_0 = arith.constant 0 : i32
    %c0_i32_1 = arith.constant 0 : i32
    return %c0_i32, %c0_i32_0 : i32, i32
  }
  func.func @transform_4(%arg0: i32) -> (i32, i32) {
    %c0_i32 = arith.constant 0 : i32
    %c0_i32_0 = arith.constant 0 : i32
    return %c0_i32, %arg0 : i32, i32
  }
  func.func @transform_5(%arg0: i32) -> (i32, i32) {
    %c0_i32 = arith.constant 0 : i32
    %c0_i32_0 = arith.constant 0 : i32
    return %c0_i32, %arg0 : i32, i32
  }
}

module attributes {stable_mosaic.version = 11 : i64} {
  func.func @kernel(%arg0: i32, %arg1: memref<10x128xbf16, #tpu.memory_space<vmem>>, %arg2: memref<128x2xbf16, #tpu.memory_space<vmem>>, %arg3: memref<10x1xf32, #tpu.memory_space<vmem>>, %arg4: memref<10x2xf32, #tpu.memory_space<vmem>>) attributes {dimension_semantics = [#tpu.dimension_semantics<parallel>], iteration_bounds = array<i64: 1>, scalar_prefetch = 0 : i64, scratch_operands = 0 : i64, tpu.core_type = #tpu.core_type<tc>, window_params = [{pipeline_mode = #tpu.pipeline_mode<synchronous>, transform_indices = @transform_0, window_bounds = array<i64: 10, 128>}, {transform_indices = @transform_1, window_bounds = array<i64: 128, 2>}, {pipeline_mode = #tpu.pipeline_mode<synchronous>, transform_indices = @transform_2, window_bounds = array<i64: 10, 1>}, {transform_indices = @transform_3, window_bounds = array<i64: 10, 2>}]} {
    %c0 = arith.constant 0 : index
    %c0_0 = arith.constant 0 : index
    %0 = vector.load %arg1[%c0, %c0_0] : memref<10x128xbf16, #tpu.memory_space<vmem>>, vector<10x128xbf16>
    %c0_1 = arith.constant 0 : index
    %c0_2 = arith.constant 0 : index
    %1 = vector.load %arg2[%c0_1, %c0_2] : memref<128x2xbf16, #tpu.memory_space<vmem>>, vector<128x2xbf16>
    %cst = arith.constant dense<0.000000e+00> : vector<10x2xf32>
    %2 = tpu.matmul %0, %1, %cst {dimension_numbers = #tpu.dot_dimension_numbers<[1], [0], [0], [1], [0, 0, 1, 1], [], []>} : vector<10x128xbf16>, vector<128x2xbf16>, vector<10x2xf32> -> vector<10x2xf32>
    %c0_3 = arith.constant 0 : index
    %c0_4 = arith.constant 0 : index
    %3 = vector.load %arg3[%c0_3, %c0_4] : memref<10x1xf32, #tpu.memory_space<vmem>>, vector<10x1xf32>
    %4 = vector.broadcast %3 : vector<10x1xf32> to vector<10x2xf32>
    %5 = arith.addf %2, %4 : vector<10x2xf32>
    %c0_5 = arith.constant 0 : index
    %c0_6 = arith.constant 0 : index
    %6 = vector.load %arg4[%c0_5, %c0_6] : memref<10x2xf32, #tpu.memory_space<vmem>>, vector<10x2xf32>
    tpu.vector_store %arg4[%c0_5, %c0_6], %5 {strides = array<i32>} : memref<10x2xf32, #tpu.memory_space<vmem>>, vector<10x2xf32>,
    return
  }
  func.func @transform_0(%arg0: i32) -> (i32, i32) {
    %c0_i32 = arith.constant 0 : i32
    %c0_i32_0 = arith.constant 0 : i32
    %c0_i32_1 = arith.constant 0 : i32
    return %c0_i32, %c0_i32_0 : i32, i32
  }
  func.func @transform_1(%arg0: i32) -> (i32, i32) {
    %c0_i32 = arith.constant 0 : i32
    %c0_i32_0 = arith.constant 0 : i32
    return %c0_i32, %arg0 : i32, i32
  }
  func.func @transform_2(%arg0: i32) -> (i32, i32) {
    %c0_i32 = arith.constant 0 : i32
    %c0_i32_0 = arith.constant 0 : i32
    %c0_i32_1 = arith.constant 0 : i32
    return %c0_i32, %c0_i32_0 : i32, i32
  }
  func.func @transform_3(%arg0: i32) -> (i32, i32) {
    %c0_i32 = arith.constant 0 : i32
    %c0_i32_0 = arith.constant 0 : i32
    return %c0_i32, %arg0 : i32, i32
  }
}

module attributes {stable_mosaic.version = 11 : i64} {
  func.func @kernel(%arg0: i32, %arg1: memref<128x1152xbf16, #tpu.memory_space<vmem>>, %arg2: memref<1152x2xbf16, #tpu.memory_space<vmem>>, %arg3: memref<128x1xf32, #tpu.memory_space<vmem>>, %arg4: memref<128x64xbf16, #tpu.memory_space<vmem>>, %arg5: memref<64x2xbf16, #tpu.memory_space<vmem>>, %arg6: memref<128x2xbf16, #tpu.memory_space<vmem>>) attributes {dimension_semantics = [#tpu.dimension_semantics<parallel>], iteration_bounds = array<i64: 1>, scalar_prefetch = 0 : i64, scratch_operands = 0 : i64, tpu.core_type = #tpu.core_type<tc>, window_params = [{pipeline_mode = #tpu.pipeline_mode<synchronous>, transform_indices = @transform_0, window_bounds = array<i64: 128, 1152>}, {transform_indices = @transform_1, window_bounds = array<i64: 1152, 2>}, {pipeline_mode = #tpu.pipeline_mode<synchronous>, transform_indices = @transform_2, window_bounds = array<i64: 128, 1>}, {pipeline_mode = #tpu.pipeline_mode<synchronous>, transform_indices = @transform_3, window_bounds = array<i64: 128, 64>}, {transform_indices = @transform_4, window_bounds = array<i64: 64, 2>}, {transform_indices = @transform_5, window_bounds = array<i64: 128, 2>}]} {
    %c0 = arith.constant 0 : index
    %c0_0 = arith.constant 0 : index
    %0 = vector.load %arg1[%c0, %c0_0] : memref<128x1152xbf16, #tpu.memory_space<vmem>>, vector<128x1152xbf16>
    %c0_1 = arith.constant 0 : index
    %c0_2 = arith.constant 0 : index
    %1 = vector.load %arg2[%c0_1, %c0_2] : memref<1152x2xbf16, #tpu.memory_space<vmem>>, vector<1152x2xbf16>
    %cst = arith.constant dense<0.000000e+00> : vector<128x2xf32>
    %2 = tpu.matmul %0, %1, %cst {dimension_numbers = #tpu.dot_dimension_numbers<[1], [0], [0], [1], [0, 0, 1, 1], [], []>} : vector<128x1152xbf16>, vector<1152x2xbf16>, vector<128x2xf32> -> vector<128x2xf32>
    %c0_3 = arith.constant 0 : index
    %c0_4 = arith.constant 0 : index
    %3 = vector.load %arg4[%c0_3, %c0_4] : memref<128x64xbf16, #tpu.memory_space<vmem>>, vector<128x64xbf16>
    %c0_5 = arith.constant 0 : index
    %c0_6 = arith.constant 0 : index
    %4 = vector.load %arg5[%c0_5, %c0_6] : memref<64x2xbf16, #tpu.memory_space<vmem>>, vector<64x2xbf16>
    %cst_7 = arith.constant dense<0.000000e+00> : vector<128x2xf32>
    %5 = tpu.matmul %3, %4, %cst_7 {dimension_numbers = #tpu.dot_dimension_numbers<[1], [0], [0], [1], [0, 0, 1, 1], [], []>} : vector<128x64xbf16>, vector<64x2xbf16>, vector<128x2xf32> -> vector<128x2xf32>
    %6 = arith.addf %2, %5 : vector<128x2xf32>
    %c0_8 = arith.constant 0 : index
    %c0_9 = arith.constant 0 : index
    %7 = vector.load %arg3[%c0_8, %c0_9] : memref<128x1xf32, #tpu.memory_space<vmem>>, vector<128x1xf32>
    %8 = vector.broadcast %7 : vector<128x1xf32> to vector<128x2xf32>
    %9 = arith.addf %6, %8 : vector<128x2xf32>
    %cst_10 = arith.constant 0.000000e+00 : f32
    %10 = vector.broadcast %cst_10 : f32 to vector<128x2xf32>
    %11 = arith.maximumf %9, %10 : vector<128x2xf32>
    %12 = arith.truncf %11 : vector<128x2xf32> to vector<128x2xbf16>
    %c0_11 = arith.constant 0 : index
    %c0_12 = arith.constant 0 : index
    %13 = vector.load %arg6[%c0_11, %c0_12] : memref<128x2xbf16, #tpu.memory_space<vmem>>, vector<128x2xbf16>
    tpu.vector_store %arg6[%c0_11, %c0_12], %12 {strides = array<i32>} : memref<128x2xbf16, #tpu.memory_space<vmem>>, vector<128x2xbf16>,
    return
  }
  func.func @transform_0(%arg0: i32) -> (i32, i32) {
    %c0_i32 = arith.constant 0 : i32
    %c0_i32_0 = arith.constant 0 : i32
    %c0_i32_1 = arith.constant 0 : i32
    return %c0_i32, %c0_i32_0 : i32, i32
  }
  func.func @transform_1(%arg0: i32) -> (i32, i32) {
    %c0_i32 = arith.constant 0 : i32
    %c0_i32_0 = arith.constant 0 : i32
    return %c0_i32, %arg0 : i32, i32
  }
  func.func @transform_2(%arg0: i32) -> (i32, i32) {
    %c0_i32 = arith.constant 0 : i32
    %c0_i32_0 = arith.constant 0 : i32
    %c0_i32_1 = arith.constant 0 : i32
    return %c0_i32, %c0_i32_0 : i32, i32
  }
  func.func @transform_3(%arg0: i32) -> (i32, i32) {
    %c0_i32 = arith.constant 0 : i32
    %c0_i32_0 = arith.constant 0 : i32
    %c0_i32_1 = arith.constant 0 : i32
    return %c0_i32, %c0_i32_0 : i32, i32
  }
  func.func @transform_4(%arg0: i32) -> (i32, i32) {
    %c0_i32 = arith.constant 0 : i32
    %c0_i32_0 = arith.constant 0 : i32
    return %c0_i32, %arg0 : i32, i32
  }
  func.func @transform_5(%arg0: i32) -> (i32, i32) {
    %c0_i32 = arith.constant 0 : i32
    %c0_i32_0 = arith.constant 0 : i32
    return %c0_i32, %arg0 : i32, i32
  }
}

module attributes {stable_mosaic.version = 11 : i64} {
  func.func @kernel(%arg0: i32, %arg1: memref<128x576xbf16, #tpu.memory_space<vmem>>, %arg2: memref<576x2xbf16, #tpu.memory_space<vmem>>, %arg3: memref<128x1xf32, #tpu.memory_space<vmem>>, %arg4: memref<128x2xbf16, #tpu.memory_space<vmem>>) attributes {dimension_semantics = [#tpu.dimension_semantics<parallel>], iteration_bounds = array<i64: 1>, scalar_prefetch = 0 : i64, scratch_operands = 0 : i64, tpu.core_type = #tpu.core_type<tc>, window_params = [{pipeline_mode = #tpu.pipeline_mode<synchronous>, transform_indices = @transform_0, window_bounds = array<i64: 128, 576>}, {transform_indices = @transform_1, window_bounds = array<i64: 576, 2>}, {pipeline_mode = #tpu.pipeline_mode<synchronous>, transform_indices = @transform_2, window_bounds = array<i64: 128, 1>}, {transform_indices = @transform_3, window_bounds = array<i64: 128, 2>}]} {
    %c0 = arith.constant 0 : index
    %c0_0 = arith.constant 0 : index
    %0 = vector.load %arg1[%c0, %c0_0] : memref<128x576xbf16, #tpu.memory_space<vmem>>, vector<128x576xbf16>
    %c0_1 = arith.constant 0 : index
    %c0_2 = arith.constant 0 : index
    %1 = vector.load %arg2[%c0_1, %c0_2] : memref<576x2xbf16, #tpu.memory_space<vmem>>, vector<576x2xbf16>
    %cst = arith.constant dense<0.000000e+00> : vector<128x2xf32>
    %2 = tpu.matmul %0, %1, %cst {dimension_numbers = #tpu.dot_dimension_numbers<[1], [0], [0], [1], [0, 0, 1, 1], [], []>} : vector<128x576xbf16>, vector<576x2xbf16>, vector<128x2xf32> -> vector<128x2xf32>
    %c0_3 = arith.constant 0 : index
    %c0_4 = arith.constant 0 : index
    %3 = vector.load %arg3[%c0_3, %c0_4] : memref<128x1xf32, #tpu.memory_space<vmem>>, vector<128x1xf32>
    %4 = vector.broadcast %3 : vector<128x1xf32> to vector<128x2xf32>
    %5 = arith.addf %2, %4 : vector<128x2xf32>
    %cst_5 = arith.constant 0.000000e+00 : f32
    %6 = vector.broadcast %cst_5 : f32 to vector<128x2xf32>
    %7 = arith.maximumf %5, %6 : vector<128x2xf32>
    %8 = arith.truncf %7 : vector<128x2xf32> to vector<128x2xbf16>
    %c0_6 = arith.constant 0 : index
    %c0_7 = arith.constant 0 : index
    %9 = vector.load %arg4[%c0_6, %c0_7] : memref<128x2xbf16, #tpu.memory_space<vmem>>, vector<128x2xbf16>
    tpu.vector_store %arg4[%c0_6, %c0_7], %8 {strides = array<i32>} : memref<128x2xbf16, #tpu.memory_space<vmem>>, vector<128x2xbf16>,
    return
  }
  func.func @transform_0(%arg0: i32) -> (i32, i32) {
    %c0_i32 = arith.constant 0 : i32
    %c0_i32_0 = arith.constant 0 : i32
    %c0_i32_1 = arith.constant 0 : i32
    return %c0_i32, %c0_i32_0 : i32, i32
  }
  func.func @transform_1(%arg0: i32) -> (i32, i32) {
    %c0_i32 = arith.constant 0 : i32
    %c0_i32_0 = arith.constant 0 : i32
    return %c0_i32, %arg0 : i32, i32
  }
  func.func @transform_2(%arg0: i32) -> (i32, i32) {
    %c0_i32 = arith.constant 0 : i32
    %c0_i32_0 = arith.constant 0 : i32
    %c0_i32_1 = arith.constant 0 : i32
    return %c0_i32, %c0_i32_0 : i32, i32
  }
  func.func @transform_3(%arg0: i32) -> (i32, i32) {
    %c0_i32 = arith.constant 0 : i32
    %c0_i32_0 = arith.constant 0 : i32
    return %c0_i32, %arg0 : i32, i32
  }
}

</mosaic_0001>

<bundles_post_ra>
// kernel: _lambda_.11
= control target key start
LH: loop header
LB: loop body
LE: loop exit
PB: predicated region body
PF: predicated region fallthrough
CT: control target
= control target key end

     0   :  { %s786_s12 = smov 0   ;;  %s788_s13 = smov 0   ;;  %s949_s0 = inlined_call_operand.vmem [shape: bf16[16,147], index: 0, kind: input, shape index: {}]   ;;  %s950_s1 = inlined_call_operand.vmem [shape: bf16[147,512], index: 1, kind: input, shape index: {}]   ;;  %s951_s2 = inlined_call_operand.vmem [shape: f32[16,1], index: 2, kind: input, shape index: {}]   ;;  %s952_s3 = inlined_call_operand.vmem [shape: bf16[16,512], index: 3, kind: output, shape index: {}]  }
   0x1   :  { %s790_s14 = smov 0  }
   0x2 LB: > { %s594_s15 = sadd.s32 4294967295, %s762_s14   ;;  %s803_s16 = sadd.s32 1, %s762_s14   ;;  %s762_s14 = sphi %s790_s14, %s956_s14   ;;  %s758_s13 = sphi %s788_s13, %s955_s13   ;;  %s754_s12 = sphi %s786_s12, %s954_s12  }
   0x3   : > { %s38_s17 = ssub.s32 %s762_s14, %s803_s16  ;;  %s41_s18 = sadd.s32 1, %s758_s13 }
   0x4   : > { %p39_p0 = scmp.eq.s32.totalorder %s38_s17, 0  ;;  %p48_p1 = scmp.ne.s32.totalorder %s758_s13, %s754_s12 }
   0x5   : > { %p49_p2 = scmp.eq.s32.totalorder %s762_s14, 0  ;;  %p99_p3 = scmp.eq.s32.totalorder %s594_s15, 1 }
   0x6   : > { %s814_s19 = scalar_select %p39_p0, %s758_s13, %s41_s18  }
   0x7   : > { %p50_p4 = por %p49_p2, %p48_p1  ;;  %p816_p5 = por %p99_p3, %p48_p1 }
   0x8   : > { %p597_p6 = scmp.ge.s32.totalorder %s762_s14, 2 }
   0xa   : > { %127 = sbr.rel (%p597_p6) target bundleno = 38 (0x26), region = 24 }
   0xf   : > { %130 = sbr.rel (!%p50_p4) target bundleno = 38 (0x26), region = 28  ;;  %s132_s21 = sand.u32 (%p50_p4), 1, %s758_s13  }
  0x10   : > { %s689_s22 = sshll.u32 (%p50_p4), %s762_s14, 3  ;;  %s711_s23 = smul.u32 (%p50_p4), 152, %s132_s21 }
  0x11   : > { %s826_s26 = scalar_lea.vmem (%p50_p4), %s950_s1, %s689_s22 }
  0x12   : > { %v202_v0 = vld [vmem:[%s826_s26] sm:$0xff] (%p50_p4)  ;;  %v204_v1 = vld [vmem:[%s826_s26 + $0x10] sm:$0xff] (%p50_p4)  ;;  %s831_s27 = scalar_lea.vmem (%p50_p4), [#allocation2], %s711_s23 }
  0x13   : > { %v206_v2 = vld [vmem:[%s826_s26 + $0x20] sm:$0xff] (%p50_p4)  ;;  %203 = vst [vmem:[%s831_s27] sm:$0xff] (%p50_p4), %v202_v0  ;;  %v208_v3 = vld [vmem:[%s826_s26 + $0x30] sm:$0xff] (%p50_p4) }
  0x14   : > { %205 = vst [vmem:[%s831_s27 + $0x8] sm:$0xff] %v204_v1  ;;  %v210_v4 = vld [vmem:[%s826_s26 + $0x40] sm:$0xff]  ;;  %v212_v5 = vld [vmem:[%s826_s26 + $0x50] sm:$0xff] }
  0x15   : > { %207 = vst [vmem:[%s831_s27 + $0x10] sm:$0xff] %v206_v2  ;;  %v214_v6 = vld [vmem:[%s826_s26 + $0x60] sm:$0xff]  ;;  %v216_v7 = vld [vmem:[%s826_s26 + $0x70] sm:$0xff] }
  0x16   : > { %209 = vst [vmem:[%s831_s27 + $0x18] sm:$0xff] %v208_v3  ;;  %v218_v8 = vld [vmem:[%s826_s26 + $0x80] sm:$0xff]  ;;  %v220_v9 = vld [vmem:[%s826_s26 + $0x90] sm:$0xff] }
  0x17   : > { %211 = vst [vmem:[%s831_s27 + $0x20] sm:$0xff] %v210_v4  ;;  %v222_v10 = vld [vmem:[%s826_s26 + $0xa0] sm:$0xff]  ;;  %v224_v11 = vld [vmem:[%s826_s26 + $0xb0] sm:$0xff] }
  0x18   : > { %213 = vst [vmem:[%s831_s27 + $0x28] sm:$0xff] %v212_v5  ;;  %v226_v12 = vld [vmem:[%s826_s26 + $0xc0] sm:$0xff]  ;;  %v228_v13 = vld [vmem:[%s826_s26 + $0xd0] sm:$0xff] }
  0x19   : > { %215 = vst [vmem:[%s831_s27 + $0x30] sm:$0xff] %v214_v6  ;;  %v230_v14 = vld [vmem:[%s826_s26 + $0xe0] sm:$0xff]  ;;  %v232_v15 = vld [vmem:[%s826_s26 + $0xf0] sm:$0xff] }
  0x1a   : > { %217 = vst [vmem:[%s831_s27 + $0x38] sm:$0xff] %v216_v7  ;;  %v234_v16 = vld [vmem:[%s826_s26 + $0x100] sm:$0xff]  ;;  %v236_v17 = vld [vmem:[%s826_s26 + $0x110] sm:$0xff] }
  0x1b   : > { %219 = vst [vmem:[%s831_s27 + $0x40] sm:$0xff] %v218_v8  ;;  %v238_v18 = vld [vmem:[%s826_s26 + $0x120] sm:$0xff] }
  0x1c   : > { %221 = vst [vmem:[%s831_s27 + $0x48] sm:$0xff] %v220_v9 }
  0x1d   : > { %223 = vst [vmem:[%s831_s27 + $0x50] sm:$0xff] %v222_v10 }
  0x1e   : > { %225 = vst [vmem:[%s831_s27 + $0x58] sm:$0xff] %v224_v11 }
  0x1f   : > { %227 = vst [vmem:[%s831_s27 + $0x60] sm:$0xff] %v226_v12 }
  0x20   : > { %229 = vst [vmem:[%s831_s27 + $0x68] sm:$0xff] %v228_v13 }
  0x21   : > { %231 = vst [vmem:[%s831_s27 + $0x70] sm:$0xff] %v230_v14 }
  0x22   : > { %233 = vst [vmem:[%s831_s27 + $0x78] sm:$0xff] %v232_v15 }
  0x23   : > { %235 = vst [vmem:[%s831_s27 + $0x80] sm:$0xff] %v234_v16 }
  0x24   : > { %237 = vst [vmem:[%s831_s27 + $0x88] sm:$0xff] %v236_v17 }
  0x25   : > { %239 = vst [vmem:[%s831_s27 + $0x90] sm:$0xff] %v238_v18 }
  0x26 PF: > { %p600_p7 = scmp.ge.s32.totalorder %s762_s14, 1  ;;  %p244_p8 = scmp.lt.s32.totalorder %s762_s14, 3 }
  0x28   : > { %p245_p9 = pnand %p600_p7, %p244_p8 }
  0x29   : > { %s251_s28 = sand.u32 (!%p245_p9), 1, %s754_s12  }
  0x2a   : > { %248 = sbr.rel (%p245_p9) target bundleno = 239 (0xef), region = 66  ;;  %s601_s23 = sshll.u32 (!%p245_p9), %s251_s28, 4 }
  0x2b   : > { %s712_s29 = smul.u32 (!%p245_p9), 152, %s251_s28  ;;  %s272_s24 = scalar_lea.vmem (!%p245_p9), [#allocation3], %s601_s23 }
  0x2d   : > { %s873_s30 = scalar_lea.vmem (!%p245_p9), [#allocation2], %s712_s29 }
  0x2f   : > { %v668_v19 = vld [vmem:[%s873_s30 + $0x70] sm:$0xf]  ;;  %v707_v20 = vld [vmem:[%s873_s30 + $0x74] sm:$0xf0]  ;;  %v706_v21 = vld [vmem:[%s873_s30 + $0x74] sm:$0xf] }
  0x30   : > { %v669_v22 = vor.u32 %v707_v20, %v668_v19  ;;  %v670_v23 = vld [vmem:[%s873_s30 + $0x78] sm:$0xf0]  ;;  %v660_v24 = vld [vmem:[%s873_s30 + $0x60] sm:$0xf]  ;;  %v705_v25 = vld [vmem:[%s873_s30 + $0x64] sm:$0xf0] }
  0x31   : > { %v673_v26 = vor.u32 %v706_v21, %v670_v23  ;;  %v704_v27 = vld [vmem:[%s873_s30 + $0x64] sm:$0xf]  ;;  %v662_v28 = vld [vmem:[%s873_s30 + $0x68] sm:$0xf0]  ;;  %vm417_vm0 = vcmask 1040384   ;;  %v661_v29 = vor.u32 %v705_v25, %v660_v24  ;;  %vm418_vm1 = vcmask 1041408  }
  0x32   : > { %427 = vmatpush.bf16.msra.mxu0 %v669_v22  ;;  %v665_v30 = vor.u32 %v704_v27, %v662_v28  ;;  %v652_v31 = vld [vmem:[%s873_s30 + $0x50] sm:$0xf]  ;;  %v703_v32 = vld [vmem:[%s873_s30 + $0x54] sm:$0xf0]  ;;  %v702_v33 = vld [vmem:[%s873_s30 + $0x54] sm:$0xf] }
  0x33   : > { %455 = vmatpush.bf16.msra.mxu2 %v673_v26  ;;  %v654_v34 = vld [vmem:[%s873_s30 + $0x58] sm:$0xf0]  ;;  %v764_v35 = vmov 65535   ;;  %v296_v37 = vld [vmem:[%s873_s30 + $0x90] sm:$0x33]  ;;  %v653_v38 = vor.u32 %v703_v32, %v652_v31  ;;  %v297_v1 = vld [vmem:[%s951_s2] sm:$0xff] }
  0x34   : > { %v419_v36 = vsel %vm417_vm0, 4294967295, %v764_v35  ;;  %v374_v39 = vunpack.c.h.b16 %v296_v37  ;;  %v373_v40 = vunpack.c.l.b16 %v296_v37  ;;  %v657_v41 = vor.u32 %v702_v33, %v654_v34  ;;  %v644_v42 = vld [vmem:[%s873_s30 + $0x40] sm:$0xf]  ;;  %v701_v43 = vld [vmem:[%s873_s30 + $0x44] sm:$0xf0]  ;;  %s710_s12 = sshll.u32 (%p816_p5), %s594_s15, 3 }
  0x35   : > { %v420_v44 = vsel %vm418_vm1, %v419_v36, 0  ;;  %v700_v45 = vld [vmem:[%s873_s30 + $0x44] sm:$0xf]  ;;  %v646_v46 = vld [vmem:[%s873_s30 + $0x48] sm:$0xf0]  ;;  %v645_v51 = vor.u32 %v701_v43, %v644_v42  ;;  %v765_v2 = vmov 0   ;;  %s500_s27 = scalar_lea.vmem (%p816_p5), %s952_s3, %s710_s12 }
  0x36   : > { %428 = vmatpush.bf16.msra.mxu0 %v661_v29  ;;  %v394_v47 = vpack.c.b16 %v374_v39, %v374_v39  ;;  %v393_v48 = vpack.c.b16 %v373_v40, %v373_v40  ;;  %v708_v49 = vld [vmem:[%s873_s30 + $0x84] sm:$0xf]  ;;  %v678_v50 = vld [vmem:[%s873_s30 + $0x88] sm:$0xf0]  ;;  %v676_v55 = vld [vmem:[%s873_s30 + $0x80] sm:$0xf]  ;;  %v649_v57 = vor.u32 %v700_v45, %v646_v46  ;;  %739 = vset.pattern.permute.xlu0 %v765_v2 }
  0x37   : > { %456 = vmatpush.bf16.msra.mxu2 %v665_v30  ;;  %v690_v54 = vld [vmem:[%s949_s0 + $0x4] sm:$0xf]  ;;  %v709_v56 = vld [vmem:[%s873_s30 + $0x84] sm:$0xf0]  ;;  %v636_v58 = vld [vmem:[%s873_s30 + $0x30] sm:$0xf]  ;;  %v681_v63 = vor.u32 %v708_v49, %v678_v50  ;;  %301 = vperm.xlu0 %739, %v297_v1  }
  0x38   : > { %v425_v52 = vand.u32 %v420_v44, %v394_v47  ;;  %v422_v53 = vand.u32 %v420_v44, %v393_v48  ;;  %v699_v59 = vld [vmem:[%s873_s30 + $0x34] sm:$0xf0]  ;;  %v606_v60 = vld [vmem:[%s949_s0 + $0x8] sm:$0xf0]  ;;  %v638_v62 = vld [vmem:[%s873_s30 + $0x38] sm:$0xf0]  ;;  %v677_v0 = vor.u32 %v709_v56, %v676_v55 }
  0x39   : > { %v698_v61 = vld [vmem:[%s873_s30 + $0x34] sm:$0xf]  ;;  %v637_v3 = vor.u32 %v699_v59, %v636_v58  ;;  %v628_v5 = vld [vmem:[%s873_s30 + $0x20] sm:$0xf]  ;;  %v697_v6 = vld [vmem:[%s873_s30 + $0x24] sm:$0xf0]  ;;  %v609_v7 = vor.u32 %v690_v54, %v606_v60 }
  0x3a   : > { %429 = vmatpush.bf16.msra.mxu0 %v653_v38  ;;  %475 = vmatpush.bf16.msra.mxu3 %v425_v52  ;;  %v641_v4 = vor.u32 %v698_v61, %v638_v62  ;;  %v696_v8 = vld [vmem:[%s873_s30 + $0x24] sm:$0xf]  ;;  %v630_v9 = vld [vmem:[%s873_s30 + $0x28] sm:$0xf0]  ;;  %vm413_vm2 = vcmask 154624   ;;  %v629_v10 = vor.u32 %v697_v6, %v628_v5 }
  0x3b   : > { %457 = vmatpush.bf16.msra.mxu2 %v657_v41  ;;  %447 = vmatpush.bf16.msra.mxu1 %v422_v53  ;;  %v633_v11 = vor.u32 %v696_v8, %v630_v9  ;;  %v620_v12 = vld [vmem:[%s873_s30 + $0x10] sm:$0xf]  ;;  %v695_v13 = vld [vmem:[%s873_s30 + $0x14] sm:$0xf0]  ;;  %v694_v15 = vld [vmem:[%s873_s30 + $0x14] sm:$0xf] }
  0x3c   : > { %v298_v14 = vld [vmem:[%s951_s2 + $0x8] sm:$0xff]  ;;  %v622_v16 = vld [vmem:[%s873_s30 + $0x18] sm:$0xf0]  ;;  %v621_v17 = vor.u32 %v695_v13, %v620_v12  ;;  %v612_v19 = vld [vmem:[%s873_s30] sm:$0xf] }
  0x3d   : > { %v625_v18 = vor.u32 %v694_v15, %v622_v16  ;;  %v693_v20 = vld [vmem:[%s873_s30 + $0x4] sm:$0xf0]  ;;  %v692_v21 = vld [vmem:[%s873_s30 + $0x4] sm:$0xf]  ;;  %v614_v22 = vld [vmem:[%s873_s30 + $0x8] sm:$0xf0] }
  0x3e   : > { %430 = vmatpush.bf16.msra.mxu0 %v645_v51  ;;  %476 = vmatpush.bf16.msra.mxu3 %v681_v63  ;;  %v613_v23 = vor.u32 %v693_v20, %v612_v19  ;;  %v604_v24 = vld [vmem:[%s949_s0] sm:$0xf]  ;;  %v691_v25 = vld [vmem:[%s949_s0 + $0x4] sm:$0xf0]  ;;  %v617_v26 = vor.u32 %v692_v21, %v614_v22 }
  0x3f   : > { %458 = vmatpush.bf16.msra.mxu2 %v649_v57  ;;  %448 = vmatpush.bf16.msra.mxu1 %v677_v0  ;;  %v605_v27 = vor.u32 %v691_v25, %v604_v24 }
  0x40   : > { %306 = vperm.xlu0 %739, %v298_v14  }
  0x41   : > { %683 = vmatmul.msk.bf16.vlgmr.msra.gmra.mxu3 %vm413_vm2, %v609_v7 }
  0x42   : > { %431 = vmatpush.bf16.msra.mxu0 %v637_v3  ;;  %682 = vmatmul.msk.bf16.vlgmr.msra.gmra.mxu1 %vm413_vm2, %v609_v7 }
  0x43   : > { %459 = vmatpush.bf16.msra.mxu2 %v641_v4 }
  0x46   : > { %432 = vmatpush.bf16.msra.mxu0 %v629_v10 }
  0x47   : > { %460 = vmatpush.bf16.msra.mxu2 %v633_v11 }
  0x4a   : > { %433 = vmatpush.bf16.msra.mxu0 %v621_v17 }
  0x4b   : > { %461 = vmatpush.bf16.msra.mxu2 %v625_v18 }
  0x4e   : > { %434 = vmatpush.bf16.msra.mxu0 %v613_v23 }
  0x4f   : > { %462 = vmatpush.bf16.msra.mxu2 %v617_v26 }
  0x51   : > { %435 = vmatmul.bf16.vlgmr.msra.gmra.mxu0 %v605_v27 }
  0x52   : > { %463 = vmatmul.bf16.vlgmr.msra.gmra.mxu2 %v605_v27 }
  0xa9   : > { %v302_v29 = vpop.permute.xlu0 %301 }
  0xb2   : > { %v307_v39 = vpop.permute.xlu0 %306 }
  0xbf   : > { %v450_v31 = vpop.f32.mrf.mxu1 }
  0xc4   : > { %v478_v33 = vpop.f32.mrf.mxu3 }
  0xc7   : > { %v452_v43 = vpop.f32.mrf.mxu1 }
  0xcc   : > { %v480_v47 = vpop.f32.mrf.mxu3 }
  0xce   : > { %v436_v28 = vpop.f32.mrf.mxu0 }
  0xcf   : > { %v437_v30 = vadd.f32 %v436_v28, %v302_v29 }
  0xd1   : > { %v451_v32 = vadd.f32 %v450_v31, %v437_v30 }
  0xd3   : > { %v483_v37 = vmax.f32 %v451_v32, 0.0 }
  0xd5   : > { %v464_v34 = vpop.f32.mrf.mxu2 }
  0xd6   : > { %v465_v35 = vadd.f32 %v464_v34, %v302_v29  ;;  %v438_v36 = vpop.f32.mrf.mxu0 }
  0xd7   : > { %v439_v41 = vadd.f32 %v438_v36, %v307_v39 }
  0xd8   : > { %v479_v38 = vadd.f32 %v478_v33, %v465_v35 }
  0xd9   : > { %v453_v45 = vadd.f32 %v452_v43, %v439_v41 }
  0xda   : > { %v484_v40 = vmax.f32 %v479_v38, 0.0 }
  0xdb   : > { %v485_v49 = vmax.f32 %v453_v45, 0.0 }
  0xdc   : > { %v487_v42 = vpack.c.bf16 %v484_v40, %v483_v37 }
  0xdd   : > { %v466_v44 = vpop.f32.mrf.mxu2 }
  0xde   : > { %489 = vst [vmem:[%s272_s24] sm:$0xff] %v487_v42  ;;  %v467_v46 = vadd.f32 %v466_v44, %v307_v39 }
  0xe0   : > { %v481_v48 = vadd.f32 %v480_v47, %v467_v46 }
  0xe2   : > { %v486_v50 = vmax.f32 %v481_v48, 0.0  ;;  %497 = sbr.rel (!%p816_p5) target bundleno = 239 (0xef), region = 74 }
  0xe4   : > { %v488_v51 = vpack.c.bf16 %v486_v50, %v485_v49 }
  0xe5   : > { %v531_v52 = vld [vmem:[%s272_s24] sm:$0xff] (%p816_p5) }
  0xe6   : > { %490 = vst [vmem:[%s272_s24 + $0x8] sm:$0xff] %v488_v51 }
  0xe7   : > { %532 = vst [vmem:[%s500_s27] sm:$0xff] %v531_v52 }
  0xed   : > { %v533_v53 = vld [vmem:[%s272_s24 + $0x8] sm:$0xff] }
  0xee   : > { %534 = vst [vmem:[%s500_s27 + $0x10] sm:$0xff] %v533_v53 }
  0xef PF: > { %p10_p10 = scmp.ge.s32.totalorder %s803_s16, 4   ;;  %s954_s12 = smov %s758_s13 }
  0xf0   : > { %s955_s13 = smov %s814_s19  ;;  %s956_s14 = smov %s803_s16 }
  0xf1   :  { %12 = sbr.rel (!%p10_p10) target bundleno = 2 (0x2), region = 143 }

// kernel: _lambda_.13
= control target key start
LH: loop header
LB: loop body
LE: loop exit
PB: predicated region body
PF: predicated region fallthrough
CT: control target
= control target key end

     0   :  { %v215_v4 = vmov 0   ;;  %vm110_vm0 = vcmask 130048   ;;  %s284_s1 = inlined_call_operand.vmem [shape: bf16[144,128], index: 1, kind: input, shape index: {}]   ;;  %s285_s0 = inlined_call_operand.vmem [shape: bf16[16,144], index: 0, kind: input, shape index: {}]   ;;  %s286_s2 = inlined_call_operand.vmem [shape: f32[16,1], index: 2, kind: input, shape index: {}]   ;;  %s287_s3 = inlined_call_operand.vmem [shape: bf16[16,128], index: 3, kind: output, shape index: {}]  }
   0x1   :  { %v206_v0 = vld [vmem:[%s284_s1 + $0x38] sm:$0xff]  ;;  %v205_v1 = vld [vmem:[%s284_s1 + $0x30] sm:$0xff]  ;;  %v207_v2 = vld [vmem:[%s284_s1 + $0x40] sm:$0xff]  ;;  %214 = vset.pattern.permute.xlu0 %v215_v4 }
   0x2   :  { %114 = vmatpush.bf16.msra.mxu0 %v206_v0  ;;  %v197_v3 = vld [vmem:[%s285_s0 + $0x4] sm:$0xf]  ;;  %v156_v5 = vld [vmem:[%s285_s0 + $0x8] sm:$0xf0]  ;;  %135 = vmatpush.bf16.msra.mxu1 %v207_v2  ;;  %v202_v11 = vld [vmem:[%s284_s1 + $0x18] sm:$0xff] }
   0x3   :  { %v159_v6 = vor.u32 %v197_v3, %v156_v5  ;;  %v35_v7 = vld [vmem:[%s286_s2] sm:$0xff]  ;;  %v204_v8 = vld [vmem:[%s284_s1 + $0x28] sm:$0xff]  ;;  %v201_v12 = vld [vmem:[%s284_s1 + $0x10] sm:$0xff] }
   0x4   :  { %39 = vperm.xlu0 %214, %v35_v7   ;;  %v203_v9 = vld [vmem:[%s284_s1 + $0x20] sm:$0xff]  ;;  %v36_v10 = vld [vmem:[%s286_s2 + $0x8] sm:$0xff] }
   0x5   :  { %196 = vmatmul.msk.bf16.vlgmr.msra.gmra.mxu1 %vm110_vm0, %v159_v6  ;;  %v200_v13 = vld [vmem:[%s284_s1 + $0x8] sm:$0xff]  ;;  %v199_v14 = vld [vmem:[%s284_s1] sm:$0xff] }
   0x6   :  { %115 = vmatpush.bf16.msra.mxu0 %v205_v1  ;;  %v154_v15 = vld [vmem:[%s285_s0] sm:$0xf]  ;;  %v198_v16 = vld [vmem:[%s285_s0 + $0x4] sm:$0xf0] }
   0x7   :  { %v155_v17 = vor.u32 %v198_v16, %v154_v15 }
   0xa   :  { %116 = vmatpush.bf16.msra.mxu0 %v204_v8 }
   0xc   :  { %44 = vperm.xlu0 %214, %v36_v10  }
   0xe   :  { %117 = vmatpush.bf16.msra.mxu0 %v203_v9 }
  0x12   :  { %118 = vmatpush.bf16.msra.mxu0 %v202_v11 }
  0x16   :  { %119 = vmatpush.bf16.msra.mxu0 %v201_v12 }
  0x1a   :  { %120 = vmatpush.bf16.msra.mxu0 %v200_v13 }
  0x1e   :  { %121 = vmatpush.bf16.msra.mxu0 %v199_v14 }
  0x21   :  { %122 = vmatmul.bf16.vlgmr.msra.gmra.mxu0 %v155_v17 }
  0x76   :  { %v40_v18 = vpop.permute.xlu0 %39 }
  0x7e   :  { %v45_v22 = vpop.permute.xlu0 %44 }
  0x82   :  { %v137_v19 = vpop.f32.mrf.mxu1 }
  0x8a   :  { %v139_v26 = vpop.f32.mrf.mxu1 }
  0x9e   :  { %v123_v20 = vpop.f32.mrf.mxu0 }
  0x9f   :  { %v124_v21 = vadd.f32 %v123_v20, %v40_v18 }
  0xa1   :  { %v138_v24 = vadd.f32 %v137_v19, %v124_v21 }
  0xa3   :  { %v142_v28 = vmax.f32 %v138_v24, 0.0 }
  0xa6   :  { %v125_v23 = vpop.f32.mrf.mxu0 }
  0xa7   :  { %v126_v25 = vadd.f32 %v125_v23, %v45_v22 }
  0xa9   :  { %v140_v27 = vadd.f32 %v139_v26, %v126_v25 }
  0xab   :  { %v143_v29 = vmax.f32 %v140_v27, 0.0 }
  0xad   :  { %v211_v30 = vpack.c.bf16 %v143_v29, %v142_v28 }
  0xaf   :  { %212 = vst [vmem:[%s287_s3] sm:$0xff] %v211_v30  }

// kernel: _lambda_.12
= control target key start
LH: loop header
LB: loop body
LE: loop exit
PB: predicated region body
PF: predicated region fallthrough
CT: control target
= control target key end

     0   :  { %vm5264_vm0 = vcmask 11264   ;;  %s12313_s0 = inlined_call_operand.vmem [shape: bf16[36,9,16,2], index: 0, kind: input, shape index: {}]   ;;  %s12314_s1 = inlined_call_operand.vmem [shape: bf16[8,8,16,2], index: 1, kind: output, shape index: {}]  }
   0x1   :  { %v6422_v0 = vld [vmem:[%s12313_s0] sm:$0xff]   ;;  %v8788_v1 = vld [vmem:[%s12313_s0 + $0x288] sm:$0xff]   ;;  %v8916_v5 = vld [vmem:[%s12313_s0 + $0x510] sm:$0xff]  }
   0x2   :  { %v8852_v2 = vld [vmem:[%s12313_s0 + $0x8] sm:$0xff]   ;;  %v6423_v3 = vunpack.c.l.bf16 %v6422_v0  ;;  %v6679_v4 = vunpack.c.l.bf16 %v8788_v1  ;;  %v8980_v6 = vld [vmem:[%s12313_s0 + $0x798] sm:$0xff]   ;;  %v6424_v8 = vunpack.c.h.bf16 %v6422_v0  ;;  %v9338_v10 = vld [vmem:[%s12313_s0 + $0x2d0] sm:$0xff]   ;;  %v6680_v12 = vunpack.c.h.bf16 %v8788_v1 }
   0x3   :  { %v9328_v7 = vld [vmem:[%s12313_s0 + $0x518] sm:$0xff]   ;;  %v9333_v9 = vld [vmem:[%s12313_s0 + $0x48] sm:$0xff]   ;;  %v9236_v11 = vld [vmem:[%s12313_s0 + $0x50] sm:$0xff]   ;;  %v6935_v14 = vunpack.c.l.bf16 %v8852_v2  ;;  %v7191_v15 = vunpack.c.l.bf16 %v8916_v5  ;;  %v7447_v16 = vunpack.c.l.bf16 %v8980_v6  ;;  %v6936_v20 = vunpack.c.h.bf16 %v8852_v2 }
   0x4   :  { %v521_v13 = vmax.f32 %v6423_v3, %v6679_v4  ;;  %v8789_v17 = vld [vmem:[%s12313_s0 + $0x290] sm:$0xff]   ;;  %v7703_v18 = vunpack.c.l.bf16 %v9328_v7  ;;  %v522_v19 = vmax.f32 %v6424_v8, %v6680_v12  ;;  %v7192_v21 = vunpack.c.h.bf16 %v8916_v5  ;;  %v8981_v31 = vld [vmem:[%s12313_s0 + $0x7a0] sm:$0xff]   ;;  %v9366_v33 = vld [vmem:[%s12313_s0 + $0x2d8] sm:$0xff]  }
   0x5   :  { %v7959_v23 = vunpack.c.l.bf16 %v9333_v9  ;;  %v8215_v24 = vunpack.c.l.bf16 %v9338_v10  ;;  %v9349_v25 = vunpack.c.l.bf16 %v9236_v11  ;;  %v8853_v26 = vld [vmem:[%s12313_s0 + $0x10] sm:$0xff]   ;;  %v7448_v28 = vunpack.c.h.bf16 %v8980_v6  ;;  %v9361_v32 = vld [vmem:[%s12313_s0 + $0x520] sm:$0xff]   ;;  %v9237_v41 = vld [vmem:[%s12313_s0 + $0x58] sm:$0xff]  }
   0x6   :  { %v1162_v22 = vmax.f32 %v521_v13, %v6935_v14  ;;  %v1163_v27 = vmax.f32 %v522_v19, %v6936_v20  ;;  %v7704_v29 = vunpack.c.h.bf16 %v9328_v7  ;;  %v6683_v30 = vunpack.c.l.bf16 %v8789_v17  ;;  %v8790_v43 = vld [vmem:[%s12313_s0 + $0x298] sm:$0xff]   ;;  %v8982_v61 = vld [vmem:[%s12313_s0 + $0x7a8] sm:$0xff]   ;;  %v9409_v12 = vld [vmem:[%s12313_s0 + $0x2e0] sm:$0xff]  }
   0x7   :  { %v7960_v35 = vunpack.c.h.bf16 %v9333_v9  ;;  %v8216_v36 = vunpack.c.h.bf16 %v9338_v10  ;;  %v9370_v37 = vunpack.c.h.bf16 %v9236_v11  ;;  %v6939_v40 = vunpack.c.l.bf16 %v8853_v26  ;;  %v9383_v52 = vld [vmem:[%s12313_s0 + $0x18] sm:$0xff]   ;;  %v9398_v2 = vld [vmem:[%s12313_s0 + $0x528] sm:$0xff]  }
   0x8   :  { %v1803_v34 = vmax.f32 %v1162_v22, %v7191_v15  ;;  %v1804_v38 = vmax.f32 %v1163_v27, %v7192_v21  ;;  %v523_v39 = vmax.f32 %v6935_v14, %v6683_v30  ;;  %v6684_v42 = vunpack.c.h.bf16 %v8789_v17  ;;  %v8791_v22 = vld [vmem:[%s12313_s0 + $0x2a0] sm:$0xff]  }
   0x9   :  { %v7451_v45 = vunpack.c.l.bf16 %v8981_v31  ;;  %v7707_v46 = vunpack.c.l.bf16 %v9361_v32  ;;  %v8219_v47 = vunpack.c.l.bf16 %v9366_v33  ;;  %v6940_v51 = vunpack.c.h.bf16 %v8853_v26  ;;  %v9238_v30 = vld [vmem:[%s12313_s0 + $0x60] sm:$0xff]  }
   0xa   :  { %v2444_v44 = vmax.f32 %v1803_v34, %v7447_v16  ;;  %v2445_v48 = vmax.f32 %v1804_v38, %v7448_v28  ;;  %v1164_v49 = vmax.f32 %v523_v39, %v6939_v40  ;;  %v524_v50 = vmax.f32 %v6936_v20, %v6684_v42  ;;  %v9428_v39 = vld [vmem:[%s12313_s0 + $0x20] sm:$0xff]  }
   0xb   :  { %v9385_v54 = vunpack.c.l.bf16 %v9237_v41  ;;  %v7452_v55 = vunpack.c.h.bf16 %v8981_v31  ;;  %v6687_v56 = vunpack.c.l.bf16 %v8790_v43  ;;  %v7708_v60 = vunpack.c.h.bf16 %v9361_v32 }
   0xc   :  { %v3085_v53 = vmax.f32 %v2444_v44, %v7703_v18  ;;  %v3086_v57 = vmax.f32 %v2445_v48, %v7704_v29  ;;  %v1805_v58 = vmax.f32 %v1164_v49, %v7703_v18  ;;  %v1165_v59 = vmax.f32 %v524_v50, %v6940_v51  ;;  %v8983_v44 = vld [vmem:[%s12313_s0 + $0x7b0] sm:$0xff]  }
   0xd   :  { %v8220_v63 = vunpack.c.h.bf16 %v9366_v33  ;;  %v525_v0 = vmax.f32 %v6939_v40, %v6687_v56  ;;  %v6943_v1 = vunpack.c.l.bf16 %v9383_v52  ;;  %v9402_v6 = vunpack.c.h.bf16 %v9237_v41  ;;  %v8990_v33 = vld [vmem:[%s12313_s0 + $0x7f0] sm:$0xff]  }
   0xe   :  { %v3726_v62 = vmax.f32 %v3085_v53, %v7959_v23  ;;  %v3727_v3 = vmax.f32 %v3086_v57, %v7960_v35  ;;  %v2446_v4 = vmax.f32 %v1805_v58, %v7451_v45  ;;  %v1806_v5 = vmax.f32 %v1165_v59, %v7704_v29 }
   0xf   :  { %v1166_v8 = vmax.f32 %v525_v0, %v6943_v1  ;;  %v7455_v11 = vunpack.c.l.bf16 %v8982_v61  ;;  %v6688_v13 = vunpack.c.h.bf16 %v8790_v43  ;;  %v7711_v17 = vunpack.c.l.bf16 %v9398_v2  ;;  %v9462_v0 = vld [vmem:[%s12313_s0 + $0x2e8] sm:$0xff]  }
  0x10   :  { %v4367_v7 = vmax.f32 %v3726_v62, %v8215_v24  ;;  %v4368_v14 = vmax.f32 %v3727_v3, %v8216_v36  ;;  %v3087_v15 = vmax.f32 %v2446_v4, %v7707_v46  ;;  %v2447_v16 = vmax.f32 %v1806_v5, %v7452_v55  ;;  %v9454_v55 = vld [vmem:[%s12313_s0 + $0x530] sm:$0xff]  }
  0x11   :  { %v1807_v19 = vmax.f32 %v1166_v8, %v7707_v46  ;;  %v526_v20 = vmax.f32 %v6940_v51, %v6688_v13  ;;  %v6944_v21 = vunpack.c.h.bf16 %v9383_v52  ;;  %v8223_v29 = vunpack.c.l.bf16 %v9409_v12  ;;  %v8792_v8 = vld [vmem:[%s12313_s0 + $0x2a8] sm:$0xff]  }
  0x12   :  { %v5008_v18 = vmax.f32 %v4367_v7, %v9349_v25  ;;  %v5009_v26 = vmax.f32 %v4368_v14, %v9370_v37  ;;  %v3728_v27 = vmax.f32 %v3087_v15, %v9349_v25  ;;  %v3088_v28 = vmax.f32 %v2447_v16, %v7708_v60 }
  0x13   :  { %v2448_v32 = vmax.f32 %v1807_v19, %v7455_v11  ;;  %v1167_v34 = vmax.f32 %v526_v20, %v6944_v21  ;;  %v7456_v38 = vunpack.c.h.bf16 %v8982_v61  ;;  %v6691_v43 = vunpack.c.l.bf16 %v8791_v22 }
  0x14   :  { %v5136_v31 = vpack.c.bf16 %v5008_v18, %v5008_v18  ;;  %v5137_v40 = vpack.c.bf16 %v5009_v26, %v5009_v26  ;;  %v4369_v41 = vmax.f32 %v3728_v27, %v8219_v47  ;;  %v3729_v42 = vmax.f32 %v3088_v28, %v9370_v37  ;;  %v8984_v28 = vld [vmem:[%s12313_s0 + $0x7b8] sm:$0xff]  }
  0x15   :  { %v3089_v45 = vmax.f32 %v2448_v32, %v7711_v17  ;;  %v9440_v46 = vunpack.c.l.bf16 %v9238_v30  ;;  %v1808_v48 = vmax.f32 %v1167_v34, %v7708_v60  ;;  %v7712_v49 = vunpack.c.h.bf16 %v9398_v2 }
  0x16   :  { %5265 = vst.msk [vmem:[%s12314_s1] sm:$0xf] %vm5264_vm0, %v5136_v31  ;;  %v5010_v50 = vmax.f32 %v4369_v41, %v9385_v54  ;;  %v4370_v51 = vmax.f32 %v3729_v42, %v8220_v63  ;;  %v527_v52 = vmax.f32 %v6943_v1, %v6691_v43  ;;  %v6947_v53 = vunpack.c.l.bf16 %v9428_v39  ;;  %v9239_v1 = vld [vmem:[%s12313_s0 + $0x68] sm:$0xff]   ;;  %v9510_v43 = vld [vmem:[%s12313_s0 + $0x2f0] sm:$0xff]  }
  0x17   :  { %5266 = vst.msk [vmem:[%s12314_s1 + $0x4] sm:$0xf] %vm5264_vm0, %v5137_v40  ;;  %v3730_v56 = vmax.f32 %v3089_v45, %v9385_v54  ;;  %v2449_v57 = vmax.f32 %v1808_v48, %v7456_v38  ;;  %v8224_v58 = vunpack.c.h.bf16 %v9409_v12  ;;  %v7459_v59 = vunpack.c.l.bf16 %v8983_v44  ;;  %v9504_v38 = vld [vmem:[%s12313_s0 + $0x538] sm:$0xff]  }
  0x18   :  { %v5138_v60 = vpack.c.bf16 %v5010_v50, %v5010_v50  ;;  %v5011_v61 = vmax.f32 %v4370_v51, %v9402_v6  ;;  %v1168_v62 = vmax.f32 %v527_v52, %v6947_v53  ;;  %v6692_v2 = vunpack.c.h.bf16 %v8791_v22  ;;  %v9488_v22 = vld [vmem:[%s12313_s0 + $0x28] sm:$0xff]  }
  0x19   :  { %v4371_v3 = vmax.f32 %v3730_v56, %v8223_v29  ;;  %v3090_v4 = vmax.f32 %v2449_v57, %v7712_v49  ;;  %v9469_v5 = vunpack.c.h.bf16 %v9238_v30  ;;  %v7715_v7 = vunpack.c.l.bf16 %v9454_v55  ;;  %v8793_v56 = vld [vmem:[%s12313_s0 + $0x2b0] sm:$0xff]  }
  0x1a   :  { %5267 = vst.msk [vmem:[%s12314_s1 + $0x8] sm:$0xf] %vm5264_vm0, %v5138_v60  ;;  %v5139_v11 = vpack.c.bf16 %v5011_v61, %v5011_v61  ;;  %v1809_v13 = vmax.f32 %v1168_v62, %v7711_v17  ;;  %v528_v14 = vmax.f32 %v6944_v21, %v6692_v2  ;;  %v6948_v15 = vunpack.c.h.bf16 %v9428_v39 }
  0x1b   :  { %v5012_v16 = vmax.f32 %v4371_v3, %v9440_v46  ;;  %v3731_v18 = vmax.f32 %v3090_v4, %v9402_v6  ;;  %v8227_v19 = vunpack.c.l.bf16 %v9462_v0  ;;  %v9483_v20 = vunpack.c.l.bf16 %v9239_v1  ;;  %v9536_v4 = vld [vmem:[%s12313_s0 + $0x30] sm:$0xff]  }
  0x1c   :  { %5268 = vst.msk [vmem:[%s12314_s1 + $0xc] sm:$0xf] %vm5264_vm0, %v5139_v11  ;;  %v2450_v17 = vmax.f32 %v1809_v13, %v7459_v59  ;;  %v1169_v21 = vmax.f32 %v528_v14, %v6948_v15  ;;  %v7460_v26 = vunpack.c.h.bf16 %v8983_v44  ;;  %v6695_v27 = vunpack.c.l.bf16 %v8792_v8 }
  0x1d   :  { %v5140_v30 = vpack.c.bf16 %v5012_v16, %v5012_v16  ;;  %v4372_v31 = vmax.f32 %v3731_v18, %v8224_v58  ;;  %v7716_v32 = vunpack.c.h.bf16 %v9454_v55  ;;  %v8228_v34 = vunpack.c.h.bf16 %v9462_v0  ;;  %v8992_v0 = vld [vmem:[%s12313_s0 + $0x800] sm:$0xff]  }
  0x1e   :  { %v3091_v39 = vmax.f32 %v2450_v17, %v7715_v7  ;;  %v1810_v40 = vmax.f32 %v1169_v21, %v7712_v49  ;;  %v529_v41 = vmax.f32 %v6947_v53, %v6695_v27  ;;  %v6951_v42 = vunpack.c.l.bf16 %v9488_v22  ;;  %v9240_v49 = vld [vmem:[%s12313_s0 + $0x70] sm:$0xff]   ;;  %v9552_v17 = vld [vmem:[%s12313_s0 + $0x540] sm:$0xff]  }
  0x1f   :  { %5269 = vst.msk [vmem:[%s12314_s1 + $0x10] sm:$0xf] %vm5264_vm0, %v5140_v30  ;;  %v5013_v44 = vmax.f32 %v4372_v31, %v9469_v5  ;;  %v9517_v45 = vunpack.c.h.bf16 %v9239_v1  ;;  %v7463_v48 = vunpack.c.l.bf16 %v8984_v28  ;;  %v6696_v50 = vunpack.c.h.bf16 %v8792_v8 }
  0x20   :  { %v3732_v51 = vmax.f32 %v3091_v39, %v9440_v46  ;;  %v2451_v52 = vmax.f32 %v1810_v40, %v7460_v26  ;;  %v1170_v53 = vmax.f32 %v529_v41, %v6951_v42  ;;  %v7719_v55 = vunpack.c.l.bf16 %v9504_v38  ;;  %v9562_v39 = vld [vmem:[%s12313_s0 + $0x2f8] sm:$0xff]  }
  0x21   :  { %v5141_v57 = vpack.c.bf16 %v5013_v44, %v5013_v44  ;;  %v8231_v59 = vunpack.c.l.bf16 %v9510_v43  ;;  %v530_v60 = vmax.f32 %v6948_v15, %v6696_v50  ;;  %v6952_v61 = vunpack.c.h.bf16 %v9488_v22  ;;  %v8985_v22 = vld [vmem:[%s12313_s0 + $0x7c0] sm:$0xff]  }
  0x22   :  { %v4373_v62 = vmax.f32 %v3732_v51, %v8227_v19  ;;  %v3092_v1 = vmax.f32 %v2451_v52, %v7716_v32  ;;  %v1811_v2 = vmax.f32 %v1170_v53, %v7715_v7  ;;  %v9531_v3 = vunpack.c.l.bf16 %v9240_v49  ;;  %v9241_v51 = vld [vmem:[%s12313_s0 + $0x78] sm:$0xff]  }
  0x23   :  { %5270 = vst.msk [vmem:[%s12314_s1 + $0x14] sm:$0xf] %vm5264_vm0, %v5141_v57  ;;  %v1171_v8 = vmax.f32 %v530_v60, %v6952_v61  ;;  %v7464_v11 = vunpack.c.h.bf16 %v8984_v28  ;;  %v7720_v13 = vunpack.c.h.bf16 %v9504_v38  ;;  %v6699_v14 = vunpack.c.l.bf16 %v8793_v56 }
  0x24   :  { %v5014_v15 = vmax.f32 %v4373_v62, %v9483_v20  ;;  %v3733_v7 = vmax.f32 %v3092_v1, %v9469_v5  ;;  %v2452_v16 = vmax.f32 %v1811_v2, %v7463_v48  ;;  %v8232_v18 = vunpack.c.h.bf16 %v9510_v43  ;;  %v9582_v1 = vld [vmem:[%s12313_s0 + $0x38] sm:$0xff]  }
  0x25   :  { %v1812_v21 = vmax.f32 %v1171_v8, %v7716_v32  ;;  %v9554_v26 = vunpack.c.h.bf16 %v9240_v49  ;;  %v531_v27 = vmax.f32 %v6951_v42, %v6699_v14  ;;  %v6955_v28 = vunpack.c.l.bf16 %v9536_v4  ;;  %v8794_v42 = vld [vmem:[%s12313_s0 + $0x2b8] sm:$0xff]  }
  0x26   :  { %v5142_v30 = vpack.c.bf16 %v5014_v15, %v5014_v15  ;;  %v4374_v31 = vmax.f32 %v3733_v7, %v8228_v34  ;;  %v3093_v38 = vmax.f32 %v2452_v16, %v7719_v55  ;;  %v6700_v40 = vunpack.c.h.bf16 %v8793_v56 }
  0x27   :  { %v2453_v41 = vmax.f32 %v1812_v21, %v7464_v11  ;;  %v1172_v44 = vmax.f32 %v531_v27, %v6955_v28  ;;  %v7467_v48 = vunpack.c.l.bf16 %v8985_v22  ;;  %v7723_v32 = vunpack.c.l.bf16 %v9552_v17 }
  0x28   :  { %5271 = vst.msk [vmem:[%s12314_s1 + $0x18] sm:$0xf] %vm5264_vm0, %v5142_v30  ;;  %v5015_v49 = vmax.f32 %v4374_v31, %v9517_v45  ;;  %v3734_v50 = vmax.f32 %v3093_v38, %v9483_v20  ;;  %v532_v52 = vmax.f32 %v6952_v61, %v6700_v40  ;;  %v6956_v53 = vunpack.c.h.bf16 %v9536_v4  ;;  %v8986_v61 = vld [vmem:[%s12313_s0 + $0x7c8] sm:$0xff]  }
  0x29   :  { %v3094_v56 = vmax.f32 %v2453_v41, %v7720_v13  ;;  %v1813_v57 = vmax.f32 %v1172_v44, %v7719_v55  ;;  %v12315_v60 = vunpack.c.l.bf16 %v9562_v39  ;;  %v7468_v62 = vunpack.c.h.bf16 %v8985_v22  ;;  %v9602_v30 = vld [vmem:[%s12313_s0 + $0x548] sm:$0xff]  }
  0x2a   :  { %v5143_v2 = vpack.c.bf16 %v5015_v49, %v5015_v49  ;;  %v4375_v8 = vmax.f32 %v3734_v50, %v8231_v59  ;;  %v1173_v11 = vmax.f32 %v532_v52, %v6956_v53  ;;  %v6703_v14 = vunpack.c.l.bf16 %v8794_v42 }
  0x2b   :  { %v3735_v55 = vmax.f32 %v3094_v56, %v9517_v45  ;;  %v2454_v4 = vmax.f32 %v1813_v57, %v7467_v48  ;;  %v9590_v15 = vunpack.c.l.bf16 %v9241_v51  ;;  %v7724_v7 = vunpack.c.h.bf16 %v9552_v17  ;;  %v8795_v57 = vld [vmem:[%s12313_s0 + $0x2c0] sm:$0xff]  }
  0x2c   :  { %5272 = vst.msk [vmem:[%s12314_s1 + $0x1c] sm:$0xf] %vm5264_vm0, %v5143_v2  ;;  %v5016_v16 = vmax.f32 %v4375_v8, %v9531_v3  ;;  %v1814_v22 = vmax.f32 %v1173_v11, %v7720_v13  ;;  %v533_v21 = vmax.f32 %v6955_v28, %v6703_v14  ;;  %v6959_v27 = vunpack.c.l.bf16 %v9582_v1  ;;  %v9610_v13 = vld [vmem:[%s12313_s0 + $0x300] sm:$0xff]  }
  0x2d   :  { %v4376_v31 = vmax.f32 %v3735_v55, %v8232_v18  ;;  %v3095_v17 = vmax.f32 %v2454_v4, %v7723_v32  ;;  %v8236_v38 = vunpack.c.h.bf16 %v9562_v39  ;;  %v7471_v40 = vunpack.c.l.bf16 %v8986_v61  ;;  %v8859_v11 = vld [vmem:[%s12313_s0 + $0x40] sm:$0xff]  }
  0x2e   :  { %v5144_v41 = vpack.c.bf16 %v5016_v16, %v5016_v16  ;;  %v2455_v44 = vmax.f32 %v1814_v22, %v7468_v62  ;;  %v1174_v48 = vmax.f32 %v533_v21, %v6959_v27  ;;  %v6704_v28 = vunpack.c.h.bf16 %v8794_v42  ;;  %v9242_v42 = vld [vmem:[%s12313_s0 + $0x80] sm:$0xff]  }
  0x2f   :  { %v5017_v49 = vmax.f32 %v4376_v31, %v9554_v26  ;;  %v3736_v50 = vmax.f32 %v3095_v17, %v9531_v3  ;;  %v9614_v52 = vunpack.c.h.bf16 %v9241_v51  ;;  %v7727_v56 = vunpack.c.l.bf16 %v9602_v30 }
  0x30   :  { %5273 = vst.msk [vmem:[%s12314_s1 + $0x20] sm:$0xf] %vm5264_vm0, %v5144_v41  ;;  %v3096_v62 = vmax.f32 %v2455_v44, %v7724_v7  ;;  %v1815_v2 = vmax.f32 %v1174_v48, %v7723_v32  ;;  %v534_v8 = vmax.f32 %v6956_v53, %v6704_v28  ;;  %v6960_v51 = vunpack.c.h.bf16 %v9582_v1  ;;  %v8987_v53 = vld [vmem:[%s12313_s0 + $0x7d0] sm:$0xff]  }
  0x31   :  { %v5145_v14 = vpack.c.bf16 %v5017_v49, %v5017_v49  ;;  %v4377_v55 = vmax.f32 %v3736_v50, %v12315_v60  ;;  %v8239_v4 = vunpack.c.l.bf16 %v9610_v13  ;;  %v7472_v16 = vunpack.c.h.bf16 %v8986_v61  ;;  %v9051_v49 = vld [vmem:[%s12313_s0 + $0x550] sm:$0xff]  }
  0x32   :  { %v3737_v32 = vmax.f32 %v3096_v62, %v9554_v26  ;;  %v2456_v22 = vmax.f32 %v1815_v2, %v7471_v40  ;;  %v1175_v21 = vmax.f32 %v534_v8, %v6960_v51  ;;  %v6707_v31 = vunpack.c.l.bf16 %v8795_v57 }
  0x33   :  { %5274 = vst.msk [vmem:[%s12314_s1 + $0x24] sm:$0xf] %vm5264_vm0, %v5145_v14  ;;  %v5018_v1 = vmax.f32 %v4377_v55, %v9590_v15  ;;  %v9643_v17 = vunpack.c.l.bf16 %v9242_v42  ;;  %v7728_v61 = vunpack.c.h.bf16 %v9602_v30  ;;  %v6963_v41 = vunpack.c.l.bf16 %v8859_v11 }
  0x34   :  { %v4378_v40 = vmax.f32 %v3737_v32, %v8236_v38  ;;  %v3097_v44 = vmax.f32 %v2456_v22, %v7727_v56  ;;  %v1816_v48 = vmax.f32 %v1175_v21, %v7724_v7  ;;  %v535_v28 = vmax.f32 %v6959_v27, %v6707_v31  ;;  %v9657_v7 = vld [vmem:[%s12313_s0 + $0x308] sm:$0xff]  }
  0x35   :  { %v5146_v50 = vpack.c.bf16 %v5018_v1, %v5018_v1  ;;  %v8240_v62 = vunpack.c.h.bf16 %v9610_v13  ;;  %v7475_v2 = vunpack.c.l.bf16 %v8987_v53  ;;  %v6708_v8 = vunpack.c.h.bf16 %v8795_v57  ;;  %v8995_v13 = vld [vmem:[%s12313_s0 + $0x818] sm:$0xff]  }
  0x36   :  { %v5019_v14 = vmax.f32 %v4378_v40, %v9614_v52  ;;  %v3738_v30 = vmax.f32 %v3097_v44, %v9590_v15  ;;  %v2457_v55 = vmax.f32 %v1816_v48, %v7472_v16  ;;  %v1176_v60 = vmax.f32 %v535_v28, %v6963_v41  ;;  %v8924_v16 = vld [vmem:[%s12313_s0 + $0x558] sm:$0xff]   ;;  %v8988_v40 = vld [vmem:[%s12313_s0 + $0x7e0] sm:$0xff]  }
  0x37   :  { %5275 = vst.msk [vmem:[%s12314_s1 + $0x28] sm:$0xf] %vm5264_vm0, %v5146_v50  ;;  %v9663_v27 = vunpack.c.h.bf16 %v9242_v42  ;;  %v7731_v32 = vunpack.c.l.bf16 %v9051_v49  ;;  %v536_v57 = vmax.f32 %v6960_v51, %v6708_v8  ;;  %v6964_v22 = vunpack.c.h.bf16 %v8859_v11  ;;  %v9677_v51 = vld [vmem:[%s12313_s0 + $0x88] sm:$0xff]  }
  0x38   :  { %v5147_v21 = vpack.c.bf16 %v5019_v14, %v5019_v14  ;;  %v4379_v31 = vmax.f32 %v3738_v30, %v8239_v4  ;;  %v3098_v1 = vmax.f32 %v2457_v55, %v7728_v61  ;;  %v1817_v41 = vmax.f32 %v1176_v60, %v7727_v56 }
  0x39   :  { %v8243_v42 = vunpack.c.l.bf16 %v9657_v7  ;;  %v1177_v11 = vmax.f32 %v536_v57, %v6964_v22  ;;  %v7476_v44 = vunpack.c.h.bf16 %v8987_v53  ;;  %v537_v48 = vmax.f32 %v7959_v23, %v8215_v24  ;;  %v9696_v22 = vld [vmem:[%s12313_s0 + $0x560] sm:$0xff]  }
  0x3a   :  { %5276 = vst.msk [vmem:[%s12314_s1 + $0x2c] sm:$0xf] %vm5264_vm0, %v5147_v21  ;;  %v5020_v60 = vmax.f32 %v4379_v31, %v9643_v17  ;;  %v3739_v56 = vmax.f32 %v3098_v1, %v9614_v52  ;;  %v2458_v28 = vmax.f32 %v1817_v41, %v7475_v2  ;;  %v7223_v50 = vunpack.c.l.bf16 %v8924_v16  ;;  %v9714_v41 = vld [vmem:[%s12313_s0 + $0x318] sm:$0xff]  }
  0x3b   :  { %v1818_v8 = vmax.f32 %v1177_v11, %v7728_v61  ;;  %v7732_v14 = vunpack.c.h.bf16 %v9051_v49  ;;  %v1178_v53 = vmax.f32 %v537_v48, %v9349_v25  ;;  %v7479_v30 = vunpack.c.l.bf16 %v8988_v40  ;;  %v9701_v61 = vld [vmem:[%s12313_s0 + $0x90] sm:$0xff]   ;;  %v9244_v11 = vld [vmem:[%s12313_s0 + $0x98] sm:$0xff]  }
  0x3c   :  { %v5148_v55 = vpack.c.bf16 %v5020_v60, %v5020_v60  ;;  %v4380_v23 = vmax.f32 %v3739_v56, %v8240_v62  ;;  %v3099_v24 = vmax.f32 %v2458_v28, %v7731_v32  ;;  %v8499_v57 = vunpack.c.l.bf16 %v9677_v51 }
  0x3d   :  { %v2459_v49 = vmax.f32 %v1818_v8, %v7476_v44  ;;  %v8244_v2 = vunpack.c.h.bf16 %v9657_v7  ;;  %v8500_v21 = vunpack.c.h.bf16 %v9677_v51  ;;  %v1819_v31 = vmax.f32 %v1178_v53, %v7223_v50  ;;  %v8996_v7 = vld [vmem:[%s12313_s0 + $0x828] sm:$0xff]   ;;  %v10057_v51 = vld [vmem:[%s12313_s0 + $0x350] sm:$0xff]  }
  0x3e   :  { %5277 = vst.msk [vmem:[%s12314_s1 + $0x30] sm:$0xf] %vm5264_vm0, %v5148_v55  ;;  %v5021_v32 = vmax.f32 %v4380_v23, %v9663_v27  ;;  %v3740_v1 = vmax.f32 %v3099_v24, %v9643_v17  ;;  %v538_v44 = vmax.f32 %v7960_v35, %v8216_v36  ;;  %v7224_v48 = vunpack.c.h.bf16 %v8924_v16  ;;  %v8989_v36 = vld [vmem:[%s12313_s0 + $0x7e8] sm:$0xff]  }
  0x3f   :  { %v3100_v60 = vmax.f32 %v2459_v49, %v7732_v14  ;;  %v2460_v56 = vmax.f32 %v1819_v31, %v7479_v30  ;;  %v7735_v28 = vunpack.c.l.bf16 %v9696_v22  ;;  %v7991_v50 = vunpack.c.l.bf16 %v9701_v61 }
  0x40   :  { %v5149_v8 = vpack.c.bf16 %v5021_v32, %v5021_v32  ;;  %v4381_v53 = vmax.f32 %v3740_v1, %v8243_v42  ;;  %v1179_v55 = vmax.f32 %v538_v44, %v9370_v37  ;;  %v7480_v23 = vunpack.c.h.bf16 %v8988_v40  ;;  %v9053_v44 = vld [vmem:[%s12313_s0 + $0x568] sm:$0xff]  }
  0x41   :  { %v3741_v24 = vmax.f32 %v3100_v60, %v9663_v27  ;;  %v3101_v10 = vmax.f32 %v2460_v56, %v7735_v28  ;;  %v8247_v9 = vunpack.c.l.bf16 %v9714_v41  ;;  %v9730_v35 = vunpack.c.l.bf16 %v9244_v11 }
  0x42   :  { %5278 = vst.msk [vmem:[%s12314_s1 + $0x34] sm:$0xf] %vm5264_vm0, %v5149_v8  ;;  %v5022_v16 = vmax.f32 %v4381_v53, %v8499_v57  ;;  %v1820_v40 = vmax.f32 %v1179_v55, %v7224_v48  ;;  %v7736_v14 = vunpack.c.h.bf16 %v9696_v22  ;;  %v539_v30 = vmax.f32 %v9349_v25, %v8219_v47  ;;  %v9757_v22 = vld [vmem:[%s12313_s0 + $0x320] sm:$0xff]  }
  0x43   :  { %v4382_v49 = vmax.f32 %v3741_v24, %v8244_v2  ;;  %v3742_v31 = vmax.f32 %v3101_v10, %v7991_v50  ;;  %v12316_v32 = vunpack.c.h.bf16 %v9701_v61  ;;  %v8248_v1 = vunpack.c.h.bf16 %v9714_v41  ;;  %v9245_v55 = vld [vmem:[%s12313_s0 + $0xa0] sm:$0xff]  }
  0x44   :  { %v5150_v25 = vpack.c.bf16 %v5022_v16, %v5022_v16  ;;  %v2461_v47 = vmax.f32 %v1820_v40, %v7480_v23  ;;  %v1180_v48 = vmax.f32 %v539_v30, %v9385_v54  ;;  %v7483_v60 = vunpack.c.l.bf16 %v8989_v36 }
  0x45   :  { %v5023_v56 = vmax.f32 %v4382_v49, %v8500_v21  ;;  %v4383_v8 = vmax.f32 %v3742_v31, %v8247_v9  ;;  %v9764_v53 = vunpack.c.h.bf16 %v9244_v11  ;;  %v540_v24 = vmax.f32 %v9370_v37, %v8220_v63 }
  0x46   :  { %5279 = vst.msk [vmem:[%s12314_s1 + $0x38] sm:$0xf] %vm5264_vm0, %v5150_v25  ;;  %v3102_v23 = vmax.f32 %v2461_v47, %v7736_v14  ;;  %v1821_v10 = vmax.f32 %v1180_v48, %v7735_v28  ;;  %v7739_v16 = vunpack.c.l.bf16 %v9053_v44  ;;  %v8251_v40 = vunpack.c.l.bf16 %v9757_v22  ;;  %v9792_v47 = vld [vmem:[%s12313_s0 + $0x570] sm:$0xff]  }
  0x47   :  { %v5151_v11 = vpack.c.bf16 %v5023_v56, %v5023_v56  ;;  %v5024_v30 = vmax.f32 %v4383_v8, %v9730_v35  ;;  %v1181_v49 = vmax.f32 %v540_v24, %v9402_v6  ;;  %v7484_v31 = vunpack.c.h.bf16 %v8989_v36  ;;  %v9802_v8 = vld [vmem:[%s12313_s0 + $0x328] sm:$0xff]  }
  0x48   :  { %v3743_v37 = vmax.f32 %v3102_v23, %v12316_v32  ;;  %v2462_v63 = vmax.f32 %v1821_v10, %v7483_v60  ;;  %v9784_v25 = vunpack.c.l.bf16 %v9245_v55  ;;  %v541_v28 = vmax.f32 %v9385_v54, %v8223_v29 }
  0x49   :  { %5280 = vst.msk [vmem:[%s12314_s1 + $0x3c] sm:$0xf] %vm5264_vm0, %v5151_v11  ;;  %v5152_v36 = vpack.c.bf16 %v5024_v30, %v5024_v30  ;;  %v1822_v48 = vmax.f32 %v1181_v49, %v7736_v14  ;;  %v7740_v56 = vunpack.c.h.bf16 %v9053_v44  ;;  %v8252_v60 = vunpack.c.h.bf16 %v9757_v22  ;;  %v9246_v11 = vld [vmem:[%s12313_s0 + $0xa8] sm:$0xff]  }
  0x4a   :  { %v4384_v54 = vmax.f32 %v3743_v37, %v8248_v1  ;;  %v3103_v29 = vmax.f32 %v2462_v63, %v7739_v16  ;;  %v1182_v24 = vmax.f32 %v541_v28, %v9440_v46  ;;  %v7487_v23 = vunpack.c.l.bf16 %v8990_v33 }
  0x4b   :  { %5281 = vst.msk [vmem:[%s12314_s1 + $0x40] sm:$0xf] %vm5264_vm0, %v5152_v36  ;;  %v2463_v14 = vmax.f32 %v1822_v48, %v7484_v31  ;;  %v9811_v44 = vunpack.c.h.bf16 %v9245_v55  ;;  %v7743_v10 = vunpack.c.l.bf16 %v9792_v47  ;;  %v542_v30 = vmax.f32 %v9402_v6, %v8224_v58  ;;  %v8991_v55 = vld [vmem:[%s12313_s0 + $0x7f8] sm:$0xff]  }
  0x4c   :  { %v5025_v49 = vmax.f32 %v4384_v54, %v9764_v53  ;;  %v3744_v37 = vmax.f32 %v3103_v29, %v9730_v35  ;;  %v1823_v63 = vmax.f32 %v1182_v24, %v7739_v16  ;;  %v8255_v28 = vunpack.c.l.bf16 %v9802_v8 }
  0x4d   :  { %v3104_v31 = vmax.f32 %v2463_v14, %v7740_v56  ;;  %v1183_v36 = vmax.f32 %v542_v30, %v9469_v5  ;;  %v7488_v48 = vunpack.c.h.bf16 %v8990_v33  ;;  %v543_v12 = vmax.f32 %v9440_v46, %v8227_v19  ;;  %v9839_v33 = vld [vmem:[%s12313_s0 + $0x578] sm:$0xff]  }
  0x4e   :  { %v5153_v6 = vpack.c.bf16 %v5025_v49, %v5025_v49  ;;  %v4385_v58 = vmax.f32 %v3744_v37, %v8251_v40  ;;  %v2464_v54 = vmax.f32 %v1823_v63, %v7487_v23  ;;  %v9832_v16 = vunpack.c.l.bf16 %v9246_v11  ;;  %v9853_v63 = vld [vmem:[%s12313_s0 + $0x330] sm:$0xff]  }
  0x4f   :  { %v3745_v29 = vmax.f32 %v3104_v31, %v9764_v53  ;;  %v1824_v24 = vmax.f32 %v1183_v36, %v7740_v56  ;;  %v1184_v32 = vmax.f32 %v543_v12, %v9483_v20  ;;  %v7491_v14 = vunpack.c.l.bf16 %v8991_v55 }
  0x50   :  { %5282 = vst.msk [vmem:[%s12314_s1 + $0x44] sm:$0xf] %vm5264_vm0, %v5153_v6  ;;  %v5026_v46 = vmax.f32 %v4385_v58, %v9784_v25  ;;  %v3105_v19 = vmax.f32 %v2464_v54, %v7743_v10  ;;  %v7744_v23 = vunpack.c.h.bf16 %v9792_v47  ;;  %v8256_v56 = vunpack.c.h.bf16 %v9802_v8 }
  0x51   :  { %v4386_v30 = vmax.f32 %v3745_v29, %v8252_v60  ;;  %v2465_v49 = vmax.f32 %v1824_v24, %v7488_v48  ;;  %v1825_v37 = vmax.f32 %v1184_v32, %v7743_v10  ;;  %v544_v31 = vmax.f32 %v9469_v5, %v8228_v34  ;;  %v9247_v32 = vld [vmem:[%s12313_s0 + $0xb0] sm:$0xff]  }
  0x52   :  { %v5154_v36 = vpack.c.bf16 %v5026_v46, %v5026_v46  ;;  %v3746_v12 = vmax.f32 %v3105_v19, %v9784_v25  ;;  %v7747_v47 = vunpack.c.l.bf16 %v9839_v33  ;;  %v7492_v6 = vunpack.c.h.bf16 %v8991_v55 }
  0x53   :  { %v5027_v58 = vmax.f32 %v4386_v30, %v9811_v44  ;;  %v3106_v54 = vmax.f32 %v2465_v49, %v7744_v23  ;;  %v2466_v48 = vmax.f32 %v1825_v37, %v7491_v14  ;;  %v1185_v10 = vmax.f32 %v544_v31, %v9517_v45 }
  0x54   :  { %5283 = vst.msk [vmem:[%s12314_s1 + $0x48] sm:$0xf] %vm5264_vm0, %v5154_v36  ;;  %v4387_v5 = vmax.f32 %v3746_v12, %v8255_v28  ;;  %v9874_v34 = vunpack.c.h.bf16 %v9246_v11  ;;  %v8259_v55 = vunpack.c.l.bf16 %v9853_v63  ;;  %v545_v29 = vmax.f32 %v9483_v20, %v8231_v59  ;;  %v9056_v36 = vld [vmem:[%s12313_s0 + $0x580] sm:$0xff]  }
  0x55   :  { %v5155_v24 = vpack.c.bf16 %v5027_v58, %v5027_v58  ;;  %v3747_v14 = vmax.f32 %v3106_v54, %v9811_v44  ;;  %v3107_v46 = vmax.f32 %v2466_v48, %v7747_v47  ;;  %v1826_v19 = vmax.f32 %v1185_v10, %v7744_v23  ;;  %v9900_v48 = vld [vmem:[%s12313_s0 + $0x338] sm:$0xff]  }
  0x56   :  { %v5028_v30 = vmax.f32 %v4387_v5, %v9832_v16  ;;  %v9882_v49 = vunpack.c.l.bf16 %v9247_v32  ;;  %v1186_v37 = vmax.f32 %v545_v29, %v9531_v3  ;;  %v7495_v31 = vunpack.c.l.bf16 %v8992_v0 }
  0x57   :  { %5284 = vst.msk [vmem:[%s12314_s1 + $0x4c] sm:$0xf] %vm5264_vm0, %v5155_v24  ;;  %v4388_v20 = vmax.f32 %v3747_v14, %v8256_v56  ;;  %v3748_v59 = vmax.f32 %v3107_v46, %v9832_v16  ;;  %v2467_v11 = vmax.f32 %v1826_v19, %v7492_v6  ;;  %v7748_v23 = vunpack.c.h.bf16 %v9839_v33 }
  0x58   :  { %v5156_v12 = vpack.c.bf16 %v5028_v30, %v5028_v30  ;;  %v8260_v58 = vunpack.c.h.bf16 %v9853_v63  ;;  %v1827_v54 = vmax.f32 %v1186_v37, %v7747_v47  ;;  %v546_v10 = vmax.f32 %v9517_v45, %v8232_v18  ;;  %v9248_v47 = vld [vmem:[%s12313_s0 + $0xb8] sm:$0xff]   ;;  %v8993_v30 = vld [vmem:[%s12313_s0 + $0x808] sm:$0xff]  }
  0x59   :  { %v5029_v6 = vmax.f32 %v4388_v20, %v9874_v34  ;;  %v4389_v33 = vmax.f32 %v3748_v59, %v8259_v55  ;;  %v3108_v5 = vmax.f32 %v2467_v11, %v7748_v23  ;;  %v9908_v29 = vunpack.c.h.bf16 %v9247_v32  ;;  %v9000_v63 = vld [vmem:[%s12313_s0 + $0x848] sm:$0xff]  }
  0x5a   :  { %5285 = vst.msk [vmem:[%s12314_s1 + $0x50] sm:$0xf] %vm5264_vm0, %v5156_v12  ;;  %v2468_v43 = vmax.f32 %v1827_v54, %v7495_v31  ;;  %v7751_v24 = vunpack.c.l.bf16 %v9056_v36  ;;  %v1187_v45 = vmax.f32 %v546_v10, %v9554_v26  ;;  %v7496_v18 = vunpack.c.h.bf16 %v8992_v0  ;;  %v9932_v0 = vld [vmem:[%s12313_s0 + $0x588] sm:$0xff]  }
  0x5b   :  { %v5157_v14 = vpack.c.bf16 %v5029_v6, %v5029_v6  ;;  %v5030_v46 = vmax.f32 %v4389_v33, %v9882_v49  ;;  %v3749_v32 = vmax.f32 %v3108_v5, %v9874_v34  ;;  %v8263_v19 = vunpack.c.l.bf16 %v9900_v48 }
  0x5c   :  { %v3109_v37 = vmax.f32 %v2468_v43, %v7751_v24  ;;  %v9924_v20 = vunpack.c.l.bf16 %v9248_v47  ;;  %v1828_v59 = vmax.f32 %v1187_v45, %v7748_v23  ;;  %v12327_v31 = vunpack.c.l.bf16 %v9562_v39 }
  0x5d   :  { %5286 = vst.msk [vmem:[%s12314_s1 + $0x54] sm:$0xf] %vm5264_vm0, %v5157_v14  ;;  %v5158_v12 = vpack.c.bf16 %v5030_v46, %v5030_v46  ;;  %v4390_v54 = vmax.f32 %v3749_v32, %v8260_v58  ;;  %v7752_v10 = vunpack.c.h.bf16 %v9056_v36  ;;  %v8264_v23 = vunpack.c.h.bf16 %v9900_v48  ;;  %v9249_v46 = vld [vmem:[%s12313_s0 + $0xc0] sm:$0xff]  }
  0x5e   :  { %v547_v11 = vmax.f32 %v9531_v3, %v12327_v31  ;;  %v9944_v3 = vld [vmem:[%s12313_s0 + $0x340] sm:$0xff]   ;;  %v3750_v6 = vmax.f32 %v3109_v37, %v9882_v49  ;;  %v2469_v33 = vmax.f32 %v1828_v59, %v7496_v18  ;;  %v7499_v43 = vunpack.c.l.bf16 %v8993_v30 }
  0x5f   :  { %5287 = vst.msk [vmem:[%s12314_s1 + $0x58] sm:$0xf] %vm5264_vm0, %v5158_v12  ;;  %v5031_v36 = vmax.f32 %v4390_v54, %v9908_v29  ;;  %v9953_v45 = vunpack.c.h.bf16 %v9248_v47  ;;  %v7755_v14 = vunpack.c.l.bf16 %v9932_v0  ;;  %v548_v18 = vmax.f32 %v9554_v26, %v8236_v38  ;;  %v8994_v47 = vld [vmem:[%s12313_s0 + $0x810] sm:$0xff]  }
  0x60   :  { %v1188_v5 = vmax.f32 %v547_v11, %v9590_v15  ;;  %v4391_v32 = vmax.f32 %v3750_v6, %v8263_v19  ;;  %v3110_v37 = vmax.f32 %v2469_v33, %v7752_v10  ;;  %v8267_v31 = vunpack.c.l.bf16 %v9944_v3 }
  0x61   :  { %v5159_v11 = vpack.c.bf16 %v5031_v36, %v5031_v36  ;;  %v1189_v12 = vmax.f32 %v548_v18, %v9614_v52  ;;  %v7500_v54 = vunpack.c.h.bf16 %v8993_v30  ;;  %v549_v39 = vmax.f32 %v9590_v15, %v8239_v4  ;;  %v9058_v15 = vld [vmem:[%s12313_s0 + $0x590] sm:$0xff]   ;;  %v9988_v4 = vld [vmem:[%s12313_s0 + $0x348] sm:$0xff]  }
  0x62   :  { %v1829_v59 = vmax.f32 %v1188_v5, %v7751_v24  ;;  %v5032_v26 = vmax.f32 %v4391_v32, %v9924_v20  ;;  %v3751_v38 = vmax.f32 %v3110_v37, %v9908_v29  ;;  %v9974_v24 = vunpack.c.l.bf16 %v9249_v46 }
  0x63   :  { %5288 = vst.msk [vmem:[%s12314_s1 + $0x5c] sm:$0xf] %vm5264_vm0, %v5159_v11  ;;  %v1830_v33 = vmax.f32 %v1189_v12, %v7752_v10  ;;  %v7756_v5 = vunpack.c.h.bf16 %v9932_v0  ;;  %v1190_v30 = vmax.f32 %v549_v39, %v9643_v17  ;;  %v7503_v36 = vunpack.c.l.bf16 %v8994_v47  ;;  %v9250_v11 = vld [vmem:[%s12313_s0 + $0xc8] sm:$0xff]  }
  0x64   :  { %v2470_v6 = vmax.f32 %v1829_v59, %v7499_v43  ;;  %v5160_v43 = vpack.c.bf16 %v5032_v26, %v5032_v26  ;;  %v4392_v18 = vmax.f32 %v3751_v38, %v8264_v23  ;;  %v8268_v10 = vunpack.c.h.bf16 %v9944_v3 }
  0x65   :  { %v2471_v0 = vmax.f32 %v1830_v33, %v7500_v54  ;;  %v9993_v37 = vunpack.c.h.bf16 %v9249_v46  ;;  %v1831_v59 = vmax.f32 %v1190_v30, %v7755_v14  ;;  %v550_v12 = vmax.f32 %v9614_v52, %v8240_v62 }
  0x66   :  { %v3111_v32 = vmax.f32 %v2470_v6, %v7755_v14  ;;  %5289 = vst.msk [vmem:[%s12314_s1 + $0x60] sm:$0xf] %vm5264_vm0, %v5160_v43  ;;  %v5033_v39 = vmax.f32 %v4392_v18, %v9953_v45  ;;  %v7759_v46 = vunpack.c.l.bf16 %v9058_v15  ;;  %v8271_v14 = vunpack.c.l.bf16 %v9988_v4 }
  0x67   :  { %v3112_v26 = vmax.f32 %v2471_v0, %v7756_v5  ;;  %v2472_v38 = vmax.f32 %v1831_v59, %v7503_v36  ;;  %v1191_v6 = vmax.f32 %v550_v12, %v9663_v27  ;;  %v7504_v33 = vunpack.c.h.bf16 %v8994_v47  ;;  %v9059_v47 = vld [vmem:[%s12313_s0 + $0x598] sm:$0xff]  }
  0x68   :  { %v3752_v54 = vmax.f32 %v3111_v32, %v9924_v20  ;;  %v5161_v52 = vpack.c.bf16 %v5033_v39, %v5033_v39  ;;  %v10014_v30 = vunpack.c.l.bf16 %v9250_v11  ;;  %v551_v43 = vmax.f32 %v9643_v17, %v8243_v42 }
  0x69   :  { %v3753_v18 = vmax.f32 %v3112_v26, %v9953_v45  ;;  %v3113_v36 = vmax.f32 %v2472_v38, %v7759_v46  ;;  %v1832_v32 = vmax.f32 %v1191_v6, %v7756_v5  ;;  %v7760_v0 = vunpack.c.h.bf16 %v9058_v15 }
  0x6a   :  { %v4393_v62 = vmax.f32 %v3752_v54, %v8267_v31  ;;  %5290 = vst.msk [vmem:[%s12314_s1 + $0x64] sm:$0xf] %vm5264_vm0, %v5161_v52  ;;  %v8272_v12 = vunpack.c.h.bf16 %v9988_v4  ;;  %v1192_v17 = vmax.f32 %v551_v43, %v8499_v57  ;;  %v7507_v42 = vunpack.c.l.bf16 %v8995_v13  ;;  %v9003_v4 = vld [vmem:[%s12313_s0 + $0x860] sm:$0xff]  }
  0x6b   :  { %v4394_v5 = vmax.f32 %v3753_v18, %v8268_v10  ;;  %v3754_v15 = vmax.f32 %v3113_v36, %v9974_v24  ;;  %v2473_v39 = vmax.f32 %v1832_v32, %v7504_v33  ;;  %v552_v54 = vmax.f32 %v9663_v27, %v8244_v2  ;;  %v8932_v33 = vld [vmem:[%s12313_s0 + $0x5a0] sm:$0xff]  }
  0x6c   :  { %v5034_v59 = vmax.f32 %v4393_v62, %v9974_v24  ;;  %v1833_v38 = vmax.f32 %v1192_v17, %v7759_v46  ;;  %v7763_v6 = vunpack.c.l.bf16 %v9059_v47  ;;  %v7508_v52 = vunpack.c.h.bf16 %v8995_v13 }
  0x6d   :  { %v5035_v62 = vmax.f32 %v4394_v5, %v9993_v37  ;;  %v4395_v57 = vmax.f32 %v3754_v15, %v8271_v14  ;;  %v3114_v43 = vmax.f32 %v2473_v39, %v7760_v0  ;;  %v1193_v18 = vmax.f32 %v552_v54, %v8500_v21 }
  0x6e   :  { %v5162_v26 = vpack.c.bf16 %v5034_v59, %v5034_v59  ;;  %v10052_v27 = vunpack.c.h.bf16 %v9250_v11  ;;  %v2474_v2 = vmax.f32 %v1833_v38, %v7507_v42  ;;  %v7764_v21 = vunpack.c.h.bf16 %v9059_v47  ;;  %v10068_v11 = vld [vmem:[%s12313_s0 + $0xd0] sm:$0xff]  }
  0x6f   :  { %v553_v46 = vmax.f32 %v7991_v50, %v8247_v9  ;;  %v5163_v13 = vpack.c.bf16 %v5035_v62, %v5035_v62  ;;  %v5036_v36 = vmax.f32 %v4395_v57, %v10014_v30  ;;  %v3755_v32 = vmax.f32 %v3114_v43, %v9993_v37  ;;  %v10095_v43 = vld [vmem:[%s12313_s0 + $0xd8] sm:$0xff]  }
  0x70   :  { %5291 = vst.msk [vmem:[%s12314_s1 + $0x68] sm:$0xf] %vm5264_vm0, %v5162_v26  ;;  %v1834_v59 = vmax.f32 %v1193_v18, %v7760_v0  ;;  %v3115_v17 = vmax.f32 %v2474_v2, %v7763_v6  ;;  %v7255_v47 = vunpack.c.l.bf16 %v8932_v33  ;;  %v7511_v5 = vunpack.c.l.bf16 %v8996_v7  ;;  %v10081_v0 = vld [vmem:[%s12313_s0 + $0x5a8] sm:$0xff]   ;;  %v10100_v18 = vld [vmem:[%s12313_s0 + $0x360] sm:$0xff]  }
  0x71   :  { %v1194_v42 = vmax.f32 %v553_v46, %v9730_v35  ;;  %5292 = vst.msk [vmem:[%s12314_s1 + $0x6c] sm:$0xf] %vm5264_vm0, %v5163_v13  ;;  %v5164_v50 = vpack.c.bf16 %v5036_v36, %v5036_v36  ;;  %v4396_v9 = vmax.f32 %v3755_v32, %v8272_v12  ;;  %v8275_v15 = vunpack.c.l.bf16 %v10057_v51  ;;  %v9252_v32 = vld [vmem:[%s12313_s0 + $0xe0] sm:$0xff]  }
  0x72   :  { %v2475_v39 = vmax.f32 %v1834_v59, %v7508_v52  ;;  %v3756_v54 = vmax.f32 %v3115_v17, %v10014_v30  ;;  %v8531_v26 = vunpack.c.l.bf16 %v10068_v11  ;;  %v8276_v38 = vunpack.c.h.bf16 %v10057_v51 }
  0x73   :  { %v1835_v6 = vmax.f32 %v1194_v42, %v7255_v47  ;;  %5293 = vst.msk [vmem:[%s12314_s1 + $0x70] sm:$0xf] %vm5264_vm0, %v5164_v50  ;;  %v5037_v62 = vmax.f32 %v4396_v9, %v10052_v27  ;;  %v8532_v57 = vunpack.c.h.bf16 %v10068_v11  ;;  %v12328_v2 = vunpack.c.h.bf16 %v9701_v61  ;;  %v8997_v9 = vld [vmem:[%s12313_s0 + $0x830] sm:$0xff]   ;;  %v10443_v11 = vld [vmem:[%s12313_s0 + $0x398] sm:$0xff]  }
  0x74   :  { %v3116_v52 = vmax.f32 %v2475_v39, %v7764_v21  ;;  %v4397_v21 = vmax.f32 %v3756_v54, %v8275_v15  ;;  %v7767_v36 = vunpack.c.l.bf16 %v10081_v0  ;;  %v7256_v59 = vunpack.c.h.bf16 %v8932_v33 }
  0x75   :  { %v554_v46 = vmax.f32 %v12328_v2, %v8248_v1  ;;  %v2476_v13 = vmax.f32 %v1835_v6, %v7511_v5  ;;  %v5165_v17 = vpack.c.bf16 %v5037_v62, %v5037_v62  ;;  %v7512_v41 = vunpack.c.h.bf16 %v8996_v7 }
  0x76   :  { %v3757_v42 = vmax.f32 %v3116_v52, %v10052_v27  ;;  %v5038_v61 = vmax.f32 %v4397_v21, %v8531_v26  ;;  %v12317_v50 = vunpack.c.l.bf16 %v10095_v43  ;;  %v8279_v5 = vunpack.c.l.bf16 %v10100_v18 }
  0x77   :  { %v1195_v47 = vmax.f32 %v554_v46, %v9764_v53  ;;  %v3117_v1 = vmax.f32 %v2476_v13, %v7767_v36  ;;  %5294 = vst.msk [vmem:[%s12314_s1 + $0x74] sm:$0xf] %vm5264_vm0, %v5165_v17  ;;  %v10127_v7 = vunpack.c.l.bf16 %v9252_v32  ;;  %v555_v54 = vmax.f32 %v9730_v35, %v8251_v40  ;;  %v9061_v46 = vld [vmem:[%s12313_s0 + $0x5b0] sm:$0xff]   ;;  %v10145_v35 = vld [vmem:[%s12313_s0 + $0x368] sm:$0xff]  }
  0x78   :  { %v4398_v33 = vmax.f32 %v3757_v42, %v8276_v38  ;;  %v5166_v6 = vpack.c.bf16 %v5038_v61, %v5038_v61  ;;  %v7768_v52 = vunpack.c.h.bf16 %v10081_v0  ;;  %v12318_v2 = vunpack.c.h.bf16 %v10095_v43 }
  0x79   :  { %v1836_v39 = vmax.f32 %v1195_v47, %v7256_v59  ;;  %v3758_v62 = vmax.f32 %v3117_v1, %v12317_v50  ;;  %v1196_v59 = vmax.f32 %v555_v54, %v9784_v25  ;;  %v7515_v17 = vunpack.c.l.bf16 %v8997_v9  ;;  %v9253_v47 = vld [vmem:[%s12313_s0 + $0xe8] sm:$0xff]   ;;  %v8998_v50 = vld [vmem:[%s12313_s0 + $0x838] sm:$0xff]  }
  0x7a   :  { %v5039_v21 = vmax.f32 %v4398_v33, %v8532_v57  ;;  %5295 = vst.msk [vmem:[%s12314_s1 + $0x78] sm:$0xf] %vm5264_vm0, %v5166_v6  ;;  %v8280_v0 = vunpack.c.h.bf16 %v10100_v18  ;;  %v10154_v42 = vunpack.c.h.bf16 %v9252_v32  ;;  %v8283_v6 = vunpack.c.l.bf16 %v10145_v35 }
  0x7b   :  { %v2477_v13 = vmax.f32 %v1836_v39, %v7512_v41  ;;  %v4399_v40 = vmax.f32 %v3758_v62, %v8279_v5  ;;  %v556_v41 = vmax.f32 %v9764_v53, %v8252_v60  ;;  %v1837_v33 = vmax.f32 %v1196_v59, %v7767_v36 }
  0x7c   :  { %v5167_v61 = vpack.c.bf16 %v5039_v21, %v5039_v21  ;;  %v7771_v39 = vunpack.c.l.bf16 %v9061_v46  ;;  %v7516_v32 = vunpack.c.h.bf16 %v8997_v9  ;;  %v10174_v60 = vunpack.c.l.bf16 %v9253_v47  ;;  %v10182_v9 = vld [vmem:[%s12313_s0 + $0x5b8] sm:$0xff]  }
  0x7d   :  { %v3118_v1 = vmax.f32 %v2477_v13, %v7768_v52  ;;  %v5040_v54 = vmax.f32 %v4399_v40, %v10127_v7  ;;  %v1197_v62 = vmax.f32 %v556_v41, %v9811_v44  ;;  %v2478_v53 = vmax.f32 %v1837_v33, %v7515_v17  ;;  %v10188_v17 = vld [vmem:[%s12313_s0 + $0x370] sm:$0xff]  }
  0x7e   :  { %5296 = vst.msk [vmem:[%s12314_s1 + $0x7c] sm:$0xf] %vm5264_vm0, %v5167_v61  ;;  %v557_v36 = vmax.f32 %v9784_v25, %v8255_v28  ;;  %v7772_v59 = vunpack.c.h.bf16 %v9061_v46  ;;  %v8284_v40 = vunpack.c.h.bf16 %v10145_v35  ;;  %v7519_v28 = vunpack.c.l.bf16 %v8998_v50  ;;  %v9254_v33 = vld [vmem:[%s12313_s0 + $0xf0] sm:$0xff]  }
  0x7f   :  { %v3759_v22 = vmax.f32 %v3118_v1, %v12318_v2  ;;  %v5168_v21 = vpack.c.bf16 %v5040_v54, %v5040_v54  ;;  %v1838_v13 = vmax.f32 %v1197_v62, %v7768_v52  ;;  %v3119_v61 = vmax.f32 %v2478_v53, %v7771_v39 }
  0x80   :  { %v1198_v25 = vmax.f32 %v557_v36, %v9832_v16  ;;  %v10197_v46 = vunpack.c.h.bf16 %v9253_v47  ;;  %v7775_v1 = vunpack.c.l.bf16 %v10182_v9  ;;  %v558_v54 = vmax.f32 %v9811_v44, %v8256_v56  ;;  %v8999_v47 = vld [vmem:[%s12313_s0 + $0x840] sm:$0xff]  }
  0x81   :  { %v4400_v41 = vmax.f32 %v3759_v22, %v8280_v0  ;;  %5297 = vst.msk [vmem:[%s12314_s1 + $0x80] sm:$0xf] %vm5264_vm0, %v5168_v21  ;;  %v2479_v52 = vmax.f32 %v1838_v13, %v7516_v32  ;;  %v3760_v22 = vmax.f32 %v3119_v61, %v10127_v7  ;;  %v8287_v36 = vunpack.c.l.bf16 %v10188_v17 }
  0x82   :  { %v1839_v53 = vmax.f32 %v1198_v25, %v7771_v39  ;;  %v1199_v21 = vmax.f32 %v558_v54, %v9874_v34  ;;  %v7520_v13 = vunpack.c.h.bf16 %v8998_v50  ;;  %v559_v8 = vmax.f32 %v9832_v16, %v8259_v55  ;;  %v10225_v50 = vld [vmem:[%s12313_s0 + $0x5c0] sm:$0xff]  }
  0x83   :  { %v5041_v62 = vmax.f32 %v4400_v41, %v10154_v42  ;;  %v3120_v32 = vmax.f32 %v2479_v52, %v7772_v59  ;;  %v4401_v56 = vmax.f32 %v3760_v22, %v8283_v6  ;;  %v10218_v39 = vunpack.c.l.bf16 %v9254_v33 }
  0x84   :  { %v2480_v41 = vmax.f32 %v1839_v53, %v7519_v28  ;;  %v1840_v25 = vmax.f32 %v1199_v21, %v7772_v59  ;;  %v1200_v2 = vmax.f32 %v559_v8, %v9882_v49  ;;  %v7523_v52 = vunpack.c.l.bf16 %v8999_v47  ;;  %v10239_v53 = vld [vmem:[%s12313_s0 + $0x378] sm:$0xff]  }
  0x85   :  { %v5169_v44 = vpack.c.bf16 %v5041_v62, %v5041_v62  ;;  %v3761_v61 = vmax.f32 %v3120_v32, %v10154_v42  ;;  %v5042_v16 = vmax.f32 %v4401_v56, %v10174_v60  ;;  %v7776_v28 = vunpack.c.h.bf16 %v10182_v9 }
  0x86   :  { %v3121_v55 = vmax.f32 %v2480_v41, %v7775_v1  ;;  %v8288_v59 = vunpack.c.h.bf16 %v10188_v17  ;;  %v2481_v62 = vmax.f32 %v1840_v25, %v7520_v13  ;;  %v1841_v22 = vmax.f32 %v1200_v2, %v7775_v1  ;;  %v9255_v2 = vld [vmem:[%s12313_s0 + $0xf8] sm:$0xff]  }
  0x87   :  { %5298 = vst.msk [vmem:[%s12314_s1 + $0x84] sm:$0xf] %vm5264_vm0, %v5169_v44  ;;  %v4402_v54 = vmax.f32 %v3761_v61, %v8284_v40  ;;  %v560_v32 = vmax.f32 %v9874_v34, %v8260_v58  ;;  %v5170_v21 = vpack.c.bf16 %v5042_v16, %v5042_v16  ;;  %v7779_v9 = vunpack.c.l.bf16 %v10225_v50 }
  0x88   :  { %v3762_v8 = vmax.f32 %v3121_v55, %v10174_v60  ;;  %v7524_v44 = vunpack.c.h.bf16 %v8999_v47  ;;  %v3122_v41 = vmax.f32 %v2481_v62, %v7776_v28  ;;  %v2482_v13 = vmax.f32 %v1841_v22, %v7523_v52 }
  0x89   :  { %v5043_v56 = vmax.f32 %v4402_v54, %v10197_v46  ;;  %v1201_v1 = vmax.f32 %v560_v32, %v9908_v29  ;;  %5299 = vst.msk [vmem:[%s12314_s1 + $0x88] sm:$0xf] %vm5264_vm0, %v5170_v21  ;;  %v10260_v58 = vunpack.c.h.bf16 %v9254_v33  ;;  %v8291_v47 = vunpack.c.l.bf16 %v10239_v53  ;;  %v9064_v21 = vld [vmem:[%s12313_s0 + $0x5c8] sm:$0xff]  }
  0x8a   :  { %v4403_v34 = vmax.f32 %v3762_v8, %v8287_v36  ;;  %v561_v61 = vmax.f32 %v9882_v49, %v8263_v19  ;;  %v3763_v52 = vmax.f32 %v3122_v41, %v10197_v46  ;;  %v3123_v16 = vmax.f32 %v2482_v13, %v7779_v9  ;;  %v10286_v13 = vld [vmem:[%s12313_s0 + $0x380] sm:$0xff]  }
  0x8b   :  { %v5171_v25 = vpack.c.bf16 %v5043_v56, %v5043_v56  ;;  %v1842_v55 = vmax.f32 %v1201_v1, %v7776_v28  ;;  %v10268_v62 = vunpack.c.l.bf16 %v9255_v2  ;;  %v7527_v32 = vunpack.c.l.bf16 %v9000_v63 }
  0x8c   :  { %v5044_v54 = vmax.f32 %v4403_v34, %v10218_v39  ;;  %v1202_v22 = vmax.f32 %v561_v61, %v9924_v20  ;;  %v4404_v49 = vmax.f32 %v3763_v52, %v8288_v59  ;;  %v3764_v19 = vmax.f32 %v3123_v16, %v10218_v39 }
  0x8d   :  { %5300 = vst.msk [vmem:[%s12314_s1 + $0x8c] sm:$0xf] %vm5264_vm0, %v5171_v25  ;;  %v2483_v33 = vmax.f32 %v1842_v55, %v7524_v44  ;;  %v7780_v28 = vunpack.c.h.bf16 %v10225_v50  ;;  %v8292_v56 = vunpack.c.h.bf16 %v10239_v53  ;;  %v562_v1 = vmax.f32 %v9908_v29, %v8264_v23  ;;  %v9008_v53 = vld [vmem:[%s12313_s0 + $0x890] sm:$0xff]  }
  0x8e   :  { %v5172_v8 = vpack.c.bf16 %v5044_v54, %v5044_v54  ;;  %v1843_v41 = vmax.f32 %v1202_v22, %v7779_v9  ;;  %v5045_v44 = vmax.f32 %v4404_v49, %v10260_v58  ;;  %v4405_v50 = vmax.f32 %v3764_v19, %v8291_v47  ;;  %v9256_v9 = vld [vmem:[%s12313_s0 + $0x100] sm:$0xff]   ;;  %v9001_v54 = vld [vmem:[%s12313_s0 + $0x850] sm:$0xff]  }
  0x8f   :  { %v3124_v34 = vmax.f32 %v2483_v33, %v7780_v28  ;;  %v10294_v61 = vunpack.c.h.bf16 %v9255_v2  ;;  %v7783_v25 = vunpack.c.l.bf16 %v9064_v21  ;;  %v1203_v29 = vmax.f32 %v562_v1, %v9953_v45 }
  0x90   :  { %5301 = vst.msk [vmem:[%s12314_s1 + $0x90] sm:$0xf] %vm5264_vm0, %v5172_v8  ;;  %v2484_v48 = vmax.f32 %v1843_v41, %v7527_v32  ;;  %v7528_v23 = vunpack.c.h.bf16 %v9000_v63  ;;  %v5173_v52 = vpack.c.bf16 %v5045_v44, %v5045_v44  ;;  %v5046_v16 = vmax.f32 %v4405_v50, %v10268_v62  ;;  %v10318_v63 = vld [vmem:[%s12313_s0 + $0x5d0] sm:$0xff]  }
  0x91   :  { %v3765_v2 = vmax.f32 %v3124_v34, %v10260_v58  ;;  %v8295_v55 = vunpack.c.l.bf16 %v10286_v13  ;;  %v10310_v49 = vunpack.c.l.bf16 %v9256_v9  ;;  %v1844_v19 = vmax.f32 %v1203_v29, %v7780_v28  ;;  %v9257_v29 = vld [vmem:[%s12313_s0 + $0x108] sm:$0xff]  }
  0x92   :  { %v3125_v22 = vmax.f32 %v2484_v48, %v7783_v25  ;;  %v563_v32 = vmax.f32 %v9924_v20, %v8267_v31  ;;  %5302 = vst.msk [vmem:[%s12314_s1 + $0x94] sm:$0xf] %vm5264_vm0, %v5173_v52  ;;  %v5174_v33 = vpack.c.bf16 %v5046_v16, %v5046_v16  ;;  %v7784_v41 = vunpack.c.h.bf16 %v9064_v21  ;;  %v10330_v20 = vld [vmem:[%s12313_s0 + $0x388] sm:$0xff]  }
  0x93   :  { %v4406_v8 = vmax.f32 %v3765_v2, %v8292_v56  ;;  %v8296_v28 = vunpack.c.h.bf16 %v10286_v13  ;;  %v2485_v1 = vmax.f32 %v1844_v19, %v7528_v23  ;;  %v7531_v50 = vunpack.c.l.bf16 %v9001_v54 }
  0x94   :  { %v3766_v31 = vmax.f32 %v3125_v22, %v10268_v62  ;;  %v1204_v44 = vmax.f32 %v563_v32, %v9974_v24  ;;  %5303 = vst.msk [vmem:[%s12314_s1 + $0x98] sm:$0xf] %vm5264_vm0, %v5174_v33  ;;  %v10339_v34 = vunpack.c.h.bf16 %v9256_v9  ;;  %v7787_v48 = vunpack.c.l.bf16 %v10318_v63  ;;  %v9002_v9 = vld [vmem:[%s12313_s0 + $0x858] sm:$0xff]  }
  0x95   :  { %v5047_v21 = vmax.f32 %v4406_v8, %v10294_v61  ;;  %v564_v23 = vmax.f32 %v9953_v45, %v8268_v10  ;;  %v3126_v16 = vmax.f32 %v2485_v1, %v7784_v41  ;;  %v8299_v22 = vunpack.c.l.bf16 %v10330_v20 }
  0x96   :  { %v4407_v52 = vmax.f32 %v3766_v31, %v8295_v55  ;;  %v1845_v2 = vmax.f32 %v1204_v44, %v7783_v25  ;;  %v7532_v33 = vunpack.c.h.bf16 %v9001_v54  ;;  %v565_v3 = vmax.f32 %v9974_v24, %v8271_v14  ;;  %v9066_v24 = vld [vmem:[%s12313_s0 + $0x5d8] sm:$0xff]   ;;  %v10374_v14 = vld [vmem:[%s12313_s0 + $0x390] sm:$0xff]  }
  0x97   :  { %v5175_v19 = vpack.c.bf16 %v5047_v21, %v5047_v21  ;;  %v1205_v32 = vmax.f32 %v564_v23, %v9993_v37  ;;  %v3767_v10 = vmax.f32 %v3126_v16, %v10294_v61  ;;  %v10360_v25 = vunpack.c.l.bf16 %v9257_v29 }
  0x98   :  { %v5048_v45 = vmax.f32 %v4407_v52, %v10310_v49  ;;  %v2486_v8 = vmax.f32 %v1845_v2, %v7531_v50  ;;  %v7788_v1 = vunpack.c.h.bf16 %v10318_v63  ;;  %v1206_v54 = vmax.f32 %v565_v3, %v10014_v30  ;;  %v9258_v2 = vld [vmem:[%s12313_s0 + $0x110] sm:$0xff]  }
  0x99   :  { %5304 = vst.msk [vmem:[%s12314_s1 + $0x9c] sm:$0xf] %vm5264_vm0, %v5175_v19  ;;  %v1846_v31 = vmax.f32 %v1205_v32, %v7784_v41  ;;  %v7535_v44 = vunpack.c.l.bf16 %v9002_v9  ;;  %v4408_v21 = vmax.f32 %v3767_v10, %v8296_v28  ;;  %v8300_v41 = vunpack.c.h.bf16 %v10330_v20 }
  0x9a   :  { %v5176_v50 = vpack.c.bf16 %v5048_v45, %v5048_v45  ;;  %v3127_v23 = vmax.f32 %v2486_v8, %v7787_v48  ;;  %v10379_v52 = vunpack.c.h.bf16 %v9257_v29  ;;  %v1847_v16 = vmax.f32 %v1206_v54, %v7787_v48 }
  0x9b   :  { %v2487_v63 = vmax.f32 %v1846_v31, %v7532_v33  ;;  %v566_v19 = vmax.f32 %v9993_v37, %v8272_v12  ;;  %v5049_v32 = vmax.f32 %v4408_v21, %v10339_v34  ;;  %v7791_v29 = vunpack.c.l.bf16 %v9066_v24 }
  0x9c   :  { %5305 = vst.msk [vmem:[%s12314_s1 + $0xa0] sm:$0xf] %vm5264_vm0, %v5176_v50  ;;  %v3768_v33 = vmax.f32 %v3127_v23, %v10310_v49  ;;  %v8303_v48 = vunpack.c.l.bf16 %v10374_v14  ;;  %v2488_v45 = vmax.f32 %v1847_v16, %v7535_v44  ;;  %v7536_v8 = vunpack.c.h.bf16 %v9002_v9  ;;  %v9067_v9 = vld [vmem:[%s12313_s0 + $0x5e0] sm:$0xff]  }
  0x9d   :  { %v3128_v3 = vmax.f32 %v2487_v63, %v7788_v1  ;;  %v1207_v10 = vmax.f32 %v566_v19, %v10052_v27  ;;  %v5177_v37 = vpack.c.bf16 %v5049_v32, %v5049_v32  ;;  %v10400_v31 = vunpack.c.l.bf16 %v9258_v2 }
  0x9e   :  { %v4409_v12 = vmax.f32 %v3768_v33, %v8299_v22  ;;  %v567_v54 = vmax.f32 %v10014_v30, %v8275_v15  ;;  %v3129_v44 = vmax.f32 %v2488_v45, %v7791_v29  ;;  %v7792_v23 = vunpack.c.h.bf16 %v9066_v24 }
  0x9f   :  { %v3769_v50 = vmax.f32 %v3128_v3, %v10339_v34  ;;  %v1848_v21 = vmax.f32 %v1207_v10, %v7788_v1  ;;  %5306 = vst.msk [vmem:[%s12314_s1 + $0xa4] sm:$0xf] %vm5264_vm0, %v5177_v37  ;;  %v8304_v16 = vunpack.c.h.bf16 %v10374_v14  ;;  %v7539_v15 = vunpack.c.l.bf16 %v9003_v4  ;;  %v9011_v14 = vld [vmem:[%s12313_s0 + $0x8a8] sm:$0xff]  }
  0xa0   :  { %v5050_v63 = vmax.f32 %v4409_v12, %v10360_v25  ;;  %v1208_v30 = vmax.f32 %v567_v54, %v8531_v26  ;;  %v3770_v24 = vmax.f32 %v3129_v44, %v10360_v25  ;;  %v568_v32 = vmax.f32 %v10052_v27, %v8276_v38  ;;  %v9004_v27 = vld [vmem:[%s12313_s0 + $0x870] sm:$0xff]  }
  0xa1   :  { %v4410_v1 = vmax.f32 %v3769_v50, %v8300_v41  ;;  %v2489_v19 = vmax.f32 %v1848_v21, %v7536_v8  ;;  %v7795_v45 = vunpack.c.l.bf16 %v9067_v9  ;;  %v7540_v10 = vunpack.c.h.bf16 %v9003_v4  ;;  %v8940_v8 = vld [vmem:[%s12313_s0 + $0x5e8] sm:$0xff]  }
  0xa2   :  { %v5178_v33 = vpack.c.bf16 %v5050_v63, %v5050_v63  ;;  %v1849_v3 = vmax.f32 %v1208_v30, %v7791_v29  ;;  %v4411_v26 = vmax.f32 %v3770_v24, %v8303_v48  ;;  %v1209_v54 = vmax.f32 %v568_v32, %v8532_v57 }
  0xa3   :  { %v5051_v37 = vmax.f32 %v4410_v1, %v10379_v52  ;;  %v3130_v12 = vmax.f32 %v2489_v19, %v7792_v23  ;;  %v10438_v51 = vunpack.c.h.bf16 %v9258_v2  ;;  %v7796_v57 = vunpack.c.h.bf16 %v9067_v9  ;;  %v10454_v2 = vld [vmem:[%s12313_s0 + $0x118] sm:$0xff]  }
  0xa4   :  { %5307 = vst.msk [vmem:[%s12314_s1 + $0xa8] sm:$0xf] %vm5264_vm0, %v5178_v33  ;;  %v2490_v38 = vmax.f32 %v1849_v3, %v7539_v15  ;;  %v12329_v29 = vunpack.c.l.bf16 %v10095_v43  ;;  %v5052_v44 = vmax.f32 %v4411_v26, %v10400_v31  ;;  %v1850_v63 = vmax.f32 %v1209_v54, %v7792_v23  ;;  %v10467_v23 = vld [vmem:[%s12313_s0 + $0x5f0] sm:$0xff]   ;;  %v10481_v54 = vld [vmem:[%s12313_s0 + $0x120] sm:$0xff]  }
  0xa5   :  { %v5179_v50 = vpack.c.bf16 %v5051_v37, %v5051_v37  ;;  %v3771_v21 = vmax.f32 %v3130_v12, %v10379_v52  ;;  %v7287_v9 = vunpack.c.l.bf16 %v8940_v8  ;;  %v7543_v1 = vunpack.c.l.bf16 %v9004_v27 }
  0xa6   :  { %v569_v4 = vmax.f32 %v12329_v29, %v8279_v5  ;;  %v3131_v30 = vmax.f32 %v2490_v38, %v7795_v45  ;;  %v5180_v5 = vpack.c.bf16 %v5052_v44, %v5052_v44  ;;  %v8307_v19 = vunpack.c.l.bf16 %v10443_v11  ;;  %v10486_v38 = vld [vmem:[%s12313_s0 + $0x3a8] sm:$0xff]  }
  0xa7   :  { %5308 = vst.msk [vmem:[%s12314_s1 + $0xac] sm:$0xf] %vm5264_vm0, %v5179_v50  ;;  %v4412_v24 = vmax.f32 %v3771_v21, %v8304_v16  ;;  %v2491_v32 = vmax.f32 %v1850_v63, %v7540_v10  ;;  %v8563_v3 = vunpack.c.l.bf16 %v10454_v2  ;;  %v8308_v45 = vunpack.c.h.bf16 %v10443_v11  ;;  %v9260_v21 = vld [vmem:[%s12313_s0 + $0x128] sm:$0xff]  }
  0xa8   :  { %v1210_v15 = vmax.f32 %v569_v4, %v10127_v7  ;;  %v3772_v33 = vmax.f32 %v3131_v30, %v10400_v31  ;;  %5309 = vst.msk [vmem:[%s12314_s1 + $0xb0] sm:$0xf] %vm5264_vm0, %v5180_v5  ;;  %v8564_v12 = vunpack.c.h.bf16 %v10454_v2  ;;  %v12330_v29 = vunpack.c.h.bf16 %v10095_v43  ;;  %v10829_v2 = vld [vmem:[%s12313_s0 + $0x3e0] sm:$0xff]  }
  0xa9   :  { %v5053_v26 = vmax.f32 %v4412_v24, %v10438_v51  ;;  %v3132_v10 = vmax.f32 %v2491_v32, %v7796_v57  ;;  %v7799_v44 = vunpack.c.l.bf16 %v10467_v23  ;;  %v7288_v63 = vunpack.c.h.bf16 %v8940_v8  ;;  %v9005_v24 = vld [vmem:[%s12313_s0 + $0x878] sm:$0xff]  }
  0xaa   :  { %v1851_v37 = vmax.f32 %v1210_v15, %v7287_v9  ;;  %v570_v4 = vmax.f32 %v12330_v29, %v8280_v0  ;;  %v4413_v57 = vmax.f32 %v3772_v33, %v8307_v19  ;;  %v7544_v18 = vunpack.c.h.bf16 %v9004_v27 }
  0xab   :  { %v5181_v30 = vpack.c.bf16 %v5053_v26, %v5053_v26  ;;  %v3773_v15 = vmax.f32 %v3132_v10, %v10438_v51  ;;  %v12319_v5 = vunpack.c.l.bf16 %v10481_v54  ;;  %v10513_v27 = vunpack.c.l.bf16 %v9260_v21 }
  0xac   :  { %v2492_v50 = vmax.f32 %v1851_v37, %v7543_v1  ;;  %v1211_v9 = vmax.f32 %v570_v4, %v10154_v42  ;;  %v5054_v43 = vmax.f32 %v4413_v57, %v8563_v3  ;;  %v8311_v1 = vunpack.c.l.bf16 %v10486_v38  ;;  %v9069_v4 = vld [vmem:[%s12313_s0 + $0x5f8] sm:$0xff]  }
  0xad   :  { %5310 = vst.msk [vmem:[%s12314_s1 + $0xb4] sm:$0xf] %vm5264_vm0, %v5181_v30  ;;  %v4414_v8 = vmax.f32 %v3773_v15, %v8308_v45  ;;  %v571_v33 = vmax.f32 %v10127_v7, %v8283_v6  ;;  %v7800_v10 = vunpack.c.h.bf16 %v10467_v23  ;;  %v12320_v29 = vunpack.c.h.bf16 %v10481_v54  ;;  %v10531_v7 = vld [vmem:[%s12313_s0 + $0x3b0] sm:$0xff]  }
  0xae   :  { %v3133_v0 = vmax.f32 %v2492_v50, %v7799_v44  ;;  %v1852_v32 = vmax.f32 %v1211_v9, %v7288_v63  ;;  %v5182_v37 = vpack.c.bf16 %v5054_v43, %v5054_v43  ;;  %v7547_v30 = vunpack.c.l.bf16 %v9005_v24  ;;  %v9261_v9 = vld [vmem:[%s12313_s0 + $0x130] sm:$0xff]  }
  0xaf   :  { %v5055_v57 = vmax.f32 %v4414_v8, %v8564_v12  ;;  %v1212_v63 = vmax.f32 %v571_v33, %v10174_v60  ;;  %v8312_v23 = vunpack.c.h.bf16 %v10486_v38  ;;  %v10540_v15 = vunpack.c.h.bf16 %v9260_v21 }
  0xb0   :  { %v3774_v26 = vmax.f32 %v3133_v0, %v12319_v5  ;;  %v2493_v50 = vmax.f32 %v1852_v32, %v7544_v18  ;;  %5311 = vst.msk [vmem:[%s12314_s1 + $0xb8] sm:$0xf] %vm5264_vm0, %v5182_v37  ;;  %v572_v18 = vmax.f32 %v10154_v42, %v8284_v40  ;;  %v7803_v32 = vunpack.c.l.bf16 %v9069_v4  ;;  %v9006_v5 = vld [vmem:[%s12313_s0 + $0x880] sm:$0xff]  }
  0xb1   :  { %v5183_v43 = vpack.c.bf16 %v5055_v57, %v5055_v57  ;;  %v1853_v8 = vmax.f32 %v1212_v63, %v7799_v44  ;;  %v8315_v37 = vunpack.c.l.bf16 %v10531_v7  ;;  %v7548_v21 = vunpack.c.h.bf16 %v9005_v24  ;;  %v10568_v24 = vld [vmem:[%s12313_s0 + $0x600] sm:$0xff]  }
  0xb2   :  { %v4415_v6 = vmax.f32 %v3774_v26, %v8311_v1  ;;  %v3134_v0 = vmax.f32 %v2493_v50, %v7800_v10  ;;  %v1213_v26 = vmax.f32 %v572_v18, %v10197_v46  ;;  %v10560_v40 = vunpack.c.l.bf16 %v9261_v9 }
  0xb3   :  { %5312 = vst.msk [vmem:[%s12314_s1 + $0xbc] sm:$0xf] %vm5264_vm0, %v5183_v43  ;;  %v2494_v42 = vmax.f32 %v1853_v8, %v7547_v30  ;;  %v573_v44 = vmax.f32 %v10174_v60, %v8287_v36  ;;  %v7804_v63 = vunpack.c.h.bf16 %v9069_v4  ;;  %v10574_v30 = vld [vmem:[%s12313_s0 + $0x3b8] sm:$0xff]   ;;  %v7551_v36 = vunpack.c.l.bf16 %v9006_v5 }
  0xb4   :  { %v5056_v33 = vmax.f32 %v4415_v6, %v10513_v27  ;;  %v3775_v35 = vmax.f32 %v3134_v0, %v12320_v29  ;;  %v1854_v50 = vmax.f32 %v1213_v26, %v7800_v10  ;;  %v8316_v6 = vunpack.c.h.bf16 %v10531_v7  ;;  %v9262_v8 = vld [vmem:[%s12313_s0 + $0x138] sm:$0xff]  }
  0xb5   :  { %v3135_v43 = vmax.f32 %v2494_v42, %v7803_v32  ;;  %v1214_v60 = vmax.f32 %v573_v44, %v10218_v39  ;;  %v10583_v4 = vunpack.c.h.bf16 %v9261_v9  ;;  %v7807_v0 = vunpack.c.l.bf16 %v10568_v24  ;;  %v9007_v9 = vld [vmem:[%s12313_s0 + $0x888] sm:$0xff]  }
  0xb6   :  { %v5184_v57 = vpack.c.bf16 %v5056_v33, %v5056_v33  ;;  %v4416_v18 = vmax.f32 %v3775_v35, %v8312_v23  ;;  %v2495_v10 = vmax.f32 %v1854_v50, %v7548_v21  ;;  %v574_v33 = vmax.f32 %v10197_v46, %v8288_v59 }
  0xb7   :  { %v3776_v35 = vmax.f32 %v3135_v43, %v10513_v27  ;;  %v1855_v42 = vmax.f32 %v1214_v60, %v7803_v32  ;;  %v8319_v44 = vunpack.c.l.bf16 %v10574_v30  ;;  %v7552_v50 = vunpack.c.h.bf16 %v9006_v5  ;;  %v10611_v5 = vld [vmem:[%s12313_s0 + $0x608] sm:$0xff]  }
  0xb8   :  { %5313 = vst.msk [vmem:[%s12314_s1 + $0xc0] sm:$0xf] %vm5264_vm0, %v5184_v57  ;;  %v5057_v26 = vmax.f32 %v4416_v18, %v10540_v15  ;;  %v3136_v21 = vmax.f32 %v2495_v10, %v7804_v63  ;;  %v1215_v57 = vmax.f32 %v574_v33, %v10260_v58  ;;  %v575_v17 = vmax.f32 %v10218_v39, %v8291_v47 }
  0xb9   :  { %v4417_v59 = vmax.f32 %v3776_v35, %v8315_v37  ;;  %v2496_v18 = vmax.f32 %v1855_v42, %v7551_v36  ;;  %v10604_v32 = vunpack.c.l.bf16 %v9262_v8  ;;  %v7555_v10 = vunpack.c.l.bf16 %v9007_v9  ;;  %v10625_v42 = vld [vmem:[%s12313_s0 + $0x3c0] sm:$0xff]  }
  0xba   :  { %v5185_v46 = vpack.c.bf16 %v5057_v26, %v5057_v26  ;;  %v3777_v43 = vmax.f32 %v3136_v21, %v10540_v15  ;;  %v1856_v60 = vmax.f32 %v1215_v57, %v7804_v63  ;;  %v1216_v29 = vmax.f32 %v575_v17, %v10268_v62 }
  0xbb   :  { %v5058_v39 = vmax.f32 %v4417_v59, %v10560_v40  ;;  %v3137_v47 = vmax.f32 %v2496_v18, %v7807_v0  ;;  %v7808_v36 = vunpack.c.h.bf16 %v10568_v24  ;;  %v8320_v63 = vunpack.c.h.bf16 %v10574_v30 }
  0xbc   :  { %5314 = vst.msk [vmem:[%s12314_s1 + $0xc4] sm:$0xf] %vm5264_vm0, %v5185_v46  ;;  %v4418_v33 = vmax.f32 %v3777_v43, %v8316_v6  ;;  %v2497_v26 = vmax.f32 %v1856_v60, %v7552_v50  ;;  %v1857_v35 = vmax.f32 %v1216_v29, %v7807_v0  ;;  %v576_v21 = vmax.f32 %v10260_v58, %v8292_v56  ;;  %v9263_v29 = vld [vmem:[%s12313_s0 + $0x140] sm:$0xff]  }
  0xbd   :  { %v5186_v57 = vpack.c.bf16 %v5058_v39, %v5058_v39  ;;  %v3778_v17 = vmax.f32 %v3137_v47, %v10560_v40  ;;  %v7811_v24 = vunpack.c.l.bf16 %v10611_v5  ;;  %v7556_v46 = vunpack.c.h.bf16 %v9007_v9 }
  0xbe   :  { %v5059_v59 = vmax.f32 %v4418_v33, %v10583_v4  ;;  %v3138_v18 = vmax.f32 %v2497_v26, %v7808_v36  ;;  %v2498_v50 = vmax.f32 %v1857_v35, %v7555_v10  ;;  %v1217_v0 = vmax.f32 %v576_v21, %v10294_v61 }
  0xbf   :  { %5315 = vst.msk [vmem:[%s12314_s1 + $0xc8] sm:$0xf] %vm5264_vm0, %v5186_v57  ;;  %v4419_v58 = vmax.f32 %v3778_v17, %v8319_v44  ;;  %v10646_v56 = vunpack.c.h.bf16 %v9262_v8  ;;  %v8323_v9 = vunpack.c.l.bf16 %v10625_v42  ;;  %v577_v43 = vmax.f32 %v10268_v62, %v8295_v55  ;;  %v9072_v57 = vld [vmem:[%s12313_s0 + $0x610] sm:$0xff]  }
  0xc0   :  { %v5187_v60 = vpack.c.bf16 %v5059_v59, %v5059_v59  ;;  %v3779_v10 = vmax.f32 %v3138_v18, %v10583_v4  ;;  %v3139_v39 = vmax.f32 %v2498_v50, %v7811_v24  ;;  %v1858_v47 = vmax.f32 %v1217_v0, %v7808_v36  ;;  %v10672_v50 = vld [vmem:[%s12313_s0 + $0x3c8] sm:$0xff]  }
  0xc1   :  { %v5060_v33 = vmax.f32 %v4419_v58, %v10604_v32  ;;  %v10654_v26 = vunpack.c.l.bf16 %v9263_v29  ;;  %v1218_v35 = vmax.f32 %v577_v43, %v10310_v49  ;;  %v7559_v21 = vunpack.c.l.bf16 %v9008_v53 }
  0xc2   :  { %5316 = vst.msk [vmem:[%s12314_s1 + $0xcc] sm:$0xf] %vm5264_vm0, %v5187_v60  ;;  %v4420_v62 = vmax.f32 %v3779_v10, %v8320_v63  ;;  %v3780_v55 = vmax.f32 %v3139_v39, %v10604_v32  ;;  %v2499_v8 = vmax.f32 %v1858_v47, %v7556_v46  ;;  %v7812_v36 = vunpack.c.h.bf16 %v10611_v5 }
  0xc3   :  { %v5188_v17 = vpack.c.bf16 %v5060_v33, %v5060_v33  ;;  %v8324_v59 = vunpack.c.h.bf16 %v10625_v42  ;;  %v1859_v18 = vmax.f32 %v1218_v35, %v7811_v24  ;;  %v578_v0 = vmax.f32 %v10294_v61, %v8296_v28  ;;  %v9264_v24 = vld [vmem:[%s12313_s0 + $0x148] sm:$0xff]   ;;  %v9009_v33 = vld [vmem:[%s12313_s0 + $0x898] sm:$0xff]  }
  0xc4   :  { %v5061_v46 = vmax.f32 %v4420_v62, %v10646_v56  ;;  %v4421_v5 = vmax.f32 %v3780_v55, %v8323_v9  ;;  %v3140_v58 = vmax.f32 %v2499_v8, %v7812_v36  ;;  %v10680_v43 = vunpack.c.h.bf16 %v9263_v29  ;;  %v9016_v42 = vld [vmem:[%s12313_s0 + $0x8d8] sm:$0xff]  }
  0xc5   :  { %5317 = vst.msk [vmem:[%s12314_s1 + $0xd0] sm:$0xf] %vm5264_vm0, %v5188_v17  ;;  %v2500_v13 = vmax.f32 %v1859_v18, %v7559_v21  ;;  %v7815_v60 = vunpack.c.l.bf16 %v9072_v57  ;;  %v1219_v61 = vmax.f32 %v578_v0, %v10339_v34  ;;  %v7560_v28 = vunpack.c.h.bf16 %v9008_v53  ;;  %v10704_v53 = vld [vmem:[%s12313_s0 + $0x618] sm:$0xff]  }
  0xc6   :  { %v5189_v10 = vpack.c.bf16 %v5061_v46, %v5061_v46  ;;  %v5062_v39 = vmax.f32 %v4421_v5, %v10654_v26  ;;  %v3781_v29 = vmax.f32 %v3140_v58, %v10646_v56  ;;  %v8327_v47 = vunpack.c.l.bf16 %v10672_v50 }
  0xc7   :  { %v3141_v35 = vmax.f32 %v2500_v13, %v7815_v60  ;;  %v10696_v62 = vunpack.c.l.bf16 %v9264_v24  ;;  %v1860_v55 = vmax.f32 %v1219_v61, %v7812_v36  ;;  %v579_v21 = vmax.f32 %v10310_v49, %v8299_v22  ;;  %v10716_v49 = vld [vmem:[%s12313_s0 + $0x3d0] sm:$0xff]  }
  0xc8   :  { %5318 = vst.msk [vmem:[%s12314_s1 + $0xd4] sm:$0xf] %vm5264_vm0, %v5189_v10  ;;  %v5190_v8 = vpack.c.bf16 %v5062_v39, %v5062_v39  ;;  %v4422_v17 = vmax.f32 %v3781_v29, %v8324_v59  ;;  %v7816_v18 = vunpack.c.h.bf16 %v9072_v57  ;;  %v8328_v36 = vunpack.c.h.bf16 %v10672_v50  ;;  %v9265_v61 = vld [vmem:[%s12313_s0 + $0x150] sm:$0xff]  }
  0xc9   :  { %v3782_v22 = vmax.f32 %v3141_v35, %v10654_v26  ;;  %v2501_v0 = vmax.f32 %v1860_v55, %v7560_v28  ;;  %v1220_v46 = vmax.f32 %v579_v21, %v10360_v25  ;;  %v7563_v5 = vunpack.c.l.bf16 %v9009_v33 }
  0xca   :  { %5319 = vst.msk [vmem:[%s12314_s1 + $0xd8] sm:$0xf] %vm5264_vm0, %v5190_v8  ;;  %v5063_v57 = vmax.f32 %v4422_v17, %v10680_v43  ;;  %v10725_v58 = vunpack.c.h.bf16 %v9264_v24  ;;  %v7819_v13 = vunpack.c.l.bf16 %v10704_v53  ;;  %v580_v28 = vmax.f32 %v10339_v34, %v8300_v41  ;;  %v9010_v24 = vld [vmem:[%s12313_s0 + $0x8a0] sm:$0xff]  }
  0xcb   :  { %v4423_v10 = vmax.f32 %v3782_v22, %v8327_v47  ;;  %v3142_v39 = vmax.f32 %v2501_v0, %v7816_v18  ;;  %v1861_v29 = vmax.f32 %v1220_v46, %v7815_v60  ;;  %v8331_v35 = vunpack.c.l.bf16 %v10716_v49 }
  0xcc   :  { %v5191_v55 = vpack.c.bf16 %v5063_v57, %v5063_v57  ;;  %v1221_v21 = vmax.f32 %v580_v28, %v10379_v52  ;;  %v7564_v8 = vunpack.c.h.bf16 %v9009_v33  ;;  %v581_v20 = vmax.f32 %v10360_v25, %v8303_v48  ;;  %v9074_v25 = vld [vmem:[%s12313_s0 + $0x620] sm:$0xff]   ;;  %v10760_v48 = vld [vmem:[%s12313_s0 + $0x3d8] sm:$0xff]  }
  0xcd   :  { %v5064_v34 = vmax.f32 %v4423_v10, %v10696_v62  ;;  %v3783_v41 = vmax.f32 %v3142_v39, %v10680_v43  ;;  %v2502_v17 = vmax.f32 %v1861_v29, %v7563_v5  ;;  %v10746_v60 = vunpack.c.l.bf16 %v9265_v61  ;;  %v9266_v29 = vld [vmem:[%s12313_s0 + $0x158] sm:$0xff]  }
  0xce   :  { %5320 = vst.msk [vmem:[%s12314_s1 + $0xdc] sm:$0xf] %vm5264_vm0, %v5191_v55  ;;  %v1862_v22 = vmax.f32 %v1221_v21, %v7816_v18  ;;  %v7820_v0 = vunpack.c.h.bf16 %v10704_v53  ;;  %v1222_v33 = vmax.f32 %v581_v20, %v10400_v31  ;;  %v7567_v46 = vunpack.c.l.bf16 %v9010_v24 }
  0xcf   :  { %v5192_v5 = vpack.c.bf16 %v5064_v34, %v5064_v34  ;;  %v4424_v57 = vmax.f32 %v3783_v41, %v8328_v36  ;;  %v3143_v28 = vmax.f32 %v2502_v17, %v7819_v13  ;;  %v8332_v18 = vunpack.c.h.bf16 %v10716_v49 }
  0xd0   :  { %v2503_v53 = vmax.f32 %v1862_v22, %v7564_v8  ;;  %v10765_v10 = vunpack.c.h.bf16 %v9265_v61  ;;  %v1863_v39 = vmax.f32 %v1222_v33, %v7819_v13  ;;  %v582_v55 = vmax.f32 %v10379_v52, %v8304_v16 }
  0xd1   :  { %5321 = vst.msk [vmem:[%s12314_s1 + $0xe0] sm:$0xf] %vm5264_vm0, %v5192_v5  ;;  %v5065_v21 = vmax.f32 %v4424_v57, %v10725_v58  ;;  %v3784_v8 = vmax.f32 %v3143_v28, %v10696_v62  ;;  %v7823_v61 = vunpack.c.l.bf16 %v9074_v25  ;;  %v8335_v13 = vunpack.c.l.bf16 %v10760_v48 }
  0xd2   :  { %v3144_v20 = vmax.f32 %v2503_v53, %v7820_v0  ;;  %v2504_v34 = vmax.f32 %v1863_v39, %v7567_v46  ;;  %v1223_v41 = vmax.f32 %v582_v55, %v10438_v51  ;;  %v7568_v17 = vunpack.c.h.bf16 %v9010_v24  ;;  %v9075_v24 = vld [vmem:[%s12313_s0 + $0x628] sm:$0xff]  }
  0xd3   :  { %v5193_v52 = vpack.c.bf16 %v5065_v21, %v5065_v21  ;;  %v4425_v16 = vmax.f32 %v3784_v8, %v8331_v35  ;;  %v10786_v22 = vunpack.c.l.bf16 %v9266_v29  ;;  %v583_v33 = vmax.f32 %v10400_v31, %v8307_v19 }
  0xd4   :  { %v3785_v5 = vmax.f32 %v3144_v20, %v10725_v58  ;;  %v3145_v46 = vmax.f32 %v2504_v34, %v7823_v61  ;;  %v1864_v57 = vmax.f32 %v1223_v41, %v7820_v0  ;;  %v7824_v28 = vunpack.c.h.bf16 %v9074_v25 }
  0xd5   :  { %5322 = vst.msk [vmem:[%s12314_s1 + $0xe4] sm:$0xf] %vm5264_vm0, %v5193_v52  ;;  %v5066_v53 = vmax.f32 %v4425_v16, %v10746_v60  ;;  %v8336_v39 = vunpack.c.h.bf16 %v10760_v48  ;;  %v1224_v31 = vmax.f32 %v583_v33, %v8563_v3  ;;  %v7571_v19 = vunpack.c.l.bf16 %v9011_v14  ;;  %v9019_v48 = vld [vmem:[%s12313_s0 + $0x8f0] sm:$0xff]  }
  0xd6   :  { %v4426_v0 = vmax.f32 %v3785_v5, %v8332_v18  ;;  %v3786_v25 = vmax.f32 %v3145_v46, %v10746_v60  ;;  %v2505_v55 = vmax.f32 %v1864_v57, %v7568_v17  ;;  %v584_v21 = vmax.f32 %v10438_v51, %v8308_v45  ;;  %v8948_v17 = vld [vmem:[%s12313_s0 + $0x630] sm:$0xff]   ;;  %v9012_v51 = vld [vmem:[%s12313_s0 + $0x8b8] sm:$0xff]  }
  0xd7   :  { %v5194_v8 = vpack.c.bf16 %v5066_v53, %v5066_v53  ;;  %v1865_v20 = vmax.f32 %v1224_v31, %v7823_v61  ;;  %v7827_v34 = vunpack.c.l.bf16 %v9075_v24  ;;  %v7572_v41 = vunpack.c.h.bf16 %v9011_v14 }
  0xd8   :  { %v5067_v52 = vmax.f32 %v4426_v0, %v10765_v10  ;;  %v4427_v3 = vmax.f32 %v3786_v25, %v8335_v13  ;;  %v3146_v16 = vmax.f32 %v2505_v55, %v7824_v28  ;;  %v1225_v33 = vmax.f32 %v584_v21, %v8564_v12 }
  0xd9   :  { %5323 = vst.msk [vmem:[%s12314_s1 + $0xe8] sm:$0xf] %vm5264_vm0, %v5194_v8  ;;  %v10824_v11 = vunpack.c.h.bf16 %v9266_v29  ;;  %v2506_v45 = vmax.f32 %v1865_v20, %v7571_v19  ;;  %v7828_v12 = vunpack.c.h.bf16 %v9075_v24  ;;  %v12331_v61 = vunpack.c.l.bf16 %v10481_v54  ;;  %v10840_v29 = vld [vmem:[%s12313_s0 + $0x160] sm:$0xff]  }
  0xda   :  { %v5195_v5 = vpack.c.bf16 %v5067_v52, %v5067_v52  ;;  %v5068_v46 = vmax.f32 %v4427_v3, %v10786_v22  ;;  %v3787_v57 = vmax.f32 %v3146_v16, %v10765_v10  ;;  %v1866_v53 = vmax.f32 %v1225_v33, %v7824_v28  ;;  %v10853_v28 = vld [vmem:[%s12313_s0 + $0x638] sm:$0xff]   ;;  %v10867_v33 = vld [vmem:[%s12313_s0 + $0x168] sm:$0xff]  }
  0xdb   :  { %v585_v14 = vmax.f32 %v12331_v61, %v8311_v1  ;;  %v3147_v31 = vmax.f32 %v2506_v45, %v7827_v34  ;;  %v7319_v24 = vunpack.c.l.bf16 %v8948_v17  ;;  %v7575_v0 = vunpack.c.l.bf16 %v9012_v51  ;;  %v10872_v45 = vld [vmem:[%s12313_s0 + $0x3f0] sm:$0xff]  }
  0xdc   :  { %5324 = vst.msk [vmem:[%s12314_s1 + $0xec] sm:$0xf] %vm5264_vm0, %v5195_v5  ;;  %v5196_v1 = vpack.c.bf16 %v5068_v46, %v5068_v46  ;;  %v4428_v25 = vmax.f32 %v3787_v57, %v8336_v39  ;;  %v8339_v55 = vunpack.c.l.bf16 %v10829_v2  ;;  %v2507_v21 = vmax.f32 %v1866_v53, %v7572_v41  ;;  %v9268_v57 = vld [vmem:[%s12313_s0 + $0x170] sm:$0xff]  }
  0xdd   :  { %v1226_v19 = vmax.f32 %v585_v14, %v10513_v27  ;;  %v3788_v8 = vmax.f32 %v3147_v31, %v10786_v22  ;;  %v8595_v20 = vunpack.c.l.bf16 %v10840_v29  ;;  %v8340_v34 = vunpack.c.h.bf16 %v10829_v2 }
  0xde   :  { %5325 = vst.msk [vmem:[%s12314_s1 + $0xf0] sm:$0xf] %vm5264_vm0, %v5196_v1  ;;  %v5069_v3 = vmax.f32 %v4428_v25, %v10824_v11  ;;  %v3148_v41 = vmax.f32 %v2507_v21, %v7828_v12  ;;  %v8596_v16 = vunpack.c.h.bf16 %v10840_v29  ;;  %v12332_v61 = vunpack.c.h.bf16 %v10481_v54  ;;  %v9013_v25 = vld [vmem:[%s12313_s0 + $0x8c0] sm:$0xff]   ;;  %v11215_v29 = vld [vmem:[%s12313_s0 + $0x428] sm:$0xff]  }
  0xdf   :  { %v1867_v52 = vmax.f32 %v1226_v19, %v7319_v24  ;;  %v4429_v12 = vmax.f32 %v3788_v8, %v8339_v55  ;;  %v7831_v46 = vunpack.c.l.bf16 %v10853_v28  ;;  %v7320_v53 = vunpack.c.h.bf16 %v8948_v17 }
  0xe0   :  { %v586_v14 = vmax.f32 %v12332_v61, %v8312_v23  ;;  %v5197_v31 = vpack.c.bf16 %v5069_v3, %v5069_v3  ;;  %v3789_v19 = vmax.f32 %v3148_v41, %v10824_v11  ;;  %v7576_v38 = vunpack.c.h.bf16 %v9012_v51 }
  0xe1   :  { %v2508_v5 = vmax.f32 %v1867_v52, %v7575_v0  ;;  %v5070_v54 = vmax.f32 %v4429_v12, %v8595_v20  ;;  %v12321_v1 = vunpack.c.l.bf16 %v10867_v33  ;;  %v8343_v0 = vunpack.c.l.bf16 %v10872_v45 }
  0xe2   :  { %v1227_v24 = vmax.f32 %v586_v14, %v10540_v15  ;;  %5326 = vst.msk [vmem:[%s12314_s1 + $0xf4] sm:$0xf] %vm5264_vm0, %v5197_v31  ;;  %v4430_v17 = vmax.f32 %v3789_v19, %v8340_v34  ;;  %v10899_v51 = vunpack.c.l.bf16 %v9268_v57  ;;  %v587_v8 = vmax.f32 %v10513_v27, %v8315_v37  ;;  %v9077_v14 = vld [vmem:[%s12313_s0 + $0x640] sm:$0xff]   ;;  %v10917_v27 = vld [vmem:[%s12313_s0 + $0x3f8] sm:$0xff]  }
  0xe3   :  { %v3149_v23 = vmax.f32 %v2508_v5, %v7831_v46  ;;  %v5198_v52 = vpack.c.bf16 %v5070_v54, %v5070_v54  ;;  %v7832_v41 = vunpack.c.h.bf16 %v10853_v28  ;;  %v12322_v61 = vunpack.c.h.bf16 %v10867_v33 }
  0xe4   :  { %v1868_v21 = vmax.f32 %v1227_v24, %v7320_v53  ;;  %v5071_v12 = vmax.f32 %v4430_v17, %v8596_v16  ;;  %v1228_v53 = vmax.f32 %v587_v8, %v10560_v40  ;;  %v7579_v31 = vunpack.c.l.bf16 %v9013_v25  ;;  %v9269_v24 = vld [vmem:[%s12313_s0 + $0x178] sm:$0xff]  }
  0xe5   :  { %v3790_v3 = vmax.f32 %v3149_v23, %v12321_v1  ;;  %5327 = vst.msk [vmem:[%s12314_s1 + $0xf8] sm:$0xf] %vm5264_vm0, %v5198_v52  ;;  %v8344_v28 = vunpack.c.h.bf16 %v10872_v45  ;;  %v10926_v19 = vunpack.c.h.bf16 %v9268_v57  ;;  %v8347_v52 = vunpack.c.l.bf16 %v10917_v27  ;;  %v9014_v1 = vld [vmem:[%s12313_s0 + $0x8c8] sm:$0xff]  }
  0xe6   :  { %v2509_v5 = vmax.f32 %v1868_v21, %v7576_v38  ;;  %v588_v38 = vmax.f32 %v10540_v15, %v8316_v6  ;;  %v5199_v54 = vpack.c.bf16 %v5071_v12, %v5071_v12  ;;  %v1869_v17 = vmax.f32 %v1228_v53, %v7831_v46 }
  0xe7   :  { %v4431_v37 = vmax.f32 %v3790_v3, %v8343_v0  ;;  %v7835_v21 = vunpack.c.l.bf16 %v9077_v14  ;;  %v7580_v57 = vunpack.c.h.bf16 %v9013_v25  ;;  %v10946_v6 = vunpack.c.l.bf16 %v9269_v24  ;;  %v10954_v25 = vld [vmem:[%s12313_s0 + $0x648] sm:$0xff]  }
  0xe8   :  { %v3150_v23 = vmax.f32 %v2509_v5, %v7832_v41  ;;  %v1229_v3 = vmax.f32 %v588_v38, %v10583_v4  ;;  %5328 = vst.msk [vmem:[%s12314_s1 + $0xfc] sm:$0xf] %vm5264_vm0, %v5199_v54  ;;  %v2510_v15 = vmax.f32 %v1869_v17, %v7579_v31  ;;  %v589_v46 = vmax.f32 %v10560_v40, %v8319_v44  ;;  %v10960_v31 = vld [vmem:[%s12313_s0 + $0x400] sm:$0xff]  }
  0xe9   :  { %v5072_v8 = vmax.f32 %v4431_v37, %v10899_v51  ;;  %v7836_v53 = vunpack.c.h.bf16 %v9077_v14  ;;  %v8348_v37 = vunpack.c.h.bf16 %v10917_v27  ;;  %v7583_v44 = vunpack.c.l.bf16 %v9014_v1  ;;  %v9270_v17 = vld [vmem:[%s12313_s0 + $0x180] sm:$0xff]  }
  0xea   :  { %v3791_v7 = vmax.f32 %v3150_v23, %v12322_v61  ;;  %v1870_v5 = vmax.f32 %v1229_v3, %v7832_v41  ;;  %v3151_v54 = vmax.f32 %v2510_v15, %v7835_v21  ;;  %v1230_v40 = vmax.f32 %v589_v46, %v10604_v32 }
  0xeb   :  { %v5200_v12 = vpack.c.bf16 %v5072_v8, %v5072_v8  ;;  %v10969_v14 = vunpack.c.h.bf16 %v9269_v24  ;;  %v7839_v23 = vunpack.c.l.bf16 %v10954_v25  ;;  %v590_v8 = vmax.f32 %v10583_v4, %v8320_v63  ;;  %v9015_v24 = vld [vmem:[%s12313_s0 + $0x8d0] sm:$0xff]  }
  0xec   :  { %v4432_v38 = vmax.f32 %v3791_v7, %v8344_v28  ;;  %v2511_v41 = vmax.f32 %v1870_v5, %v7580_v57  ;;  %v3792_v7 = vmax.f32 %v3151_v54, %v10899_v51  ;;  %v1871_v15 = vmax.f32 %v1230_v40, %v7835_v21 }
  0xed   :  { %5329 = vst.msk [vmem:[%s12314_s1 + $0x100] sm:$0xf] %vm5264_vm0, %v5200_v12  ;;  %v8351_v46 = vunpack.c.l.bf16 %v10960_v31  ;;  %v1231_v12 = vmax.f32 %v590_v8, %v10646_v56  ;;  %v7584_v5 = vunpack.c.h.bf16 %v9014_v1  ;;  %v591_v30 = vmax.f32 %v10604_v32, %v8323_v9  ;;  %v10997_v1 = vld [vmem:[%s12313_s0 + $0x650] sm:$0xff]  }
  0xee   :  { %v5073_v3 = vmax.f32 %v4432_v38, %v10926_v19  ;;  %v3152_v57 = vmax.f32 %v2511_v41, %v7836_v53  ;;  %v4433_v63 = vmax.f32 %v3792_v7, %v8347_v52  ;;  %v2512_v38 = vmax.f32 %v1871_v15, %v7583_v44  ;;  %v11011_v15 = vld [vmem:[%s12313_s0 + $0x408] sm:$0xff]  }
  0xef   :  { %v10990_v21 = vunpack.c.l.bf16 %v9270_v17  ;;  %v1872_v40 = vmax.f32 %v1231_v12, %v7836_v53  ;;  %v1232_v61 = vmax.f32 %v591_v30, %v10654_v26  ;;  %v7587_v41 = vunpack.c.l.bf16 %v9015_v24 }
  0xf0   :  { %v5201_v4 = vpack.c.bf16 %v5073_v3, %v5073_v3  ;;  %v3793_v54 = vmax.f32 %v3152_v57, %v10926_v19  ;;  %v5074_v32 = vmax.f32 %v4433_v63, %v10946_v6  ;;  %v3153_v9 = vmax.f32 %v2512_v38, %v7839_v23 }
  0xf1   :  { %v7840_v44 = vunpack.c.h.bf16 %v10954_v25  ;;  %v8352_v53 = vunpack.c.h.bf16 %v10960_v31  ;;  %v2513_v3 = vmax.f32 %v1872_v40, %v7584_v5  ;;  %v1873_v7 = vmax.f32 %v1232_v61, %v7839_v23  ;;  %v9271_v61 = vld [vmem:[%s12313_s0 + $0x188] sm:$0xff]  }
  0xf2   :  { %5330 = vst.msk [vmem:[%s12314_s1 + $0x104] sm:$0xf] %vm5264_vm0, %v5201_v4  ;;  %v4434_v8 = vmax.f32 %v3793_v54, %v8348_v37  ;;  %v592_v57 = vmax.f32 %v10646_v56, %v8324_v59  ;;  %v5202_v12 = vpack.c.bf16 %v5074_v32, %v5074_v32  ;;  %v3794_v30 = vmax.f32 %v3153_v9, %v10946_v6 }
  0xf3   :  { %v7843_v25 = vunpack.c.l.bf16 %v10997_v1  ;;  %v7588_v4 = vunpack.c.h.bf16 %v9015_v24  ;;  %v3154_v38 = vmax.f32 %v2513_v3, %v7840_v44  ;;  %v2514_v5 = vmax.f32 %v1873_v7, %v7587_v41 }
  0xf4   :  { %v5075_v63 = vmax.f32 %v4434_v8, %v10969_v14  ;;  %v1233_v23 = vmax.f32 %v592_v57, %v10680_v43  ;;  %5331 = vst.msk [vmem:[%s12314_s1 + $0x108] sm:$0xf] %vm5264_vm0, %v5202_v12  ;;  %v4435_v56 = vmax.f32 %v3794_v30, %v8351_v46  ;;  %v11032_v59 = vunpack.c.h.bf16 %v9270_v17  ;;  %v9080_v12 = vld [vmem:[%s12313_s0 + $0x658] sm:$0xff]  }
  0xf5   :  { %v8355_v24 = vunpack.c.l.bf16 %v11011_v15  ;;  %v593_v54 = vmax.f32 %v10654_v26, %v8327_v47  ;;  %v3795_v41 = vmax.f32 %v3154_v38, %v10969_v14  ;;  %v3155_v32 = vmax.f32 %v2514_v5, %v7843_v25  ;;  %v11058_v5 = vld [vmem:[%s12313_s0 + $0x410] sm:$0xff]  }
  0xf6   :  { %v5203_v40 = vpack.c.bf16 %v5075_v63, %v5075_v63  ;;  %v1874_v9 = vmax.f32 %v1233_v23, %v7840_v44  ;;  %v5076_v8 = vmax.f32 %v4435_v56, %v10990_v21  ;;  %v11040_v3 = vunpack.c.l.bf16 %v9271_v61 }
  0xf7   :  { %v1234_v7 = vmax.f32 %v593_v54, %v10696_v62  ;;  %v7591_v57 = vunpack.c.l.bf16 %v9016_v42  ;;  %v4436_v26 = vmax.f32 %v3795_v41, %v8352_v53  ;;  %v3796_v47 = vmax.f32 %v3155_v32, %v10990_v21 }
  0xf8   :  { %5332 = vst.msk [vmem:[%s12314_s1 + $0x10c] sm:$0xf] %vm5264_vm0, %v5203_v40  ;;  %v2515_v17 = vmax.f32 %v1874_v9, %v7588_v4  ;;  %v7844_v44 = vunpack.c.h.bf16 %v10997_v1  ;;  %v5204_v30 = vpack.c.bf16 %v5076_v8, %v5076_v8  ;;  %v8356_v63 = vunpack.c.h.bf16 %v11011_v15  ;;  %v9017_v8 = vld [vmem:[%s12313_s0 + $0x8e0] sm:$0xff]  }
  0xf9   :  { %v1875_v38 = vmax.f32 %v1234_v7, %v7843_v25  ;;  %v594_v23 = vmax.f32 %v10680_v43, %v8328_v36  ;;  %v5077_v4 = vmax.f32 %v4436_v26, %v11032_v59  ;;  %v4437_v1 = vmax.f32 %v3796_v47, %v8355_v24  ;;  %v9272_v25 = vld [vmem:[%s12313_s0 + $0x190] sm:$0xff]   ;;  %v9024_v15 = vld [vmem:[%s12313_s0 + $0x920] sm:$0xff]  }
  0xfa   :  { %v3156_v56 = vmax.f32 %v2515_v17, %v7844_v44  ;;  %v11066_v54 = vunpack.c.h.bf16 %v9271_v61  ;;  %5333 = vst.msk [vmem:[%s12314_s1 + $0x110] sm:$0xf] %vm5264_vm0, %v5204_v30  ;;  %v7847_v40 = vunpack.c.l.bf16 %v9080_v12  ;;  %v7592_v36 = vunpack.c.h.bf16 %v9016_v42  ;;  %v11090_v42 = vld [vmem:[%s12313_s0 + $0x660] sm:$0xff]  }
  0xfb   :  { %v2516_v50 = vmax.f32 %v1875_v38, %v7591_v57  ;;  %v1235_v43 = vmax.f32 %v594_v23, %v10725_v58  ;;  %v5205_v41 = vpack.c.bf16 %v5077_v4, %v5077_v4  ;;  %v5078_v32 = vmax.f32 %v4437_v1, %v11040_v3 }
  0xfc   :  { %v3797_v61 = vmax.f32 %v3156_v56, %v11032_v59  ;;  %v8359_v9 = vunpack.c.l.bf16 %v11058_v5  ;;  %v11082_v26 = vunpack.c.l.bf16 %v9272_v25  ;;  %v595_v57 = vmax.f32 %v10696_v62, %v8331_v35  ;;  %v11102_v62 = vld [vmem:[%s12313_s0 + $0x418] sm:$0xff]  }
  0xfd   :  { %v3157_v7 = vmax.f32 %v2516_v50, %v7847_v40  ;;  %v1876_v47 = vmax.f32 %v1235_v43, %v7844_v44  ;;  %5334 = vst.msk [vmem:[%s12314_s1 + $0x114] sm:$0xf] %vm5264_vm0, %v5205_v41  ;;  %v5206_v17 = vpack.c.bf16 %v5078_v32, %v5078_v32  ;;  %v7848_v38 = vunpack.c.h.bf16 %v9080_v12  ;;  %v9273_v43 = vld [vmem:[%s12313_s0 + $0x198] sm:$0xff]  }
  0xfe   :  { %v4438_v30 = vmax.f32 %v3797_v61, %v8356_v63  ;;  %v8360_v44 = vunpack.c.h.bf16 %v11058_v5  ;;  %v1236_v4 = vmax.f32 %v595_v57, %v10746_v60  ;;  %v7595_v1 = vunpack.c.l.bf16 %v9017_v8 }
  0xff   :  { %v3798_v35 = vmax.f32 %v3157_v7, %v11040_v3  ;;  %v2517_v23 = vmax.f32 %v1876_v47, %v7592_v36  ;;  %5335 = vst.msk [vmem:[%s12314_s1 + $0x118] sm:$0xf] %vm5264_vm0, %v5206_v17  ;;  %v11111_v56 = vunpack.c.h.bf16 %v9272_v25  ;;  %v7851_v50 = vunpack.c.l.bf16 %v11090_v42  ;;  %v9018_v25 = vld [vmem:[%s12313_s0 + $0x8e8] sm:$0xff]  }
 0x100   :  { %v5079_v12 = vmax.f32 %v4438_v30, %v11066_v54  ;;  %v596_v36 = vmax.f32 %v10725_v58, %v8332_v18  ;;  %v1877_v61 = vmax.f32 %v1236_v4, %v7847_v40  ;;  %v8363_v7 = vunpack.c.l.bf16 %v11102_v62 }
 0x101   :  { %v4439_v41 = vmax.f32 %v3798_v35, %v8359_v9  ;;  %v3158_v32 = vmax.f32 %v2517_v23, %v7848_v38  ;;  %v7596_v17 = vunpack.c.h.bf16 %v9017_v8  ;;  %v597_v49 = vmax.f32 %v10746_v60, %v8335_v13  ;;  %v9082_v60 = vld [vmem:[%s12313_s0 + $0x668] sm:$0xff]   ;;  %v11146_v13 = vld [vmem:[%s12313_s0 + $0x420] sm:$0xff]  }
 0x102   :  { %v5207_v47 = vpack.c.bf16 %v5079_v12, %v5079_v12  ;;  %v1237_v57 = vmax.f32 %v596_v36, %v10765_v10  ;;  %v2518_v30 = vmax.f32 %v1877_v61, %v7595_v1  ;;  %v11132_v40 = vunpack.c.l.bf16 %v9273_v43  ;;  %v9274_v61 = vld [vmem:[%s12313_s0 + $0x1a0] sm:$0xff]  }
 0x103   :  { %v5080_v58 = vmax.f32 %v4439_v41, %v11082_v26  ;;  %v3799_v18 = vmax.f32 %v3158_v32, %v11066_v54  ;;  %v7852_v23 = vunpack.c.h.bf16 %v11090_v42  ;;  %v1238_v8 = vmax.f32 %v597_v49, %v10786_v22 }
 0x104   :  { %5336 = vst.msk [vmem:[%s12314_s1 + $0x11c] sm:$0xf] %vm5264_vm0, %v5207_v47  ;;  %v1878_v35 = vmax.f32 %v1237_v57, %v7848_v38  ;;  %v7599_v4 = vunpack.c.l.bf16 %v9018_v25  ;;  %v3159_v36 = vmax.f32 %v2518_v30, %v7851_v50  ;;  %v8364_v38 = vunpack.c.h.bf16 %v11102_v62 }
 0x105   :  { %v5208_v1 = vpack.c.bf16 %v5080_v58, %v5080_v58  ;;  %v4440_v12 = vmax.f32 %v3799_v18, %v8360_v44  ;;  %v11151_v41 = vunpack.c.h.bf16 %v9273_v43  ;;  %v1879_v32 = vmax.f32 %v1238_v8, %v7851_v50 }
 0x106   :  { %v2519_v42 = vmax.f32 %v1878_v35, %v7596_v17  ;;  %v598_v47 = vmax.f32 %v10765_v10, %v8336_v39  ;;  %v3800_v17 = vmax.f32 %v3159_v36, %v11082_v26  ;;  %v7855_v43 = vunpack.c.l.bf16 %v9082_v60 }
 0x107   :  { %5337 = vst.msk [vmem:[%s12314_s1 + $0x120] sm:$0xf] %vm5264_vm0, %v5208_v1  ;;  %v5081_v57 = vmax.f32 %v4440_v12, %v11111_v56  ;;  %v8367_v50 = vunpack.c.l.bf16 %v11146_v13  ;;  %v2520_v58 = vmax.f32 %v1879_v32, %v7599_v4  ;;  %v7600_v30 = vunpack.c.h.bf16 %v9018_v25  ;;  %v9083_v25 = vld [vmem:[%s12313_s0 + $0x670] sm:$0xff]  }
 0x108   :  { %v3160_v49 = vmax.f32 %v2519_v42, %v7852_v23  ;;  %v1239_v18 = vmax.f32 %v598_v47, %v10824_v11  ;;  %v4441_v39 = vmax.f32 %v3800_v17, %v8363_v7  ;;  %v11172_v35 = vunpack.c.l.bf16 %v9274_v61 }
 0x109   :  { %v5209_v10 = vpack.c.bf16 %v5081_v57, %v5081_v57  ;;  %v599_v8 = vmax.f32 %v10786_v22, %v8339_v55  ;;  %v3161_v4 = vmax.f32 %v2520_v58, %v7855_v43  ;;  %v7856_v36 = vunpack.c.h.bf16 %v9082_v60 }
 0x10a   :  { %v3801_v1 = vmax.f32 %v3160_v49, %v11111_v56  ;;  %v1880_v12 = vmax.f32 %v1239_v18, %v7852_v23  ;;  %v5082_v42 = vmax.f32 %v4441_v39, %v11132_v40  ;;  %v8368_v32 = vunpack.c.h.bf16 %v11146_v13  ;;  %v9027_v13 = vld [vmem:[%s12313_s0 + $0x938] sm:$0xff]  }
 0x10b   :  { %5338 = vst.msk [vmem:[%s12314_s1 + $0x124] sm:$0xf] %vm5264_vm0, %v5209_v10  ;;  %v1240_v22 = vmax.f32 %v599_v8, %v8595_v20  ;;  %v7603_v55 = vunpack.c.l.bf16 %v9019_v48  ;;  %v3802_v60 = vmax.f32 %v3161_v4, %v11132_v40  ;;  %v600_v57 = vmax.f32 %v10824_v11, %v8340_v34  ;;  %v9020_v11 = vld [vmem:[%s12313_s0 + $0x900] sm:$0xff]  }
 0x10c   :  { %v4442_v23 = vmax.f32 %v3801_v1, %v8364_v38  ;;  %v2521_v47 = vmax.f32 %v1880_v12, %v7600_v30  ;;  %v5210_v17 = vpack.c.bf16 %v5082_v42, %v5082_v42  ;;  %v7859_v58 = vunpack.c.l.bf16 %v9083_v25  ;;  %v8956_v30 = vld [vmem:[%s12313_s0 + $0x678] sm:$0xff]  }
 0x10d   :  { %v1881_v49 = vmax.f32 %v1240_v22, %v7855_v43  ;;  %v7604_v18 = vunpack.c.h.bf16 %v9019_v48  ;;  %v4443_v20 = vmax.f32 %v3802_v60, %v8367_v50  ;;  %v1241_v8 = vmax.f32 %v600_v57, %v8596_v16 }
 0x10e   :  { %v5083_v10 = vmax.f32 %v4442_v23, %v11151_v41  ;;  %v3162_v39 = vmax.f32 %v2521_v47, %v7856_v36  ;;  %5339 = vst.msk [vmem:[%s12314_s1 + $0x128] sm:$0xf] %vm5264_vm0, %v5210_v17  ;;  %v11210_v2 = vunpack.c.h.bf16 %v9274_v61  ;;  %v7860_v16 = vunpack.c.h.bf16 %v9083_v25  ;;  %v11226_v61 = vld [vmem:[%s12313_s0 + $0x1a8] sm:$0xff]  }
 0x10f   :  { %v2522_v34 = vmax.f32 %v1881_v49, %v7603_v55  ;;  %v12333_v43 = vunpack.c.l.bf16 %v10867_v33  ;;  %v5084_v4 = vmax.f32 %v4443_v20, %v11172_v35  ;;  %v1882_v42 = vmax.f32 %v1241_v8, %v7856_v36  ;;  %v11239_v36 = vld [vmem:[%s12313_s0 + $0x680] sm:$0xff]   ;;  %v11253_v8 = vld [vmem:[%s12313_s0 + $0x1b0] sm:$0xff]  }
 0x110   :  { %v5211_v1 = vpack.c.bf16 %v5083_v10, %v5083_v10  ;;  %v3803_v12 = vmax.f32 %v3162_v39, %v11151_v41  ;;  %v7351_v25 = vunpack.c.l.bf16 %v8956_v30  ;;  %v7607_v23 = vunpack.c.l.bf16 %v9020_v11 }
 0x111   :  { %v601_v48 = vmax.f32 %v12333_v43, %v8343_v0  ;;  %v3163_v22 = vmax.f32 %v2522_v34, %v7859_v58  ;;  %v5212_v0 = vpack.c.bf16 %v5084_v4, %v5084_v4  ;;  %v8371_v47 = vunpack.c.l.bf16 %v11215_v29  ;;  %v11258_v34 = vld [vmem:[%s12313_s0 + $0x438] sm:$0xff]  }
 0x112   :  { %5340 = vst.msk [vmem:[%s12314_s1 + $0x12c] sm:$0xf] %vm5264_vm0, %v5211_v1  ;;  %v4444_v60 = vmax.f32 %v3803_v12, %v8368_v32  ;;  %v2523_v57 = vmax.f32 %v1882_v42, %v7604_v18  ;;  %v8627_v49 = vunpack.c.l.bf16 %v11226_v61  ;;  %v8372_v58 = vunpack.c.h.bf16 %v11215_v29  ;;  %v9276_v12 = vld [vmem:[%s12313_s0 + $0x1b8] sm:$0xff]  }
 0x113   :  { %v1242_v55 = vmax.f32 %v601_v48, %v10899_v51  ;;  %v3804_v17 = vmax.f32 %v3163_v22, %v11172_v35  ;;  %5341 = vst.msk [vmem:[%s12314_s1 + $0x130] sm:$0xf] %vm5264_vm0, %v5212_v0  ;;  %v8628_v39 = vunpack.c.h.bf16 %v11226_v61  ;;  %v12334_v43 = vunpack.c.h.bf16 %v10867_v33  ;;  %v11601_v61 = vld [vmem:[%s12313_s0 + $0x470] sm:$0xff]  }
 0x114   :  { %v5085_v20 = vmax.f32 %v4444_v60, %v11210_v2  ;;  %v3164_v18 = vmax.f32 %v2523_v57, %v7860_v16  ;;  %v7863_v4 = vunpack.c.l.bf16 %v11239_v36  ;;  %v7352_v42 = vunpack.c.h.bf16 %v8956_v30  ;;  %v9021_v60 = vld [vmem:[%s12313_s0 + $0x908] sm:$0xff]  }
 0x115   :  { %v1883_v10 = vmax.f32 %v1242_v55, %v7351_v25  ;;  %v602_v48 = vmax.f32 %v12334_v43, %v8344_v28  ;;  %v4445_v16 = vmax.f32 %v3804_v17, %v8371_v47  ;;  %v7608_v45 = vunpack.c.h.bf16 %v9020_v11 }
 0x116   :  { %v5213_v22 = vpack.c.bf16 %v5085_v20, %v5085_v20  ;;  %v3805_v55 = vmax.f32 %v3164_v18, %v11210_v2  ;;  %v12323_v0 = vunpack.c.l.bf16 %v11253_v8  ;;  %v11285_v11 = vunpack.c.l.bf16 %v9276_v12 }
 0x117   :  { %v2524_v1 = vmax.f32 %v1883_v10, %v7607_v23  ;;  %v1243_v25 = vmax.f32 %v602_v48, %v10926_v19  ;;  %v5086_v33 = vmax.f32 %v4445_v16, %v8627_v49  ;;  %v8375_v23 = vunpack.c.l.bf16 %v11258_v34  ;;  %v9085_v48 = vld [vmem:[%s12313_s0 + $0x688] sm:$0xff]  }
 0x118   :  { %5342 = vst.msk [vmem:[%s12314_s1 + $0x134] sm:$0xf] %vm5264_vm0, %v5213_v22  ;;  %v4446_v30 = vmax.f32 %v3805_v55, %v8372_v58  ;;  %v603_v17 = vmax.f32 %v10899_v51, %v8347_v52  ;;  %v7864_v18 = vunpack.c.h.bf16 %v11239_v36  ;;  %v12324_v43 = vunpack.c.h.bf16 %v11253_v8  ;;  %v11303_v51 = vld [vmem:[%s12313_s0 + $0x440] sm:$0xff]  }
 0x119   :  { %v3165_v28 = vmax.f32 %v2524_v1, %v7863_v4  ;;  %v1884_v57 = vmax.f32 %v1243_v25, %v7352_v42  ;;  %v5214_v10 = vpack.c.bf16 %v5086_v33, %v5086_v33  ;;  %v7611_v22 = vunpack.c.l.bf16 %v9021_v60  ;;  %v9277_v25 = vld [vmem:[%s12313_s0 + $0x1c0] sm:$0xff]  }
 0x11a   :  { %v5087_v16 = vmax.f32 %v4446_v30, %v8628_v39  ;;  %v1244_v42 = vmax.f32 %v603_v17, %v10946_v6  ;;  %v8376_v36 = vunpack.c.h.bf16 %v11258_v34  ;;  %v11312_v55 = vunpack.c.h.bf16 %v9276_v12 }
 0x11b   :  { %v3806_v20 = vmax.f32 %v3165_v28, %v12323_v0  ;;  %v2525_v1 = vmax.f32 %v1884_v57, %v7608_v45  ;;  %5343 = vst.msk [vmem:[%s12314_s1 + $0x138] sm:$0xf] %vm5264_vm0, %v5214_v10  ;;  %v604_v45 = vmax.f32 %v10926_v19, %v8348_v37  ;;  %v7867_v57 = vunpack.c.l.bf16 %v9085_v48  ;;  %v9022_v0 = vld [vmem:[%s12313_s0 + $0x910] sm:$0xff]  }
 0x11c   :  { %v5215_v33 = vpack.c.bf16 %v5087_v16, %v5087_v16  ;;  %v1885_v30 = vmax.f32 %v1244_v42, %v7863_v4  ;;  %v8379_v10 = vunpack.c.l.bf16 %v11303_v51  ;;  %v7612_v12 = vunpack.c.h.bf16 %v9021_v60  ;;  %v11340_v60 = vld [vmem:[%s12313_s0 + $0x690] sm:$0xff]  }
 0x11d   :  { %v4447_v52 = vmax.f32 %v3806_v20, %v8375_v23  ;;  %v3166_v28 = vmax.f32 %v2525_v1, %v7864_v18  ;;  %v1245_v20 = vmax.f32 %v604_v45, %v10969_v14  ;;  %v11332_v37 = vunpack.c.l.bf16 %v9277_v25 }
 0x11e   :  { %5344 = vst.msk [vmem:[%s12314_s1 + $0x13c] sm:$0xf] %vm5264_vm0, %v5215_v33  ;;  %v2526_v19 = vmax.f32 %v1885_v30, %v7611_v22  ;;  %v605_v4 = vmax.f32 %v10946_v6, %v8351_v46  ;;  %v7868_v42 = vunpack.c.h.bf16 %v9085_v48  ;;  %v11346_v22 = vld [vmem:[%s12313_s0 + $0x448] sm:$0xff]   ;;  %v7615_v46 = vunpack.c.l.bf16 %v9022_v0 }
 0x11f   :  { %v5088_v17 = vmax.f32 %v4447_v52, %v11285_v11  ;;  %v3807_v27 = vmax.f32 %v3166_v28, %v12324_v43  ;;  %v1886_v1 = vmax.f32 %v1245_v20, %v7864_v18  ;;  %v8380_v52 = vunpack.c.h.bf16 %v11303_v51  ;;  %v9278_v30 = vld [vmem:[%s12313_s0 + $0x1c8] sm:$0xff]  }
 0x120   :  { %v3167_v33 = vmax.f32 %v2526_v19, %v7867_v57  ;;  %v1246_v6 = vmax.f32 %v605_v4, %v10990_v21  ;;  %v11355_v48 = vunpack.c.h.bf16 %v9277_v25  ;;  %v7871_v28 = vunpack.c.l.bf16 %v11340_v60  ;;  %v9023_v25 = vld [vmem:[%s12313_s0 + $0x918] sm:$0xff]  }
 0x121   :  { %v5216_v16 = vpack.c.bf16 %v5088_v17, %v5088_v17  ;;  %v4448_v45 = vmax.f32 %v3807_v27, %v8376_v36  ;;  %v2527_v18 = vmax.f32 %v1886_v1, %v7612_v12  ;;  %v606_v17 = vmax.f32 %v10969_v14, %v8352_v53 }
 0x122   :  { %v3808_v27 = vmax.f32 %v3167_v33, %v11285_v11  ;;  %v1887_v19 = vmax.f32 %v1246_v6, %v7867_v57  ;;  %v8383_v4 = vunpack.c.l.bf16 %v11346_v22  ;;  %v7616_v1 = vunpack.c.h.bf16 %v9022_v0  ;;  %v11383_v0 = vld [vmem:[%s12313_s0 + $0x698] sm:$0xff]  }
 0x123   :  { %5345 = vst.msk [vmem:[%s12314_s1 + $0x140] sm:$0xf] %vm5264_vm0, %v5216_v16  ;;  %v5089_v20 = vmax.f32 %v4448_v45, %v11312_v55  ;;  %v3168_v12 = vmax.f32 %v2527_v18, %v7868_v42  ;;  %v1247_v16 = vmax.f32 %v606_v17, %v11032_v59  ;;  %v607_v31 = vmax.f32 %v10990_v21, %v8355_v24 }
 0x124   :  { %v4449_v53 = vmax.f32 %v3808_v27, %v8379_v10  ;;  %v2528_v45 = vmax.f32 %v1887_v19, %v7615_v46  ;;  %v11376_v57 = vunpack.c.l.bf16 %v9278_v30  ;;  %v7619_v18 = vunpack.c.l.bf16 %v9023_v25  ;;  %v11397_v19 = vld [vmem:[%s12313_s0 + $0x450] sm:$0xff]  }
 0x125   :  { %v5217_v14 = vpack.c.bf16 %v5089_v20, %v5089_v20  ;;  %v3809_v33 = vmax.f32 %v3168_v12, %v11312_v55  ;;  %v1888_v6 = vmax.f32 %v1247_v16, %v7868_v42  ;;  %v1248_v43 = vmax.f32 %v607_v31, %v11040_v3 }
 0x126   :  { %v5090_v21 = vmax.f32 %v4449_v53, %v11332_v37  ;;  %v3169_v24 = vmax.f32 %v2528_v45, %v7871_v28  ;;  %v7872_v46 = vunpack.c.h.bf16 %v11340_v60  ;;  %v8384_v42 = vunpack.c.h.bf16 %v11346_v22 }
 0x127   :  { %5346 = vst.msk [vmem:[%s12314_s1 + $0x144] sm:$0xf] %vm5264_vm0, %v5217_v14  ;;  %v4450_v17 = vmax.f32 %v3809_v33, %v8380_v52  ;;  %v2529_v20 = vmax.f32 %v1888_v6, %v7616_v1  ;;  %v1889_v27 = vmax.f32 %v1248_v43, %v7871_v28  ;;  %v608_v12 = vmax.f32 %v11032_v59, %v8356_v63  ;;  %v9279_v43 = vld [vmem:[%s12313_s0 + $0x1d0] sm:$0xff]  }
 0x128   :  { %v5218_v16 = vpack.c.bf16 %v5090_v21, %v5090_v21  ;;  %v3810_v31 = vmax.f32 %v3169_v24, %v11332_v37  ;;  %v7875_v60 = vunpack.c.l.bf16 %v11383_v0  ;;  %v7620_v14 = vunpack.c.h.bf16 %v9023_v25 }
 0x129   :  { %v5091_v53 = vmax.f32 %v4450_v17, %v11355_v48  ;;  %v3170_v45 = vmax.f32 %v2529_v20, %v7872_v46  ;;  %v2530_v1 = vmax.f32 %v1889_v27, %v7619_v18  ;;  %v1249_v28 = vmax.f32 %v608_v12, %v11066_v54 }
 0x12a   :  { %5347 = vst.msk [vmem:[%s12314_s1 + $0x148] sm:$0xf] %vm5264_vm0, %v5218_v16  ;;  %v4451_v59 = vmax.f32 %v3810_v31, %v8383_v4  ;;  %v11418_v63 = vunpack.c.h.bf16 %v9278_v30  ;;  %v8387_v25 = vunpack.c.l.bf16 %v11397_v19  ;;  %v609_v33 = vmax.f32 %v11040_v3, %v8359_v9  ;;  %v9088_v16 = vld [vmem:[%s12313_s0 + $0x6a0] sm:$0xff]  }
 0x12b   :  { %v5219_v6 = vpack.c.bf16 %v5091_v53, %v5091_v53  ;;  %v3811_v18 = vmax.f32 %v3170_v45, %v11355_v48  ;;  %v3171_v21 = vmax.f32 %v2530_v1, %v7875_v60  ;;  %v1890_v24 = vmax.f32 %v1249_v28, %v7872_v46  ;;  %v11444_v1 = vld [vmem:[%s12313_s0 + $0x458] sm:$0xff]  }
 0x12c   :  { %v5092_v17 = vmax.f32 %v4451_v59, %v11376_v57  ;;  %v11426_v20 = vunpack.c.l.bf16 %v9279_v43  ;;  %v1250_v27 = vmax.f32 %v609_v33, %v11082_v26  ;;  %v7623_v12 = vunpack.c.l.bf16 %v9024_v15 }
 0x12d   :  { %5348 = vst.msk [vmem:[%s12314_s1 + $0x14c] sm:$0xf] %vm5264_vm0, %v5219_v6  ;;  %v4452_v3 = vmax.f32 %v3811_v18, %v8384_v42  ;;  %v3812_v9 = vmax.f32 %v3171_v21, %v11376_v57  ;;  %v2531_v30 = vmax.f32 %v1890_v24, %v7620_v14  ;;  %v7876_v46 = vunpack.c.h.bf16 %v11383_v0 }
 0x12e   :  { %v5220_v31 = vpack.c.bf16 %v5092_v17, %v5092_v17  ;;  %v8388_v53 = vunpack.c.h.bf16 %v11397_v19  ;;  %v1891_v45 = vmax.f32 %v1250_v27, %v7875_v60  ;;  %v610_v28 = vmax.f32 %v11066_v54, %v8360_v44  ;;  %v9280_v60 = vld [vmem:[%s12313_s0 + $0x1d8] sm:$0xff]   ;;  %v9025_v17 = vld [vmem:[%s12313_s0 + $0x928] sm:$0xff]  }
 0x12f   :  { %v5093_v14 = vmax.f32 %v4452_v3, %v11418_v63  ;;  %v4453_v0 = vmax.f32 %v3812_v9, %v8387_v25  ;;  %v3172_v59 = vmax.f32 %v2531_v30, %v7876_v46  ;;  %v11452_v33 = vunpack.c.h.bf16 %v9279_v43  ;;  %v9032_v19 = vld [vmem:[%s12313_s0 + $0x968] sm:$0xff]  }
 0x130   :  { %5349 = vst.msk [vmem:[%s12314_s1 + $0x150] sm:$0xf] %vm5264_vm0, %v5220_v31  ;;  %v2532_v5 = vmax.f32 %v1891_v45, %v7623_v12  ;;  %v7879_v6 = vunpack.c.l.bf16 %v9088_v16  ;;  %v1251_v54 = vmax.f32 %v610_v28, %v11111_v56  ;;  %v7624_v44 = vunpack.c.h.bf16 %v9024_v15  ;;  %v11476_v15 = vld [vmem:[%s12313_s0 + $0x6a8] sm:$0xff]  }
 0x131   :  { %v5221_v18 = vpack.c.bf16 %v5093_v14, %v5093_v14  ;;  %v5094_v21 = vmax.f32 %v4453_v0, %v11426_v20  ;;  %v3813_v43 = vmax.f32 %v3172_v59, %v11418_v63  ;;  %v8391_v24 = vunpack.c.l.bf16 %v11444_v1 }
 0x132   :  { %v3173_v27 = vmax.f32 %v2532_v5, %v7879_v6  ;;  %v11468_v3 = vunpack.c.l.bf16 %v9280_v60  ;;  %v1892_v9 = vmax.f32 %v1251_v54, %v7876_v46  ;;  %v611_v12 = vmax.f32 %v11082_v26, %v8363_v7  ;;  %v11488_v26 = vld [vmem:[%s12313_s0 + $0x460] sm:$0xff]  }
 0x133   :  { %5350 = vst.msk [vmem:[%s12314_s1 + $0x154] sm:$0xf] %vm5264_vm0, %v5221_v18  ;;  %v5222_v30 = vpack.c.bf16 %v5094_v21, %v5094_v21  ;;  %v4454_v31 = vmax.f32 %v3813_v43, %v8388_v53  ;;  %v7880_v45 = vunpack.c.h.bf16 %v9088_v16  ;;  %v8392_v46 = vunpack.c.h.bf16 %v11444_v1  ;;  %v9281_v54 = vld [vmem:[%s12313_s0 + $0x1e0] sm:$0xff]  }
 0x134   :  { %v3814_v7 = vmax.f32 %v3173_v27, %v11426_v20  ;;  %v2533_v28 = vmax.f32 %v1892_v9, %v7624_v44  ;;  %v1252_v14 = vmax.f32 %v611_v12, %v11132_v40  ;;  %v7627_v0 = vunpack.c.l.bf16 %v9025_v17 }
 0x135   :  { %5351 = vst.msk [vmem:[%s12314_s1 + $0x158] sm:$0xf] %vm5264_vm0, %v5222_v30  ;;  %v5095_v16 = vmax.f32 %v4454_v31, %v11452_v33  ;;  %v11497_v59 = vunpack.c.h.bf16 %v9280_v60  ;;  %v7883_v5 = vunpack.c.l.bf16 %v11476_v15  ;;  %v612_v44 = vmax.f32 %v11111_v56, %v8364_v38  ;;  %v9026_v60 = vld [vmem:[%s12313_s0 + $0x930] sm:$0xff]  }
 0x136   :  { %v4455_v18 = vmax.f32 %v3814_v7, %v8391_v24  ;;  %v3174_v21 = vmax.f32 %v2533_v28, %v7880_v45  ;;  %v1893_v43 = vmax.f32 %v1252_v14, %v7879_v6  ;;  %v8395_v27 = vunpack.c.l.bf16 %v11488_v26 }
 0x137   :  { %v5223_v9 = vpack.c.bf16 %v5095_v16, %v5095_v16  ;;  %v1253_v12 = vmax.f32 %v612_v44, %v11151_v41  ;;  %v7628_v30 = vunpack.c.h.bf16 %v9025_v17  ;;  %v613_v62 = vmax.f32 %v11132_v40, %v8367_v50  ;;  %v9090_v40 = vld [vmem:[%s12313_s0 + $0x6b0] sm:$0xff]   ;;  %v11532_v50 = vld [vmem:[%s12313_s0 + $0x468] sm:$0xff]  }
 0x138   :  { %v5096_v56 = vmax.f32 %v4455_v18, %v11468_v3  ;;  %v3815_v38 = vmax.f32 %v3174_v21, %v11452_v33  ;;  %v2534_v31 = vmax.f32 %v1893_v43, %v7627_v0  ;;  %v11518_v6 = vunpack.c.l.bf16 %v9281_v54  ;;  %v9282_v43 = vld [vmem:[%s12313_s0 + $0x1e8] sm:$0xff]  }
 0x139   :  { %5352 = vst.msk [vmem:[%s12314_s1 + $0x15c] sm:$0xf] %vm5264_vm0, %v5223_v9  ;;  %v1894_v7 = vmax.f32 %v1253_v12, %v7880_v45  ;;  %v7884_v28 = vunpack.c.h.bf16 %v11476_v15  ;;  %v1254_v17 = vmax.f32 %v613_v62, %v11172_v35  ;;  %v7631_v14 = vunpack.c.l.bf16 %v9026_v60 }
 0x13a   :  { %v5224_v0 = vpack.c.bf16 %v5096_v56, %v5096_v56  ;;  %v4456_v16 = vmax.f32 %v3815_v38, %v8392_v46  ;;  %v3175_v44 = vmax.f32 %v2534_v31, %v7883_v5  ;;  %v8396_v45 = vunpack.c.h.bf16 %v11488_v26 }
 0x13b   :  { %v2535_v15 = vmax.f32 %v1894_v7, %v7628_v30  ;;  %v11537_v18 = vunpack.c.h.bf16 %v9281_v54  ;;  %v1895_v21 = vmax.f32 %v1254_v17, %v7883_v5  ;;  %v614_v9 = vmax.f32 %v11151_v41, %v8368_v32 }
 0x13c   :  { %5353 = vst.msk [vmem:[%s12314_s1 + $0x160] sm:$0xf] %vm5264_vm0, %v5224_v0  ;;  %v5097_v12 = vmax.f32 %v4456_v16, %v11497_v59  ;;  %v3816_v30 = vmax.f32 %v3175_v44, %v11468_v3  ;;  %v7887_v54 = vunpack.c.l.bf16 %v9090_v40  ;;  %v8399_v5 = vunpack.c.l.bf16 %v11532_v50 }
 0x13d   :  { %v3176_v62 = vmax.f32 %v2535_v15, %v7884_v28  ;;  %v2536_v56 = vmax.f32 %v1895_v21, %v7631_v14  ;;  %v1255_v38 = vmax.f32 %v614_v9, %v11210_v2  ;;  %v7632_v31 = vunpack.c.h.bf16 %v9026_v60  ;;  %v9091_v60 = vld [vmem:[%s12313_s0 + $0x6b8] sm:$0xff]  }
 0x13e   :  { %v5225_v41 = vpack.c.bf16 %v5097_v12, %v5097_v12  ;;  %v4457_v32 = vmax.f32 %v3816_v30, %v8395_v27  ;;  %v11558_v7 = vunpack.c.l.bf16 %v9282_v43  ;;  %v615_v17 = vmax.f32 %v11172_v35, %v8371_v47 }
 0x13f   :  { %v3817_v0 = vmax.f32 %v3176_v62, %v11497_v59  ;;  %v3177_v14 = vmax.f32 %v2536_v56, %v7887_v54  ;;  %v1896_v16 = vmax.f32 %v1255_v38, %v7884_v28  ;;  %v7888_v44 = vunpack.c.h.bf16 %v9090_v40 }
 0x140   :  { %5354 = vst.msk [vmem:[%s12314_s1 + $0x164] sm:$0xf] %vm5264_vm0, %v5225_v41  ;;  %v5098_v15 = vmax.f32 %v4457_v32, %v11518_v6  ;;  %v8400_v21 = vunpack.c.h.bf16 %v11532_v50  ;;  %v1256_v35 = vmax.f32 %v615_v17, %v8627_v49  ;;  %v7635_v47 = vunpack.c.l.bf16 %v9027_v13  ;;  %v9035_v50 = vld [vmem:[%s12313_s0 + $0x980] sm:$0xff]  }
 0x141   :  { %v4458_v28 = vmax.f32 %v3817_v0, %v8396_v45  ;;  %v3818_v40 = vmax.f32 %v3177_v14, %v11518_v6  ;;  %v2537_v9 = vmax.f32 %v1896_v16, %v7632_v31  ;;  %v616_v12 = vmax.f32 %v11210_v2, %v8372_v58  ;;  %v8964_v31 = vld [vmem:[%s12313_s0 + $0x6c0] sm:$0xff]   ;;  %v9028_v2 = vld [vmem:[%s12313_s0 + $0x948] sm:$0xff]  }
 0x142   :  { %v5226_v30 = vpack.c.bf16 %v5098_v15, %v5098_v15  ;;  %v1897_v62 = vmax.f32 %v1256_v35, %v7887_v54  ;;  %v7891_v56 = vunpack.c.l.bf16 %v9091_v60  ;;  %v7636_v38 = vunpack.c.h.bf16 %v9027_v13 }
 0x143   :  { %v5099_v41 = vmax.f32 %v4458_v28, %v11537_v18  ;;  %v4459_v49 = vmax.f32 %v3818_v40, %v8399_v5  ;;  %v3178_v32 = vmax.f32 %v2537_v9, %v7888_v44  ;;  %v1257_v17 = vmax.f32 %v616_v12, %v8628_v39 }
 0x144   :  { %5355 = vst.msk [vmem:[%s12314_s1 + $0x168] sm:$0xf] %vm5264_vm0, %v5226_v30  ;;  %v11596_v29 = vunpack.c.h.bf16 %v9282_v43  ;;  %v2538_v58 = vmax.f32 %v1897_v62, %v7635_v47  ;;  %v7892_v39 = vunpack.c.h.bf16 %v9091_v60  ;;  %v12335_v54 = vunpack.c.l.bf16 %v11253_v8  ;;  %v11612_v43 = vld [vmem:[%s12313_s0 + $0x1f0] sm:$0xff]  }
 0x145   :  { %v5227_v0 = vpack.c.bf16 %v5099_v41, %v5099_v41  ;;  %v5100_v14 = vmax.f32 %v4459_v49, %v11558_v7  ;;  %v3819_v16 = vmax.f32 %v3178_v32, %v11537_v18  ;;  %v1898_v15 = vmax.f32 %v1257_v17, %v7888_v44  ;;  %v11625_v44 = vld [vmem:[%s12313_s0 + $0x6c8] sm:$0xff]   ;;  %v11639_v17 = vld [vmem:[%s12313_s0 + $0x1f8] sm:$0xff]  }
 0x146   :  { %v617_v13 = vmax.f32 %v12335_v54, %v8375_v23  ;;  %v3179_v35 = vmax.f32 %v2538_v58, %v7891_v56  ;;  %v7383_v60 = vunpack.c.l.bf16 %v8964_v31  ;;  %v7639_v28 = vunpack.c.l.bf16 %v9028_v2  ;;  %v11644_v58 = vld [vmem:[%s12313_s0 + $0x480] sm:$0xff]  }
 0x147   :  { %5356 = vst.msk [vmem:[%s12314_s1 + $0x16c] sm:$0xf] %vm5264_vm0, %v5227_v0  ;;  %v5228_v23 = vpack.c.bf16 %v5100_v14, %v5100_v14  ;;  %v4460_v40 = vmax.f32 %v3819_v16, %v8400_v21  ;;  %v8403_v9 = vunpack.c.l.bf16 %v11601_v61  ;;  %v2539_v12 = vmax.f32 %v1898_v15, %v7636_v38  ;;  %v9284_v16 = vld [vmem:[%s12313_s0 + $0x200] sm:$0xff]  }
 0x148   :  { %v1258_v47 = vmax.f32 %v617_v13, %v11285_v11  ;;  %v3820_v30 = vmax.f32 %v3179_v35, %v11558_v7  ;;  %v8659_v62 = vunpack.c.l.bf16 %v11612_v43  ;;  %v8404_v56 = vunpack.c.h.bf16 %v11601_v61 }
 0x149   :  { %5357 = vst.msk [vmem:[%s12314_s1 + $0x170] sm:$0xf] %vm5264_vm0, %v5228_v23  ;;  %v5101_v49 = vmax.f32 %v4460_v40, %v11596_v29  ;;  %v3180_v38 = vmax.f32 %v2539_v12, %v7892_v39  ;;  %v8660_v32 = vunpack.c.h.bf16 %v11612_v43  ;;  %v12336_v54 = vunpack.c.h.bf16 %v11253_v8  ;;  %v9029_v40 = vld [vmem:[%s12313_s0 + $0x950] sm:$0xff]   ;;  %v11987_v43 = vld [vmem:[%s12313_s0 + $0x4b8] sm:$0xff]  }
 0x14a   :  { %v1899_v41 = vmax.f32 %v1258_v47, %v7383_v60  ;;  %v4461_v39 = vmax.f32 %v3820_v30, %v8403_v9  ;;  %v7895_v14 = vunpack.c.l.bf16 %v11625_v44  ;;  %v7384_v15 = vunpack.c.h.bf16 %v8964_v31 }
 0x14b   :  { %v618_v13 = vmax.f32 %v12336_v54, %v8376_v36  ;;  %v5229_v35 = vpack.c.bf16 %v5101_v49, %v5101_v49  ;;  %v3821_v47 = vmax.f32 %v3180_v38, %v11596_v29  ;;  %v7640_v34 = vunpack.c.h.bf16 %v9028_v2 }
 0x14c   :  { %v2540_v0 = vmax.f32 %v1899_v41, %v7639_v28  ;;  %v5102_v8 = vmax.f32 %v4461_v39, %v8659_v62  ;;  %v12325_v23 = vunpack.c.l.bf16 %v11639_v17  ;;  %v8407_v28 = vunpack.c.l.bf16 %v11644_v58 }
 0x14d   :  { %v1259_v60 = vmax.f32 %v618_v13, %v11312_v55  ;;  %5358 = vst.msk [vmem:[%s12314_s1 + $0x174] sm:$0xf] %vm5264_vm0, %v5229_v35  ;;  %v4462_v31 = vmax.f32 %v3821_v47, %v8404_v56  ;;  %v11671_v2 = vunpack.c.l.bf16 %v9284_v16  ;;  %v619_v30 = vmax.f32 %v11285_v11, %v8379_v10  ;;  %v9093_v13 = vld [vmem:[%s12313_s0 + $0x6d0] sm:$0xff]   ;;  %v11689_v11 = vld [vmem:[%s12313_s0 + $0x488] sm:$0xff]  }
 0x14e   :  { %v3181_v36 = vmax.f32 %v2540_v0, %v7895_v14  ;;  %v5230_v41 = vpack.c.bf16 %v5102_v8, %v5102_v8  ;;  %v7896_v38 = vunpack.c.h.bf16 %v11625_v44  ;;  %v12326_v54 = vunpack.c.h.bf16 %v11639_v17 }
 0x14f   :  { %v1900_v12 = vmax.f32 %v1259_v60, %v7384_v15  ;;  %v5103_v39 = vmax.f32 %v4462_v31, %v8660_v32  ;;  %v1260_v15 = vmax.f32 %v619_v30, %v11332_v37  ;;  %v7643_v35 = vunpack.c.l.bf16 %v9029_v40  ;;  %v9285_v60 = vld [vmem:[%s12313_s0 + $0x208] sm:$0xff]  }
 0x150   :  { %v3822_v49 = vmax.f32 %v3181_v36, %v12325_v23  ;;  %5359 = vst.msk [vmem:[%s12314_s1 + $0x178] sm:$0xf] %vm5264_vm0, %v5230_v41  ;;  %v8408_v44 = vunpack.c.h.bf16 %v11644_v58  ;;  %v11698_v47 = vunpack.c.h.bf16 %v9284_v16  ;;  %v8411_v41 = vunpack.c.l.bf16 %v11689_v11  ;;  %v9030_v23 = vld [vmem:[%s12313_s0 + $0x958] sm:$0xff]  }
 0x151   :  { %v2541_v0 = vmax.f32 %v1900_v12, %v7640_v34  ;;  %v620_v34 = vmax.f32 %v11312_v55, %v8380_v52  ;;  %v5231_v8 = vpack.c.bf16 %v5103_v39, %v5103_v39  ;;  %v1901_v31 = vmax.f32 %v1260_v15, %v7895_v14 }
 0x152   :  { %v4463_v10 = vmax.f32 %v3822_v49, %v8407_v28  ;;  %v7899_v12 = vunpack.c.l.bf16 %v9093_v13  ;;  %v7644_v16 = vunpack.c.h.bf16 %v9029_v40  ;;  %v11718_v52 = vunpack.c.l.bf16 %v9285_v60  ;;  %v11726_v40 = vld [vmem:[%s12313_s0 + $0x6d8] sm:$0xff]  }
 0x153   :  { %v3182_v36 = vmax.f32 %v2541_v0, %v7896_v38  ;;  %v1261_v49 = vmax.f32 %v620_v34, %v11355_v48  ;;  %5360 = vst.msk [vmem:[%s12314_s1 + $0x17c] sm:$0xf] %vm5264_vm0, %v5231_v8  ;;  %v2542_v55 = vmax.f32 %v1901_v31, %v7643_v35  ;;  %v621_v14 = vmax.f32 %v11332_v37, %v8383_v4  ;;  %v11732_v35 = vld [vmem:[%s12313_s0 + $0x490] sm:$0xff]  }
 0x154   :  { %v5104_v30 = vmax.f32 %v4463_v10, %v11671_v2  ;;  %v7900_v15 = vunpack.c.h.bf16 %v9093_v13  ;;  %v8412_v10 = vunpack.c.h.bf16 %v11689_v11  ;;  %v7647_v4 = vunpack.c.l.bf16 %v9030_v23  ;;  %v9286_v31 = vld [vmem:[%s12313_s0 + $0x210] sm:$0xff]  }
 0x155   :  { %v3823_v51 = vmax.f32 %v3182_v36, %v12326_v54  ;;  %v1902_v0 = vmax.f32 %v1261_v49, %v7896_v38  ;;  %v3183_v8 = vmax.f32 %v2542_v55, %v7899_v12  ;;  %v1262_v37 = vmax.f32 %v621_v14, %v11376_v57 }
 0x156   :  { %v5232_v39 = vpack.c.bf16 %v5104_v30, %v5104_v30  ;;  %v11741_v13 = vunpack.c.h.bf16 %v9285_v60  ;;  %v7903_v36 = vunpack.c.l.bf16 %v11726_v40  ;;  %v622_v30 = vmax.f32 %v11355_v48, %v8384_v42  ;;  %v9031_v60 = vld [vmem:[%s12313_s0 + $0x960] sm:$0xff]  }
 0x157   :  { %v4464_v34 = vmax.f32 %v3823_v51, %v8408_v44  ;;  %v2543_v38 = vmax.f32 %v1902_v0, %v7644_v16  ;;  %v3824_v51 = vmax.f32 %v3183_v8, %v11671_v2  ;;  %v1903_v55 = vmax.f32 %v1262_v37, %v7899_v12 }
 0x158   :  { %5361 = vst.msk [vmem:[%s12314_s1 + $0x180] sm:$0xf] %vm5264_vm0, %v5232_v39  ;;  %v8415_v14 = vunpack.c.l.bf16 %v11732_v35  ;;  %v1263_v39 = vmax.f32 %v622_v30, %v11418_v63  ;;  %v7648_v0 = vunpack.c.h.bf16 %v9030_v23  ;;  %v623_v22 = vmax.f32 %v11376_v57, %v8387_v25  ;;  %v11769_v23 = vld [vmem:[%s12313_s0 + $0x6e0] sm:$0xff]  }
 0x159   :  { %v5105_v49 = vmax.f32 %v4464_v34, %v11698_v47  ;;  %v3184_v16 = vmax.f32 %v2543_v38, %v7900_v15  ;;  %v4465_v42 = vmax.f32 %v3824_v51, %v8411_v41  ;;  %v2544_v34 = vmax.f32 %v1903_v55, %v7647_v4  ;;  %v11783_v55 = vld [vmem:[%s12313_s0 + $0x498] sm:$0xff]  }
 0x15a   :  { %v11762_v12 = vunpack.c.l.bf16 %v9286_v31  ;;  %v1904_v37 = vmax.f32 %v1263_v39, %v7900_v15  ;;  %v1264_v54 = vmax.f32 %v623_v22, %v11426_v20  ;;  %v7651_v38 = vunpack.c.l.bf16 %v9031_v60 }
 0x15b   :  { %v5233_v48 = vpack.c.bf16 %v5105_v49, %v5105_v49  ;;  %v3825_v8 = vmax.f32 %v3184_v16, %v11698_v47  ;;  %v5106_v57 = vmax.f32 %v4465_v42, %v11718_v52  ;;  %v3185_v25 = vmax.f32 %v2544_v34, %v7903_v36 }
 0x15c   :  { %v7904_v4 = vunpack.c.h.bf16 %v11726_v40  ;;  %v8416_v15 = vunpack.c.h.bf16 %v11732_v35  ;;  %v2545_v49 = vmax.f32 %v1904_v37, %v7648_v0  ;;  %v1905_v51 = vmax.f32 %v1264_v54, %v7903_v36  ;;  %v9287_v54 = vld [vmem:[%s12313_s0 + $0x218] sm:$0xff]  }
 0x15d   :  { %5362 = vst.msk [vmem:[%s12314_s1 + $0x184] sm:$0xf] %vm5264_vm0, %v5233_v48  ;;  %v4466_v30 = vmax.f32 %v3825_v8, %v8412_v10  ;;  %v624_v16 = vmax.f32 %v11418_v63, %v8388_v53  ;;  %v5234_v39 = vpack.c.bf16 %v5106_v57, %v5106_v57  ;;  %v3826_v22 = vmax.f32 %v3185_v25, %v11718_v52 }
 0x15e   :  { %v7907_v40 = vunpack.c.l.bf16 %v11769_v23  ;;  %v7652_v48 = vunpack.c.h.bf16 %v9031_v60  ;;  %v3186_v34 = vmax.f32 %v2545_v49, %v7904_v4  ;;  %v2546_v0 = vmax.f32 %v1905_v51, %v7651_v38 }
 0x15f   :  { %v5107_v42 = vmax.f32 %v4466_v30, %v11741_v13  ;;  %v1265_v36 = vmax.f32 %v624_v16, %v11452_v33  ;;  %5363 = vst.msk [vmem:[%s12314_s1 + $0x188] sm:$0xf] %vm5264_vm0, %v5234_v39  ;;  %v4467_v63 = vmax.f32 %v3826_v22, %v8415_v14  ;;  %v11804_v53 = vunpack.c.h.bf16 %v9286_v31  ;;  %v9096_v39 = vld [vmem:[%s12313_s0 + $0x6e8] sm:$0xff]  }
 0x160   :  { %v8419_v60 = vunpack.c.l.bf16 %v11783_v55  ;;  %v625_v8 = vmax.f32 %v11426_v20, %v8391_v24  ;;  %v3827_v38 = vmax.f32 %v3186_v34, %v11741_v13  ;;  %v3187_v57 = vmax.f32 %v2546_v0, %v7907_v40  ;;  %v11830_v0 = vld [vmem:[%s12313_s0 + $0x4a0] sm:$0xff]  }
 0x161   :  { %v5235_v37 = vpack.c.bf16 %v5107_v42, %v5107_v42  ;;  %v1906_v25 = vmax.f32 %v1265_v36, %v7904_v4  ;;  %v5108_v30 = vmax.f32 %v4467_v63, %v11762_v12  ;;  %v11812_v49 = vunpack.c.l.bf16 %v9287_v54 }
 0x162   :  { %v1266_v51 = vmax.f32 %v625_v8, %v11468_v3  ;;  %v7655_v16 = vunpack.c.l.bf16 %v9032_v19  ;;  %v4468_v20 = vmax.f32 %v3827_v38, %v8416_v15  ;;  %v3828_v24 = vmax.f32 %v3187_v57, %v11762_v12 }
 0x163   :  { %5364 = vst.msk [vmem:[%s12314_s1 + $0x18c] sm:$0xf] %vm5264_vm0, %v5235_v37  ;;  %v2547_v31 = vmax.f32 %v1906_v25, %v7652_v48  ;;  %v7908_v4 = vunpack.c.h.bf16 %v11769_v23  ;;  %v5236_v22 = vpack.c.bf16 %v5108_v30, %v5108_v30  ;;  %v8420_v42 = vunpack.c.h.bf16 %v11783_v55  ;;  %v9033_v30 = vld [vmem:[%s12313_s0 + $0x970] sm:$0xff]  }
 0x164   :  { %v1907_v34 = vmax.f32 %v1266_v51, %v7907_v40  ;;  %v626_v36 = vmax.f32 %v11452_v33, %v8392_v46  ;;  %v5109_v48 = vmax.f32 %v4468_v20, %v11804_v53  ;;  %v4469_v23 = vmax.f32 %v3828_v24, %v8419_v60  ;;  %v9288_v40 = vld [vmem:[%s12313_s0 + $0x220] sm:$0xff]   ;;  %v9040_v55 = vld [vmem:[%s12313_s0 + $0x9b0] sm:$0xff]  }
 0x165   :  { %v3188_v63 = vmax.f32 %v2547_v31, %v7908_v4  ;;  %v11838_v8 = vunpack.c.h.bf16 %v9287_v54  ;;  %5365 = vst.msk [vmem:[%s12314_s1 + $0x190] sm:$0xf] %vm5264_vm0, %v5236_v22  ;;  %v7911_v37 = vunpack.c.l.bf16 %v9096_v39  ;;  %v7656_v46 = vunpack.c.h.bf16 %v9032_v19  ;;  %v11862_v19 = vld [vmem:[%s12313_s0 + $0x6f0] sm:$0xff]  }
 0x166   :  { %v2548_v1 = vmax.f32 %v1907_v34, %v7655_v16  ;;  %v1267_v33 = vmax.f32 %v626_v36, %v11497_v59  ;;  %v5237_v38 = vpack.c.bf16 %v5109_v48, %v5109_v48  ;;  %v5110_v57 = vmax.f32 %v4469_v23, %v11812_v49 }
 0x167   :  { %v3829_v54 = vmax.f32 %v3188_v63, %v11804_v53  ;;  %v8423_v25 = vunpack.c.l.bf16 %v11830_v0  ;;  %v11854_v20 = vunpack.c.l.bf16 %v9288_v40  ;;  %v627_v16 = vmax.f32 %v11468_v3, %v8395_v27  ;;  %v11874_v3 = vld [vmem:[%s12313_s0 + $0x4a8] sm:$0xff]  }
 0x168   :  { %v3189_v51 = vmax.f32 %v2548_v1, %v7911_v37  ;;  %v1908_v24 = vmax.f32 %v1267_v33, %v7908_v4  ;;  %5366 = vst.msk [vmem:[%s12314_s1 + $0x194] sm:$0xf] %vm5264_vm0, %v5237_v38  ;;  %v5238_v31 = vpack.c.bf16 %v5110_v57, %v5110_v57  ;;  %v7912_v34 = vunpack.c.h.bf16 %v9096_v39  ;;  %v9289_v33 = vld [vmem:[%s12313_s0 + $0x228] sm:$0xff]  }
 0x169   :  { %v4470_v22 = vmax.f32 %v3829_v54, %v8420_v42  ;;  %v8424_v4 = vunpack.c.h.bf16 %v11830_v0  ;;  %v1268_v48 = vmax.f32 %v627_v16, %v11518_v6  ;;  %v7659_v23 = vunpack.c.l.bf16 %v9033_v30 }
 0x16a   :  { %v3830_v27 = vmax.f32 %v3189_v51, %v11812_v49  ;;  %v2549_v36 = vmax.f32 %v1908_v24, %v7656_v46  ;;  %5367 = vst.msk [vmem:[%s12314_s1 + $0x198] sm:$0xf] %vm5264_vm0, %v5238_v31  ;;  %v11883_v63 = vunpack.c.h.bf16 %v9288_v40  ;;  %v7915_v1 = vunpack.c.l.bf16 %v11862_v19  ;;  %v9034_v40 = vld [vmem:[%s12313_s0 + $0x978] sm:$0xff]  }
 0x16b   :  { %v5111_v39 = vmax.f32 %v4470_v22, %v11838_v8  ;;  %v628_v46 = vmax.f32 %v11497_v59, %v8396_v45  ;;  %v1909_v54 = vmax.f32 %v1268_v48, %v7911_v37  ;;  %v8427_v51 = vunpack.c.l.bf16 %v11874_v3 }
 0x16c   :  { %v4471_v38 = vmax.f32 %v3830_v27, %v8423_v25  ;;  %v3190_v57 = vmax.f32 %v2549_v36, %v7912_v34  ;;  %v7660_v31 = vunpack.c.h.bf16 %v9033_v30  ;;  %v629_v26 = vmax.f32 %v11518_v6, %v8399_v5  ;;  %v9098_v6 = vld [vmem:[%s12313_s0 + $0x6f8] sm:$0xff]   ;;  %v11918_v5 = vld [vmem:[%s12313_s0 + $0x4b0] sm:$0xff]  }
 0x16d   :  { %v5239_v24 = vpack.c.bf16 %v5111_v39, %v5111_v39  ;;  %v1269_v16 = vmax.f32 %v628_v46, %v11537_v18  ;;  %v2550_v22 = vmax.f32 %v1909_v54, %v7659_v23  ;;  %v11904_v37 = vunpack.c.l.bf16 %v9289_v33  ;;  %v9290_v54 = vld [vmem:[%s12313_s0 + $0x230] sm:$0xff]  }
 0x16e   :  { %v5112_v59 = vmax.f32 %v4471_v38, %v11854_v20  ;;  %v3831_v45 = vmax.f32 %v3190_v57, %v11838_v8  ;;  %v7916_v36 = vunpack.c.h.bf16 %v11862_v19  ;;  %v1270_v30 = vmax.f32 %v629_v26, %v11558_v7 }
 0x16f   :  { %5368 = vst.msk [vmem:[%s12314_s1 + $0x19c] sm:$0xf] %vm5264_vm0, %v5239_v24  ;;  %v1910_v27 = vmax.f32 %v1269_v16, %v7912_v34  ;;  %v7663_v48 = vunpack.c.l.bf16 %v9034_v40  ;;  %v3191_v46 = vmax.f32 %v2550_v22, %v7915_v1  ;;  %v8428_v34 = vunpack.c.h.bf16 %v11874_v3 }
 0x170   :  { %v5240_v23 = vpack.c.bf16 %v5112_v59, %v5112_v59  ;;  %v4472_v39 = vmax.f32 %v3831_v45, %v8424_v4  ;;  %v11923_v38 = vunpack.c.h.bf16 %v9289_v33  ;;  %v1911_v57 = vmax.f32 %v1270_v30, %v7915_v1 }
 0x171   :  { %v2551_v19 = vmax.f32 %v1910_v27, %v7660_v31  ;;  %v630_v24 = vmax.f32 %v11537_v18, %v8400_v21  ;;  %v3832_v31 = vmax.f32 %v3191_v46, %v11854_v20  ;;  %v7919_v33 = vunpack.c.l.bf16 %v9098_v6 }
 0x172   :  { %5369 = vst.msk [vmem:[%s12314_s1 + $0x1a0] sm:$0xf] %vm5264_vm0, %v5240_v23  ;;  %v5113_v16 = vmax.f32 %v4472_v39, %v11883_v63  ;;  %v8431_v1 = vunpack.c.l.bf16 %v11918_v5  ;;  %v2552_v59 = vmax.f32 %v1911_v57, %v7663_v48  ;;  %v7664_v22 = vunpack.c.h.bf16 %v9034_v40  ;;  %v9099_v40 = vld [vmem:[%s12313_s0 + $0x700] sm:$0xff]  }
 0x173   :  { %v3192_v26 = vmax.f32 %v2551_v19, %v7916_v36  ;;  %v1271_v45 = vmax.f32 %v630_v24, %v11596_v29  ;;  %v4473_v21 = vmax.f32 %v3832_v31, %v8427_v51  ;;  %v11944_v27 = vunpack.c.l.bf16 %v9290_v54 }
 0x174   :  { %v5241_v18 = vpack.c.bf16 %v5113_v16, %v5113_v16  ;;  %v631_v30 = vmax.f32 %v11558_v7, %v8403_v9  ;;  %v3193_v48 = vmax.f32 %v2552_v59, %v7919_v33  ;;  %v7920_v46 = vunpack.c.h.bf16 %v9098_v6 }
 0x175   :  { %v3833_v23 = vmax.f32 %v3192_v26, %v11883_v63  ;;  %v1912_v39 = vmax.f32 %v1271_v45, %v7916_v36  ;;  %v5114_v19 = vmax.f32 %v4473_v21, %v11904_v37  ;;  %v8432_v57 = vunpack.c.h.bf16 %v11918_v5  ;;  %v9043_v5 = vld [vmem:[%s12313_s0 + $0x9c8] sm:$0xff]  }
 0x176   :  { %5370 = vst.msk [vmem:[%s12314_s1 + $0x1a4] sm:$0xf] %vm5264_vm0, %v5241_v18  ;;  %v1272_v7 = vmax.f32 %v631_v30, %v8659_v62  ;;  %v7667_v9 = vunpack.c.l.bf16 %v9035_v50  ;;  %v3834_v6 = vmax.f32 %v3193_v48, %v11904_v37  ;;  %v632_v16 = vmax.f32 %v11596_v29, %v8404_v56  ;;  %v9036_v29 = vld [vmem:[%s12313_s0 + $0x990] sm:$0xff]  }
 0x177   :  { %v4474_v36 = vmax.f32 %v3833_v23, %v8428_v34  ;;  %v2553_v24 = vmax.f32 %v1912_v39, %v7664_v22  ;;  %v5242_v31 = vpack.c.bf16 %v5114_v19, %v5114_v19  ;;  %v7923_v59 = vunpack.c.l.bf16 %v9099_v40  ;;  %v8972_v22 = vld [vmem:[%s12313_s0 + $0x708] sm:$0xff]  }
 0x178   :  { %v1913_v26 = vmax.f32 %v1272_v7, %v7919_v33  ;;  %v7668_v45 = vunpack.c.h.bf16 %v9035_v50  ;;  %v4475_v62 = vmax.f32 %v3834_v6, %v8431_v1  ;;  %v1273_v30 = vmax.f32 %v632_v16, %v8660_v32 }
 0x179   :  { %v5115_v18 = vmax.f32 %v4474_v36, %v11923_v38  ;;  %v3194_v21 = vmax.f32 %v2553_v24, %v7920_v46  ;;  %5371 = vst.msk [vmem:[%s12314_s1 + $0x1a8] sm:$0xf] %vm5264_vm0, %v5242_v31  ;;  %v11982_v61 = vunpack.c.h.bf16 %v9290_v54  ;;  %v7924_v32 = vunpack.c.h.bf16 %v9099_v40  ;;  %v11998_v54 = vld [vmem:[%s12313_s0 + $0x238] sm:$0xff]   ;;  %v9164_v31 = vld [vmem:[%s12313_s0 + $0x240] sm:$0xff]  }
 0x17a   :  { %v2554_v56 = vmax.f32 %v1913_v26, %v7667_v9  ;;  %v12337_v33 = vunpack.c.l.bf16 %v11639_v17  ;;  %v5116_v48 = vmax.f32 %v4475_v62, %v11944_v27  ;;  %v1914_v19 = vmax.f32 %v1273_v30, %v7920_v46 }
 0x17b   :  { %v5243_v23 = vpack.c.bf16 %v5115_v18, %v5115_v18  ;;  %v3835_v39 = vmax.f32 %v3194_v21, %v11923_v38  ;;  %v7415_v40 = vunpack.c.l.bf16 %v8972_v22  ;;  %v7671_v36 = vunpack.c.l.bf16 %v9036_v29 }
 0x17c   :  { %v633_v50 = vmax.f32 %v12337_v33, %v8407_v28  ;;  %v3195_v7 = vmax.f32 %v2554_v56, %v7923_v59  ;;  %v12004_v28 = vld [vmem:[%s12313_s0 + $0x710] sm:$0xff]   ;;  %v5244_v6 = vpack.c.bf16 %v5116_v48, %v5116_v48  ;;  %v8435_v46 = vunpack.c.l.bf16 %v11987_v43  ;;  %v9228_v56 = vld [vmem:[%s12313_s0 + $0x4c8] sm:$0xff]  }
 0x17d   :  { %5372 = vst.msk [vmem:[%s12314_s1 + $0x1ac] sm:$0xf] %vm5264_vm0, %v5243_v23  ;;  %v4476_v24 = vmax.f32 %v3835_v39, %v8432_v57  ;;  %v2555_v16 = vmax.f32 %v1914_v19, %v7668_v45  ;;  %v8691_v59 = vunpack.c.l.bf16 %v11998_v54  ;;  %v8436_v18 = vunpack.c.h.bf16 %v11987_v43 }
 0x17e   :  { %v1274_v9 = vmax.f32 %v633_v50, %v11671_v2  ;;  %v3836_v26 = vmax.f32 %v3195_v7, %v11944_v27  ;;  %5373 = vst.msk [vmem:[%s12314_s1 + $0x1b0] sm:$0xf] %vm5264_vm0, %v5244_v6  ;;  %v7927_v45 = vunpack.c.l.bf16 %v12004_v28  ;;  %v12338_v33 = vunpack.c.h.bf16 %v11639_v17 }
 0x17f   :  { %v5117_v21 = vmax.f32 %v4476_v24, %v11982_v61  ;;  %v3196_v30 = vmax.f32 %v2555_v16, %v7924_v32  ;;  %v8183_v39 = vunpack.c.l.bf16 %v9164_v31  ;;  %v12037_v32 = vld [vmem:[%s12313_s0 + $0x248] sm:$0xff]   ;;  %v7416_v19 = vunpack.c.h.bf16 %v8972_v22  ;;  %v9037_v24 = vld [vmem:[%s12313_s0 + $0x998] sm:$0xff]  }
 0x180   :  { %v1915_v62 = vmax.f32 %v1274_v9, %v7415_v40  ;;  %v634_v50 = vmax.f32 %v12338_v33, %v8408_v44  ;;  %v4477_v23 = vmax.f32 %v3836_v26, %v8435_v46  ;;  %v7672_v58 = vunpack.c.h.bf16 %v9036_v29 }
 0x181   :  { %v5245_v7 = vpack.c.bf16 %v5117_v21, %v5117_v21  ;;  %v3837_v9 = vmax.f32 %v3196_v30, %v11982_v61  ;;  %v8692_v44 = vunpack.c.h.bf16 %v11998_v54  ;;  %v8695_v29 = vunpack.c.l.bf16 %v12037_v32 }
 0x182   :  { %v2556_v48 = vmax.f32 %v1915_v62, %v7671_v36  ;;  %v1275_v40 = vmax.f32 %v634_v50, %v11698_v47  ;;  %v5118_v17 = vmax.f32 %v4477_v23, %v8691_v59  ;;  %v8439_v36 = vunpack.c.l.bf16 %v9228_v56  ;;  %v9101_v50 = vld [vmem:[%s12313_s0 + $0x718] sm:$0xff]  }
 0x183   :  { %5374 = vst.msk [vmem:[%s12314_s1 + $0x1b4] sm:$0xf] %vm5264_vm0, %v5245_v7  ;;  %v4478_v22 = vmax.f32 %v3837_v9, %v8436_v18  ;;  %v635_v26 = vmax.f32 %v11671_v2, %v8411_v41  ;;  %v7928_v30 = vunpack.c.h.bf16 %v12004_v28  ;;  %v8184_v33 = vunpack.c.h.bf16 %v9164_v31  ;;  %v9229_v2 = vld [vmem:[%s12313_s0 + $0x4d0] sm:$0xff]  }
 0x184   :  { %v3197_v6 = vmax.f32 %v2556_v48, %v7927_v45  ;;  %v1916_v16 = vmax.f32 %v1275_v40, %v7416_v19  ;;  %v5246_v62 = vpack.c.bf16 %v5118_v17, %v5118_v17  ;;  %v7675_v19 = vunpack.c.l.bf16 %v9037_v24 }
 0x185   :  { %v5119_v23 = vmax.f32 %v4478_v22, %v8692_v44  ;;  %v1276_v7 = vmax.f32 %v635_v26, %v11718_v52  ;;  %v8440_v28 = vunpack.c.h.bf16 %v9228_v56  ;;  %v8696_v31 = vunpack.c.h.bf16 %v12037_v32  ;;  %v9038_v32 = vld [vmem:[%s12313_s0 + $0x9a0] sm:$0xff]  }
 0x186   :  { %v3838_v21 = vmax.f32 %v3197_v6, %v8183_v39  ;;  %v2557_v48 = vmax.f32 %v1916_v16, %v7672_v58  ;;  %5375 = vst.msk [vmem:[%s12314_s1 + $0x1b8] sm:$0xf] %vm5264_vm0, %v5246_v62  ;;  %v12075_v39 = vld [vmem:[%s12313_s0 + $0x250] sm:$0xff]   ;;  %v636_v9 = vmax.f32 %v11698_v47, %v8412_v10  ;;  %v7931_v6 = vunpack.c.l.bf16 %v9101_v50 }
 0x187   :  { %v5247_v40 = vpack.c.bf16 %v5119_v23, %v5119_v23  ;;  %v1917_v17 = vmax.f32 %v1276_v7, %v7927_v45  ;;  %v8443_v16 = vunpack.c.l.bf16 %v9229_v2  ;;  %v7676_v56 = vunpack.c.h.bf16 %v9037_v24  ;;  %v12095_v24 = vld [vmem:[%s12313_s0 + $0x720] sm:$0xff]  }
 0x188   :  { %v4479_v41 = vmax.f32 %v3838_v21, %v8439_v36  ;;  %v3198_v58 = vmax.f32 %v2557_v48, %v7928_v30  ;;  %v1277_v36 = vmax.f32 %v636_v9, %v11741_v13  ;;  %v8699_v10 = vunpack.c.l.bf16 %v12075_v39 }
 0x189   :  { %5376 = vst.msk [vmem:[%s12314_s1 + $0x1bc] sm:$0xf] %vm5264_vm0, %v5247_v40  ;;  %v2558_v47 = vmax.f32 %v1917_v17, %v7675_v19  ;;  %v637_v45 = vmax.f32 %v11718_v52, %v8415_v14  ;;  %v7932_v21 = vunpack.c.h.bf16 %v9101_v50  ;;  %v8444_v23 = vunpack.c.h.bf16 %v9229_v2  ;;  %v12112_v50 = vld [vmem:[%s12313_s0 + $0x258] sm:$0xff]  }
 0x18a   :  { %v5120_v22 = vmax.f32 %v4479_v41, %v8695_v29  ;;  %v3839_v11 = vmax.f32 %v3198_v58, %v8184_v33  ;;  %v1918_v62 = vmax.f32 %v1277_v36, %v7928_v30  ;;  %v12100_v33 = vld [vmem:[%s12313_s0 + $0x4d8] sm:$0xff]   ;;  %v7679_v41 = vunpack.c.l.bf16 %v9038_v32 }
 0x18b   :  { %v3199_v7 = vmax.f32 %v2558_v47, %v7931_v6  ;;  %v1278_v19 = vmax.f32 %v637_v45, %v11762_v12  ;;  %v8700_v14 = vunpack.c.h.bf16 %v12075_v39  ;;  %v7935_v30 = vunpack.c.l.bf16 %v12095_v24  ;;  %v9039_v39 = vld [vmem:[%s12313_s0 + $0x9a8] sm:$0xff]  }
 0x18c   :  { %v5248_v26 = vpack.c.bf16 %v5120_v22, %v5120_v22  ;;  %v4480_v48 = vmax.f32 %v3839_v11, %v8440_v28  ;;  %v2559_v52 = vmax.f32 %v1918_v62, %v7676_v56  ;;  %v638_v2 = vmax.f32 %v11741_v13, %v8416_v15 }
 0x18d   :  { %v3840_v9 = vmax.f32 %v3199_v7, %v8695_v29  ;;  %v1919_v40 = vmax.f32 %v1278_v19, %v7931_v6  ;;  %v8447_v58 = vunpack.c.l.bf16 %v12100_v33  ;;  %v7680_v36 = vunpack.c.h.bf16 %v9038_v32 }
 0x18e   :  { %5377 = vst.msk [vmem:[%s12314_s1 + $0x1c0] sm:$0xf] %vm5264_vm0, %v5248_v26  ;;  %v5121_v28 = vmax.f32 %v4480_v48, %v8696_v31  ;;  %v3200_v17 = vmax.f32 %v2559_v52, %v7932_v21  ;;  %v1279_v22 = vmax.f32 %v638_v2, %v11804_v53  ;;  %v639_v56 = vmax.f32 %v11762_v12, %v8419_v60  ;;  %v12130_v26 = vld [vmem:[%s12313_s0 + $0x728] sm:$0xff]   ;;  %v9231_v48 = vld [vmem:[%s12313_s0 + $0x4e0] sm:$0xff]  }
 0x18f   :  { %v4481_v11 = vmax.f32 %v3840_v9, %v8443_v16  ;;  %v2560_v13 = vmax.f32 %v1919_v40, %v7679_v41  ;;  %v8703_v15 = vunpack.c.l.bf16 %v12112_v50  ;;  %v7683_v45 = vunpack.c.l.bf16 %v9039_v39 }
 0x190   :  { %v5249_v35 = vpack.c.bf16 %v5121_v28, %v5121_v28  ;;  %v3841_v29 = vmax.f32 %v3200_v17, %v8696_v31  ;;  %v1920_v6 = vmax.f32 %v1279_v22, %v7932_v21  ;;  %v1280_v47 = vmax.f32 %v639_v56, %v11812_v49 }
 0x191   :  { %v5122_v12 = vmax.f32 %v4481_v11, %v8699_v10  ;;  %v3201_v60 = vmax.f32 %v2560_v13, %v7935_v30  ;;  %v7936_v16 = vunpack.c.h.bf16 %v12095_v24  ;;  %v8448_v31 = vunpack.c.h.bf16 %v12100_v33 }
 0x192   :  { %5378 = vst.msk [vmem:[%s12314_s1 + $0x1c4] sm:$0xf] %vm5264_vm0, %v5249_v35  ;;  %v4482_v32 = vmax.f32 %v3841_v29, %v8444_v23  ;;  %v2561_v62 = vmax.f32 %v1920_v6, %v7680_v36  ;;  %v1921_v21 = vmax.f32 %v1280_v47, %v7935_v30  ;;  %v640_v7 = vmax.f32 %v11804_v53, %v8420_v42  ;;  %v12148_v23 = vld [vmem:[%s12313_s0 + $0x260] sm:$0xff]   ;;  %v9232_v47 = vld [vmem:[%s12313_s0 + $0x4e8] sm:$0xff]  }
 0x193   :  { %v5250_v19 = vpack.c.bf16 %v5122_v12, %v5122_v12  ;;  %v3842_v41 = vmax.f32 %v3201_v60, %v8699_v10  ;;  %v7939_v52 = vunpack.c.l.bf16 %v12130_v26  ;;  %v7684_v2 = vunpack.c.h.bf16 %v9039_v39 }
 0x194   :  { %v5123_v28 = vmax.f32 %v4482_v32, %v8700_v14  ;;  %v3202_v24 = vmax.f32 %v2561_v62, %v7936_v16  ;;  %v2562_v9 = vmax.f32 %v1921_v21, %v7683_v45  ;;  %v1281_v33 = vmax.f32 %v640_v7, %v11838_v8  ;;  %v9041_v7 = vld [vmem:[%s12313_s0 + $0x9b8] sm:$0xff]  }
 0x195   :  { %5379 = vst.msk [vmem:[%s12314_s1 + $0x1c8] sm:$0xf] %vm5264_vm0, %v5250_v19  ;;  %v4483_v53 = vmax.f32 %v3842_v41, %v8447_v58  ;;  %v8704_v42 = vunpack.c.h.bf16 %v12112_v50  ;;  %v8451_v10 = vunpack.c.l.bf16 %v9231_v48  ;;  %v641_v30 = vmax.f32 %v11812_v49, %v8423_v25  ;;  %v9104_v25 = vld [vmem:[%s12313_s0 + $0x730] sm:$0xff]  }
 0x196   :  { %v5251_v40 = vpack.c.bf16 %v5123_v28, %v5123_v28  ;;  %v3843_v39 = vmax.f32 %v3202_v24, %v8700_v14  ;;  %v3203_v17 = vmax.f32 %v2562_v9, %v7939_v52  ;;  %v1922_v22 = vmax.f32 %v1281_v33, %v7936_v16  ;;  %v12182_v16 = vld [vmem:[%s12313_s0 + $0x268] sm:$0xff]   ;;  %v12199_v28 = vld [vmem:[%s12313_s0 + $0x738] sm:$0xff]  }
 0x197   :  { %v5124_v36 = vmax.f32 %v4483_v53, %v8703_v15  ;;  %v8707_v56 = vunpack.c.l.bf16 %v12148_v23  ;;  %v1282_v35 = vmax.f32 %v641_v30, %v11854_v20  ;;  %v7687_v11 = vunpack.c.l.bf16 %v9040_v55 }
 0x198   :  { %5380 = vst.msk [vmem:[%s12314_s1 + $0x1cc] sm:$0xf] %vm5264_vm0, %v5251_v40  ;;  %v4484_v50 = vmax.f32 %v3843_v39, %v8448_v31  ;;  %v3844_v58 = vmax.f32 %v3203_v17, %v8703_v15  ;;  %v2563_v13 = vmax.f32 %v1922_v22, %v7684_v2  ;;  %v7940_v49 = vunpack.c.h.bf16 %v12130_v26  ;;  %v12220_v39 = vld [vmem:[%s12313_s0 + $0x270] sm:$0xff]  }
 0x199   :  { %v5252_v14 = vpack.c.bf16 %v5124_v36, %v5124_v36  ;;  %v8452_v29 = vunpack.c.h.bf16 %v9231_v48  ;;  %v1923_v6 = vmax.f32 %v1282_v35, %v7939_v52  ;;  %v642_v45 = vmax.f32 %v11838_v8, %v8424_v4 }
 0x19a   :  { %v5125_v12 = vmax.f32 %v4484_v50, %v8704_v42  ;;  %v4485_v15 = vmax.f32 %v3844_v58, %v8451_v10  ;;  %v3204_v60 = vmax.f32 %v2563_v13, %v7940_v49  ;;  %v8708_v26 = vunpack.c.h.bf16 %v12148_v23 }
 0x19b   :  { %5381 = vst.msk [vmem:[%s12314_s1 + $0x1d0] sm:$0xf] %vm5264_vm0, %v5252_v14  ;;  %v2564_v31 = vmax.f32 %v1923_v6, %v7687_v11  ;;  %v7943_v32 = vunpack.c.l.bf16 %v9104_v25  ;;  %v1283_v0 = vmax.f32 %v642_v45, %v11883_v63  ;;  %v7688_v8 = vunpack.c.h.bf16 %v9040_v55  ;;  %v12208_v55 = vld [vmem:[%s12313_s0 + $0x4f0] sm:$0xff]   ;;  %v9042_v11 = vld [vmem:[%s12313_s0 + $0x9c0] sm:$0xff]  }
 0x19c   :  { %v5253_v4 = vpack.c.bf16 %v5125_v12, %v5125_v12  ;;  %v5126_v62 = vmax.f32 %v4485_v15, %v8707_v56  ;;  %v3845_v21 = vmax.f32 %v3204_v60, %v8704_v42  ;;  %v8455_v48 = vunpack.c.l.bf16 %v9232_v47 }
 0x19d   :  { %v3205_v19 = vmax.f32 %v2564_v31, %v7943_v32  ;;  %v8711_v41 = vunpack.c.l.bf16 %v12182_v16  ;;  %v1924_v52 = vmax.f32 %v1283_v0, %v7940_v49  ;;  %v643_v2 = vmax.f32 %v11854_v20, %v8427_v51 }
 0x19e   :  { %5382 = vst.msk [vmem:[%s12314_s1 + $0x1d4] sm:$0xf] %vm5264_vm0, %v5253_v4  ;;  %v5254_v24 = vpack.c.bf16 %v5126_v62, %v5126_v62  ;;  %v4486_v9 = vmax.f32 %v3845_v21, %v8452_v29  ;;  %v7944_v23 = vunpack.c.h.bf16 %v9104_v25  ;;  %v8456_v33 = vunpack.c.h.bf16 %v9232_v47 }
 0x19f   :  { %v3846_v20 = vmax.f32 %v3205_v19, %v8707_v56  ;;  %v2565_v51 = vmax.f32 %v1924_v52, %v7688_v8  ;;  %v1284_v53 = vmax.f32 %v643_v2, %v11904_v37  ;;  %v7691_v42 = vunpack.c.l.bf16 %v9041_v7 }
 0x1a0   :  { %5383 = vst.msk [vmem:[%s12314_s1 + $0x1d8] sm:$0xf] %vm5264_vm0, %v5254_v24  ;;  %v5127_v10 = vmax.f32 %v4486_v9, %v8708_v26  ;;  %v8712_v30 = vunpack.c.h.bf16 %v12182_v16  ;;  %v7947_v40 = vunpack.c.l.bf16 %v12199_v28  ;;  %v644_v17 = vmax.f32 %v11883_v63, %v8428_v34 }
 0x1a1   :  { %v4487_v22 = vmax.f32 %v3846_v20, %v8455_v48  ;;  %v3206_v36 = vmax.f32 %v2565_v51, %v7944_v23  ;;  %v1925_v56 = vmax.f32 %v1284_v53, %v7943_v32  ;;  %v8459_v35 = vunpack.c.l.bf16 %v12208_v55  ;;  %v12251_v32 = vld [vmem:[%s12313_s0 + $0x278] sm:$0xff]  }
 0x1a2   :  { %v5255_v50 = vpack.c.bf16 %v5127_v10, %v5127_v10  ;;  %v1285_v58 = vmax.f32 %v644_v17, %v11923_v38  ;;  %v7692_v13 = vunpack.c.h.bf16 %v9041_v7  ;;  %v645_v49 = vmax.f32 %v11904_v37, %v8431_v1  ;;  %v9106_v37 = vld [vmem:[%s12313_s0 + $0x740] sm:$0xff]   ;;  %v9234_v1 = vld [vmem:[%s12313_s0 + $0x4f8] sm:$0xff]  }
 0x1a3   :  { %v5128_v3 = vmax.f32 %v4487_v22, %v8711_v41  ;;  %v3847_v25 = vmax.f32 %v3206_v36, %v8708_v26  ;;  %v2566_v63 = vmax.f32 %v1925_v56, %v7691_v42  ;;  %v8715_v34 = vunpack.c.l.bf16 %v12220_v39 }
 0x1a4   :  { %5384 = vst.msk [vmem:[%s12314_s1 + $0x1dc] sm:$0xf] %vm5264_vm0, %v5255_v50  ;;  %v1926_v14 = vmax.f32 %v1285_v58, %v7944_v23  ;;  %v7948_v29 = vunpack.c.h.bf16 %v12199_v28  ;;  %v1286_v6 = vmax.f32 %v645_v49, %v11944_v27  ;;  %v7695_v47 = vunpack.c.l.bf16 %v9042_v11  ;;  %v9299_v58 = vld [vmem:[%s12313_s0 + $0x280] sm:$0xff]  }
 0x1a5   :  { %v5256_v45 = vpack.c.bf16 %v5128_v3, %v5128_v3  ;;  %v4488_v12 = vmax.f32 %v3847_v25, %v8456_v33  ;;  %v3207_v15 = vmax.f32 %v2566_v63, %v7947_v40  ;;  %v8460_v60 = vunpack.c.h.bf16 %v12208_v55  ;;  %v9107_v33 = vld [vmem:[%s12313_s0 + $0x748] sm:$0xff]  }
 0x1a6   :  { %v2567_v26 = vmax.f32 %v1926_v14, %v7692_v13  ;;  %v8716_v16 = vunpack.c.h.bf16 %v12220_v39  ;;  %v1927_v31 = vmax.f32 %v1286_v6, %v7947_v40  ;;  %v646_v0 = vmax.f32 %v11923_v38, %v8432_v57 }
 0x1a7   :  { %5385 = vst.msk [vmem:[%s12314_s1 + $0x1e0] sm:$0xf] %vm5264_vm0, %v5256_v45  ;;  %v5129_v8 = vmax.f32 %v4488_v12, %v8712_v30  ;;  %v3848_v4 = vmax.f32 %v3207_v15, %v8711_v41  ;;  %v7951_v62 = vunpack.c.l.bf16 %v9106_v37  ;;  %v8463_v21 = vunpack.c.l.bf16 %v9234_v1 }
 0x1a8   :  { %v3208_v48 = vmax.f32 %v2567_v26, %v7948_v29  ;;  %v2568_v7 = vmax.f32 %v1927_v31, %v7695_v47  ;;  %v1287_v19 = vmax.f32 %v646_v0, %v11982_v61  ;;  %v7696_v52 = vunpack.c.h.bf16 %v9042_v11 }
 0x1a9   :  { %v5257_v2 = vpack.c.bf16 %v5129_v8, %v5129_v8  ;;  %v4489_v38 = vmax.f32 %v3848_v4, %v8459_v35  ;;  %v8719_v57 = vunpack.c.l.bf16 %v12251_v32  ;;  %v647_v28 = vmax.f32 %v11944_v27, %v8435_v46  ;;  %v9235_v35 = vld [vmem:[%s12313_s0 + $0x500] sm:$0xff]  }
 0x1aa   :  { %v3849_v41 = vmax.f32 %v3208_v48, %v8712_v30  ;;  %v3209_v24 = vmax.f32 %v2568_v7, %v7951_v62  ;;  %v1928_v9 = vmax.f32 %v1287_v19, %v7948_v29  ;;  %v7952_v23 = vunpack.c.h.bf16 %v9106_v37 }
 0x1ab   :  { %5386 = vst.msk [vmem:[%s12314_s1 + $0x1e4] sm:$0xf] %vm5264_vm0, %v5257_v2  ;;  %v5130_v55 = vmax.f32 %v4489_v38, %v8715_v34  ;;  %v8464_v20 = vunpack.c.h.bf16 %v9234_v1  ;;  %v1288_v51 = vmax.f32 %v647_v28, %v8691_v59  ;;  %v7699_v53 = vunpack.c.l.bf16 %v9043_v5 }
 0x1ac   :  { %v4490_v27 = vmax.f32 %v3849_v41, %v8460_v60  ;;  %v3850_v46 = vmax.f32 %v3209_v24, %v8715_v34  ;;  %v2569_v42 = vmax.f32 %v1928_v9, %v7696_v52  ;;  %v648_v10 = vmax.f32 %v11982_v61, %v8436_v18 }
 0x1ad   :  { %v5258_v30 = vpack.c.bf16 %v5130_v55, %v5130_v55  ;;  %v1929_v40 = vmax.f32 %v1288_v51, %v7951_v62  ;;  %v7955_v39 = vunpack.c.l.bf16 %v9107_v33  ;;  %v7700_v17 = vunpack.c.h.bf16 %v9043_v5 }
 0x1ae   :  { %v5131_v22 = vmax.f32 %v4490_v27, %v8716_v16  ;;  %v4491_v36 = vmax.f32 %v3850_v46, %v8463_v21  ;;  %v3210_v56 = vmax.f32 %v2569_v42, %v7952_v23  ;;  %v1289_v59 = vmax.f32 %v648_v10, %v8692_v44 }
 0x1af   :  { %5387 = vst.msk [vmem:[%s12314_s1 + $0x1e8] sm:$0xf] %vm5264_vm0, %v5258_v30  ;;  %v2570_v61 = vmax.f32 %v1929_v40, %v7699_v53  ;;  %v7956_v43 = vunpack.c.h.bf16 %v9107_v33  ;;  %v8467_v3 = vunpack.c.l.bf16 %v9235_v35  ;;  %v8720_v25 = vunpack.c.h.bf16 %v12251_v32 }
 0x1b0   :  { %v5259_v18 = vpack.c.bf16 %v5131_v22, %v5131_v22  ;;  %v5132_v11 = vmax.f32 %v4491_v36, %v8719_v57  ;;  %v3851_v50 = vmax.f32 %v3210_v56, %v8716_v16  ;;  %v1930_v13 = vmax.f32 %v1289_v59, %v7952_v23 }
 0x1b1   :  { %v3211_v49 = vmax.f32 %v2570_v61, %v7955_v39  ;;  %v8723_v14 = vunpack.c.l.bf16 %v9299_v58  ;;  %v8468_v47 = vunpack.c.h.bf16 %v9235_v35  ;;  %v8724_v12 = vunpack.c.h.bf16 %v9299_v58 }
 0x1b2   :  { %5388 = vst.msk [vmem:[%s12314_s1 + $0x1ec] sm:$0xf] %vm5264_vm0, %v5259_v18  ;;  %v5260_v54 = vpack.c.bf16 %v5132_v11, %v5132_v11  ;;  %v4492_v44 = vmax.f32 %v3851_v50, %v8464_v20  ;;  %v2571_v63 = vmax.f32 %v1930_v13, %v7700_v17 }
 0x1b3   :  { %v3852_v34 = vmax.f32 %v3211_v49, %v8719_v57 }
 0x1b4   :  { %5389 = vst.msk [vmem:[%s12314_s1 + $0x1f0] sm:$0xf] %vm5264_vm0, %v5260_v54  ;;  %v5133_v29 = vmax.f32 %v4492_v44, %v8720_v25  ;;  %v3212_v6 = vmax.f32 %v2571_v63, %v7956_v43 }
 0x1b5   :  { %v4493_v37 = vmax.f32 %v3852_v34, %v8467_v3 }
 0x1b6   :  { %v5261_v1 = vpack.c.bf16 %v5133_v29, %v5133_v29  ;;  %v3853_v45 = vmax.f32 %v3212_v6, %v8720_v25 }
 0x1b7   :  { %v5134_v15 = vmax.f32 %v4493_v37, %v8723_v14 }
 0x1b8   :  { %5390 = vst.msk [vmem:[%s12314_s1 + $0x1f4] sm:$0xf] %vm5264_vm0, %v5261_v1  ;;  %v4494_v60 = vmax.f32 %v3853_v45, %v8468_v47 }
 0x1b9   :  { %v5262_v26 = vpack.c.bf16 %v5134_v15, %v5134_v15 }
 0x1ba   :  { %v5135_v16 = vmax.f32 %v4494_v60, %v8724_v12 }
 0x1bb   :  { %5391 = vst.msk [vmem:[%s12314_s1 + $0x1f8] sm:$0xf] %vm5264_vm0, %v5262_v26 }
 0x1bc   :  { %v5263_v31 = vpack.c.bf16 %v5135_v16, %v5135_v16 }
 0x1be   :  { %5392 = vst.msk [vmem:[%s12314_s1 + $0x1fc] sm:$0xf] %vm5264_vm0, %v5263_v31 }

// kernel: _lambda_.14
= control target key start
LH: loop header
LB: loop body
LE: loop exit
PB: predicated region body
PF: predicated region fallthrough
CT: control target
= control target key end

     0   :  { %v228_v4 = vmov 0   ;;  %vm113_vm0 = vcmask 130048   ;;  %s305_s1 = inlined_call_operand.vmem [shape: bf16[144,128], index: 1, kind: input, shape index: {}]   ;;  %s306_s0 = inlined_call_operand.vmem [shape: bf16[16,144], index: 0, kind: input, shape index: {}]   ;;  %s307_s2 = inlined_call_operand.vmem [shape: f32[16,1], index: 2, kind: input, shape index: {}]   ;;  %s308_s3 = inlined_call_operand.vmem [shape: bf16[16,128], index: 3, kind: input, shape index: {}]   ;;  %s309_s4 = inlined_call_operand.vmem [shape: bf16[16,128], index: 4, kind: output, shape index: {}]  }
   0x1   :  { %v215_v0 = vld [vmem:[%s305_s1 + $0x38] sm:$0xff]  ;;  %v214_v1 = vld [vmem:[%s305_s1 + $0x30] sm:$0xff]  ;;  %v216_v2 = vld [vmem:[%s305_s1 + $0x40] sm:$0xff]  ;;  %227 = vset.pattern.permute.xlu0 %v228_v4 }
   0x2   :  { %117 = vmatpush.bf16.msra.mxu0 %v215_v0  ;;  %v206_v3 = vld [vmem:[%s306_s0 + $0x4] sm:$0xf]  ;;  %v165_v5 = vld [vmem:[%s306_s0 + $0x8] sm:$0xf0]  ;;  %138 = vmatpush.bf16.msra.mxu1 %v216_v2  ;;  %v211_v11 = vld [vmem:[%s305_s1 + $0x18] sm:$0xff] }
   0x3   :  { %v168_v6 = vor.u32 %v206_v3, %v165_v5  ;;  %v38_v7 = vld [vmem:[%s307_s2] sm:$0xff]  ;;  %v213_v8 = vld [vmem:[%s305_s1 + $0x28] sm:$0xff]  ;;  %v210_v12 = vld [vmem:[%s305_s1 + $0x10] sm:$0xff] }
   0x4   :  { %42 = vperm.xlu0 %227, %v38_v7   ;;  %v212_v9 = vld [vmem:[%s305_s1 + $0x20] sm:$0xff]  ;;  %v39_v10 = vld [vmem:[%s307_s2 + $0x8] sm:$0xff] }
   0x5   :  { %205 = vmatmul.msk.bf16.vlgmr.msra.gmra.mxu1 %vm113_vm0, %v168_v6  ;;  %v209_v13 = vld [vmem:[%s305_s1 + $0x8] sm:$0xff]  ;;  %v208_v14 = vld [vmem:[%s305_s1] sm:$0xff] }
   0x6   :  { %118 = vmatpush.bf16.msra.mxu0 %v214_v1  ;;  %v163_v15 = vld [vmem:[%s306_s0] sm:$0xf]  ;;  %v207_v16 = vld [vmem:[%s306_s0 + $0x4] sm:$0xf0] }
   0x7   :  { %v164_v17 = vor.u32 %v207_v16, %v163_v15  ;;  %v218_v22 = vld [vmem:[%s308_s3] sm:$0xff]  }
   0x8   :  { %v219_v24 = vunpack.c.l.bf16 %v218_v22  ;;  %v220_v28 = vunpack.c.h.bf16 %v218_v22 }
   0xa   :  { %119 = vmatpush.bf16.msra.mxu0 %v213_v8 }
   0xc   :  { %47 = vperm.xlu0 %227, %v39_v10  }
   0xe   :  { %120 = vmatpush.bf16.msra.mxu0 %v212_v9 }
  0x12   :  { %121 = vmatpush.bf16.msra.mxu0 %v211_v11 }
  0x16   :  { %122 = vmatpush.bf16.msra.mxu0 %v210_v12 }
  0x1a   :  { %123 = vmatpush.bf16.msra.mxu0 %v209_v13 }
  0x1e   :  { %124 = vmatpush.bf16.msra.mxu0 %v208_v14 }
  0x21   :  { %125 = vmatmul.bf16.vlgmr.msra.gmra.mxu0 %v164_v17 }
  0x76   :  { %v43_v18 = vpop.permute.xlu0 %42 }
  0x7e   :  { %v48_v25 = vpop.permute.xlu0 %47 }
  0x82   :  { %v140_v19 = vpop.f32.mrf.mxu1 }
  0x8a   :  { %v142_v29 = vpop.f32.mrf.mxu1 }
  0x9e   :  { %v126_v20 = vpop.f32.mrf.mxu0 }
  0x9f   :  { %v127_v21 = vadd.f32 %v126_v20, %v43_v18 }
  0xa1   :  { %v141_v23 = vadd.f32 %v140_v19, %v127_v21 }
  0xa3   :  { %v149_v30 = vadd.f32 %v219_v24, %v141_v23 }
  0xa5   :  { %v151_v33 = vmax.f32 %v149_v30, 0.0 }
  0xa6   :  { %v128_v26 = vpop.f32.mrf.mxu0 }
  0xa7   :  { %v129_v27 = vadd.f32 %v128_v26, %v48_v25 }
  0xa9   :  { %v143_v31 = vadd.f32 %v142_v29, %v129_v27 }
  0xab   :  { %v150_v32 = vadd.f32 %v220_v28, %v143_v31 }
  0xad   :  { %v152_v34 = vmax.f32 %v150_v32, 0.0 }
  0xaf   :  { %v224_v35 = vpack.c.bf16 %v152_v34, %v151_v33 }
  0xb1   :  { %225 = vst [vmem:[%s309_s4] sm:$0xff] %v224_v35  }

// kernel: _lambda_.15
= control target key start
LH: loop header
LB: loop body
LE: loop exit
PB: predicated region body
PF: predicated region fallthrough
CT: control target
= control target key end

     0   :  { %v273_v6 = vmov 0   ;;  %vm133_vm0 = vcmask 130048   ;;  %vm186_vm1 = vcmask 257024   ;;  %s375_s1 = inlined_call_operand.vmem [shape: bf16[144,32], index: 1, kind: input, shape index: {}]   ;;  %s376_s0 = inlined_call_operand.vmem [shape: bf16[32,144], index: 0, kind: input, shape index: {}]   ;;  %s377_s2 = inlined_call_operand.vmem [shape: f32[32,1], index: 2, kind: input, shape index: {}]   ;;  %s378_s3 = inlined_call_operand.vmem [shape: bf16[32,32], index: 3, kind: output, shape index: {}]  }
   0x1   :  { %v260_v0 = vld [vmem:[%s375_s1 + $0x38] sm:$0xff]  ;;  %v261_v1 = vld [vmem:[%s375_s1 + $0x40] sm:$0xff]  ;;  %v259_v3 = vld [vmem:[%s375_s1 + $0x30] sm:$0xff]  ;;  %272 = vset.pattern.permute.xlu1 %v273_v6  ;;  %271 = vset.pattern.permute.xlu0 %v273_v6 }
   0x2   :  { %v249_v2 = vld [vmem:[%s376_s0 + $0x4] sm:$0xf]  ;;  %140 = vmatpush.bf16.msra.mxu0 %v260_v0  ;;  %262 = vmatpush.bf16.msra.mxu2 %v260_v0  ;;  %v199_v4 = vld [vmem:[%s376_s0 + $0x8] sm:$0xf0]  ;;  %v39_v7 = vld [vmem:[%s377_s2 + $0x10] sm:$0xff] }
   0x3   :  { %166 = vmatpush.bf16.msra.mxu1 %v261_v1  ;;  %v202_v5 = vor.u32 %v249_v2, %v199_v4  ;;  %v258_v8 = vld [vmem:[%s375_s1 + $0x28] sm:$0xff]  ;;  %v37_v9 = vld [vmem:[%s377_s2] sm:$0xff]  ;;  %53 = vperm.xlu1 %272, %v39_v7   ;;  %v40_v11 = vld [vmem:[%s377_s2 + $0x18] sm:$0xff] }
   0x4   :  { %43 = vperm.xlu0 %271, %v37_v9   ;;  %v257_v10 = vld [vmem:[%s375_s1 + $0x20] sm:$0xff]  ;;  %v38_v12 = vld [vmem:[%s377_s2 + $0x8] sm:$0xff]  ;;  %v256_v13 = vld [vmem:[%s375_s1 + $0x18] sm:$0xff] }
   0x5   :  { %v251_v14 = vld [vmem:[%s376_s0 + $0x14] sm:$0xf]  ;;  %v207_v15 = vld [vmem:[%s376_s0 + $0x18] sm:$0xf0]  ;;  %v254_v18 = vld [vmem:[%s375_s1 + $0x8] sm:$0xff] }
   0x6   :  { %141 = vmatpush.bf16.msra.mxu0 %v259_v3  ;;  %263 = vmatpush.bf16.msra.mxu2 %v259_v3  ;;  %v255_v16 = vld [vmem:[%s375_s1 + $0x10] sm:$0xff]  ;;  %v210_v17 = vor.u32 %v251_v14, %v207_v15  ;;  %v253_v19 = vld [vmem:[%s375_s1] sm:$0xff]  ;;  %v250_v21 = vld [vmem:[%s376_s0 + $0x4] sm:$0xf0] }
   0x7   :  { %247 = vmatmul.msk.bf16.vlgmr.msra.gmra.mxu1 %vm133_vm0, %v202_v5  ;;  %v197_v20 = vld [vmem:[%s376_s0] sm:$0xf]  ;;  %v205_v22 = vld [vmem:[%s376_s0 + $0x10] sm:$0xf]  ;;  %v252_v23 = vld [vmem:[%s376_s0 + $0x14] sm:$0xf0] }
   0x8   :  { %v198_v24 = vor.u32 %v250_v21, %v197_v20  ;;  %v206_v25 = vor.u32 %v252_v23, %v205_v22 }
   0xa   :  { %142 = vmatpush.bf16.msra.mxu0 %v258_v8  ;;  %264 = vmatpush.bf16.msra.mxu2 %v258_v8 }
   0xb   :  { %58 = vperm.xlu1 %272, %v40_v11  }
   0xc   :  { %48 = vperm.xlu0 %271, %v38_v12  }
   0xe   :  { %143 = vmatpush.bf16.msra.mxu0 %v257_v10  ;;  %265 = vmatpush.bf16.msra.mxu2 %v257_v10 }
  0x12   :  { %144 = vmatpush.bf16.msra.mxu0 %v256_v13  ;;  %266 = vmatpush.bf16.msra.mxu2 %v256_v13 }
  0x16   :  { %145 = vmatpush.bf16.msra.mxu0 %v255_v16  ;;  %267 = vmatpush.bf16.msra.mxu2 %v255_v16 }
  0x17   :  { %248 = vmatmul.msk.bf16.gmra.mxu1 %vm133_vm0, %v210_v17 }
  0x1a   :  { %146 = vmatpush.bf16.msra.mxu0 %v254_v18  ;;  %268 = vmatpush.bf16.msra.mxu2 %v254_v18 }
  0x1e   :  { %147 = vmatpush.bf16.msra.mxu0 %v253_v19  ;;  %269 = vmatpush.bf16.msra.mxu2 %v253_v19 }
  0x21   :  { %148 = vmatmul.bf16.vlgmr.msra.gmra.mxu0 %v198_v24  ;;  %153 = vmatmul.bf16.vlgmr.msra.gmra.mxu2 %v206_v25 }
  0x75   :  { %v54_v32 = vpop.permute.xlu1 %53 }
  0x76   :  { %v44_v28 = vpop.permute.xlu0 %43 }
  0x7d   :  { %v59_v46 = vpop.permute.xlu1 %58 }
  0x7e   :  { %v49_v38 = vpop.permute.xlu0 %48 }
  0x84   :  { %v168_v26 = vpop.f32.mrf.mxu1 }
  0x8c   :  { %v170_v27 = vpop.f32.mrf.mxu1 }
  0x94   :  { %v173_v34 = vpop.f32.mrf.mxu1 }
  0x9c   :  { %v175_v50 = vpop.f32.mrf.mxu1 }
  0x9e   :  { %v149_v29 = vpop.f32.mrf.mxu0 }
  0x9f   :  { %v150_v30 = vadd.f32 %v149_v29, %v44_v28 }
  0xa1   :  { %v169_v31 = vadd.f32 %v168_v26, %v150_v30 }
  0xa3   :  { %v178_v33 = vmax.f32 %v169_v31, 0.0 }
  0xa4   :  { %v154_v35 = vpop.f32.mrf.mxu2 }
  0xa5   :  { %v182_v36 = vpack.c.bf16 %v178_v33, %v178_v33  ;;  %v155_v37 = vadd.f32 %v154_v35, %v54_v32 }
  0xa6   :  { %v151_v39 = vpop.f32.mrf.mxu0 }
  0xa7   :  { %187 = vst.msk [vmem:[%s378_s3] sm:$0xf] %vm186_vm1, %v182_v36  ;;  %v174_v40 = vadd.f32 %v173_v34, %v155_v37  ;;  %v152_v41 = vadd.f32 %v151_v39, %v49_v38 }
  0xa9   :  { %v180_v42 = vmax.f32 %v174_v40, 0.0  ;;  %v171_v43 = vadd.f32 %v170_v27, %v152_v41 }
  0xab   :  { %v184_v44 = vpack.c.bf16 %v180_v42, %v180_v42  ;;  %v179_v45 = vmax.f32 %v171_v43, 0.0 }
  0xac   :  { %v156_v47 = vpop.f32.mrf.mxu2 }
  0xad   :  { %189 = vst.msk [vmem:[%s378_s3 + $0x8] sm:$0xf] %vm186_vm1, %v184_v44  ;;  %v183_v48 = vpack.c.bf16 %v179_v45, %v179_v45  ;;  %v157_v49 = vadd.f32 %v156_v47, %v59_v46 }
  0xaf   :  { %188 = vst.msk [vmem:[%s378_s3 + $0x4] sm:$0xf] %vm186_vm1, %v183_v48  ;;  %v176_v51 = vadd.f32 %v175_v50, %v157_v49 }
  0xb1   :  { %v181_v52 = vmax.f32 %v176_v51, 0.0 }
  0xb3   :  { %v185_v53 = vpack.c.bf16 %v181_v52, %v181_v52 }
  0xb5   :  { %190 = vst.msk [vmem:[%s378_s3 + $0xc] sm:$0xf] %vm186_vm1, %v185_v53 }

// kernel: _lambda_.16
= control target key start
LH: loop header
LB: loop body
LE: loop exit
PB: predicated region body
PF: predicated region fallthrough
CT: control target
= control target key end

     0   :  { %vm87_vm0 = vcmask 130048   ;;  %vm251_vm1 = vcmask 261120   ;;  %v510_v22 = vmov 0   ;;  %vm351_vm2 = vcmask 257024   ;;  %s672_s4 = inlined_call_operand.vmem [shape: bf16[16,32], index: 4, kind: input, shape index: {}]   ;;  %s673_s1 = inlined_call_operand.vmem [shape: bf16[288,32], index: 1, kind: input, shape index: {}]   ;;  %s674_s3 = inlined_call_operand.vmem [shape: bf16[32,16], index: 3, kind: input, shape index: {}]   ;;  %s675_s0 = inlined_call_operand.vmem [shape: bf16[32,288], index: 0, kind: input, shape index: {}]   ;;  %s676_s2 = inlined_call_operand.vmem [shape: f32[32,1], index: 2, kind: input, shape index: {}]   ;;  %s677_s5 = inlined_call_operand.vmem [shape: bf16[32,32], index: 5, kind: output, shape index: {}]  }
   0x1   :  { %v498_v0 = vld [vmem:[%s672_s4] sm:$0xff]  ;;  %v485_v1 = vld [vmem:[%s673_s1 + $0x38] sm:$0xff]  ;;  %v484_v4 = vld [vmem:[%s673_s1 + $0x30] sm:$0xff]  ;;  %508 = vset.pattern.permute.xlu0 %v510_v22  ;;  %509 = vset.pattern.permute.xlu1 %v510_v22 }
   0x2   :  { %v493_v2 = vld [vmem:[%s673_s1 + $0x78] sm:$0xff]  ;;  %v496_v3 = vld [vmem:[%s674_s3] sm:$0xff]  ;;  %101 = vmatpush.bf16.msra.mxu0 %v498_v0  ;;  %499 = vmatpush.bf16.msra.mxu1 %v485_v1  ;;  %v492_v5 = vld [vmem:[%s673_s1 + $0x70] sm:$0xff] }
   0x3   :  { %277 = vmatpush.bf16.msra.mxu2 %v493_v2  ;;  %v495_v6 = vld [vmem:[%s673_s1 + $0x88] sm:$0xff]  ;;  %v494_v8 = vld [vmem:[%s673_s1 + $0x80] sm:$0xff]  ;;  %v474_v10 = vld [vmem:[%s675_s0 + $0x10] sm:$0xf0] }
   0x4   :  { %v483_v7 = vld [vmem:[%s673_s1 + $0x28] sm:$0xff]  ;;  %302 = vmatpush.bf16.msra.mxu3 %v495_v6  ;;  %v482_v13 = vld [vmem:[%s673_s1 + $0x20] sm:$0xff]  ;;  %v481_v15 = vld [vmem:[%s673_s1 + $0x18] sm:$0xff] }
   0x5   :  { %372 = vmatmul.msk.bf16.vlgmr.msra.gmra.mxu0 %vm87_vm0, %v496_v3  ;;  %v384_v9 = vld [vmem:[%s675_s0 + $0x8] sm:$0xf]  ;;  %v490_v14 = vld [vmem:[%s673_s1 + $0x60] sm:$0xff]  ;;  %v489_v16 = vld [vmem:[%s673_s1 + $0x58] sm:$0xff] }
   0x6   :  { %258 = vmatpush.bf16.msrb.mxu0 %v485_v1  ;;  %500 = vmatpush.bf16.msra.mxu1 %v484_v4  ;;  %v491_v11 = vld [vmem:[%s673_s1 + $0x68] sm:$0xff]  ;;  %v385_v12 = vor.u32 %v474_v10, %v384_v9  ;;  %v480_v18 = vld [vmem:[%s673_s1 + $0x10] sm:$0xff]  ;;  %v315_v19 = vld [vmem:[%s676_s2] sm:$0xff] }
   0x7   :  { %278 = vmatpush.bf16.msra.mxu2 %v492_v5  ;;  %v497_v17 = vld [vmem:[%s674_s3 + $0x8] sm:$0xff]  ;;  %v488_v20 = vld [vmem:[%s673_s1 + $0x50] sm:$0xff]  ;;  %321 = vperm.xlu0 %508, %v315_v19   ;;  %v396_v24 = vld [vmem:[%s675_s0 + $0x20] sm:$0xf] }
   0x8   :  { %303 = vmatpush.bf16.msra.mxu3 %v494_v8  ;;  %v317_v21 = vld [vmem:[%s676_s2 + $0x10] sm:$0xff]  ;;  %v479_v23 = vld [vmem:[%s673_s1 + $0x8] sm:$0xff]  ;;  %v478_v27 = vld [vmem:[%s673_s1] sm:$0xff] }
   0x9   :  { %v477_v25 = vld [vmem:[%s675_s0 + $0x28] sm:$0xf0]  ;;  %331 = vperm.xlu1 %509, %v317_v21   ;;  %v486_v28 = vld [vmem:[%s673_s1 + $0x40] sm:$0xff]  ;;  %v388_v30 = vld [vmem:[%s675_s0 + $0x18] sm:$0xf] }
   0xa   :  { %259 = vmatpush.bf16.msrb.mxu0 %v484_v4  ;;  %501 = vmatpush.bf16.msra.mxu1 %v483_v7  ;;  %v487_v26 = vld [vmem:[%s673_s1 + $0x48] sm:$0xff]  ;;  %v397_v29 = vor.u32 %v477_v25, %v396_v24  ;;  %v476_v31 = vld [vmem:[%s675_s0 + $0x20] sm:$0xf0]  ;;  %v378_v34 = vld [vmem:[%s675_s0 + $0xc] sm:$0xf0] }
   0xb   :  { %279 = vmatpush.bf16.msra.mxu2 %v491_v11  ;;  %470 = vmatmul.msk.bf16.vlgmr.msra.gmra.mxu3 %vm251_vm1, %v385_v12  ;;  %v316_v32 = vld [vmem:[%s676_s2 + $0x8] sm:$0xff]  ;;  %v472_v33 = vld [vmem:[%s675_s0 + $0x4] sm:$0xf]  ;;  %v318_v35 = vld [vmem:[%s676_s2 + $0x18] sm:$0xff]  ;;  %v389_v36 = vor.u32 %v476_v31, %v388_v30 }
   0xc   :  { %v381_v37 = vor.u32 %v472_v33, %v378_v34  ;;  %v376_v38 = vld [vmem:[%s675_s0] sm:$0xf]  ;;  %v473_v39 = vld [vmem:[%s675_s0 + $0x8] sm:$0xf0]  ;;  %v475_v41 = vld [vmem:[%s675_s0 + $0x1c] sm:$0xf] }
   0xd   :  { %v377_v40 = vor.u32 %v473_v39, %v376_v38  ;;  %v390_v42 = vld [vmem:[%s675_s0 + $0x24] sm:$0xf0] }
   0xe   :  { %260 = vmatpush.bf16.msrb.mxu0 %v483_v7  ;;  %502 = vmatpush.bf16.msra.mxu1 %v482_v13  ;;  %v393_v43 = vor.u32 %v475_v41, %v390_v42 }
   0xf   :  { %280 = vmatpush.bf16.msra.mxu2 %v490_v14  ;;  %326 = vperm.xlu0 %508, %v316_v32  }
  0x11   :  { %336 = vperm.xlu1 %509, %v318_v35  }
  0x12   :  { %261 = vmatpush.bf16.msrb.mxu0 %v482_v13  ;;  %503 = vmatpush.bf16.msra.mxu1 %v481_v15 }
  0x13   :  { %281 = vmatpush.bf16.msra.mxu2 %v489_v16 }
  0x15   :  { %373 = vmatmul.msk.bf16.gmra.mxu0 %vm87_vm0, %v497_v17 }
  0x16   :  { %262 = vmatpush.bf16.msrb.mxu0 %v481_v15  ;;  %504 = vmatpush.bf16.msra.mxu1 %v480_v18 }
  0x17   :  { %282 = vmatpush.bf16.msra.mxu2 %v488_v20 }
  0x1a   :  { %263 = vmatpush.bf16.msrb.mxu0 %v480_v18  ;;  %505 = vmatpush.bf16.msra.mxu1 %v479_v23 }
  0x1b   :  { %283 = vmatpush.bf16.msra.mxu2 %v487_v26  ;;  %471 = vmatmul.msk.bf16.gmra.mxu3 %vm251_vm1, %v397_v29 }
  0x1e   :  { %264 = vmatpush.bf16.msrb.mxu0 %v479_v23  ;;  %506 = vmatpush.bf16.msra.mxu1 %v478_v27 }
  0x1f   :  { %284 = vmatpush.bf16.msra.mxu2 %v486_v28 }
  0x21   :  { %271 = vmatmul.bf16.vlgmr.msra.gmra.mxu1 %v389_v36 }
  0x22   :  { %265 = vmatpush.bf16.msrb.mxu0 %v478_v27  ;;  %285 = vmatmul.bf16.vlgmr.msra.gmra.mxu2 %v381_v37 }
  0x25   :  { %266 = vmatmul.bf16.vlgmr.msrb.gmra.mxu0 %v377_v40 }
  0x32   :  { %290 = vmatmul.bf16.gmra.mxu2 %v393_v43 }
  0x79   :  { %v322_v52 = vpop.permute.xlu0 %321 }
  0x7b   :  { %v332_v9 = vpop.permute.xlu1 %331 }
  0x81   :  { %v327_v0 = vpop.permute.xlu0 %326 }
  0x82   :  { %v103_v44 = vpop.f32.mrf.mxu0 }
  0x83   :  { %v337_v20 = vpop.permute.xlu1 %336 }
  0x8a   :  { %v105_v45 = vpop.f32.mrf.mxu0 }
  0x8e   :  { %v305_v48 = vpop.f32.mrf.mxu3 }
  0x92   :  { %v108_v46 = vpop.f32.mrf.mxu0 }
  0x96   :  { %v307_v57 = vpop.f32.mrf.mxu3 }
  0x9a   :  { %v110_v47 = vpop.f32.mrf.mxu0 }
  0x9e   :  { %v272_v63 = vpop.f32.mrf.mxu1  ;;  %v310_v5 = vpop.f32.mrf.mxu3 }
  0x9f   :  { %v273_v3 = vadd.f32 %v272_v63, %v108_v46 }
  0xa2   :  { %v267_v49 = vpop.f32.mrf.mxu0 }
  0xa3   :  { %v268_v50 = vadd.f32 %v267_v49, %v103_v44 }
  0xa5   :  { %v286_v51 = vpop.f32.mrf.mxu2 }
  0xa6   :  { %v287_v53 = vadd.f32 %v286_v51, %v268_v50  ;;  %v274_v11 = vpop.f32.mrf.mxu1  ;;  %v312_v18 = vpop.f32.mrf.mxu3 }
  0xa7   :  { %v275_v13 = vadd.f32 %v274_v11, %v110_v47 }
  0xa8   :  { %v306_v54 = vadd.f32 %v305_v48, %v287_v53 }
  0xaa   :  { %v339_v55 = vadd.f32 %v322_v52, %v306_v54  ;;  %v269_v56 = vpop.f32.mrf.mxu0 }
  0xab   :  { %v270_v58 = vadd.f32 %v269_v56, %v105_v45 }
  0xac   :  { %v343_v59 = vmax.f32 %v339_v55, 0.0 }
  0xad   :  { %v288_v60 = vpop.f32.mrf.mxu2 }
  0xae   :  { %v347_v61 = vpack.c.bf16 %v343_v59, %v343_v59  ;;  %v289_v62 = vadd.f32 %v288_v60, %v270_v58 }
  0xb0   :  { %352 = vst.msk [vmem:[%s677_s5] sm:$0xf] %vm351_vm2, %v347_v61  ;;  %v308_v1 = vadd.f32 %v307_v57, %v289_v62 }
  0xb2   :  { %v340_v2 = vadd.f32 %v327_v0, %v308_v1 }
  0xb4   :  { %v344_v4 = vmax.f32 %v340_v2, 0.0 }
  0xb5   :  { %v291_v6 = vpop.f32.mrf.mxu2 }
  0xb6   :  { %v348_v7 = vpack.c.bf16 %v344_v4, %v344_v4  ;;  %v292_v8 = vadd.f32 %v291_v6, %v273_v3 }
  0xb8   :  { %353 = vst.msk [vmem:[%s677_s5 + $0x4] sm:$0xf] %vm351_vm2, %v348_v7  ;;  %v311_v10 = vadd.f32 %v310_v5, %v292_v8 }
  0xba   :  { %v341_v12 = vadd.f32 %v332_v9, %v311_v10 }
  0xbc   :  { %v345_v14 = vmax.f32 %v341_v12, 0.0 }
  0xbd   :  { %v293_v15 = vpop.f32.mrf.mxu2 }
  0xbe   :  { %v349_v16 = vpack.c.bf16 %v345_v14, %v345_v14  ;;  %v294_v17 = vadd.f32 %v293_v15, %v275_v13 }
  0xc0   :  { %354 = vst.msk [vmem:[%s677_s5 + $0x8] sm:$0xf] %vm351_vm2, %v349_v16  ;;  %v313_v19 = vadd.f32 %v312_v18, %v294_v17 }
  0xc2   :  { %v342_v21 = vadd.f32 %v337_v20, %v313_v19 }
  0xc4   :  { %v346_v22 = vmax.f32 %v342_v21, 0.0 }
  0xc6   :  { %v350_v23 = vpack.c.bf16 %v346_v22, %v346_v22 }
  0xc8   :  { %355 = vst.msk [vmem:[%s677_s5 + $0xc] sm:$0xf] %vm351_vm2, %v350_v23 }

// kernel: _lambda_.17
= control target key start
LH: loop header
LB: loop body
LE: loop exit
PB: predicated region body
PF: predicated region fallthrough
CT: control target
= control target key end

     0   :  { %vm283_vm0 = vcmask 261120   ;;  %v586_v15 = vmov 0   ;;  %vm399_vm1 = vcmask 60416   ;;  %s813_s1 = inlined_call_operand.vmem [shape: bf16[288,8], index: 1, kind: input, shape index: {}]   ;;  %s814_s0 = inlined_call_operand.vmem [shape: bf16[64,288], index: 0, kind: input, shape index: {}]   ;;  %s815_s2 = inlined_call_operand.vmem [shape: f32[64,1], index: 2, kind: input, shape index: {}]   ;;  %s816_s3 = inlined_call_operand.vmem [shape: bf16[64,8], index: 3, kind: output, shape index: {}]  }
   0x1   :  { %v555_v0 = vld [vmem:[%s813_s1 + $0x38] sm:$0xff]  ;;  %v565_v2 = vld [vmem:[%s813_s1 + $0x88] sm:$0xff]  ;;  %v554_v3 = vld [vmem:[%s813_s1 + $0x30] sm:$0xff]  ;;  %584 = vset.pattern.permute.xlu1 %v586_v15  ;;  %583 = vset.pattern.permute.xlu0 %v586_v15 }
   0x2   :  { %v613_v1 = vld [vmem:[%s813_s1 + $0x78] sm:$0xff]  ;;  %296 = vmatpush.bf16.msra.mxu0 %v555_v0  ;;  %566 = vmatpush.bf16.msra.mxu3 %v555_v0  ;;  %v625_v4 = vld [vmem:[%s813_s1 + $0x70] sm:$0xff]  ;;  %v564_v5 = vld [vmem:[%s813_s1 + $0x80] sm:$0xff] }
   0x3   :  { %574 = vmatpush.bf16.msra.mxu1 %v613_v1  ;;  %360 = vmatpush.bf16.msra.mxu2 %v565_v2  ;;  %v422_v6 = vld [vmem:[%s814_s0 + $0x8] sm:$0xf]  ;;  %v538_v7 = vld [vmem:[%s814_s0 + $0x10] sm:$0xf0]  ;;  %v552_v11 = vld [vmem:[%s813_s1 + $0x20] sm:$0xff] }
   0x4   :  { %v553_v8 = vld [vmem:[%s813_s1 + $0x28] sm:$0xff]  ;;  %v423_v10 = vor.u32 %v538_v7, %v422_v6  ;;  %v653_v12 = vld [vmem:[%s813_s1 + $0x60] sm:$0xff]  ;;  %v551_v13 = vld [vmem:[%s813_s1 + $0x18] sm:$0xff]  ;;  %585 = vset.pattern.permute.xlu2 %v586_v15 }
   0x5   :  { %v643_v9 = vld [vmem:[%s813_s1 + $0x68] sm:$0xff]  ;;  %v662_v14 = vld [vmem:[%s813_s1 + $0x58] sm:$0xff]  ;;  %v550_v16 = vld [vmem:[%s813_s1 + $0x10] sm:$0xff] }
   0x6   :  { %297 = vmatpush.bf16.msra.mxu0 %v554_v3  ;;  %567 = vmatpush.bf16.msra.mxu3 %v554_v3  ;;  %v69_v17 = vld [vmem:[%s815_s2 + $0x10] sm:$0xff]  ;;  %v434_v19 = vld [vmem:[%s814_s0 + $0x20] sm:$0xf]  ;;  %v541_v20 = vld [vmem:[%s814_s0 + $0x28] sm:$0xf0] }
   0x7   :  { %575 = vmatpush.bf16.msra.mxu1 %v625_v4  ;;  %361 = vmatpush.bf16.msra.mxu2 %v564_v5  ;;  %v558_v18 = vld [vmem:[%s813_s1 + $0x50] sm:$0xff]  ;;  %v549_v21 = vld [vmem:[%s813_s1 + $0x8] sm:$0xff]  ;;  %v435_v23 = vor.u32 %v541_v20, %v434_v19  ;;  %v67_v24 = vld [vmem:[%s815_s2] sm:$0xff] }
   0x8   :  { %87 = vperm.xlu1 %584, %v69_v17   ;;  %v557_v22 = vld [vmem:[%s813_s1 + $0x48] sm:$0xff]  ;;  %77 = vperm.xlu0 %583, %v67_v24   ;;  %v548_v25 = vld [vmem:[%s813_s1] sm:$0xff]  ;;  %v426_v26 = vld [vmem:[%s814_s0 + $0x18] sm:$0xf] }
   0x9   :  { %v70_v27 = vld [vmem:[%s815_s2 + $0x18] sm:$0xff]  ;;  %v540_v28 = vld [vmem:[%s814_s0 + $0x20] sm:$0xf0]  ;;  %v414_v29 = vld [vmem:[%s814_s0] sm:$0xf] }
   0xa   :  { %298 = vmatpush.bf16.msra.mxu0 %v553_v8  ;;  %568 = vmatpush.bf16.msra.mxu3 %v553_v8  ;;  %v537_v30 = vld [vmem:[%s814_s0 + $0x8] sm:$0xf0]  ;;  %v556_v31 = vld [vmem:[%s813_s1 + $0x40] sm:$0xff]  ;;  %v539_v32 = vld [vmem:[%s814_s0 + $0x1c] sm:$0xf]  ;;  %v427_v34 = vor.u32 %v540_v28, %v426_v26 }
   0xb   :  { %576 = vmatpush.bf16.msra.mxu1 %v643_v9  ;;  %532 = vmatmul.msk.bf16.vlgmr.msra.gmra.mxu2 %vm283_vm0, %v423_v10  ;;  %v428_v33 = vld [vmem:[%s814_s0 + $0x24] sm:$0xf0]  ;;  %v415_v35 = vor.u32 %v537_v30, %v414_v29  ;;  %v74_v38 = vld [vmem:[%s815_s2 + $0x38] sm:$0xff]  ;;  %v71_v39 = vld [vmem:[%s815_s2 + $0x20] sm:$0xff] }
   0xc   :  { %v431_v36 = vor.u32 %v539_v32, %v428_v33  ;;  %v68_v37 = vld [vmem:[%s815_s2 + $0x8] sm:$0xff]  ;;  %v446_v40 = vld [vmem:[%s814_s0 + $0x38] sm:$0xf]  ;;  %v544_v41 = vld [vmem:[%s814_s0 + $0x40] sm:$0xf0]  ;;  %97 = vperm.xlu2 %585, %v71_v39  }
   0xd   :  { %v447_v42 = vor.u32 %v544_v41, %v446_v40  ;;  %v73_v43 = vld [vmem:[%s815_s2 + $0x30] sm:$0xff]  ;;  %v72_v44 = vld [vmem:[%s815_s2 + $0x28] sm:$0xff]  ;;  %v543_v46 = vld [vmem:[%s814_s0 + $0x38] sm:$0xf0] }
   0xe   :  { %299 = vmatpush.bf16.msra.mxu0 %v552_v11  ;;  %569 = vmatpush.bf16.msra.mxu3 %v552_v11  ;;  %v438_v45 = vld [vmem:[%s814_s0 + $0x30] sm:$0xf]  ;;  %v542_v47 = vld [vmem:[%s814_s0 + $0x34] sm:$0xf]  ;;  %v440_v48 = vld [vmem:[%s814_s0 + $0x3c] sm:$0xf0] }
   0xf   :  { %577 = vmatpush.bf16.msra.mxu1 %v653_v12  ;;  %v439_v49 = vor.u32 %v543_v46, %v438_v45  ;;  %v443_v50 = vor.u32 %v542_v47, %v440_v48  ;;  %v458_v51 = vld [vmem:[%s814_s0 + $0x50] sm:$0xf]  ;;  %v547_v52 = vld [vmem:[%s814_s0 + $0x58] sm:$0xf0]  ;;  %v536_v54 = vld [vmem:[%s814_s0 + $0x4] sm:$0xf] }
  0x10   :  { %92 = vperm.xlu1 %584, %v70_v27   ;;  %82 = vperm.xlu0 %583, %v68_v37   ;;  %v459_v53 = vor.u32 %v547_v52, %v458_v51  ;;  %v416_v55 = vld [vmem:[%s814_s0 + $0xc] sm:$0xf0]  ;;  %v450_v57 = vld [vmem:[%s814_s0 + $0x48] sm:$0xf]  ;;  %v546_v58 = vld [vmem:[%s814_s0 + $0x50] sm:$0xf0] }
  0x11   :  { %v419_v56 = vor.u32 %v536_v54, %v416_v55  ;;  %v545_v59 = vld [vmem:[%s814_s0 + $0x4c] sm:$0xf]  ;;  %v452_v60 = vld [vmem:[%s814_s0 + $0x54] sm:$0xf0]  ;;  %v451_v61 = vor.u32 %v546_v58, %v450_v57 }
  0x12   :  { %300 = vmatpush.bf16.msra.mxu0 %v551_v13  ;;  %570 = vmatpush.bf16.msra.mxu3 %v551_v13  ;;  %v455_v62 = vor.u32 %v545_v59, %v452_v60 }
  0x13   :  { %578 = vmatpush.bf16.msra.mxu1 %v662_v14 }
  0x14   :  { %102 = vperm.xlu2 %585, %v72_v44  }
  0x16   :  { %301 = vmatpush.bf16.msra.mxu0 %v550_v16  ;;  %571 = vmatpush.bf16.msra.mxu3 %v550_v16 }
  0x17   :  { %579 = vmatpush.bf16.msra.mxu1 %v558_v18 }
  0x18   :  { %112 = vperm.xlu1 %584, %v74_v38   ;;  %107 = vperm.xlu0 %583, %v73_v43  }
  0x1a   :  { %302 = vmatpush.bf16.msra.mxu0 %v549_v21  ;;  %572 = vmatpush.bf16.msra.mxu3 %v549_v21 }
  0x1b   :  { %580 = vmatpush.bf16.msra.mxu1 %v557_v22  ;;  %533 = vmatmul.msk.bf16.gmra.mxu2 %vm283_vm0, %v435_v23 }
  0x1e   :  { %303 = vmatpush.bf16.msra.mxu0 %v548_v25  ;;  %573 = vmatpush.bf16.msra.mxu3 %v548_v25 }
  0x1f   :  { %581 = vmatpush.bf16.msra.mxu1 %v556_v31 }
  0x21   :  { %309 = vmatmul.bf16.vlgmr.msra.gmra.mxu3 %v427_v34  ;;  %304 = vmatmul.bf16.vlgmr.msra.gmra.mxu0 %v415_v35 }
  0x22   :  { %325 = vmatpush.bf16.msrb.mxu0 %v613_v1  ;;  %338 = vmatmul.bf16.vlgmr.msra.gmra.mxu1 %v431_v36 }
  0x26   :  { %326 = vmatpush.bf16.msrb.mxu0 %v625_v4 }
  0x2a   :  { %327 = vmatpush.bf16.msrb.mxu0 %v643_v9 }
  0x2b   :  { %534 = vmatmul.msk.bf16.gmra.mxu2 %vm283_vm0, %v447_v42 }
  0x2e   :  { %328 = vmatpush.bf16.msrb.mxu0 %v653_v12 }
  0x31   :  { %314 = vmatmul.bf16.gmra.mxu3 %v439_v49 }
  0x32   :  { %329 = vmatpush.bf16.msrb.mxu0 %v662_v14  ;;  %343 = vmatmul.bf16.gmra.mxu1 %v443_v50 }
  0x36   :  { %330 = vmatpush.bf16.msrb.mxu0 %v558_v18 }
  0x3a   :  { %331 = vmatpush.bf16.msrb.mxu0 %v557_v22 }
  0x3b   :  { %535 = vmatmul.msk.bf16.gmra.mxu2 %vm283_vm0, %v459_v53 }
  0x3e   :  { %332 = vmatpush.bf16.msrb.mxu0 %v556_v31 }
  0x41   :  { %333 = vmatmul.bf16.vlgmr.msrb.gmra.mxu0 %v419_v56  ;;  %319 = vmatmul.bf16.gmra.mxu3 %v451_v61 }
  0x42   :  { %348 = vmatmul.bf16.gmra.mxu1 %v455_v62 }
  0x66   :  { %v98_v19 = vpop.permute.xlu2 %97 }
  0x6e   :  { %v103_v32 = vpop.permute.xlu2 %102 }
  0x7a   :  { %v88_v3 = vpop.permute.xlu1 %87  ;;  %v78_v16 = vpop.permute.xlu0 %77 }
  0x82   :  { %v93_v11 = vpop.permute.xlu1 %92  ;;  %v83_v28 = vpop.permute.xlu0 %82 }
  0x8a   :  { %v108_v46 = vpop.permute.xlu0 %107  ;;  %v113_v61 = vpop.permute.xlu1 %112 }
  0x8e   :  { %v363_v63 = vpop.f32.mrf.mxu2 }
  0x96   :  { %v365_v0 = vpop.f32.mrf.mxu2 }
  0x9e   :  { %v368_v1 = vpop.f32.mrf.mxu2  ;;  %v305_v8 = vpop.f32.mrf.mxu0 }
  0x9f   :  { %v339_v2 = vpop.f32.mrf.mxu1  ;;  %v306_v30 = vadd.f32 %v305_v8, %v78_v16 }
  0xa4   :  { %v310_v4 = vpop.f32.mrf.mxu3 }
  0xa5   :  { %v311_v5 = vadd.f32 %v310_v4, %v88_v3 }
  0xa6   :  { %v370_v9 = vpop.f32.mrf.mxu2  ;;  %v307_v21 = vpop.f32.mrf.mxu0 }
  0xa7   :  { %v340_v6 = vadd.f32 %v339_v2, %v311_v5  ;;  %v341_v7 = vpop.f32.mrf.mxu1  ;;  %v308_v44 = vadd.f32 %v307_v21, %v83_v28 }
  0xa9   :  { %v369_v10 = vadd.f32 %v368_v1, %v340_v6 }
  0xab   :  { %v385_v12 = vmax.f32 %v369_v10, 0.0 }
  0xac   :  { %v312_v13 = vpop.f32.mrf.mxu3 }
  0xad   :  { %v393_v14 = vpack.c.bf16 %v385_v12, %v385_v12  ;;  %v313_v15 = vadd.f32 %v312_v13, %v93_v11 }
  0xae   :  { %v373_v22 = vpop.f32.mrf.mxu2 }
  0xaf   :  { %402 = vst.msk [vmem:[%s816_s3 + $0x8] sm:$0xf] %vm399_vm1, %v393_v14  ;;  %v342_v17 = vadd.f32 %v341_v7, %v313_v15  ;;  %v344_v18 = vpop.f32.mrf.mxu1 }
  0xb1   :  { %v371_v20 = vadd.f32 %v370_v9, %v342_v17 }
  0xb3   :  { %v386_v23 = vmax.f32 %v371_v20, 0.0 }
  0xb4   :  { %v315_v24 = vpop.f32.mrf.mxu3 }
  0xb5   :  { %v394_v25 = vpack.c.bf16 %v386_v23, %v386_v23  ;;  %v316_v26 = vadd.f32 %v315_v24, %v98_v19 }
  0xb6   :  { %v375_v35 = vpop.f32.mrf.mxu2 }
  0xb7   :  { %403 = vst.msk [vmem:[%s816_s3 + $0xc] sm:$0xf] %vm399_vm1, %v394_v25  ;;  %v345_v27 = vadd.f32 %v344_v18, %v316_v26  ;;  %v346_v31 = vpop.f32.mrf.mxu1 }
  0xb9   :  { %v374_v29 = vadd.f32 %v373_v22, %v345_v27 }
  0xbb   :  { %v387_v33 = vmax.f32 %v374_v29, 0.0 }
  0xbc   :  { %v317_v37 = vpop.f32.mrf.mxu3 }
  0xbd   :  { %v395_v38 = vpack.c.bf16 %v387_v33, %v387_v33  ;;  %v318_v39 = vadd.f32 %v317_v37, %v103_v32 }
  0xbe   :  { %v334_v34 = vpop.f32.mrf.mxu0  ;;  %v378_v54 = vpop.f32.mrf.mxu2 }
  0xbf   :  { %v335_v36 = vadd.f32 %v334_v34, %v306_v30  ;;  %404 = vst.msk [vmem:[%s816_s3 + $0x10] sm:$0xf] %vm399_vm1, %v395_v38  ;;  %v347_v41 = vadd.f32 %v346_v31, %v318_v39  ;;  %v349_v49 = vpop.f32.mrf.mxu1 }
  0xc1   :  { %v364_v40 = vadd.f32 %v363_v63, %v335_v36  ;;  %v376_v43 = vadd.f32 %v375_v35, %v347_v41 }
  0xc3   :  { %v383_v42 = vmax.f32 %v364_v40, 0.0  ;;  %v388_v47 = vmax.f32 %v376_v43, 0.0 }
  0xc4   :  { %v320_v51 = vpop.f32.mrf.mxu3 }
  0xc5   :  { %v391_v45 = vpack.c.bf16 %v383_v42, %v383_v42  ;;  %v396_v52 = vpack.c.bf16 %v388_v47, %v388_v47  ;;  %v321_v53 = vadd.f32 %v320_v51, %v108_v46 }
  0xc6   :  { %v336_v48 = vpop.f32.mrf.mxu0  ;;  %v380_v3 = vpop.f32.mrf.mxu2 }
  0xc7   :  { %400 = vst.msk [vmem:[%s816_s3] sm:$0xf] %vm399_vm1, %v391_v45  ;;  %v337_v50 = vadd.f32 %v336_v48, %v308_v44  ;;  %v350_v56 = vadd.f32 %v349_v49, %v321_v53 }
  0xc8   :  { %405 = vst.msk [vmem:[%s816_s3 + $0x14] sm:$0xf] %vm399_vm1, %v396_v52 }
  0xc9   :  { %v366_v55 = vadd.f32 %v365_v0, %v337_v50  ;;  %v379_v58 = vadd.f32 %v378_v54, %v350_v56  ;;  %v351_v0 = vpop.f32.mrf.mxu1 }
  0xcb   :  { %v384_v57 = vmax.f32 %v366_v55, 0.0  ;;  %v389_v60 = vmax.f32 %v379_v58, 0.0 }
  0xcc   :  { %v322_v62 = vpop.f32.mrf.mxu3 }
  0xcd   :  { %v392_v59 = vpack.c.bf16 %v384_v57, %v384_v57  ;;  %v397_v63 = vpack.c.bf16 %v389_v60, %v389_v60  ;;  %v323_v1 = vadd.f32 %v322_v62, %v113_v61 }
  0xcf   :  { %401 = vst.msk [vmem:[%s816_s3 + $0x4] sm:$0xf] %vm399_vm1, %v392_v59  ;;  %v352_v2 = vadd.f32 %v351_v0, %v323_v1 }
  0xd0   :  { %406 = vst.msk [vmem:[%s816_s3 + $0x18] sm:$0xf] %vm399_vm1, %v397_v63 }
  0xd1   :  { %v381_v4 = vadd.f32 %v380_v3, %v352_v2 }
  0xd3   :  { %v390_v5 = vmax.f32 %v381_v4, 0.0 }
  0xd5   :  { %v398_v6 = vpack.c.bf16 %v390_v5, %v390_v5 }
  0xd7   :  { %407 = vst.msk [vmem:[%s816_s3 + $0x1c] sm:$0xf] %vm399_vm1, %v398_v6 }

// kernel: _lambda_.18
= control target key start
LH: loop header
LB: loop body
LE: loop exit
PB: predicated region body
PF: predicated region fallthrough
CT: control target
= control target key end

     0   :  { %vm161_vm0 = vcmask 261120   ;;  %v1094_v59 = vmov 0   ;;  %vm519_vm1 = vcmask 523264   ;;  %vm749_vm2 = vcmask 60416   ;;  %s1459_s1 = inlined_call_operand.vmem [shape: bf16[576,8], index: 1, kind: input, shape index: {}]   ;;  %s1460_s4 = inlined_call_operand.vmem [shape: bf16[32,8], index: 4, kind: input, shape index: {}]   ;;  %s1461_s3 = inlined_call_operand.vmem [shape: bf16[64,32], index: 3, kind: input, shape index: {}]   ;;  %s1462_s0 = inlined_call_operand.vmem [shape: bf16[64,576], index: 0, kind: input, shape index: {}]   ;;  %s1463_s2 = inlined_call_operand.vmem [shape: f32[64,1], index: 2, kind: input, shape index: {}]   ;;  %s1464_s5 = inlined_call_operand.vmem [shape: bf16[64,8], index: 5, kind: output, shape index: {}]  }
   0x1   :  { %v1045_v0 = vld [vmem:[%s1459_s1 + $0x38] sm:$0xff]  ;;  %v1079_v1 = vld [vmem:[%s1460_s4 + $0x8] sm:$0xff]  ;;  %v1044_v2 = vld [vmem:[%s1459_s1 + $0x30] sm:$0xff]  ;;  %1091 = vset.pattern.permute.xlu0 %v1094_v59  ;;  %1092 = vset.pattern.permute.xlu1 %v1094_v59 }
   0x2   :  { %1082 = vmatpush.bf16.msra.mxu2 %v1045_v0  ;;  %532 = vmatpush.bf16.msra.mxu1 %v1045_v0  ;;  %v1078_v3 = vld [vmem:[%s1460_s4] sm:$0xff]  ;;  %v1061_v4 = vld [vmem:[%s1459_s1 + $0xb8] sm:$0xff]  ;;  %v1043_v5 = vld [vmem:[%s1459_s1 + $0x28] sm:$0xff] }
   0x3   :  { %1080 = vmatpush.bf16.msra.mxu3 %v1079_v1  ;;  %180 = vmatpush.bf16.msra.mxu0 %v1079_v1  ;;  %v1069_v6 = vld [vmem:[%s1459_s1 + $0xf8] sm:$0xff]  ;;  %v1076_v7 = vld [vmem:[%s1461_s3 + $0x10] sm:$0xff]  ;;  %v1074_v8 = vld [vmem:[%s1461_s3] sm:$0xff] }
   0x4   :  { %v1060_v9 = vld [vmem:[%s1459_s1 + $0xb0] sm:$0xff]  ;;  %v1042_v11 = vld [vmem:[%s1459_s1 + $0x20] sm:$0xff]  ;;  %v1059_v12 = vld [vmem:[%s1459_s1 + $0xa8] sm:$0xff]  ;;  %1093 = vset.pattern.permute.xlu2 %v1094_v59 }
   0x5   :  { %v1068_v10 = vld [vmem:[%s1459_s1 + $0xf0] sm:$0xff]  ;;  %v1067_v13 = vld [vmem:[%s1459_s1 + $0xe8] sm:$0xff]  ;;  %v1041_v14 = vld [vmem:[%s1459_s1 + $0x18] sm:$0xff] }
   0x6   :  { %1083 = vmatpush.bf16.msra.mxu2 %v1044_v2  ;;  %533 = vmatpush.bf16.msra.mxu1 %v1044_v2  ;;  %v1058_v15 = vld [vmem:[%s1459_s1 + $0xa0] sm:$0xff]  ;;  %v1040_v17 = vld [vmem:[%s1459_s1 + $0x10] sm:$0xff]  ;;  %v1057_v18 = vld [vmem:[%s1459_s1 + $0x98] sm:$0xff] }
   0x7   :  { %1081 = vmatpush.bf16.msra.mxu3 %v1078_v3  ;;  %181 = vmatpush.bf16.msra.mxu0 %v1078_v3  ;;  %v1066_v16 = vld [vmem:[%s1459_s1 + $0xe0] sm:$0xff]  ;;  %v1065_v19 = vld [vmem:[%s1459_s1 + $0xd8] sm:$0xff]  ;;  %v1039_v20 = vld [vmem:[%s1459_s1 + $0x8] sm:$0xff] }
   0x8   :  { %v1077_v21 = vld [vmem:[%s1461_s3 + $0x18] sm:$0xff]  ;;  %v1075_v22 = vld [vmem:[%s1461_s3 + $0x8] sm:$0xff]  ;;  %v1056_v23 = vld [vmem:[%s1459_s1 + $0x90] sm:$0xff] }
   0x9   :  { %v1064_v24 = vld [vmem:[%s1459_s1 + $0xd0] sm:$0xff]  ;;  %v1038_v25 = vld [vmem:[%s1459_s1] sm:$0xff]  ;;  %v1053_v30 = vld [vmem:[%s1459_s1 + $0x78] sm:$0xff] }
   0xa   :  { %1084 = vmatpush.bf16.msra.mxu2 %v1043_v5  ;;  %534 = vmatpush.bf16.msra.mxu1 %v1043_v5  ;;  %v832_v26 = vld [vmem:[%s1462_s0 + $0x50] sm:$0xf]  ;;  %v1030_v27 = vld [vmem:[%s1462_s0 + $0x60] sm:$0xf0]  ;;  %v792_v28 = vld [vmem:[%s1462_s0] sm:$0xf] }
   0xb   :  { %590 = vmatpush.bf16.msrb.mxu3 %v1061_v4  ;;  %619 = vmatpush.bf16.msrb.mxu0 %v1069_v6  ;;  %v1020_v29 = vld [vmem:[%s1462_s0 + $0x10] sm:$0xf0]  ;;  %v1073_v31 = vld [vmem:[%s1459_s1 + $0x118] sm:$0xff]  ;;  %v1055_v32 = vld [vmem:[%s1459_s1 + $0x88] sm:$0xff]  ;;  %v833_v34 = vor.u32 %v1030_v27, %v832_v26 }
   0xc   :  { %788 = vmatmul.msk.bf16.vlgmr.msra.gmra.mxu3 %vm161_vm0, %v1076_v7  ;;  %786 = vmatmul.msk.bf16.vlgmr.msra.gmra.mxu0 %vm161_vm0, %v1074_v8  ;;  %v1063_v33 = vld [vmem:[%s1459_s1 + $0xc8] sm:$0xff]  ;;  %v793_v35 = vor.u32 %v1020_v29, %v792_v28  ;;  %v1052_v36 = vld [vmem:[%s1459_s1 + $0x70] sm:$0xff]  ;;  %v1054_v38 = vld [vmem:[%s1459_s1 + $0x80] sm:$0xff] }
   0xd   :  { %v1072_v37 = vld [vmem:[%s1459_s1 + $0x110] sm:$0xff]  ;;  %v1062_v39 = vld [vmem:[%s1459_s1 + $0xc0] sm:$0xff]  ;;  %v1051_v40 = vld [vmem:[%s1459_s1 + $0x68] sm:$0xff] }
   0xe   :  { %1085 = vmatpush.bf16.msra.mxu2 %v1042_v11  ;;  %535 = vmatpush.bf16.msra.mxu1 %v1042_v11  ;;  %v1071_v41 = vld [vmem:[%s1459_s1 + $0x108] sm:$0xff]  ;;  %v1021_v43 = vld [vmem:[%s1462_s0 + $0x18] sm:$0xf0]  ;;  %v802_v45 = vld [vmem:[%s1462_s0 + $0x1c] sm:$0xf0] }
   0xf   :  { %591 = vmatpush.bf16.msrb.mxu3 %v1060_v9  ;;  %620 = vmatpush.bf16.msrb.mxu0 %v1068_v10  ;;  %v800_v42 = vld [vmem:[%s1462_s0 + $0x8] sm:$0xf]  ;;  %v1019_v44 = vld [vmem:[%s1462_s0 + $0xc] sm:$0xf]  ;;  %v1050_v46 = vld [vmem:[%s1459_s1 + $0x60] sm:$0xff] }
  0x10   :  { %v801_v47 = vor.u32 %v1021_v43, %v800_v42  ;;  %v1070_v48 = vld [vmem:[%s1459_s1 + $0x100] sm:$0xff]  ;;  %v805_v49 = vor.u32 %v1019_v44, %v802_v45  ;;  %v852_v50 = vld [vmem:[%s1462_s0 + $0x78] sm:$0xf]  ;;  %v1035_v51 = vld [vmem:[%s1462_s0 + $0x88] sm:$0xf0] }
  0x11   :  { %v812_v52 = vld [vmem:[%s1462_s0 + $0x28] sm:$0xf]  ;;  %v1025_v53 = vld [vmem:[%s1462_s0 + $0x38] sm:$0xf0]  ;;  %v853_v55 = vor.u32 %v1035_v51, %v852_v50  ;;  %v1048_v57 = vld [vmem:[%s1459_s1 + $0x50] sm:$0xff] }
  0x12   :  { %1086 = vmatpush.bf16.msra.mxu2 %v1041_v14  ;;  %536 = vmatpush.bf16.msra.mxu1 %v1041_v14  ;;  %v1049_v54 = vld [vmem:[%s1459_s1 + $0x58] sm:$0xff]  ;;  %v813_v56 = vor.u32 %v1025_v53, %v812_v52  ;;  %v677_v58 = vld [vmem:[%s1463_s2] sm:$0xff]  ;;  %v1047_v60 = vld [vmem:[%s1459_s1 + $0x48] sm:$0xff] }
  0x13   :  { %592 = vmatpush.bf16.msrb.mxu3 %v1059_v12  ;;  %621 = vmatpush.bf16.msrb.mxu0 %v1067_v13  ;;  %v820_v61 = vld [vmem:[%s1462_s0 + $0x30] sm:$0xf]  ;;  %v1026_v62 = vld [vmem:[%s1462_s0 + $0x40] sm:$0xf0]  ;;  %v1024_v63 = vld [vmem:[%s1462_s0 + $0x34] sm:$0xf] }
  0x14   :  { %687 = vperm.xlu0 %1091, %v677_v58   ;;  %v822_v0 = vld [vmem:[%s1462_s0 + $0x44] sm:$0xf0]  ;;  %v1046_v1 = vld [vmem:[%s1459_s1 + $0x40] sm:$0xff]  ;;  %v821_v2 = vor.u32 %v1026_v62, %v820_v61  ;;  %v794_v5 = vld [vmem:[%s1462_s0 + $0x14] sm:$0xf0] }
  0x15   :  { %v825_v3 = vor.u32 %v1024_v63, %v822_v0  ;;  %v1018_v4 = vld [vmem:[%s1462_s0 + $0x4] sm:$0xf]  ;;  %v808_v6 = vld [vmem:[%s1462_s0 + $0x10] sm:$0xf]  ;;  %v678_v10 = vld [vmem:[%s1463_s2 + $0x8] sm:$0xff] }
  0x16   :  { %1087 = vmatpush.bf16.msra.mxu2 %v1040_v17  ;;  %537 = vmatpush.bf16.msra.mxu1 %v1040_v17  ;;  %v1022_v7 = vld [vmem:[%s1462_s0 + $0x20] sm:$0xf0]  ;;  %v797_v8 = vor.u32 %v1018_v4, %v794_v5  ;;  %v679_v11 = vld [vmem:[%s1463_s2 + $0x10] sm:$0xff]  ;;  %v840_v12 = vld [vmem:[%s1462_s0 + $0x58] sm:$0xf] }
  0x17   :  { %593 = vmatpush.bf16.msrb.mxu3 %v1058_v15  ;;  %622 = vmatpush.bf16.msrb.mxu0 %v1066_v16  ;;  %v809_v9 = vor.u32 %v1022_v7, %v808_v6  ;;  %v1031_v13 = vld [vmem:[%s1462_s0 + $0x68] sm:$0xf0]  ;;  %v1029_v14 = vld [vmem:[%s1462_s0 + $0x5c] sm:$0xf]  ;;  %v842_v15 = vld [vmem:[%s1462_s0 + $0x6c] sm:$0xf0] }
  0x18   :  { %697 = vperm.xlu1 %1092, %v679_v11   ;;  %v841_v16 = vor.u32 %v1031_v13, %v840_v12  ;;  %v845_v17 = vor.u32 %v1029_v14, %v842_v15  ;;  %v681_v26 = vld [vmem:[%s1463_s2 + $0x20] sm:$0xff]  ;;  %v1036_v28 = vld [vmem:[%s1462_s0 + $0x90] sm:$0xf0]  ;;  %v854_v42 = vld [vmem:[%s1462_s0 + $0x8c] sm:$0xf0] }
  0x19   :  { %707 = vperm.xlu2 %1093, %v681_v26   ;;  %v860_v27 = vld [vmem:[%s1462_s0 + $0x80] sm:$0xf]  ;;  %v1034_v29 = vld [vmem:[%s1462_s0 + $0x84] sm:$0xf]  ;;  %v868_v43 = vld [vmem:[%s1462_s0 + $0x88] sm:$0xf] }
  0x1a   :  { %1088 = vmatpush.bf16.msra.mxu2 %v1039_v20  ;;  %538 = vmatpush.bf16.msra.mxu1 %v1039_v20  ;;  %v828_v20 = vld [vmem:[%s1462_s0 + $0x38] sm:$0xf]  ;;  %v1037_v44 = vld [vmem:[%s1462_s0 + $0x98] sm:$0xf0] }
  0x1b   :  { %594 = vmatpush.bf16.msrb.mxu3 %v1057_v18  ;;  %623 = vmatpush.bf16.msrb.mxu0 %v1065_v19  ;;  %v1023_v18 = vld [vmem:[%s1462_s0 + $0x2c] sm:$0xf]  ;;  %v814_v19 = vld [vmem:[%s1462_s0 + $0x3c] sm:$0xf0] }
  0x1c   :  { %789 = vmatmul.msk.bf16.gmra.mxu3 %vm161_vm0, %v1077_v21  ;;  %787 = vmatmul.msk.bf16.gmra.mxu0 %vm161_vm0, %v1075_v22  ;;  %v1027_v21 = vld [vmem:[%s1462_s0 + $0x48] sm:$0xf0]  ;;  %v817_v22 = vor.u32 %v1023_v18, %v814_v19 }
  0x1d   :  { %692 = vperm.xlu0 %1091, %v678_v10  }
  0x1e   :  { %1089 = vmatpush.bf16.msra.mxu2 %v1038_v25  ;;  %539 = vmatpush.bf16.msra.mxu1 %v1038_v25  ;;  %v683_v25 = vld [vmem:[%s1463_s2 + $0x30] sm:$0xff] }
  0x1f   :  { %595 = vmatpush.bf16.msrb.mxu3 %v1056_v23  ;;  %624 = vmatpush.bf16.msrb.mxu0 %v1064_v24  ;;  %v829_v23 = vor.u32 %v1027_v21, %v828_v20  ;;  %v680_v24 = vld [vmem:[%s1463_s2 + $0x18] sm:$0xff] }
  0x20   :  { %702 = vperm.xlu1 %1092, %v680_v24  }
  0x21   :  { %550 = vmatmul.bf16.vlgmr.msra.gmra.mxu2 %v833_v34  ;;  %540 = vmatmul.bf16.vlgmr.msra.gmra.mxu1 %v793_v35  ;;  %v682_v34 = vld [vmem:[%s1463_s2 + $0x28] sm:$0xff]  ;;  %v1028_v35 = vld [vmem:[%s1462_s0 + $0x54] sm:$0xf] }
  0x22   :  { %561 = vmatpush.bf16.msrb.mxu2 %v1053_v30  ;;  %652 = vmatpush.bf16.msrb.mxu1 %v1073_v31  ;;  %v862_v30 = vld [vmem:[%s1462_s0 + $0x94] sm:$0xf0]  ;;  %v861_v31 = vor.u32 %v1036_v28, %v860_v27 }
  0x23   :  { %596 = vmatpush.bf16.msrb.mxu3 %v1055_v32  ;;  %625 = vmatpush.bf16.msrb.mxu0 %v1063_v33  ;;  %v684_v32 = vld [vmem:[%s1463_s2 + $0x38] sm:$0xff]  ;;  %v865_v33 = vor.u32 %v1034_v29, %v862_v30 }
  0x24   :  { %712 = vperm.xlu2 %1093, %v682_v34  }
  0x25   :  { %717 = vperm.xlu0 %1091, %v683_v25  }
  0x26   :  { %562 = vmatpush.bf16.msrb.mxu2 %v1052_v36  ;;  %653 = vmatpush.bf16.msrb.mxu1 %v1072_v37  ;;  %v834_v36 = vld [vmem:[%s1462_s0 + $0x64] sm:$0xf0]  ;;  %v848_v37 = vld [vmem:[%s1462_s0 + $0x60] sm:$0xf] }
  0x27   :  { %597 = vmatpush.bf16.msrb.mxu3 %v1054_v38  ;;  %626 = vmatpush.bf16.msrb.mxu0 %v1062_v39  ;;  %v1032_v38 = vld [vmem:[%s1462_s0 + $0x70] sm:$0xf0]  ;;  %v837_v39 = vor.u32 %v1028_v35, %v834_v36 }
  0x28   :  { %722 = vperm.xlu1 %1092, %v684_v32  }
  0x2a   :  { %563 = vmatpush.bf16.msrb.mxu2 %v1051_v40  ;;  %654 = vmatpush.bf16.msrb.mxu1 %v1071_v41  ;;  %v849_v40 = vor.u32 %v1032_v38, %v848_v37  ;;  %v1033_v41 = vld [vmem:[%s1462_s0 + $0x7c] sm:$0xf] }
  0x2b   :  { %v857_v45 = vor.u32 %v1033_v41, %v854_v42 }
  0x2c   :  { %598 = vmatmul.bf16.vlgmr.msrb.gmra.mxu3 %v801_v47  ;;  %627 = vmatmul.bf16.vlgmr.msrb.gmra.mxu0 %v805_v49 }
  0x2e   :  { %564 = vmatpush.bf16.msrb.mxu2 %v1050_v46  ;;  %655 = vmatpush.bf16.msrb.mxu1 %v1070_v48  ;;  %v869_v46 = vor.u32 %v1037_v44, %v868_v43 }
  0x31   :  { %555 = vmatmul.bf16.gmra.mxu2 %v853_v55  ;;  %545 = vmatmul.bf16.gmra.mxu1 %v813_v56 }
  0x32   :  { %565 = vmatpush.bf16.msrb.mxu2 %v1049_v54 }
  0x36   :  { %566 = vmatpush.bf16.msrb.mxu2 %v1048_v57 }
  0x3a   :  { %567 = vmatpush.bf16.msrb.mxu2 %v1047_v60 }
  0x3c   :  { %603 = vmatmul.bf16.gmra.mxu3 %v821_v2  ;;  %632 = vmatmul.bf16.gmra.mxu0 %v825_v3 }
  0x3e   :  { %568 = vmatpush.bf16.msrb.mxu2 %v1046_v1 }
  0x41   :  { %569 = vmatmul.bf16.vlgmr.msrb.gmra.mxu2 %v797_v8  ;;  %1014 = vmatmul.msk.bf16.vlgmr.msrb.gmra.mxu1 %vm519_vm1, %v809_v9 }
  0x4c   :  { %608 = vmatmul.bf16.gmra.mxu3 %v841_v16  ;;  %637 = vmatmul.bf16.gmra.mxu0 %v845_v17 }
  0x51   :  { %574 = vmatmul.bf16.gmra.mxu2 %v817_v22  ;;  %1015 = vmatmul.msk.bf16.gmra.mxu1 %vm519_vm1, %v829_v23 }
  0x5c   :  { %613 = vmatmul.bf16.gmra.mxu3 %v861_v31  ;;  %642 = vmatmul.bf16.gmra.mxu0 %v865_v33 }
  0x61   :  { %579 = vmatmul.bf16.gmra.mxu2 %v837_v39  ;;  %1016 = vmatmul.msk.bf16.gmra.mxu1 %vm519_vm1, %v849_v40 }
  0x71   :  { %584 = vmatmul.bf16.gmra.mxu2 %v857_v45  ;;  %1017 = vmatmul.msk.bf16.gmra.mxu1 %vm519_vm1, %v869_v46 }
  0x86   :  { %v688_v9 = vpop.permute.xlu0 %687 }
  0x89   :  { %v183_v48 = vpop.f32.mrf.mxu0 }
  0x8a   :  { %v698_v33 = vpop.permute.xlu1 %697 }
  0x8f   :  { %v1403_v47 = vpop.f32.mrf.mxu3  ;;  %v693_v23 = vpop.permute.xlu0 %692 }
  0x91   :  { %v185_v50 = vpop.f32.mrf.mxu0 }
  0x97   :  { %v1405_v49 = vpop.f32.mrf.mxu3 }
  0x99   :  { %v188_v55 = vpop.f32.mrf.mxu0 }
  0x9e   :  { %v541_v51 = vpop.f32.mrf.mxu1 }
  0x9f   :  { %v1409_v53 = vpop.f32.mrf.mxu3  ;;  %v542_v3 = vadd.f32 %v541_v51, %v183_v48 }
  0xa1   :  { %v190_v59 = vpop.f32.mrf.mxu0 }
  0xa4   :  { %v1407_v52 = vpop.f32.mrf.mxu2 }
  0xa5   :  { %v552_v51 = vadd.f32 %v1407_v52, %v1403_v47 }
  0xa6   :  { %v543_v54 = vpop.f32.mrf.mxu1 }
  0xa7   :  { %v1413_v58 = vpop.f32.mrf.mxu3  ;;  %v544_v11 = vadd.f32 %v543_v54, %v185_v50  ;;  %v703_v50 = vpop.permute.xlu1 %702 }
  0xa9   :  { %v628_v63 = vpop.f32.mrf.mxu0 }
  0xac   :  { %v1411_v56 = vpop.f32.mrf.mxu2 }
  0xae   :  { %v546_v57 = vpop.f32.mrf.mxu1 }
  0xaf   :  { %v599_v62 = vpop.f32.mrf.mxu3  ;;  %v547_v24 = vadd.f32 %v546_v57, %v188_v55 }
  0xb1   :  { %v630_v5 = vpop.f32.mrf.mxu0 }
  0xb4   :  { %v1415_v60 = vpop.f32.mrf.mxu2 }
  0xb6   :  { %v548_v61 = vpop.f32.mrf.mxu1 }
  0xb7   :  { %v601_v2 = vpop.f32.mrf.mxu3  ;;  %v549_v37 = vadd.f32 %v548_v61, %v190_v59 }
  0xb9   :  { %v633_v17 = vpop.f32.mrf.mxu0 }
  0xbc   :  { %v1417_v0 = vpop.f32.mrf.mxu2 }
  0xbe   :  { %v657_v1 = vpop.f32.mrf.mxu1 }
  0xbf   :  { %v604_v14 = vpop.f32.mrf.mxu3 }
  0xc1   :  { %v635_v32 = vpop.f32.mrf.mxu0 }
  0xc4   :  { %v570_v4 = vpop.f32.mrf.mxu2 }
  0xc5   :  { %v571_v6 = vadd.f32 %v570_v4, %v542_v3 }
  0xc6   :  { %v659_v7 = vpop.f32.mrf.mxu1 }
  0xc7   :  { %v600_v8 = vadd.f32 %v599_v62, %v571_v6  ;;  %v606_v29 = vpop.f32.mrf.mxu3 }
  0xc9   :  { %v629_v10 = vadd.f32 %v628_v63, %v600_v8  ;;  %v638_v48 = vpop.f32.mrf.mxu0 }
  0xcb   :  { %v658_v12 = vadd.f32 %v657_v1, %v629_v10  ;;  %v708_v1 = vpop.permute.xlu2 %707 }
  0xcc   :  { %v572_v13 = vpop.f32.mrf.mxu2 }
  0xcd   :  { %v725_v15 = vadd.f32 %v688_v9, %v658_v12  ;;  %v573_v16 = vadd.f32 %v572_v13, %v544_v11 }
  0xce   :  { %v662_v20 = vpop.f32.mrf.mxu1 }
  0xcf   :  { %v733_v18 = vmax.f32 %v725_v15, 0.0  ;;  %v602_v19 = vadd.f32 %v601_v2, %v573_v16  ;;  %v609_v44 = vpop.f32.mrf.mxu3  ;;  %v557_v15 = vadd.f32 %v1415_v60, %v1409_v53  ;;  %v718_v60 = vpop.permute.xlu0 %717 }
  0xd1   :  { %v741_v21 = vpack.c.bf16 %v733_v18, %v733_v18  ;;  %v631_v22 = vadd.f32 %v630_v5, %v602_v19  ;;  %v554_v5 = vadd.f32 %v1411_v56, %v1405_v49  ;;  %v640_v52 = vpop.f32.mrf.mxu0 }
  0xd3   :  { %750 = vst.msk [vmem:[%s1464_s5] sm:$0xf] %vm749_vm2, %v741_v21  ;;  %v660_v25 = vadd.f32 %v659_v7, %v631_v22 }
  0xd4   :  { %v575_v26 = vpop.f32.mrf.mxu2 }
  0xd5   :  { %v726_v27 = vadd.f32 %v693_v23, %v660_v25  ;;  %v576_v28 = vadd.f32 %v575_v26, %v547_v24  ;;  %v559_v25 = vadd.f32 %v1417_v0, %v1413_v58  ;;  %v723_v0 = vpop.permute.xlu1 %722 }
  0xd6   :  { %v664_v36 = vpop.f32.mrf.mxu1 }
  0xd7   :  { %v734_v30 = vmax.f32 %v726_v27, 0.0  ;;  %v605_v31 = vadd.f32 %v604_v14, %v576_v28  ;;  %v611_v4 = vpop.f32.mrf.mxu3  ;;  %v713_v14 = vpop.permute.xlu2 %712 }
  0xd9   :  { %v742_v34 = vpack.c.bf16 %v734_v30, %v734_v30  ;;  %v634_v35 = vadd.f32 %v633_v17, %v605_v31  ;;  %v643_v19 = vpop.f32.mrf.mxu0 }
  0xdb   :  { %751 = vst.msk [vmem:[%s1464_s5 + $0x4] sm:$0xf] %vm749_vm2, %v742_v34  ;;  %v663_v38 = vadd.f32 %v662_v20, %v634_v35 }
  0xdc   :  { %v577_v39 = vpop.f32.mrf.mxu2 }
  0xdd   :  { %v727_v40 = vadd.f32 %v698_v33, %v663_v38  ;;  %v578_v41 = vadd.f32 %v577_v39, %v549_v37 }
  0xde   :  { %v667_v55 = vpop.f32.mrf.mxu1 }
  0xdf   :  { %v735_v42 = vmax.f32 %v727_v40, 0.0  ;;  %v607_v43 = vadd.f32 %v606_v29, %v578_v41  ;;  %v614_v56 = vpop.f32.mrf.mxu3 }
  0xe1   :  { %v743_v45 = vpack.c.bf16 %v735_v42, %v735_v42  ;;  %v636_v46 = vadd.f32 %v635_v32, %v607_v43  ;;  %v645_v32 = vpop.f32.mrf.mxu0 }
  0xe3   :  { %752 = vst.msk [vmem:[%s1464_s5 + $0x8] sm:$0xf] %vm749_vm2, %v743_v45  ;;  %v665_v54 = vadd.f32 %v664_v36, %v636_v46 }
  0xe4   :  { %v580_v57 = vpop.f32.mrf.mxu2 }
  0xe5   :  { %v728_v59 = vadd.f32 %v703_v50, %v665_v54  ;;  %v581_v61 = vadd.f32 %v580_v57, %v552_v51 }
  0xe6   :  { %v669_v9 = vpop.f32.mrf.mxu1 }
  0xe7   :  { %v736_v62 = vmax.f32 %v728_v59, 0.0  ;;  %v610_v63 = vadd.f32 %v609_v44, %v581_v61  ;;  %v616_v29 = vpop.f32.mrf.mxu3 }
  0xe9   :  { %v744_v2 = vpack.c.bf16 %v736_v62, %v736_v62  ;;  %v639_v3 = vadd.f32 %v638_v48, %v610_v63 }
  0xeb   :  { %753 = vst.msk [vmem:[%s1464_s5 + $0xc] sm:$0xf] %vm749_vm2, %v744_v2  ;;  %v668_v47 = vadd.f32 %v667_v55, %v639_v3 }
  0xec   :  { %v582_v6 = vpop.f32.mrf.mxu2 }
  0xed   :  { %v729_v7 = vadd.f32 %v708_v1, %v668_v47  ;;  %v583_v8 = vadd.f32 %v582_v6, %v554_v5 }
  0xee   :  { %v672_v22 = vpop.f32.mrf.mxu1 }
  0xef   :  { %v737_v10 = vmax.f32 %v729_v7, 0.0  ;;  %v612_v11 = vadd.f32 %v611_v4, %v583_v8 }
  0xf1   :  { %v745_v12 = vpack.c.bf16 %v737_v10, %v737_v10  ;;  %v641_v13 = vadd.f32 %v640_v52, %v612_v11 }
  0xf3   :  { %754 = vst.msk [vmem:[%s1464_s5 + $0x10] sm:$0xf] %vm749_vm2, %v745_v12  ;;  %v670_v49 = vadd.f32 %v669_v9, %v641_v13 }
  0xf4   :  { %v585_v16 = vpop.f32.mrf.mxu2 }
  0xf5   :  { %v730_v17 = vadd.f32 %v713_v14, %v670_v49  ;;  %v586_v18 = vadd.f32 %v585_v16, %v557_v15 }
  0xf6   :  { %v674_v35 = vpop.f32.mrf.mxu1 }
  0xf7   :  { %v738_v20 = vmax.f32 %v730_v17, 0.0  ;;  %v615_v21 = vadd.f32 %v614_v56, %v586_v18 }
  0xf9   :  { %v746_v23 = vpack.c.bf16 %v738_v20, %v738_v20  ;;  %v644_v24 = vadd.f32 %v643_v19, %v615_v21 }
  0xfb   :  { %755 = vst.msk [vmem:[%s1464_s5 + $0x14] sm:$0xf] %vm749_vm2, %v746_v23  ;;  %v673_v53 = vadd.f32 %v672_v22, %v644_v24 }
  0xfc   :  { %v587_v26 = vpop.f32.mrf.mxu2 }
  0xfd   :  { %v731_v27 = vadd.f32 %v718_v60, %v673_v53  ;;  %v588_v28 = vadd.f32 %v587_v26, %v559_v25 }
  0xff   :  { %v739_v30 = vmax.f32 %v731_v27, 0.0  ;;  %v617_v31 = vadd.f32 %v616_v29, %v588_v28 }
 0x101   :  { %v747_v33 = vpack.c.bf16 %v739_v30, %v739_v30  ;;  %v646_v34 = vadd.f32 %v645_v32, %v617_v31 }
 0x103   :  { %756 = vst.msk [vmem:[%s1464_s5 + $0x18] sm:$0xf] %vm749_vm2, %v747_v33  ;;  %v675_v58 = vadd.f32 %v674_v35, %v646_v34 }
 0x105   :  { %v732_v36 = vadd.f32 %v723_v0, %v675_v58 }
 0x107   :  { %v740_v37 = vmax.f32 %v732_v36, 0.0 }
 0x109   :  { %v748_v38 = vpack.c.bf16 %v740_v37, %v740_v37 }
 0x10b   :  { %757 = vst.msk [vmem:[%s1464_s5 + $0x1c] sm:$0xf] %vm749_vm2, %v748_v38 }

// kernel: _lambda_.21
= control target key start
LH: loop header
LB: loop body
LE: loop exit
PB: predicated region body
PF: predicated region fallthrough
CT: control target
= control target key end

     0   :  { %v167_v2 = vmov 0   ;;  %vm112_vm0 = vcmask 15360   ;;  %vm114_vm1 = vcmask 9216   ;;  %s230_s1 = inlined_call_operand.vmem [shape: bf16[128,2], index: 1, kind: input, shape index: {}]   ;;  %s231_s2 = inlined_call_operand.vmem [shape: f32[10,1], index: 2, kind: input, shape index: {}]   ;;  %s232_s0 = inlined_call_operand.vmem [shape: bf16[10,128], index: 0, kind: input, shape index: {}]   ;;  %s233_s3 = inlined_call_operand.vmem [shape: f32[10,2], index: 3, kind: output, shape index: {}]  }
   0x1   :  { %v164_v0 = vld [vmem:[%s230_s1 + $0x38] sm:$0xff]  ;;  %v163_v1 = vld [vmem:[%s230_s1 + $0x30] sm:$0xff]  ;;  %166 = vset.pattern.permute.xlu0 %v167_v2  ;;  %v32_v3 = vld [vmem:[%s231_s2] sm:$0xff] }
   0x2   :  { %98 = vmatpush.bf16.msra.mxu0 %v164_v0  ;;  %36 = vperm.xlu0 %166, %v32_v3   ;;  %v162_v4 = vld [vmem:[%s230_s1 + $0x28] sm:$0xff]  ;;  %v161_v6 = vld [vmem:[%s230_s1 + $0x20] sm:$0xff]  ;;  %v160_v7 = vld [vmem:[%s230_s1 + $0x18] sm:$0xff] }
   0x3   :  { %v33_v5 = vld [vmem:[%s231_s2 + $0x8] sm:$0x3]  ;;  %v159_v8 = vld [vmem:[%s230_s1 + $0x10] sm:$0xff]  ;;  %v157_v10 = vld [vmem:[%s230_s1] sm:$0xff] }
   0x4   :  { %v158_v9 = vld [vmem:[%s230_s1 + $0x8] sm:$0xff]  ;;  %v122_v11 = vld [vmem:[%s232_s0] sm:$0xf]  ;;  %v156_v12 = vld [vmem:[%s232_s0] sm:$0x10] }
   0x5   :  { %v123_v13 = vor.u32 %v156_v12, %v122_v11 }
   0x6   :  { %99 = vmatpush.bf16.msra.mxu0 %v163_v1 }
   0xa   :  { %100 = vmatpush.bf16.msra.mxu0 %v162_v4  ;;  %41 = vperm.xlu0 %166, %v33_v5  }
   0xe   :  { %101 = vmatpush.bf16.msra.mxu0 %v161_v6 }
  0x12   :  { %102 = vmatpush.bf16.msra.mxu0 %v160_v7 }
  0x16   :  { %103 = vmatpush.bf16.msra.mxu0 %v159_v8 }
  0x1a   :  { %104 = vmatpush.bf16.msra.mxu0 %v158_v9 }
  0x1e   :  { %105 = vmatpush.bf16.msra.mxu0 %v157_v10 }
  0x21   :  { %106 = vmatmul.bf16.vlgmr.msra.gmra.mxu0 %v123_v13 }
  0x74   :  { %v37_v14 = vpop.permute.xlu0 %36 }
  0x7c   :  { %v42_v17 = vpop.permute.xlu0 %41 }
  0x9e   :  { %v107_v15 = vpop.f32.mrf.mxu0 }
  0x9f   :  { %v108_v16 = vadd.f32 %v107_v15, %v37_v14 }
  0xa1   :  { %113 = vst.msk [vmem:[%s233_s3] sm:$0xff] %vm112_vm0, %v108_v16 }
  0xa6   :  { %v109_v18 = vpop.f32.mrf.mxu0 }
  0xa7   :  { %v110_v19 = vadd.f32 %v109_v18, %v42_v17 }
  0xa9   :  { %115 = vst.msk [vmem:[%s233_s3 + $0x8] sm:$0x3] %vm114_vm1, %v110_v19 }

// kernel: _lambda_.19
= control target key start
LH: loop header
LB: loop body
LE: loop exit
PB: predicated region body
PF: predicated region fallthrough
CT: control target
= control target key end

     0   :  { %v1386_v1 = vmov 0   ;;  %vm647_vm0 = vcmask 523264   ;;  %vm949_vm1 = vcmask 11264   ;;  %s1911_s1 = inlined_call_operand.vmem [shape: bf16[576,2], index: 1, kind: input, shape index: {}]   ;;  %s1912_s2 = inlined_call_operand.vmem [shape: f32[128,1], index: 2, kind: input, shape index: {}]   ;;  %s1913_s0 = inlined_call_operand.vmem [shape: bf16[128,576], index: 0, kind: input, shape index: {}]   ;;  %s1914_s3 = inlined_call_operand.vmem [shape: bf16[128,2], index: 3, kind: output, shape index: {}]  }
   0x1   :  { %v1329_v0 = vld [vmem:[%s1911_s1 + $0x38] sm:$0xff]  ;;  %1383 = vset.pattern.permute.xlu0 %v1386_v1  ;;  %1384 = vset.pattern.permute.xlu1 %v1386_v1  ;;  %v135_v2 = vld [vmem:[%s1912_s2] sm:$0xff]  ;;  %v1328_v3 = vld [vmem:[%s1911_s1 + $0x30] sm:$0xff] }
   0x2   :  { %1385 = vset.pattern.permute.xlu2 %v1386_v1  ;;  %1358 = vmatpush.bf16.msra.mxu1 %v1329_v0  ;;  %v137_v4 = vld [vmem:[%s1912_s2 + $0x10] sm:$0xff]  ;;  %v1327_v5 = vld [vmem:[%s1911_s1 + $0x28] sm:$0xff]  ;;  %v138_v7 = vld [vmem:[%s1912_s2 + $0x18] sm:$0xff] }
   0x3   :  { %1359 = vmatpush.bf16.msra.mxu2 %v1329_v0  ;;  %1360 = vmatpush.bf16.msra.mxu3 %v1329_v0  ;;  %v136_v6 = vld [vmem:[%s1912_s2 + $0x8] sm:$0xff]  ;;  %v1326_v8 = vld [vmem:[%s1911_s1 + $0x20] sm:$0xff]  ;;  %v1325_v9 = vld [vmem:[%s1911_s1 + $0x18] sm:$0xff] }
   0x4   :  { %672 = vmatpush.bf16.msra.mxu0 %v1329_v0  ;;  %153 = vperm.xlu0 %1383, %v135_v2   ;;  %v141_v10 = vld [vmem:[%s1912_s2 + $0x30] sm:$0xff]  ;;  %v142_v11 = vld [vmem:[%s1912_s2 + $0x38] sm:$0xff]  ;;  %v1323_v13 = vld [vmem:[%s1911_s1 + $0x8] sm:$0xff] }
   0x5   :  { %163 = vperm.xlu1 %1384, %v137_v4   ;;  %v1324_v12 = vld [vmem:[%s1911_s1 + $0x10] sm:$0xff]  ;;  %v1322_v14 = vld [vmem:[%s1911_s1] sm:$0xff]  ;;  %v144_v18 = vld [vmem:[%s1912_s2 + $0x48] sm:$0xff] }
   0x6   :  { %1361 = vmatpush.bf16.msra.mxu1 %v1328_v3  ;;  %v1012_v15 = vld [vmem:[%s1913_s0 + $0x50] sm:$0xf]  ;;  %v139_v16 = vld [vmem:[%s1912_s2 + $0x20] sm:$0xff]  ;;  %v1304_v21 = vld [vmem:[%s1913_s0 + $0xb0] sm:$0xf0] }
   0x7   :  { %1362 = vmatpush.bf16.msra.mxu2 %v1328_v3  ;;  %1363 = vmatpush.bf16.msra.mxu3 %v1328_v3  ;;  %v1294_v17 = vld [vmem:[%s1913_s0 + $0x60] sm:$0xf0]  ;;  %v145_v19 = vld [vmem:[%s1912_s2 + $0x50] sm:$0xff]  ;;  %v1052_v20 = vld [vmem:[%s1913_s0 + $0xa0] sm:$0xf] }
   0x8   :  { %673 = vmatpush.bf16.msra.mxu0 %v1328_v3  ;;  %173 = vperm.xlu2 %1385, %v139_v16   ;;  %v1092_v22 = vld [vmem:[%s1913_s0 + $0xf0] sm:$0xf]  ;;  %v1314_v23 = vld [vmem:[%s1913_s0 + $0x100] sm:$0xf0]  ;;  %v972_v24 = vld [vmem:[%s1913_s0] sm:$0xf]  ;;  %v1013_v28 = vor.u32 %v1294_v17, %v1012_v15  ;;  %v1053_v29 = vor.u32 %v1304_v21, %v1052_v20 }
   0x9   :  { %v1284_v25 = vld [vmem:[%s1913_s0 + $0x10] sm:$0xf0]  ;;  %v1345_v26 = vld [vmem:[%s1911_s1 + $0xb8] sm:$0xff]  ;;  %v1093_v30 = vor.u32 %v1314_v23, %v1092_v22  ;;  %v147_v36 = vld [vmem:[%s1912_s2 + $0x60] sm:$0xff] }
   0xa   :  { %1364 = vmatpush.bf16.msra.mxu1 %v1327_v5  ;;  %v1337_v27 = vld [vmem:[%s1911_s1 + $0x78] sm:$0xff]  ;;  %v973_v31 = vor.u32 %v1284_v25, %v972_v24  ;;  %v1344_v34 = vld [vmem:[%s1911_s1 + $0xb0] sm:$0xff]  ;;  %v148_v37 = vld [vmem:[%s1912_s2 + $0x68] sm:$0xff] }
   0xb   :  { %1365 = vmatpush.bf16.msra.mxu2 %v1327_v5  ;;  %1366 = vmatpush.bf16.msra.mxu3 %v1327_v5  ;;  %v1353_v32 = vld [vmem:[%s1911_s1 + $0xf8] sm:$0xff]  ;;  %v1336_v35 = vld [vmem:[%s1911_s1 + $0x70] sm:$0xff]  ;;  %v140_v40 = vld [vmem:[%s1912_s2 + $0x28] sm:$0xff] }
   0xc   :  { %674 = vmatpush.bf16.msra.mxu0 %v1327_v5  ;;  %158 = vperm.xlu0 %1383, %v136_v6   ;;  %v1357_v33 = vld [vmem:[%s1911_s1 + $0x118] sm:$0xff]  ;;  %v1352_v38 = vld [vmem:[%s1911_s1 + $0xf0] sm:$0xff]  ;;  %v1343_v41 = vld [vmem:[%s1911_s1 + $0xa8] sm:$0xff] }
   0xd   :  { %168 = vperm.xlu1 %1384, %v138_v7   ;;  %v1356_v39 = vld [vmem:[%s1911_s1 + $0x110] sm:$0xff]  ;;  %v1335_v42 = vld [vmem:[%s1911_s1 + $0x68] sm:$0xff]  ;;  %v1342_v44 = vld [vmem:[%s1911_s1 + $0xa0] sm:$0xff] }
   0xe   :  { %1367 = vmatpush.bf16.msra.mxu1 %v1326_v8  ;;  %v1351_v43 = vld [vmem:[%s1911_s1 + $0xe8] sm:$0xff]  ;;  %v1334_v46 = vld [vmem:[%s1911_s1 + $0x60] sm:$0xff]  ;;  %v1032_v47 = vld [vmem:[%s1913_s0 + $0x78] sm:$0xf] }
   0xf   :  { %1368 = vmatpush.bf16.msra.mxu2 %v1326_v8  ;;  %1369 = vmatpush.bf16.msra.mxu3 %v1326_v8  ;;  %v1355_v45 = vld [vmem:[%s1911_s1 + $0x108] sm:$0xff]  ;;  %v1350_v49 = vld [vmem:[%s1911_s1 + $0xe0] sm:$0xff]  ;;  %v1309_v51 = vld [vmem:[%s1913_s0 + $0xd8] sm:$0xf0] }
  0x10   :  { %675 = vmatpush.bf16.msra.mxu0 %v1326_v8  ;;  %178 = vperm.xlu2 %1385, %v140_v40   ;;  %v1299_v48 = vld [vmem:[%s1913_s0 + $0x88] sm:$0xf0]  ;;  %v1072_v50 = vld [vmem:[%s1913_s0 + $0xc8] sm:$0xf]  ;;  %v1112_v52 = vld [vmem:[%s1913_s0 + $0x118] sm:$0xf] }
  0x11   :  { %v1319_v53 = vld [vmem:[%s1913_s0 + $0x128] sm:$0xf0]  ;;  %v992_v54 = vld [vmem:[%s1913_s0 + $0x28] sm:$0xf]  ;;  %v150_v55 = vld [vmem:[%s1912_s2 + $0x78] sm:$0xff]  ;;  %v1033_v61 = vor.u32 %v1299_v48, %v1032_v47  ;;  %v1073_v62 = vor.u32 %v1309_v51, %v1072_v50 }
  0x12   :  { %1370 = vmatpush.bf16.msra.mxu1 %v1325_v9  ;;  %v1289_v56 = vld [vmem:[%s1913_s0 + $0x38] sm:$0xf0]  ;;  %v1354_v57 = vld [vmem:[%s1911_s1 + $0x100] sm:$0xff]  ;;  %v1113_v63 = vor.u32 %v1319_v53, %v1112_v52  ;;  %v1340_v2 = vld [vmem:[%s1911_s1 + $0x90] sm:$0xff] }
  0x13   :  { %1371 = vmatpush.bf16.msra.mxu2 %v1325_v9  ;;  %1372 = vmatpush.bf16.msra.mxu3 %v1325_v9  ;;  %v143_v58 = vld [vmem:[%s1912_s2 + $0x40] sm:$0xff]  ;;  %v1341_v59 = vld [vmem:[%s1911_s1 + $0x98] sm:$0xff]  ;;  %v993_v0 = vor.u32 %v1289_v56, %v992_v54  ;;  %v1332_v3 = vld [vmem:[%s1911_s1 + $0x50] sm:$0xff] }
  0x14   :  { %676 = vmatpush.bf16.msra.mxu0 %v1325_v9  ;;  %183 = vperm.xlu0 %1383, %v141_v10   ;;  %v1333_v60 = vld [vmem:[%s1911_s1 + $0x58] sm:$0xff]  ;;  %v1348_v4 = vld [vmem:[%s1911_s1 + $0xd0] sm:$0xff]  ;;  %v1339_v6 = vld [vmem:[%s1911_s1 + $0x88] sm:$0xff] }
  0x15   :  { %188 = vperm.xlu1 %1384, %v142_v11   ;;  %v1349_v1 = vld [vmem:[%s1911_s1 + $0xd8] sm:$0xff]  ;;  %v1331_v7 = vld [vmem:[%s1911_s1 + $0x48] sm:$0xff]  ;;  %v1338_v9 = vld [vmem:[%s1911_s1 + $0x80] sm:$0xff] }
  0x16   :  { %1373 = vmatpush.bf16.msra.mxu1 %v1324_v12  ;;  %v146_v5 = vld [vmem:[%s1912_s2 + $0x58] sm:$0xff]  ;;  %v1347_v8 = vld [vmem:[%s1911_s1 + $0xc8] sm:$0xff]  ;;  %v1330_v10 = vld [vmem:[%s1911_s1 + $0x40] sm:$0xff] }
  0x17   :  { %1374 = vmatpush.bf16.msra.mxu2 %v1324_v12  ;;  %1375 = vmatpush.bf16.msra.mxu3 %v1324_v12  ;;  %v1346_v11 = vld [vmem:[%s1911_s1 + $0xc0] sm:$0xff]  ;;  %v1285_v15 = vld [vmem:[%s1913_s0 + $0x18] sm:$0xf0]  ;;  %v1283_v16 = vld [vmem:[%s1913_s0 + $0xc] sm:$0xf] }
  0x18   :  { %677 = vmatpush.bf16.msra.mxu0 %v1324_v12  ;;  %193 = vperm.xlu2 %1385, %v143_v58   ;;  %v1282_v12 = vld [vmem:[%s1913_s0 + $0x4] sm:$0xf]  ;;  %v982_v17 = vld [vmem:[%s1913_s0 + $0x1c] sm:$0xf0]  ;;  %v149_v20 = vld [vmem:[%s1912_s2 + $0x70] sm:$0xff] }
  0x19   :  { %v985_v23 = vor.u32 %v1283_v16, %v982_v17  ;;  %v1287_v25 = vld [vmem:[%s1913_s0 + $0x2c] sm:$0xf]  ;;  %v1034_v50 = vld [vmem:[%s1913_s0 + $0x8c] sm:$0xf0]  ;;  %v1040_v51 = vld [vmem:[%s1913_s0 + $0x80] sm:$0xf] }
  0x1a   :  { %1376 = vmatpush.bf16.msra.mxu1 %v1323_v13  ;;  %v1295_v40 = vld [vmem:[%s1913_s0 + $0x68] sm:$0xf0]  ;;  %v1300_v52 = vld [vmem:[%s1913_s0 + $0x90] sm:$0xf0]  ;;  %v1298_v53 = vld [vmem:[%s1913_s0 + $0x84] sm:$0xf] }
  0x1b   :  { %1377 = vmatpush.bf16.msra.mxu2 %v1323_v13  ;;  %1378 = vmatpush.bf16.msra.mxu3 %v1323_v13  ;;  %v1042_v54 = vld [vmem:[%s1913_s0 + $0x94] sm:$0xf0]  ;;  %v1301_v56 = vld [vmem:[%s1913_s0 + $0x98] sm:$0xf0]  ;;  %v1041_v58 = vor.u32 %v1300_v52, %v1040_v51  ;;  %v1311_v16 = vld [vmem:[%s1913_s0 + $0xe8] sm:$0xf0] }
  0x1c   :  { %678 = vmatpush.bf16.msra.mxu0 %v1323_v13  ;;  %198 = vperm.xlu0 %1383, %v144_v18   ;;  %v974_v13 = vld [vmem:[%s1913_s0 + $0x14] sm:$0xf0]  ;;  %v988_v18 = vld [vmem:[%s1913_s0 + $0x10] sm:$0xf] }
  0x1d   :  { %203 = vperm.xlu1 %1384, %v145_v19   ;;  %v1286_v19 = vld [vmem:[%s1913_s0 + $0x20] sm:$0xf0]  ;;  %v977_v21 = vor.u32 %v1282_v12, %v974_v13  ;;  %v1308_v13 = vld [vmem:[%s1913_s0 + $0xd4] sm:$0xf] }
  0x1e   :  { %1379 = vmatpush.bf16.msra.mxu1 %v1322_v14  ;;  %v989_v24 = vor.u32 %v1286_v19, %v988_v18  ;;  %v1310_v12 = vld [vmem:[%s1913_s0 + $0xe0] sm:$0xf0] }
  0x1f   :  { %1380 = vmatpush.bf16.msra.mxu2 %v1322_v14  ;;  %1381 = vmatpush.bf16.msra.mxu3 %v1322_v14 }
  0x20   :  { %679 = vmatpush.bf16.msra.mxu0 %v1322_v14  ;;  %208 = vperm.xlu2 %1385, %v146_v5   ;;  %v980_v14 = vld [vmem:[%s1913_s0 + $0x8] sm:$0xf] }
  0x21   :  { %690 = vmatmul.bf16.vlgmr.msra.gmra.mxu1 %v1013_v28  ;;  %v981_v22 = vor.u32 %v1285_v15, %v980_v14  ;;  %v1290_v28 = vld [vmem:[%s1913_s0 + $0x40] sm:$0xf0]  ;;  %v1082_v14 = vld [vmem:[%s1913_s0 + $0xe4] sm:$0xf0]  ;;  %v1088_v15 = vld [vmem:[%s1913_s0 + $0xd8] sm:$0xf] }
  0x22   :  { %721 = vmatpush.bf16.msrb.mxu1 %v1337_v27  ;;  %700 = vmatmul.bf16.vlgmr.msra.gmra.mxu2 %v1053_v29  ;;  %v1000_v27 = vld [vmem:[%s1913_s0 + $0x30] sm:$0xf]  ;;  %v1288_v29 = vld [vmem:[%s1913_s0 + $0x34] sm:$0xf]  ;;  %v1085_v19 = vor.u32 %v1308_v13, %v1082_v14 }
  0x23   :  { %770 = vmatpush.bf16.msrb.mxu2 %v1345_v26  ;;  %710 = vmatmul.bf16.vlgmr.msra.gmra.mxu3 %v1093_v30  ;;  %v994_v26 = vld [vmem:[%s1913_s0 + $0x3c] sm:$0xf0]  ;;  %v1002_v30 = vld [vmem:[%s1913_s0 + $0x44] sm:$0xf0] }
  0x24   :  { %680 = vmatmul.bf16.vlgmr.msra.gmra.mxu0 %v973_v31  ;;  %819 = vmatpush.bf16.msrb.mxu3 %v1353_v32  ;;  %v1008_v31 = vld [vmem:[%s1913_s0 + $0x38] sm:$0xf]  ;;  %v1291_v32 = vld [vmem:[%s1913_s0 + $0x48] sm:$0xf0] }
  0x25   :  { %872 = vmatpush.bf16.msrb.mxu0 %v1357_v33  ;;  %213 = vperm.xlu0 %1383, %v147_v36   ;;  %v997_v33 = vor.u32 %v1287_v25, %v994_v26  ;;  %v1009_v36 = vor.u32 %v1291_v32, %v1008_v31  ;;  %v1313_v25 = vld [vmem:[%s1913_s0 + $0xfc] sm:$0xf]  ;;  %v1102_v26 = vld [vmem:[%s1913_s0 + $0x10c] sm:$0xf0] }
  0x26   :  { %722 = vmatpush.bf16.msrb.mxu1 %v1336_v35  ;;  %218 = vperm.xlu1 %1384, %v148_v37   ;;  %v1005_v35 = vor.u32 %v1288_v29, %v1002_v30  ;;  %v1292_v37 = vld [vmem:[%s1913_s0 + $0x54] sm:$0xf]  ;;  %v1105_v32 = vor.u32 %v1313_v25, %v1102_v26 }
  0x27   :  { %771 = vmatpush.bf16.msrb.mxu2 %v1344_v34  ;;  %v1001_v34 = vor.u32 %v1290_v28, %v1000_v27  ;;  %v1108_v27 = vld [vmem:[%s1913_s0 + $0x100] sm:$0xf]  ;;  %v1316_v28 = vld [vmem:[%s1913_s0 + $0x110] sm:$0xf0] }
  0x28   :  { %820 = vmatpush.bf16.msrb.mxu3 %v1352_v38  ;;  %223 = vperm.xlu2 %1385, %v149_v20   ;;  %v1014_v38 = vld [vmem:[%s1913_s0 + $0x64] sm:$0xf0]  ;;  %v1089_v20 = vor.u32 %v1311_v16, %v1088_v15 }
  0x29   :  { %873 = vmatpush.bf16.msrb.mxu0 %v1356_v39  ;;  %v1020_v39 = vld [vmem:[%s1913_s0 + $0x58] sm:$0xf] }
  0x2a   :  { %723 = vmatpush.bf16.msrb.mxu1 %v1335_v42  ;;  %v1022_v42 = vld [vmem:[%s1913_s0 + $0x6c] sm:$0xf0] }
  0x2b   :  { %772 = vmatpush.bf16.msrb.mxu2 %v1343_v41  ;;  %v1293_v41 = vld [vmem:[%s1913_s0 + $0x5c] sm:$0xf] }
  0x2c   :  { %821 = vmatpush.bf16.msrb.mxu3 %v1351_v43  ;;  %v1028_v43 = vld [vmem:[%s1913_s0 + $0x60] sm:$0xf]  ;;  %v1025_v47 = vor.u32 %v1293_v41, %v1022_v42  ;;  %v1320_v42 = vld [vmem:[%s1913_s0 + $0x130] sm:$0xf0] }
  0x2d   :  { %874 = vmatpush.bf16.msrb.mxu0 %v1355_v45  ;;  %228 = vperm.xlu0 %1383, %v150_v55   ;;  %v1017_v45 = vor.u32 %v1292_v37, %v1014_v38  ;;  %v1048_v55 = vld [vmem:[%s1913_s0 + $0x88] sm:$0xf]  ;;  %v1120_v41 = vld [vmem:[%s1913_s0 + $0x120] sm:$0xf] }
  0x2e   :  { %724 = vmatpush.bf16.msrb.mxu1 %v1334_v46  ;;  %v1021_v46 = vor.u32 %v1295_v40, %v1020_v39  ;;  %v1317_v39 = vld [vmem:[%s1913_s0 + $0x11c] sm:$0xf]  ;;  %v1114_v40 = vld [vmem:[%s1913_s0 + $0x12c] sm:$0xf0] }
  0x2f   :  { %773 = vmatpush.bf16.msrb.mxu2 %v1342_v44  ;;  %v1296_v44 = vld [vmem:[%s1913_s0 + $0x70] sm:$0xf0] }
  0x30   :  { %822 = vmatpush.bf16.msrb.mxu3 %v1350_v49  ;;  %v1029_v48 = vor.u32 %v1296_v44, %v1028_v43  ;;  %v1297_v49 = vld [vmem:[%s1913_s0 + $0x7c] sm:$0xf]  ;;  %v1318_v43 = vld [vmem:[%s1913_s0 + $0x124] sm:$0xf]  ;;  %v1122_v44 = vld [vmem:[%s1913_s0 + $0x134] sm:$0xf0] }
  0x31   :  { %875 = vmatpush.bf16.msrb.mxu0 %v1354_v57  ;;  %695 = vmatmul.bf16.gmra.mxu1 %v1033_v61  ;;  %v1037_v57 = vor.u32 %v1297_v49, %v1034_v50  ;;  %v1302_v61 = vld [vmem:[%s1913_s0 + $0xa4] sm:$0xf]  ;;  %v1117_v49 = vor.u32 %v1317_v39, %v1114_v40  ;;  %v1121_v50 = vor.u32 %v1320_v42, %v1120_v41 }
  0x32   :  { %725 = vmatpush.bf16.msrb.mxu1 %v1333_v60  ;;  %705 = vmatmul.bf16.gmra.mxu2 %v1073_v62  ;;  %v1049_v60 = vor.u32 %v1301_v56, %v1048_v55  ;;  %v1054_v62 = vld [vmem:[%s1913_s0 + $0xb4] sm:$0xf0]  ;;  %v1125_v52 = vor.u32 %v1318_v43, %v1122_v44 }
  0x33   :  { %774 = vmatpush.bf16.msrb.mxu2 %v1341_v59  ;;  %715 = vmatmul.bf16.gmra.mxu3 %v1113_v63  ;;  %v1045_v59 = vor.u32 %v1298_v53, %v1042_v54  ;;  %v1060_v63 = vld [vmem:[%s1913_s0 + $0xa8] sm:$0xf]  ;;  %v1057_v5 = vor.u32 %v1302_v61, %v1054_v62 }
  0x34   :  { %685 = vmatmul.bf16.gmra.mxu0 %v993_v0  ;;  %823 = vmatpush.bf16.msrb.mxu3 %v1349_v1  ;;  %v1305_v0 = vld [vmem:[%s1913_s0 + $0xb8] sm:$0xf0]  ;;  %v1303_v1 = vld [vmem:[%s1913_s0 + $0xac] sm:$0xf] }
  0x36   :  { %726 = vmatpush.bf16.msrb.mxu1 %v1332_v3  ;;  %v1068_v3 = vld [vmem:[%s1913_s0 + $0xb0] sm:$0xf] }
  0x37   :  { %775 = vmatpush.bf16.msrb.mxu2 %v1340_v2  ;;  %v1062_v2 = vld [vmem:[%s1913_s0 + $0xbc] sm:$0xf0] }
  0x38   :  { %824 = vmatpush.bf16.msrb.mxu3 %v1348_v4  ;;  %v1306_v4 = vld [vmem:[%s1913_s0 + $0xc0] sm:$0xf0] }
  0x3a   :  { %727 = vmatpush.bf16.msrb.mxu1 %v1331_v7  ;;  %v1065_v7 = vor.u32 %v1303_v1, %v1062_v2 }
  0x3b   :  { %776 = vmatpush.bf16.msrb.mxu2 %v1339_v6  ;;  %v1061_v6 = vor.u32 %v1305_v0, %v1060_v63 }
  0x3c   :  { %825 = vmatpush.bf16.msrb.mxu3 %v1347_v8  ;;  %v1069_v8 = vor.u32 %v1306_v4, %v1068_v3 }
  0x3e   :  { %728 = vmatpush.bf16.msrb.mxu1 %v1330_v10  ;;  %v1074_v10 = vld [vmem:[%s1913_s0 + $0xdc] sm:$0xf0] }
  0x3f   :  { %777 = vmatpush.bf16.msrb.mxu2 %v1338_v9  ;;  %v1307_v9 = vld [vmem:[%s1913_s0 + $0xcc] sm:$0xf] }
  0x40   :  { %826 = vmatpush.bf16.msrb.mxu3 %v1346_v11  ;;  %v1080_v11 = vld [vmem:[%s1913_s0 + $0xd0] sm:$0xf]  ;;  %v1077_v17 = vor.u32 %v1307_v9, %v1074_v10 }
  0x41   :  { %729 = vmatmul.bf16.vlgmr.msrb.gmra.mxu1 %v977_v21  ;;  %v1081_v18 = vor.u32 %v1310_v12, %v1080_v11  ;;  %v1312_v21 = vld [vmem:[%s1913_s0 + $0xf4] sm:$0xf] }
  0x42   :  { %778 = vmatmul.bf16.vlgmr.msrb.gmra.mxu2 %v981_v22  ;;  %v1094_v22 = vld [vmem:[%s1913_s0 + $0x104] sm:$0xf0] }
  0x43   :  { %827 = vmatmul.bf16.vlgmr.msrb.gmra.mxu3 %v985_v23  ;;  %v1100_v23 = vld [vmem:[%s1913_s0 + $0xf8] sm:$0xf]  ;;  %v1097_v29 = vor.u32 %v1312_v21, %v1094_v22 }
  0x44   :  { %1274 = vmatmul.msk.bf16.vlgmr.msrb.gmra.mxu0 %vm647_vm0, %v989_v24  ;;  %v1315_v24 = vld [vmem:[%s1913_s0 + $0x108] sm:$0xf0] }
  0x45   :  { %v1101_v30 = vor.u32 %v1315_v24, %v1100_v23 }
  0x51   :  { %734 = vmatmul.bf16.gmra.mxu1 %v997_v33  ;;  %v1109_v33 = vor.u32 %v1316_v28, %v1108_v27 }
  0x52   :  { %783 = vmatmul.bf16.gmra.mxu2 %v1001_v34 }
  0x53   :  { %832 = vmatmul.bf16.gmra.mxu3 %v1005_v35 }
  0x54   :  { %1275 = vmatmul.msk.bf16.gmra.mxu0 %vm647_vm0, %v1009_v36 }
  0x61   :  { %739 = vmatmul.bf16.gmra.mxu1 %v1017_v45  ;;  %v1128_v45 = vld [vmem:[%s1913_s0 + $0x128] sm:$0xf] }
  0x62   :  { %788 = vmatmul.bf16.gmra.mxu2 %v1021_v46  ;;  %v1321_v46 = vld [vmem:[%s1913_s0 + $0x138] sm:$0xf0] }
  0x63   :  { %837 = vmatmul.bf16.gmra.mxu3 %v1025_v47  ;;  %v1129_v53 = vor.u32 %v1321_v46, %v1128_v45  ;;  %v174_v45 = vpop.permute.xlu2 %173 }
  0x64   :  { %1276 = vmatmul.msk.bf16.gmra.mxu0 %vm647_vm0, %v1029_v48 }
  0x71   :  { %744 = vmatmul.bf16.gmra.mxu1 %v1037_v57 }
  0x72   :  { %793 = vmatmul.bf16.gmra.mxu2 %v1041_v58 }
  0x73   :  { %842 = vmatmul.bf16.gmra.mxu3 %v1045_v59 }
  0x74   :  { %1277 = vmatmul.msk.bf16.gmra.mxu0 %vm647_vm0, %v1049_v60 }
  0x76   :  { %v154_v61 = vpop.permute.xlu0 %153 }
  0x81   :  { %749 = vmatmul.bf16.gmra.mxu1 %v1057_v5 }
  0x82   :  { %798 = vmatmul.bf16.gmra.mxu2 %v1061_v6 }
  0x83   :  { %847 = vmatmul.bf16.gmra.mxu3 %v1065_v7 }
  0x84   :  { %1278 = vmatmul.msk.bf16.gmra.mxu0 %vm647_vm0, %v1069_v8  ;;  %v159_v8 = vpop.permute.xlu0 %158 }
  0x91   :  { %754 = vmatmul.bf16.gmra.mxu1 %v1077_v17  ;;  %v164_v17 = vpop.permute.xlu1 %163 }
  0x92   :  { %803 = vmatmul.bf16.gmra.mxu2 %v1081_v18 }
  0x93   :  { %852 = vmatmul.bf16.gmra.mxu3 %v1085_v19 }
  0x94   :  { %1279 = vmatmul.msk.bf16.gmra.mxu0 %vm647_vm0, %v1089_v20 }
  0x9e   :  { %v1785_v31 = vpop.f32.mrf.mxu1 }
  0xa1   :  { %v681_v34 = vpop.f32.mrf.mxu0  ;;  %759 = vmatmul.bf16.gmra.mxu1 %v1097_v29 }
  0xa2   :  { %808 = vmatmul.bf16.gmra.mxu2 %v1101_v30  ;;  %v682_v0 = vadd.f32 %v681_v34, %v154_v61 }
  0xa3   :  { %857 = vmatmul.bf16.gmra.mxu3 %v1105_v32 }
  0xa4   :  { %1280 = vmatmul.msk.bf16.gmra.mxu0 %vm647_vm0, %v1109_v33  ;;  %v169_v33 = vpop.permute.xlu1 %168 }
  0xa5   :  { %v1788_v35 = vpop.f32.mrf.mxu2 }
  0xa6   :  { %v1790_v36 = vpop.f32.mrf.mxu3  ;;  %v1792_v37 = vpop.f32.mrf.mxu1 }
  0xa9   :  { %v683_v38 = vpop.f32.mrf.mxu0 }
  0xaa   :  { %v684_v9 = vadd.f32 %v683_v38, %v159_v8 }
  0xad   :  { %v1818_v47 = vpop.f32.mrf.mxu2 }
  0xae   :  { %v1820_v48 = vpop.f32.mrf.mxu3  ;;  %v1822_v51 = vpop.f32.mrf.mxu1 }
  0xb1   :  { %v686_v54 = vpop.f32.mrf.mxu0  ;;  %764 = vmatmul.bf16.gmra.mxu1 %v1117_v49 }
  0xb2   :  { %813 = vmatmul.bf16.gmra.mxu2 %v1121_v50  ;;  %v687_v21 = vadd.f32 %v686_v54, %v164_v17 }
  0xb3   :  { %862 = vmatmul.bf16.gmra.mxu3 %v1125_v52  ;;  %v692_v52 = vadd.f32 %v1785_v31, %v174_v45 }
  0xb4   :  { %1281 = vmatmul.msk.bf16.gmra.mxu0 %vm647_vm0, %v1129_v53 }
  0xb5   :  { %v1825_v55 = vpop.f32.mrf.mxu2 }
  0xb6   :  { %v1827_v56 = vpop.f32.mrf.mxu3  ;;  %v1829_v57 = vpop.f32.mrf.mxu1 }
  0xb9   :  { %v688_v58 = vpop.f32.mrf.mxu0 }
  0xba   :  { %v689_v34 = vadd.f32 %v688_v58, %v169_v33 }
  0xbd   :  { %v1831_v59 = vpop.f32.mrf.mxu2 }
  0xbe   :  { %v1833_v60 = vpop.f32.mrf.mxu3  ;;  %v730_v62 = vpop.f32.mrf.mxu1 }
  0xbf   :  { %v731_v1 = vadd.f32 %v730_v62, %v682_v0 }
  0xc1   :  { %v877_v63 = vpop.f32.mrf.mxu0 }
  0xc5   :  { %v779_v2 = vpop.f32.mrf.mxu2 }
  0xc6   :  { %v780_v3 = vadd.f32 %v779_v2, %v731_v1  ;;  %v828_v4 = vpop.f32.mrf.mxu3  ;;  %v732_v5 = vpop.f32.mrf.mxu1 }
  0xc7   :  { %v733_v12 = vadd.f32 %v732_v5, %v684_v9 }
  0xc8   :  { %v829_v6 = vadd.f32 %v828_v4, %v780_v3  ;;  %v179_v4 = vpop.permute.xlu2 %178 }
  0xc9   :  { %v879_v7 = vpop.f32.mrf.mxu0  ;;  %v694_v5 = vadd.f32 %v1792_v37, %v179_v4 }
  0xca   :  { %v878_v10 = vadd.f32 %v877_v63, %v829_v6 }
  0xcc   :  { %v917_v11 = vmax.f32 %v878_v10, 0.0 }
  0xcd   :  { %v781_v13 = vpop.f32.mrf.mxu2 }
  0xce   :  { %v933_v14 = vpack.c.bf16 %v917_v11, %v917_v11  ;;  %v782_v15 = vadd.f32 %v781_v13, %v733_v12  ;;  %v830_v16 = vpop.f32.mrf.mxu3  ;;  %v735_v18 = vpop.f32.mrf.mxu1 }
  0xcf   :  { %v736_v24 = vadd.f32 %v735_v18, %v687_v21 }
  0xd0   :  { %950 = vst.msk [vmem:[%s1914_s3] sm:$0xf] %vm949_vm1, %v933_v14  ;;  %v831_v19 = vadd.f32 %v830_v16, %v782_v15  ;;  %v184_v15 = vpop.permute.xlu0 %183 }
  0xd1   :  { %v882_v20 = vpop.f32.mrf.mxu0  ;;  %v697_v16 = vadd.f32 %v1822_v51, %v184_v15 }
  0xd2   :  { %v880_v22 = vadd.f32 %v879_v7, %v831_v19 }
  0xd4   :  { %v918_v23 = vmax.f32 %v880_v22, 0.0 }
  0xd5   :  { %v784_v25 = vpop.f32.mrf.mxu2 }
  0xd6   :  { %v934_v26 = vpack.c.bf16 %v918_v23, %v918_v23  ;;  %v785_v27 = vadd.f32 %v784_v25, %v736_v24  ;;  %v833_v28 = vpop.f32.mrf.mxu3  ;;  %v737_v29 = vpop.f32.mrf.mxu1 }
  0xd7   :  { %v738_v40 = vadd.f32 %v737_v29, %v689_v34 }
  0xd8   :  { %951 = vst.msk [vmem:[%s1914_s3 + $0x4] sm:$0xf] %vm949_vm1, %v934_v26  ;;  %v834_v30 = vadd.f32 %v833_v28, %v785_v27  ;;  %v189_v26 = vpop.permute.xlu1 %188 }
  0xd9   :  { %v884_v32 = vpop.f32.mrf.mxu0  ;;  %v699_v27 = vadd.f32 %v1829_v57, %v189_v26 }
  0xda   :  { %v883_v38 = vadd.f32 %v882_v20, %v834_v30 }
  0xdc   :  { %v919_v39 = vmax.f32 %v883_v38, 0.0  ;;  %v194_v38 = vpop.permute.xlu2 %193 }
  0xdd   :  { %v786_v41 = vpop.f32.mrf.mxu2 }
  0xde   :  { %v935_v42 = vpack.c.bf16 %v919_v39, %v919_v39  ;;  %v787_v43 = vadd.f32 %v786_v41, %v738_v40  ;;  %v835_v44 = vpop.f32.mrf.mxu3  ;;  %v740_v46 = vpop.f32.mrf.mxu1 }
  0xdf   :  { %v741_v58 = vadd.f32 %v740_v46, %v692_v52 }
  0xe0   :  { %952 = vst.msk [vmem:[%s1914_s3 + $0x8] sm:$0xf] %vm949_vm1, %v935_v42  ;;  %v836_v49 = vadd.f32 %v835_v44, %v787_v43  ;;  %v702_v42 = vadd.f32 %v1788_v35, %v194_v38 }
  0xe1   :  { %v887_v50 = vpop.f32.mrf.mxu0 }
  0xe2   :  { %v885_v53 = vadd.f32 %v884_v32, %v836_v49 }
  0xe4   :  { %v920_v54 = vmax.f32 %v885_v53, 0.0 }
  0xe5   :  { %v789_v61 = vpop.f32.mrf.mxu2 }
  0xe6   :  { %v936_v62 = vpack.c.bf16 %v920_v54, %v920_v54  ;;  %v790_v63 = vadd.f32 %v789_v61, %v741_v58  ;;  %v838_v0 = vpop.f32.mrf.mxu3  ;;  %v742_v1 = vpop.f32.mrf.mxu1 }
  0xe7   :  { %v743_v7 = vadd.f32 %v742_v1, %v694_v5  ;;  %v199_v58 = vpop.permute.xlu0 %198 }
  0xe8   :  { %953 = vst.msk [vmem:[%s1914_s3 + $0xc] sm:$0xf] %vm949_vm1, %v936_v62  ;;  %v839_v2 = vadd.f32 %v838_v0, %v790_v63  ;;  %v704_v61 = vadd.f32 %v1818_v47, %v199_v58 }
  0xe9   :  { %v889_v3 = vpop.f32.mrf.mxu0 }
  0xea   :  { %v888_v6 = vadd.f32 %v887_v50, %v839_v2 }
  0xec   :  { %v921_v31 = vmax.f32 %v888_v6, 0.0 }
  0xed   :  { %v791_v8 = vpop.f32.mrf.mxu2 }
  0xee   :  { %v937_v9 = vpack.c.bf16 %v921_v31, %v921_v31  ;;  %v792_v10 = vadd.f32 %v791_v8, %v743_v7  ;;  %v840_v11 = vpop.f32.mrf.mxu3  ;;  %v745_v12 = vpop.f32.mrf.mxu1 }
  0xef   :  { %v746_v18 = vadd.f32 %v745_v12, %v697_v16  ;;  %v204_v31 = vpop.permute.xlu1 %203  ;;  %v209_v16 = vpop.permute.xlu2 %208 }
  0xf0   :  { %954 = vst.msk [vmem:[%s1914_s3 + $0x10] sm:$0xf] %vm949_vm1, %v937_v9  ;;  %v841_v13 = vadd.f32 %v840_v11, %v792_v10  ;;  %v707_v7 = vadd.f32 %v1825_v55, %v204_v31 }
  0xf1   :  { %v892_v14 = vpop.f32.mrf.mxu0 }
  0xf2   :  { %v890_v17 = vadd.f32 %v889_v3, %v841_v13 }
  0xf4   :  { %v922_v37 = vmax.f32 %v890_v17, 0.0 }
  0xf5   :  { %v794_v19 = vpop.f32.mrf.mxu2 }
  0xf6   :  { %v938_v20 = vpack.c.bf16 %v922_v37, %v922_v37  ;;  %v795_v21 = vadd.f32 %v794_v19, %v746_v18  ;;  %v843_v22 = vpop.f32.mrf.mxu3  ;;  %v747_v23 = vpop.f32.mrf.mxu1  ;;  %v709_v37 = vadd.f32 %v1831_v59, %v209_v16 }
  0xf7   :  { %v748_v29 = vadd.f32 %v747_v23, %v699_v27  ;;  %v219_v38 = vpop.permute.xlu1 %218 }
  0xf8   :  { %955 = vst.msk [vmem:[%s1914_s3 + $0x14] sm:$0xf] %vm949_vm1, %v938_v20  ;;  %v844_v24 = vadd.f32 %v843_v22, %v795_v21 }
  0xf9   :  { %v894_v25 = vpop.f32.mrf.mxu0 }
  0xfa   :  { %v893_v28 = vadd.f32 %v892_v14, %v844_v24  ;;  %v214_v24 = vpop.permute.xlu0 %213 }
  0xfb   :  { %v712_v27 = vadd.f32 %v1790_v36, %v214_v24 }
  0xfc   :  { %v923_v51 = vmax.f32 %v893_v28, 0.0 }
  0xfd   :  { %v796_v30 = vpop.f32.mrf.mxu2 }
  0xfe   :  { %v939_v32 = vpack.c.bf16 %v923_v51, %v923_v51  ;;  %v797_v33 = vadd.f32 %v796_v30, %v748_v29  ;;  %v845_v34 = vpop.f32.mrf.mxu3  ;;  %v750_v39 = vpop.f32.mrf.mxu1 }
  0xff   :  { %v751_v44 = vadd.f32 %v750_v39, %v702_v42 }
 0x100   :  { %956 = vst.msk [vmem:[%s1914_s3 + $0x18] sm:$0xf] %vm949_vm1, %v939_v32  ;;  %v846_v40 = vadd.f32 %v845_v34, %v797_v33 }
 0x101   :  { %v897_v41 = vpop.f32.mrf.mxu0 }
 0x102   :  { %v895_v43 = vadd.f32 %v894_v25, %v846_v40 }
 0x104   :  { %v924_v57 = vmax.f32 %v895_v43, 0.0 }
 0x105   :  { %v799_v45 = vpop.f32.mrf.mxu2 }
 0x106   :  { %v940_v46 = vpack.c.bf16 %v924_v57, %v924_v57  ;;  %v800_v49 = vadd.f32 %v799_v45, %v751_v44  ;;  %v848_v50 = vpop.f32.mrf.mxu3  ;;  %v752_v52 = vpop.f32.mrf.mxu1 }
 0x107   :  { %v753_v63 = vadd.f32 %v752_v52, %v704_v61 }
 0x108   :  { %957 = vst.msk [vmem:[%s1914_s3 + $0x1c] sm:$0xf] %vm949_vm1, %v940_v46  ;;  %v849_v53 = vadd.f32 %v848_v50, %v800_v49  ;;  %v224_v50 = vpop.permute.xlu2 %223 }
 0x109   :  { %v899_v54 = vpop.f32.mrf.mxu0 }
 0x10a   :  { %v898_v62 = vadd.f32 %v897_v41, %v849_v53  ;;  %v714_v41 = vadd.f32 %v1820_v48, %v219_v38 }
 0x10c   :  { %v925_v35 = vmax.f32 %v898_v62, 0.0 }
 0x10d   :  { %v801_v0 = vpop.f32.mrf.mxu2 }
 0x10e   :  { %v941_v1 = vpack.c.bf16 %v925_v35, %v925_v35  ;;  %v802_v2 = vadd.f32 %v801_v0, %v753_v63  ;;  %v850_v3 = vpop.f32.mrf.mxu3  ;;  %v755_v4 = vpop.f32.mrf.mxu1 }
 0x10f   :  { %v756_v9 = vadd.f32 %v755_v4, %v707_v7 }
 0x110   :  { %958 = vst.msk [vmem:[%s1914_s3 + $0x20] sm:$0xf] %vm949_vm1, %v941_v1  ;;  %v851_v5 = vadd.f32 %v850_v3, %v802_v2  ;;  %v229_v1 = vpop.permute.xlu0 %228 }
 0x111   :  { %v902_v6 = vpop.f32.mrf.mxu0 }
 0x112   :  { %v900_v8 = vadd.f32 %v899_v54, %v851_v5  ;;  %v717_v54 = vadd.f32 %v1827_v56, %v224_v50  ;;  %v719_v5 = vadd.f32 %v1833_v60, %v229_v1 }
 0x114   :  { %v926_v47 = vmax.f32 %v900_v8, 0.0 }
 0x115   :  { %v804_v10 = vpop.f32.mrf.mxu2 }
 0x116   :  { %v942_v11 = vpack.c.bf16 %v926_v47, %v926_v47  ;;  %v805_v12 = vadd.f32 %v804_v10, %v756_v9  ;;  %v853_v13 = vpop.f32.mrf.mxu3  ;;  %v757_v14 = vpop.f32.mrf.mxu1 }
 0x117   :  { %v758_v19 = vadd.f32 %v757_v14, %v709_v37 }
 0x118   :  { %959 = vst.msk [vmem:[%s1914_s3 + $0x24] sm:$0xf] %vm949_vm1, %v942_v11  ;;  %v854_v15 = vadd.f32 %v853_v13, %v805_v12 }
 0x119   :  { %v904_v17 = vpop.f32.mrf.mxu0 }
 0x11a   :  { %v903_v18 = vadd.f32 %v902_v6, %v854_v15 }
 0x11c   :  { %v927_v55 = vmax.f32 %v903_v18, 0.0 }
 0x11d   :  { %v806_v20 = vpop.f32.mrf.mxu2 }
 0x11e   :  { %v943_v21 = vpack.c.bf16 %v927_v55, %v927_v55  ;;  %v807_v22 = vadd.f32 %v806_v20, %v758_v19  ;;  %v855_v23 = vpop.f32.mrf.mxu3  ;;  %v760_v25 = vpop.f32.mrf.mxu1 }
 0x11f   :  { %v761_v29 = vadd.f32 %v760_v25, %v712_v27 }
 0x120   :  { %960 = vst.msk [vmem:[%s1914_s3 + $0x28] sm:$0xf] %vm949_vm1, %v943_v21  ;;  %v856_v26 = vadd.f32 %v855_v23, %v807_v22 }
 0x121   :  { %v907_v51 = vpop.f32.mrf.mxu0 }
 0x122   :  { %v905_v28 = vadd.f32 %v904_v17, %v856_v26 }
 0x124   :  { %v928_v59 = vmax.f32 %v905_v28, 0.0 }
 0x125   :  { %v809_v30 = vpop.f32.mrf.mxu2 }
 0x126   :  { %v944_v32 = vpack.c.bf16 %v928_v59, %v928_v59  ;;  %v810_v33 = vadd.f32 %v809_v30, %v761_v29  ;;  %v858_v34 = vpop.f32.mrf.mxu3  ;;  %v762_v39 = vpop.f32.mrf.mxu1 }
 0x127   :  { %v763_v43 = vadd.f32 %v762_v39, %v714_v41 }
 0x128   :  { %961 = vst.msk [vmem:[%s1914_s3 + $0x2c] sm:$0xf] %vm949_vm1, %v944_v32  ;;  %v859_v40 = vadd.f32 %v858_v34, %v810_v33 }
 0x129   :  { %v909_v57 = vpop.f32.mrf.mxu0 }
 0x12a   :  { %v908_v42 = vadd.f32 %v907_v51, %v859_v40 }
 0x12c   :  { %v929_v36 = vmax.f32 %v908_v42, 0.0 }
 0x12d   :  { %v811_v44 = vpop.f32.mrf.mxu2 }
 0x12e   :  { %v945_v45 = vpack.c.bf16 %v929_v36, %v929_v36  ;;  %v812_v46 = vadd.f32 %v811_v44, %v763_v43  ;;  %v860_v49 = vpop.f32.mrf.mxu3  ;;  %v765_v52 = vpop.f32.mrf.mxu1 }
 0x12f   :  { %v766_v61 = vadd.f32 %v765_v52, %v717_v54 }
 0x130   :  { %962 = vst.msk [vmem:[%s1914_s3 + $0x30] sm:$0xf] %vm949_vm1, %v945_v45  ;;  %v861_v53 = vadd.f32 %v860_v49, %v812_v46 }
 0x131   :  { %v912_v2 = vpop.f32.mrf.mxu0 }
 0x132   :  { %v910_v58 = vadd.f32 %v909_v57, %v861_v53 }
 0x134   :  { %v930_v48 = vmax.f32 %v910_v58, 0.0 }
 0x135   :  { %v814_v62 = vpop.f32.mrf.mxu2 }
 0x136   :  { %v946_v35 = vpack.c.bf16 %v930_v48, %v930_v48  ;;  %v815_v63 = vadd.f32 %v814_v62, %v766_v61  ;;  %v863_v0 = vpop.f32.mrf.mxu3  ;;  %v767_v4 = vpop.f32.mrf.mxu1 }
 0x137   :  { %v768_v31 = vadd.f32 %v767_v4, %v719_v5 }
 0x138   :  { %963 = vst.msk [vmem:[%s1914_s3 + $0x34] sm:$0xf] %vm949_vm1, %v946_v35  ;;  %v864_v3 = vadd.f32 %v863_v0, %v815_v63 }
 0x139   :  { %v914_v11 = vpop.f32.mrf.mxu0 }
 0x13a   :  { %v913_v6 = vadd.f32 %v912_v2, %v864_v3 }
 0x13c   :  { %v931_v56 = vmax.f32 %v913_v6, 0.0 }
 0x13d   :  { %v816_v7 = vpop.f32.mrf.mxu2 }
 0x13e   :  { %v947_v8 = vpack.c.bf16 %v931_v56, %v931_v56  ;;  %v817_v47 = vadd.f32 %v816_v7, %v768_v31  ;;  %v865_v9 = vpop.f32.mrf.mxu3 }
 0x140   :  { %964 = vst.msk [vmem:[%s1914_s3 + $0x38] sm:$0xf] %vm949_vm1, %v947_v8  ;;  %v866_v10 = vadd.f32 %v865_v9, %v817_v47 }
 0x142   :  { %v915_v12 = vadd.f32 %v914_v11, %v866_v10 }
 0x144   :  { %v932_v13 = vmax.f32 %v915_v12, 0.0 }
 0x146   :  { %v948_v14 = vpack.c.bf16 %v932_v13, %v932_v13 }
 0x148   :  { %965 = vst.msk [vmem:[%s1914_s3 + $0x3c] sm:$0xf] %vm949_vm1, %v948_v14 }

// kernel: _lambda_.20
= control target key start
LH: loop header
LB: loop body
LE: loop exit
PB: predicated region body
PF: predicated region fallthrough
CT: control target
= control target key end

     0   :  { %vm333_vm0 = vcmask 523264   ;;  %vm1792_vm1 = vcmask 11264   ;;  %s3605_s4 = inlined_call_operand.vmem [shape: bf16[64,2], index: 4, kind: input, shape index: {}]   ;;  %s3606_s1 = inlined_call_operand.vmem [shape: bf16[1152,2], index: 1, kind: input, shape index: {}]   ;;  %s3607_s3 = inlined_call_operand.vmem [shape: bf16[128,64], index: 3, kind: input, shape index: {}]   ;;  %s3608_s0 = inlined_call_operand.vmem [shape: bf16[128,1152], index: 0, kind: input, shape index: {}]   ;;  %s3609_s2 = inlined_call_operand.vmem [shape: f32[128,1], index: 2, kind: input, shape index: {}]   ;;  %s3610_s5 = inlined_call_operand.vmem [shape: bf16[128,2], index: 5, kind: output, shape index: {}]  }
   0x1   :  { %v2600_v0 = vld [vmem:[%s3605_s4 + $0x18] sm:$0xff]  ;;  %v2599_v2 = vld [vmem:[%s3605_s4 + $0x10] sm:$0xff]  ;;  %v2598_v4 = vld [vmem:[%s3605_s4 + $0x8] sm:$0xff] }
   0x2   :  { %v2524_v1 = vld [vmem:[%s3606_s1 + $0x38] sm:$0xff]  ;;  %362 = vmatpush.bf16.msra.mxu0 %v2600_v0  ;;  %v2523_v3 = vld [vmem:[%s3606_s1 + $0x30] sm:$0xff]  ;;  %2601 = vmatpush.bf16.msra.mxu3 %v2600_v0  ;;  %v2522_v5 = vld [vmem:[%s3606_s1 + $0x28] sm:$0xff] }
   0x3   :  { %1207 = vmatpush.bf16.msra.mxu1 %v2524_v1  ;;  %2605 = vmatpush.bf16.msra.mxu2 %v2524_v1  ;;  %v2597_v6 = vld [vmem:[%s3605_s4] sm:$0xff]  ;;  %v2548_v8 = vld [vmem:[%s3606_s1 + $0xf8] sm:$0xff]  ;;  %v2547_v11 = vld [vmem:[%s3606_s1 + $0xf0] sm:$0xff] }
   0x4   :  { %v2521_v7 = vld [vmem:[%s3606_s1 + $0x20] sm:$0xff]  ;;  %v2520_v10 = vld [vmem:[%s3606_s1 + $0x18] sm:$0xff]  ;;  %v2594_v12 = vld [vmem:[%s3607_s3 + $0x28] sm:$0xff] }
   0x5   :  { %v2589_v9 = vld [vmem:[%s3607_s3] sm:$0xff]  ;;  %v2519_v13 = vld [vmem:[%s3606_s1 + $0x10] sm:$0xff]  ;;  %v2540_v14 = vld [vmem:[%s3606_s1 + $0xb8] sm:$0xff] }
   0x6   :  { %363 = vmatpush.bf16.msra.mxu0 %v2599_v2  ;;  %2602 = vmatpush.bf16.msra.mxu3 %v2599_v2  ;;  %v2546_v15 = vld [vmem:[%s3606_s1 + $0xe8] sm:$0xff]  ;;  %v2539_v16 = vld [vmem:[%s3606_s1 + $0xb0] sm:$0xff]  ;;  %v2545_v18 = vld [vmem:[%s3606_s1 + $0xe0] sm:$0xff] }
   0x7   :  { %1208 = vmatpush.bf16.msra.mxu1 %v2523_v3  ;;  %2606 = vmatpush.bf16.msra.mxu2 %v2523_v3  ;;  %v2518_v17 = vld [vmem:[%s3606_s1 + $0x8] sm:$0xff]  ;;  %v2517_v20 = vld [vmem:[%s3606_s1] sm:$0xff]  ;;  %v2556_v25 = vld [vmem:[%s3606_s1 + $0x138] sm:$0xff] }
   0x8   :  { %v2538_v19 = vld [vmem:[%s3606_s1 + $0xa8] sm:$0xff]  ;;  %v1871_v21 = vld [vmem:[%s3608_s0] sm:$0xf]  ;;  %v2449_v22 = vld [vmem:[%s3608_s0 + $0x20] sm:$0xf0] }
   0x9   :  { %v2015_v23 = vld [vmem:[%s3608_s0 + $0x120] sm:$0xf]  ;;  %v2485_v24 = vld [vmem:[%s3608_s0 + $0x140] sm:$0xf0]  ;;  %v2532_v26 = vld [vmem:[%s3606_s1 + $0x78] sm:$0xff]  ;;  %v1872_v28 = vor.u32 %v2449_v22, %v1871_v21 }
   0xa   :  { %364 = vmatpush.bf16.msra.mxu0 %v2598_v4  ;;  %2603 = vmatpush.bf16.msra.mxu3 %v2598_v4  ;;  %v2590_v27 = vld [vmem:[%s3607_s3 + $0x8] sm:$0xff]  ;;  %v2016_v29 = vor.u32 %v2485_v24, %v2015_v23  ;;  %v2555_v30 = vld [vmem:[%s3606_s1 + $0x130] sm:$0xff]  ;;  %v2544_v33 = vld [vmem:[%s3606_s1 + $0xd8] sm:$0xff] }
   0xb   :  { %1209 = vmatpush.bf16.msra.mxu1 %v2522_v5  ;;  %2607 = vmatpush.bf16.msra.mxu2 %v2522_v5  ;;  %v2531_v31 = vld [vmem:[%s3606_s1 + $0x70] sm:$0xff]  ;;  %v2537_v34 = vld [vmem:[%s3606_s1 + $0xa0] sm:$0xff]  ;;  %v2554_v35 = vld [vmem:[%s3606_s1 + $0x128] sm:$0xff] }
   0xc   :  { %v2595_v32 = vld [vmem:[%s3607_s3 + $0x30] sm:$0xff]  ;;  %v2530_v36 = vld [vmem:[%s3606_s1 + $0x68] sm:$0xff]  ;;  %v2536_v37 = vld [vmem:[%s3606_s1 + $0x98] sm:$0xff] }
   0xd   :  { %v2543_v38 = vld [vmem:[%s3606_s1 + $0xd0] sm:$0xff]  ;;  %v2553_v39 = vld [vmem:[%s3606_s1 + $0x120] sm:$0xff]  ;;  %v1907_v42 = vld [vmem:[%s3608_s0 + $0x48] sm:$0xf] }
   0xe   :  { %365 = vmatpush.bf16.msra.mxu0 %v2597_v6  ;;  %2604 = vmatpush.bf16.msra.mxu3 %v2597_v6  ;;  %v2529_v40 = vld [vmem:[%s3606_s1 + $0x60] sm:$0xff]  ;;  %v2535_v41 = vld [vmem:[%s3606_s1 + $0x90] sm:$0xff]  ;;  %v2458_v43 = vld [vmem:[%s3608_s0 + $0x68] sm:$0xf0] }
   0xf   :  { %1210 = vmatpush.bf16.msra.mxu1 %v2521_v7  ;;  %2608 = vmatpush.bf16.msra.mxu2 %v2521_v7  ;;  %v2051_v44 = vld [vmem:[%s3608_s0 + $0x168] sm:$0xf]  ;;  %v2494_v45 = vld [vmem:[%s3608_s0 + $0x188] sm:$0xf0]  ;;  %v2552_v46 = vld [vmem:[%s3606_s1 + $0x118] sm:$0xff]  ;;  %v1908_v49 = vor.u32 %v2458_v43, %v1907_v42 }
  0x10   :  { %v2528_v47 = vld [vmem:[%s3606_s1 + $0x58] sm:$0xff]  ;;  %v2591_v48 = vld [vmem:[%s3607_s3 + $0x10] sm:$0xff]  ;;  %v2052_v50 = vor.u32 %v2494_v45, %v2051_v44  ;;  %v2534_v53 = vld [vmem:[%s3606_s1 + $0x88] sm:$0xff] }
  0x11   :  { %1861 = vmatmul.msk.bf16.vlgmr.msra.gmra.mxu0 %vm333_vm0, %v2589_v9  ;;  %1866 = vmatmul.msk.bf16.vlgmr.msra.gmra.mxu3 %vm333_vm0, %v2594_v12  ;;  %v2527_v51 = vld [vmem:[%s3606_s1 + $0x50] sm:$0xff]  ;;  %v2596_v52 = vld [vmem:[%s3607_s3 + $0x38] sm:$0xff]  ;;  %v2542_v55 = vld [vmem:[%s3606_s1 + $0xc8] sm:$0xff] }
  0x12   :  { %1354 = vmatpush.bf16.msrb.mxu0 %v2548_v8  ;;  %1305 = vmatpush.bf16.msrb.mxu3 %v2540_v14  ;;  %v2551_v54 = vld [vmem:[%s3606_s1 + $0x110] sm:$0xff]  ;;  %v2526_v56 = vld [vmem:[%s3606_s1 + $0x48] sm:$0xff]  ;;  %v2533_v57 = vld [vmem:[%s3606_s1 + $0x80] sm:$0xff] }
  0x13   :  { %1211 = vmatpush.bf16.msra.mxu1 %v2520_v10  ;;  %2609 = vmatpush.bf16.msra.mxu2 %v2520_v10  ;;  %v2550_v58 = vld [vmem:[%s3606_s1 + $0x108] sm:$0xff]  ;;  %v2541_v59 = vld [vmem:[%s3606_s1 + $0xc0] sm:$0xff]  ;;  %v1943_v61 = vld [vmem:[%s3608_s0 + $0x90] sm:$0xf] }
  0x14   :  { %v2525_v60 = vld [vmem:[%s3606_s1 + $0x40] sm:$0xff]  ;;  %v2467_v62 = vld [vmem:[%s3608_s0 + $0xb0] sm:$0xf0]  ;;  %v2087_v63 = vld [vmem:[%s3608_s0 + $0x1b0] sm:$0xf] }
  0x15   :  { %v2503_v0 = vld [vmem:[%s3608_s0 + $0x1d0] sm:$0xf0]  ;;  %v2592_v1 = vld [vmem:[%s3607_s3 + $0x18] sm:$0xff]  ;;  %v1944_v2 = vor.u32 %v2467_v62, %v1943_v61  ;;  %v1879_v3 = vld [vmem:[%s3608_s0 + $0x8] sm:$0xf] }
  0x16   :  { %1355 = vmatpush.bf16.msrb.mxu0 %v2547_v11  ;;  %1306 = vmatpush.bf16.msrb.mxu3 %v2539_v16  ;;  %v2450_v4 = vld [vmem:[%s3608_s0 + $0x28] sm:$0xf0]  ;;  %v2088_v5 = vor.u32 %v2503_v0, %v2087_v63  ;;  %v2549_v7 = vld [vmem:[%s3606_s1 + $0x100] sm:$0xff]  ;;  %v2564_v8 = vld [vmem:[%s3606_s1 + $0x178] sm:$0xff] }
  0x17   :  { %1212 = vmatpush.bf16.msra.mxu1 %v2519_v13  ;;  %2610 = vmatpush.bf16.msra.mxu2 %v2519_v13  ;;  %v1880_v6 = vor.u32 %v2450_v4, %v1879_v3  ;;  %v2572_v9 = vld [vmem:[%s3606_s1 + $0x1b8] sm:$0xff]  ;;  %v2593_v16 = vld [vmem:[%s3607_s3 + $0x20] sm:$0xff]  ;;  %v2563_v22 = vld [vmem:[%s3606_s1 + $0x170] sm:$0xff] }
  0x18   :  { %v2580_v10 = vld [vmem:[%s3606_s1 + $0x1f8] sm:$0xff]  ;;  %v2571_v23 = vld [vmem:[%s3606_s1 + $0x1b0] sm:$0xff]  ;;  %v2469_v61 = vld [vmem:[%s3608_s0 + $0xc0] sm:$0xf0] }
  0x19   :  { %v2588_v11 = vld [vmem:[%s3606_s1 + $0x238] sm:$0xff]  ;;  %v2579_v24 = vld [vmem:[%s3606_s1 + $0x1f0] sm:$0xff]  ;;  %v2486_v3 = vld [vmem:[%s3608_s0 + $0x148] sm:$0xf0] }
  0x1a   :  { %1356 = vmatpush.bf16.msrb.mxu0 %v2546_v15  ;;  %1307 = vmatpush.bf16.msrb.mxu3 %v2538_v19  ;;  %v1979_v12 = vld [vmem:[%s3608_s0 + $0xd8] sm:$0xf]  ;;  %v2476_v13 = vld [vmem:[%s3608_s0 + $0xf8] sm:$0xf0]  ;;  %v2459_v19 = vld [vmem:[%s3608_s0 + $0x70] sm:$0xf0] }
  0x1b   :  { %1213 = vmatpush.bf16.msra.mxu1 %v2518_v17  ;;  %2611 = vmatpush.bf16.msra.mxu2 %v2518_v17  ;;  %v2123_v14 = vld [vmem:[%s3608_s0 + $0x1f8] sm:$0xf]  ;;  %v2512_v15 = vld [vmem:[%s3608_s0 + $0x218] sm:$0xf0]  ;;  %v1980_v17 = vor.u32 %v2476_v13, %v1979_v12  ;;  %v2455_v42 = vld [vmem:[%s3608_s0 + $0x54] sm:$0xf] }
  0x1c   :  { %v1917_v43 = vld [vmem:[%s3608_s0 + $0x74] sm:$0xf0]  ;;  %v2460_v45 = vld [vmem:[%s3608_s0 + $0x78] sm:$0xf0]  ;;  %v2463_v62 = vld [vmem:[%s3608_s0 + $0x94] sm:$0xf] }
  0x1d   :  { %v1923_v44 = vld [vmem:[%s3608_s0 + $0x58] sm:$0xf]  ;;  %v2478_v12 = vld [vmem:[%s3608_s0 + $0x108] sm:$0xf0]  ;;  %v2472_v13 = vld [vmem:[%s3608_s0 + $0xdc] sm:$0xf] }
  0x1e   :  { %1357 = vmatpush.bf16.msrb.mxu0 %v2545_v18  ;;  %1308 = vmatpush.bf16.msrb.mxu3 %v2537_v34  ;;  %v1915_v18 = vld [vmem:[%s3608_s0 + $0x50] sm:$0xf]  ;;  %v1951_v34 = vld [vmem:[%s3608_s0 + $0x98] sm:$0xf] }
  0x1f   :  { %1214 = vmatpush.bf16.msra.mxu1 %v2517_v20  ;;  %2612 = vmatpush.bf16.msra.mxu2 %v2517_v20  ;;  %v2124_v20 = vor.u32 %v2512_v15, %v2123_v14  ;;  %v1916_v21 = vor.u32 %v2459_v19, %v1915_v18  ;;  %v1945_v63 = vld [vmem:[%s3608_s0 + $0xb4] sm:$0xf0]  ;;  %v1981_v14 = vld [vmem:[%s3608_s0 + $0xfc] sm:$0xf0]  ;;  %v2495_v18 = vld [vmem:[%s3608_s0 + $0x190] sm:$0xf0] }
  0x20   :  { %v1948_v4 = vor.u32 %v2463_v62, %v1945_v63  ;;  %v2584_v19 = vld [vmem:[%s3606_s1 + $0x218] sm:$0xff]  ;;  %v2131_v62 = vld [vmem:[%s3608_s0 + $0x200] sm:$0xf]  ;;  %v2513_v63 = vld [vmem:[%s3608_s0 + $0x220] sm:$0xf0] }
  0x21   :  { %1862 = vmatmul.msk.bf16.gmra.mxu0 %vm333_vm0, %v2590_v27  ;;  %1867 = vmatmul.msk.bf16.gmra.mxu3 %vm333_vm0, %v2595_v32  ;;  %v1881_v27 = vld [vmem:[%s3608_s0 + $0x2c] sm:$0xf0] }
  0x22   :  { %1215 = vmatmul.bf16.vlgmr.msra.gmra.mxu1 %v1872_v28  ;;  %1235 = vmatmul.bf16.vlgmr.msra.gmra.mxu2 %v2016_v29  ;;  %v1887_v28 = vld [vmem:[%s3608_s0 + $0x10] sm:$0xf]  ;;  %v2451_v29 = vld [vmem:[%s3608_s0 + $0x30] sm:$0xf0] }
  0x23   :  { %1403 = vmatpush.bf16.msrb.mxu1 %v2556_v25  ;;  %1256 = vmatpush.bf16.msrb.mxu2 %v2532_v26  ;;  %v2587_v25 = vld [vmem:[%s3606_s1 + $0x230] sm:$0xff]  ;;  %v2446_v26 = vld [vmem:[%s3608_s0 + $0xc] sm:$0xf] }
  0x24   :  { %1358 = vmatpush.bf16.msrb.mxu0 %v2544_v33  ;;  %1309 = vmatpush.bf16.msrb.mxu3 %v2536_v37  ;;  %v1884_v32 = vor.u32 %v2446_v26, %v1881_v27  ;;  %v1888_v33 = vor.u32 %v2451_v29, %v1887_v28  ;;  %v2575_v27 = vld [vmem:[%s3606_s1 + $0x1d0] sm:$0xff]  ;;  %v2482_v28 = vld [vmem:[%s3608_s0 + $0x12c] sm:$0xf] }
  0x25   :  { %v2025_v29 = vld [vmem:[%s3608_s0 + $0x14c] sm:$0xf0] }
  0x27   :  { %1404 = vmatpush.bf16.msrb.mxu1 %v2555_v30  ;;  %1257 = vmatpush.bf16.msrb.mxu2 %v2531_v31  ;;  %v2445_v30 = vld [vmem:[%s3608_s0 + $0x4] sm:$0xf]  ;;  %v1873_v31 = vld [vmem:[%s3608_s0 + $0x24] sm:$0xf0] }
  0x28   :  { %1359 = vmatpush.bf16.msrb.mxu0 %v2543_v38  ;;  %1310 = vmatpush.bf16.msrb.mxu3 %v2535_v41  ;;  %v2562_v38 = vld [vmem:[%s3606_s1 + $0x168] sm:$0xff] }
  0x29   :  { %v2586_v41 = vld [vmem:[%s3606_s1 + $0x228] sm:$0xff] }
  0x2b   :  { %1405 = vmatpush.bf16.msrb.mxu1 %v2554_v35  ;;  %1258 = vmatpush.bf16.msrb.mxu2 %v2530_v36  ;;  %v2468_v35 = vld [vmem:[%s3608_s0 + $0xb8] sm:$0xf0]  ;;  %v1876_v36 = vor.u32 %v2445_v30, %v1873_v31  ;;  %v2031_v30 = vld [vmem:[%s3608_s0 + $0x130] sm:$0xf]  ;;  %v2487_v31 = vld [vmem:[%s3608_s0 + $0x150] sm:$0xf0] }
  0x2c   :  { %1311 = vmatpush.bf16.msrb.mxu3 %v2534_v53  ;;  %1360 = vmatpush.bf16.msrb.mxu0 %v2542_v55  ;;  %v1952_v37 = vor.u32 %v2468_v35, %v1951_v34  ;;  %v2569_v55 = vld [vmem:[%s3606_s1 + $0x1a0] sm:$0xff]  ;;  %v2028_v34 = vor.u32 %v2482_v28, %v2025_v29  ;;  %v2032_v35 = vor.u32 %v2487_v31, %v2031_v30 }
  0x2d   :  { %v2581_v31 = vld [vmem:[%s3606_s1 + $0x200] sm:$0xff] }
  0x2f   :  { %1406 = vmatpush.bf16.msrb.mxu1 %v2553_v39  ;;  %1259 = vmatpush.bf16.msrb.mxu2 %v2529_v40  ;;  %v2570_v39 = vld [vmem:[%s3606_s1 + $0x1a8] sm:$0xff] }
  0x30   :  { %1312 = vmatpush.bf16.msrb.mxu3 %v2533_v57  ;;  %1361 = vmatpush.bf16.msrb.mxu0 %v2541_v59  ;;  %v2578_v40 = vld [vmem:[%s3606_s1 + $0x1e8] sm:$0xff]  ;;  %v2585_v57 = vld [vmem:[%s3606_s1 + $0x220] sm:$0xff] }
  0x31   :  { %1863 = vmatmul.msk.bf16.gmra.mxu0 %vm333_vm0, %v2591_v48  ;;  %1868 = vmatmul.msk.bf16.gmra.mxu3 %vm333_vm0, %v2596_v52  ;;  %v1920_v48 = vor.u32 %v2455_v42, %v1917_v43  ;;  %v1953_v59 = vld [vmem:[%s3608_s0 + $0xbc] sm:$0xf0] }
  0x32   :  { %1220 = vmatmul.bf16.gmra.mxu1 %v1908_v49  ;;  %1240 = vmatmul.bf16.gmra.mxu2 %v2052_v50  ;;  %v1924_v49 = vor.u32 %v2460_v45, %v1923_v44  ;;  %v1987_v50 = vld [vmem:[%s3608_s0 + $0xe0] sm:$0xf]  ;;  %v2558_v45 = vld [vmem:[%s3606_s1 + $0x148] sm:$0xff] }
  0x33   :  { %1407 = vmatpush.bf16.msrb.mxu1 %v2552_v46  ;;  %1260 = vmatpush.bf16.msrb.mxu2 %v2528_v47  ;;  %v2454_v46 = vld [vmem:[%s3608_s0 + $0x4c] sm:$0xf]  ;;  %v1909_v47 = vld [vmem:[%s3608_s0 + $0x6c] sm:$0xf0] }
  0x34   :  { %1501 = vmatpush.bf16.msra.mxu3 %v2572_v9  ;;  %1550 = vmatpush.bf16.msra.mxu0 %v2580_v10  ;;  %v1912_v52 = vor.u32 %v2454_v46, %v1909_v47  ;;  %v2473_v9 = vld [vmem:[%s3608_s0 + $0xe4] sm:$0xf]  ;;  %v1989_v10 = vld [vmem:[%s3608_s0 + $0x104] sm:$0xf0] }
  0x35   :  { %v1992_v15 = vor.u32 %v2473_v9, %v1989_v10  ;;  %v2566_v46 = vld [vmem:[%s3606_s1 + $0x188] sm:$0xff] }
  0x37   :  { %1261 = vmatpush.bf16.msrb.mxu2 %v2527_v51  ;;  %1408 = vmatpush.bf16.msrb.mxu1 %v2551_v54  ;;  %v2477_v51 = vld [vmem:[%s3608_s0 + $0x100] sm:$0xf0] }
  0x38   :  { %1502 = vmatpush.bf16.msra.mxu3 %v2571_v23  ;;  %1551 = vmatpush.bf16.msra.mxu0 %v2579_v24  ;;  %v1988_v53 = vor.u32 %v2477_v51, %v1987_v50  ;;  %v2561_v54 = vld [vmem:[%s3606_s1 + $0x160] sm:$0xff]  ;;  %v2559_v23 = vld [vmem:[%s3606_s1 + $0x150] sm:$0xff] }
  0x39   :  { %v2567_v24 = vld [vmem:[%s3606_s1 + $0x190] sm:$0xff] }
  0x3b   :  { %1262 = vmatpush.bf16.msrb.mxu2 %v2526_v56  ;;  %1409 = vmatpush.bf16.msrb.mxu1 %v2550_v58  ;;  %v2577_v56 = vld [vmem:[%s3606_s1 + $0x1e0] sm:$0xff]  ;;  %v2464_v58 = vld [vmem:[%s3608_s0 + $0x9c] sm:$0xf] }
  0x3c   :  { %1503 = vmatpush.bf16.msra.mxu3 %v2570_v39  ;;  %1552 = vmatpush.bf16.msra.mxu0 %v2578_v40  ;;  %v1956_v0 = vor.u32 %v2464_v58, %v1953_v59  ;;  %v2053_v58 = vld [vmem:[%s3608_s0 + $0x18c] sm:$0xf0] }
  0x3f   :  { %1263 = vmatpush.bf16.msrb.mxu2 %v2525_v60  ;;  %1410 = vmatpush.bf16.msrb.mxu1 %v2549_v7  ;;  %v1959_v60 = vld [vmem:[%s3608_s0 + $0xa0] sm:$0xf]  ;;  %v2568_v7 = vld [vmem:[%s3606_s1 + $0x198] sm:$0xff] }
  0x40   :  { %1504 = vmatpush.bf16.msra.mxu3 %v2569_v55  ;;  %1553 = vmatpush.bf16.msra.mxu0 %v2577_v56  ;;  %v2067_v55 = vld [vmem:[%s3608_s0 + $0x178] sm:$0xf]  ;;  %v2496_v56 = vld [vmem:[%s3608_s0 + $0x198] sm:$0xf0] }
  0x41   :  { %1864 = vmatmul.msk.bf16.gmra.mxu0 %vm333_vm0, %v2592_v1  ;;  %1313 = vmatmul.bf16.vlgmr.msrb.gmra.mxu3 %v1880_v6  ;;  %v1960_v1 = vor.u32 %v2469_v61, %v1959_v60  ;;  %v2560_v6 = vld [vmem:[%s3606_s1 + $0x158] sm:$0xff]  ;;  %v2068_v61 = vor.u32 %v2496_v56, %v2067_v55 }
  0x42   :  { %1225 = vmatmul.bf16.gmra.mxu1 %v1944_v2  ;;  %1245 = vmatmul.bf16.gmra.mxu2 %v2088_v5  ;;  %v2023_v2 = vld [vmem:[%s3608_s0 + $0x128] sm:$0xf] }
  0x43   :  { %1452 = vmatpush.bf16.msra.mxu2 %v2564_v8  ;;  %1599 = vmatpush.bf16.msra.mxu1 %v2588_v11  ;;  %v2024_v5 = vor.u32 %v2486_v3, %v2023_v2  ;;  %v2576_v8 = vld [vmem:[%s3606_s1 + $0x1d8] sm:$0xff]  ;;  %v1995_v11 = vld [vmem:[%s3608_s0 + $0xe8] sm:$0xf] }
  0x44   :  { %1505 = vmatpush.bf16.msra.mxu3 %v2568_v7  ;;  %1554 = vmatpush.bf16.msra.mxu0 %v2576_v8  ;;  %v2582_v3 = vld [vmem:[%s3606_s1 + $0x208] sm:$0xff]  ;;  %v2557_v7 = vld [vmem:[%s3606_s1 + $0x140] sm:$0xff] }
  0x45   :  { %v2565_v8 = vld [vmem:[%s3606_s1 + $0x180] sm:$0xff] }
  0x47   :  { %1453 = vmatpush.bf16.msra.mxu2 %v2563_v22  ;;  %1600 = vmatpush.bf16.msra.mxu1 %v2587_v25 }
  0x48   :  { %1506 = vmatpush.bf16.msra.mxu3 %v2567_v24  ;;  %1555 = vmatpush.bf16.msra.mxu0 %v2575_v27 }
  0x4b   :  { %1454 = vmatpush.bf16.msra.mxu2 %v2562_v38  ;;  %1601 = vmatpush.bf16.msra.mxu1 %v2586_v41  ;;  %v2583_v41 = vld [vmem:[%s3606_s1 + $0x210] sm:$0xff] }
  0x4c   :  { %1507 = vmatpush.bf16.msra.mxu3 %v2566_v46  ;;  %v2508_v46 = vld [vmem:[%s3608_s0 + $0x1fc] sm:$0xf] }
  0x4f   :  { %1455 = vmatpush.bf16.msra.mxu2 %v2561_v54  ;;  %1602 = vmatpush.bf16.msra.mxu1 %v2585_v57  ;;  %v2061_v54 = vld [vmem:[%s3608_s0 + $0x194] sm:$0xf0]  ;;  %v2490_v57 = vld [vmem:[%s3608_s0 + $0x16c] sm:$0xf] }
  0x50   :  { %v2056_v2 = vor.u32 %v2490_v57, %v2053_v58  ;;  %1508 = vmatpush.bf16.msra.mxu3 %v2565_v8  ;;  %v2448_v8 = vld [vmem:[%s3608_s0 + $0x1c] sm:$0xf] }
  0x51   :  { %1865 = vmatmul.msk.bf16.gmra.mxu0 %vm333_vm0, %v2593_v16  ;;  %1318 = vmatmul.bf16.gmra.mxu3 %v1916_v21  ;;  %v1996_v16 = vor.u32 %v2478_v12, %v1995_v11  ;;  %v1984_v21 = vor.u32 %v2472_v13, %v1981_v14 }
  0x52   :  { %1230 = vmatmul.bf16.gmra.mxu1 %v1980_v17  ;;  %1250 = vmatmul.bf16.gmra.mxu2 %v2124_v20  ;;  %v2059_v17 = vld [vmem:[%s3608_s0 + $0x170] sm:$0xf] }
  0x53   :  { %1456 = vmatpush.bf16.msra.mxu2 %v2560_v6  ;;  %1603 = vmatpush.bf16.msra.mxu1 %v2584_v19  ;;  %v2060_v22 = vor.u32 %v2495_v18, %v2059_v17  ;;  %v2132_v6 = vor.u32 %v2513_v63, %v2131_v62  ;;  %v2097_v17 = vld [vmem:[%s3608_s0 + $0x1dc] sm:$0xf0]  ;;  %v2505_v19 = vld [vmem:[%s3608_s0 + $0x1e0] sm:$0xf0] }
  0x54   :  { %v2103_v18 = vld [vmem:[%s3608_s0 + $0x1c0] sm:$0xf] }
  0x55   :  { %v2104_v24 = vor.u32 %v2505_v19, %v2103_v18  ;;  %v1967_v19 = vld [vmem:[%s3608_s0 + $0xa8] sm:$0xf] }
  0x57   :  { %1457 = vmatpush.bf16.msra.mxu2 %v2559_v23  ;;  %1604 = vmatpush.bf16.msra.mxu1 %v2583_v41  ;;  %v2509_v41 = vld [vmem:[%s3608_s0 + $0x204] sm:$0xf] }
  0x5b   :  { %1458 = vmatpush.bf16.msra.mxu2 %v2558_v45  ;;  %1605 = vmatpush.bf16.msra.mxu1 %v2582_v3  ;;  %v2514_v45 = vld [vmem:[%s3608_s0 + $0x228] sm:$0xf0] }
  0x5f   :  { %1459 = vmatpush.bf16.msra.mxu2 %v2557_v7  ;;  %1606 = vmatpush.bf16.msra.mxu1 %v2581_v31  ;;  %v1648_v7 = vld [vmem:[%s3609_s2] sm:$0xff] }
  0x61   :  { %1362 = vmatmul.bf16.vlgmr.msrb.gmra.mxu0 %v1884_v32  ;;  %1323 = vmatmul.bf16.gmra.mxu3 %v1952_v37  ;;  %v2481_v32 = vld [vmem:[%s3608_s0 + $0x124] sm:$0xf]  ;;  %v2504_v37 = vld [vmem:[%s3608_s0 + $0x1d8] sm:$0xf0] }
  0x62   :  { %1411 = vmatmul.bf16.vlgmr.msrb.gmra.mxu1 %v1888_v33  ;;  %1264 = vmatmul.bf16.vlgmr.msrb.gmra.mxu2 %v1876_v36  ;;  %v2017_v33 = vld [vmem:[%s3608_s0 + $0x144] sm:$0xf0]  ;;  %v2095_v36 = vld [vmem:[%s3608_s0 + $0x1b8] sm:$0xf] }
  0x63   :  { %v2020_v40 = vor.u32 %v2481_v32, %v2017_v33  ;;  %v2096_v44 = vor.u32 %v2504_v37, %v2095_v36 }
  0x71   :  { %1367 = vmatmul.bf16.gmra.mxu0 %v1920_v48  ;;  %1328 = vmatmul.bf16.gmra.mxu3 %v1988_v53  ;;  %v2491_v53 = vld [vmem:[%s3608_s0 + $0x174] sm:$0xf] }
  0x72   :  { %1416 = vmatmul.bf16.gmra.mxu1 %v1924_v49  ;;  %1269 = vmatmul.bf16.gmra.mxu2 %v1912_v52  ;;  %v2574_v52 = vld [vmem:[%s3606_s1 + $0x1c8] sm:$0xff]  ;;  %v2064_v60 = vor.u32 %v2491_v53, %v2061_v54  ;;  %v1931_v53 = vld [vmem:[%s3608_s0 + $0x60] sm:$0xf]  ;;  %v2461_v54 = vld [vmem:[%s3608_s0 + $0x80] sm:$0xf0] }
  0x73   :  { %1556 = vmatpush.bf16.msra.mxu0 %v2574_v52  ;;  %v1932_v63 = vor.u32 %v2461_v54, %v1931_v53  ;;  %v2479_v53 = vld [vmem:[%s3608_s0 + $0x110] sm:$0xf0] }
  0x81   :  { %1372 = vmatmul.bf16.gmra.mxu0 %v1956_v0  ;;  %1333 = vmatmul.bf16.gmra.mxu3 %v2024_v5 }
  0x82   :  { %1421 = vmatmul.bf16.gmra.mxu1 %v1960_v1  ;;  %1274 = vmatmul.bf16.gmra.mxu2 %v1948_v4 }
  0x8e   :  { %v367_v20 = vpop.f32.mrf.mxu0 }
  0x91   :  { %1377 = vmatmul.bf16.gmra.mxu0 %v1992_v15  ;;  %1338 = vmatmul.bf16.gmra.mxu3 %v2060_v22  ;;  %v2573_v15 = vld [vmem:[%s3606_s1 + $0x1c0] sm:$0xff] }
  0x92   :  { %1426 = vmatmul.bf16.gmra.mxu1 %v1996_v16  ;;  %1279 = vmatmul.bf16.gmra.mxu2 %v1984_v21  ;;  %v2500_v16 = vld [vmem:[%s3608_s0 + $0x1bc] sm:$0xf]  ;;  %v2089_v21 = vld [vmem:[%s3608_s0 + $0x1d4] sm:$0xf0] }
  0x93   :  { %1557 = vmatpush.bf16.msra.mxu0 %v2573_v15  ;;  %v2100_v23 = vor.u32 %v2500_v16, %v2097_v17  ;;  %v1889_v15 = vld [vmem:[%s3608_s0 + $0x34] sm:$0xf0] }
  0x94   :  { %v3034_v26 = vpop.f32.mrf.mxu3 }
  0x96   :  { %v369_v25 = vpop.f32.mrf.mxu0 }
  0x9c   :  { %v3068_v43 = vpop.f32.mrf.mxu3 }
  0x9e   :  { %v372_v38 = vpop.f32.mrf.mxu0 }
  0x9f   :  { %v1216_v39 = vpop.f32.mrf.mxu1 }
  0xa0   :  { %v3066_v42 = vadd.f32 %v1216_v39, %v367_v20  ;;  %v2499_v20 = vld [vmem:[%s3608_s0 + $0x1b4] sm:$0xf] }
  0xa1   :  { %1382 = vmatmul.bf16.gmra.mxu0 %v2028_v34  ;;  %1343 = vmatmul.bf16.gmra.mxu3 %v2096_v44  ;;  %v2092_v30 = vor.u32 %v2499_v20, %v2089_v21  ;;  %v2139_v44 = vld [vmem:[%s3608_s0 + $0x208] sm:$0xf]  ;;  %v2470_v20 = vld [vmem:[%s3608_s0 + $0xc8] sm:$0xf0] }
  0xa2   :  { %1431 = vmatmul.bf16.gmra.mxu1 %v2032_v35  ;;  %1284 = vmatmul.bf16.gmra.mxu2 %v2020_v40  ;;  %v2140_v52 = vor.u32 %v2514_v45, %v2139_v44  ;;  %v2456_v44 = vld [vmem:[%s3608_s0 + $0x5c] sm:$0xf]  ;;  %v1925_v45 = vld [vmem:[%s3608_s0 + $0x7c] sm:$0xf0] }
  0xa4   :  { %v3080_v51 = vpop.f32.mrf.mxu3 }
  0xa5   :  { %v3076_v47 = vpop.f32.mrf.mxu2 }
  0xa6   :  { %v374_v48 = vpop.f32.mrf.mxu0 }
  0xa7   :  { %v1218_v49 = vpop.f32.mrf.mxu1 }
  0xa8   :  { %v3078_v50 = vadd.f32 %v1218_v49, %v369_v25  ;;  %v1895_v25 = vld [vmem:[%s3608_s0 + $0x18] sm:$0xf] }
  0xac   :  { %v399_v5 = vpop.f32.mrf.mxu3 }
  0xad   :  { %v3103_v59 = vpop.f32.mrf.mxu2 }
  0xae   :  { %v377_v0 = vpop.f32.mrf.mxu0 }
  0xaf   :  { %v1221_v1 = vpop.f32.mrf.mxu1 }
  0xb0   :  { %v3114_v4 = vadd.f32 %v1221_v1, %v372_v38 }
  0xb1   :  { %1387 = vmatmul.bf16.gmra.mxu0 %v2064_v60  ;;  %1348 = vmatmul.bf16.gmra.mxu3 %v2132_v6 }
  0xb2   :  { %1436 = vmatmul.bf16.gmra.mxu1 %v2068_v61  ;;  %1289 = vmatmul.bf16.gmra.mxu2 %v2056_v2 }
  0xb4   :  { %v402_v14 = vpop.f32.mrf.mxu3 }
  0xb5   :  { %v1241_v9 = vpop.f32.mrf.mxu2 }
  0xb6   :  { %v3123_v10 = vadd.f32 %v1241_v9, %v3034_v26  ;;  %v379_v11 = vpop.f32.mrf.mxu0  ;;  %v2452_v26 = vld [vmem:[%s3608_s0 + $0x38] sm:$0xf0]  ;;  %v2617_v9 = vmov 0  }
  0xb7   :  { %v1223_v12 = vpop.f32.mrf.mxu1  ;;  %v1896_v34 = vor.u32 %v2452_v26, %v1895_v25  ;;  %2614 = vset.pattern.permute.xlu0 %v2617_v9  ;;  %2615 = vset.pattern.permute.xlu1 %v2617_v9  ;;  %v1968_v26 = vor.u32 %v2470_v20, %v1967_v19 }
  0xb8   :  { %v3125_v13 = vadd.f32 %v1223_v12, %v374_v48  ;;  %v2125_v48 = vld [vmem:[%s3608_s0 + $0x21c] sm:$0xf0]  ;;  %v2453_v12 = vld [vmem:[%s3608_s0 + $0x40] sm:$0xf0]  ;;  %1666 = vperm.xlu0 %2614, %v1648_v7   ;;  %2616 = vset.pattern.permute.xlu2 %v2617_v9 }
  0xb9   :  { %v2128_v58 = vor.u32 %v2508_v46, %v2125_v48 }
  0xbc   :  { %v404_v33 = vpop.f32.mrf.mxu3 }
  0xbd   :  { %v1243_v22 = vpop.f32.mrf.mxu2 }
  0xbe   :  { %v3155_v27 = vadd.f32 %v1243_v22, %v3068_v43  ;;  %v382_v28 = vpop.f32.mrf.mxu0  ;;  %v2133_v43 = vld [vmem:[%s3608_s0 + $0x224] sm:$0xf0] }
  0xbf   :  { %v1226_v29 = vpop.f32.mrf.mxu1 }
  0xc0   :  { %v3160_v32 = vadd.f32 %v1226_v29, %v377_v0 }
  0xc1   :  { %1392 = vmatmul.bf16.gmra.mxu0 %v2100_v23  ;;  %1509 = vmatmul.bf16.vlgmr.msra.gmra.mxu3 %v1896_v34 }
  0xc2   :  { %1441 = vmatmul.bf16.gmra.mxu1 %v2104_v24  ;;  %1294 = vmatmul.bf16.gmra.mxu2 %v2092_v30 }
  0xc4   :  { %v3167_v40 = vpop.f32.mrf.mxu3 }
  0xc5   :  { %v1246_v35 = vpop.f32.mrf.mxu2 }
  0xc6   :  { %v3163_v36 = vadd.f32 %v1246_v35, %v3080_v51  ;;  %v384_v37 = vpop.f32.mrf.mxu0  ;;  %v2136_v51 = vor.u32 %v2509_v41, %v2133_v43  ;;  %v1933_v41 = vld [vmem:[%s3608_s0 + $0x84] sm:$0xf0] }
  0xc7   :  { %v1228_v38 = vpop.f32.mrf.mxu1 }
  0xc8   :  { %v3165_v39 = vadd.f32 %v1228_v38, %v379_v11  ;;  %v1903_v11 = vld [vmem:[%s3608_s0 + $0x20] sm:$0xf]  ;;  %v2457_v38 = vld [vmem:[%s3608_s0 + $0x64] sm:$0xf] }
  0xc9   :  { %v1904_v18 = vor.u32 %v2453_v12, %v1903_v11 }
  0xcc   :  { %v3200_v62 = vpop.f32.mrf.mxu3 }
  0xcd   :  { %v1248_v49 = vpop.f32.mrf.mxu2 }
  0xce   :  { %v3193_v55 = vadd.f32 %v1248_v49, %v399_v5  ;;  %v387_v56 = vpop.f32.mrf.mxu0  ;;  %v1936_v49 = vor.u32 %v2457_v38, %v1933_v41 }
  0xcf   :  { %v1231_v57 = vpop.f32.mrf.mxu1  ;;  %v3196_v60 = vadd.f32 %v3076_v47, %v387_v56 }
  0xd0   :  { %v3198_v61 = vadd.f32 %v1231_v57, %v382_v28  ;;  %v1649_v28 = vld [vmem:[%s3609_s2 + $0x8] sm:$0xff]  ;;  %v1928_v57 = vor.u32 %v2456_v44, %v1925_v45 }
  0xd1   :  { %1397 = vmatmul.bf16.gmra.mxu0 %v2136_v51  ;;  %1514 = vmatmul.bf16.gmra.mxu3 %v1932_v63 }
  0xd2   :  { %1446 = vmatmul.bf16.gmra.mxu1 %v2140_v52  ;;  %1299 = vmatmul.bf16.gmra.mxu2 %v2128_v58  ;;  %v2003_v52 = vld [vmem:[%s3608_s0 + $0xf0] sm:$0xf] }
  0xd3   :  { %1671 = vperm.xlu0 %2614, %v1649_v28  }
  0xd4   :  { %v3209_v47 = vpop.f32.mrf.mxu3 }
  0xd5   :  { %v1251_v0 = vpop.f32.mrf.mxu2 }
  0xd6   :  { %v3202_v1 = vadd.f32 %v1251_v0, %v402_v14  ;;  %v389_v2 = vpop.f32.mrf.mxu0  ;;  %v2447_v14 = vld [vmem:[%s3608_s0 + $0x14] sm:$0xf] }
  0xd7   :  { %v1233_v3 = vpop.f32.mrf.mxu1  ;;  %v3205_v5 = vadd.f32 %v3103_v59, %v389_v2  ;;  %v1897_v59 = vld [vmem:[%s3608_s0 + $0x3c] sm:$0xf0]  ;;  %v1892_v23 = vor.u32 %v2447_v14, %v1889_v15  ;;  %v2004_v2 = vor.u32 %v2479_v53, %v2003_v52  ;;  %v2466_v14 = vld [vmem:[%s3608_s0 + $0xac] sm:$0xf]  ;;  %v1969_v15 = vld [vmem:[%s3608_s0 + $0xcc] sm:$0xf0] }
  0xd8   :  { %v3207_v6 = vadd.f32 %v1233_v3, %v384_v37  ;;  %v1900_v17 = vor.u32 %v2448_v8, %v1897_v59  ;;  %v1650_v37 = vld [vmem:[%s3609_s2 + $0x10] sm:$0xff]  ;;  %v1651_v3 = vld [vmem:[%s3609_s2 + $0x18] sm:$0xff]  ;;  %v2474_v52 = vld [vmem:[%s3608_s0 + $0xec] sm:$0xf] }
  0xd9   :  { %1676 = vperm.xlu1 %2615, %v1650_v37   ;;  %v1997_v53 = vld [vmem:[%s3608_s0 + $0x10c] sm:$0xf0] }
  0xdc   :  { %v3240_v25 = vpop.f32.mrf.mxu3 }
  0xdd   :  { %v1253_v16 = vpop.f32.mrf.mxu2 }
  0xde   :  { %v3238_v21 = vadd.f32 %v1253_v16, %v404_v33  ;;  %v1363_v22 = vpop.f32.mrf.mxu0  ;;  %v1975_v16 = vld [vmem:[%s3608_s0 + $0xb0] sm:$0xf] }
  0xdf   :  { %v1412_v24 = vpop.f32.mrf.mxu1 }
  0xe1   :  { %1558 = vmatmul.bf16.vlgmr.msra.gmra.mxu0 %v1900_v17  ;;  %1519 = vmatmul.bf16.gmra.mxu3 %v1968_v26  ;;  %v2488_v26 = vld [vmem:[%s3608_s0 + $0x158] sm:$0xf0] }
  0xe2   :  { %1607 = vmatmul.bf16.vlgmr.msra.gmra.mxu1 %v1904_v18  ;;  %1460 = vmatmul.bf16.vlgmr.msra.gmra.mxu2 %v1892_v23  ;;  %v1961_v18 = vld [vmem:[%s3608_s0 + $0xc4] sm:$0xf0] }
  0xe3   :  { %1681 = vperm.xlu1 %2615, %v1651_v3  }
  0xe4   :  { %v3246_v34 = vpop.f32.mrf.mxu3 }
  0xe5   :  { %v1265_v29 = vpop.f32.mrf.mxu2 }
  0xe6   :  { %v1266_v30 = vadd.f32 %v1265_v29, %v3066_v42  ;;  %v1365_v31 = vpop.f32.mrf.mxu0  ;;  %v1939_v42 = vld [vmem:[%s3608_s0 + $0x68] sm:$0xf] }
  0xe7   :  { %v1414_v33 = vpop.f32.mrf.mxu1 }
  0xe8   :  { %v1315_v35 = vadd.f32 %v3167_v40, %v1266_v30  ;;  %v2462_v40 = vld [vmem:[%s3608_s0 + $0x88] sm:$0xf0] }
  0xe9   :  { %v1940_v51 = vor.u32 %v2462_v40, %v1939_v42 }
  0xea   :  { %v1364_v43 = vadd.f32 %v1363_v22, %v1315_v35  ;;  %v1972_v22 = vor.u32 %v2466_v14, %v1969_v15  ;;  %v1652_v14 = vld [vmem:[%s3609_s2 + $0x20] sm:$0xff]  ;;  %v1655_v15 = vld [vmem:[%s3609_s2 + $0x38] sm:$0xff] }
  0xeb   :  { %1686 = vperm.xlu2 %2616, %v1652_v14   ;;  %1701 = vperm.xlu1 %2615, %v1655_v15  }
  0xec   :  { %v3270_v46 = vadd.f32 %v1412_v24, %v1364_v43  ;;  %v3279_v63 = vpop.f32.mrf.mxu3  ;;  %v2039_v24 = vld [vmem:[%s3608_s0 + $0x138] sm:$0xf] }
  0xed   :  { %v1267_v48 = vpop.f32.mrf.mxu2  ;;  %v2040_v37 = vor.u32 %v2488_v26, %v2039_v24  ;;  %v2484_v24 = vld [vmem:[%s3608_s0 + $0x13c] sm:$0xf]  ;;  %v2489_v26 = vld [vmem:[%s3608_s0 + $0x160] sm:$0xf0] }
  0xee   :  { %v1268_v54 = vadd.f32 %v1267_v48, %v3078_v50  ;;  %v1368_v56 = vpop.f32.mrf.mxu0  ;;  %v2475_v48 = vld [vmem:[%s3608_s0 + $0xf4] sm:$0xf] }
  0xef   :  { %v1417_v58 = vpop.f32.mrf.mxu1 }
  0xf0   :  { %v1317_v0 = vadd.f32 %v3200_v62, %v1268_v54 }
  0xf1   :  { %1563 = vmatmul.bf16.gmra.mxu0 %v1936_v49  ;;  %1524 = vmatmul.bf16.gmra.mxu3 %v2004_v2  ;;  %v2005_v49 = vld [vmem:[%s3608_s0 + $0x114] sm:$0xf0]  ;;  %v2497_v2 = vld [vmem:[%s3608_s0 + $0x1a0] sm:$0xf0] }
  0xf2   :  { %1612 = vmatmul.bf16.gmra.mxu1 %v1940_v51  ;;  %1465 = vmatmul.bf16.gmra.mxu2 %v1928_v57  ;;  %v1366_v7 = vadd.f32 %v1365_v31, %v1317_v0  ;;  %v2008_v57 = vor.u32 %v2475_v48, %v2005_v49  ;;  %v2075_v0 = vld [vmem:[%s3608_s0 + $0x180] sm:$0xf] }
  0xf4   :  { %v3285_v8 = vadd.f32 %v1414_v33, %v1366_v7  ;;  %v3288_v12 = vpop.f32.mrf.mxu3 }
  0xf5   :  { %v1270_v50 = vpop.f32.mrf.mxu2 }
  0xf6   :  { %v1271_v9 = vadd.f32 %v1270_v50, %v3114_v4  ;;  %v1370_v59 = vpop.f32.mrf.mxu0  ;;  %v2471_v4 = vld [vmem:[%s3608_s0 + $0xd0] sm:$0xf0]  ;;  %v2000_v50 = vor.u32 %v2474_v52, %v1997_v53 }
  0xf7   :  { %v1419_v11 = vpop.f32.mrf.mxu1  ;;  %v1976_v23 = vor.u32 %v2471_v4, %v1975_v16 }
  0xf8   :  { %v1320_v62 = vadd.f32 %v3209_v47, %v1271_v9  ;;  %v2465_v47 = vld [vmem:[%s3608_s0 + $0xa4] sm:$0xf] }
  0xf9   :  { %v1964_v30 = vor.u32 %v2465_v47, %v1961_v18 }
  0xfa   :  { %v1369_v17 = vadd.f32 %v1368_v56, %v1320_v62  ;;  %v2076_v62 = vor.u32 %v2497_v2, %v2075_v0  ;;  %v1658_v0 = vld [vmem:[%s3609_s2 + $0x50] sm:$0xff]  ;;  %v1663_v2 = vld [vmem:[%s3609_s2 + $0x78] sm:$0xff] }
  0xfb   :  { %1716 = vperm.xlu1 %2615, %v1658_v0   ;;  %v1659_v0 = vld [vmem:[%s3609_s2 + $0x58] sm:$0xff] }
  0xfc   :  { %v3309_v19 = vadd.f32 %v1417_v58, %v1369_v17  ;;  %v3318_v33 = vpop.f32.mrf.mxu3 }
  0xfd   :  { %v1272_v20 = vpop.f32.mrf.mxu2 }
  0xfe   :  { %v1273_v28 = vadd.f32 %v1272_v20, %v3125_v13  ;;  %v1373_v29 = vpop.f32.mrf.mxu0 }
  0xff   :  { %v1422_v31 = vpop.f32.mrf.mxu1 }
 0x100   :  { %v1322_v35 = vadd.f32 %v3240_v25, %v1273_v28  ;;  %v1654_v25 = vld [vmem:[%s3609_s2 + $0x30] sm:$0xff] }
 0x101   :  { %1568 = vmatmul.bf16.gmra.mxu0 %v1972_v22  ;;  %1529 = vmatmul.bf16.gmra.mxu3 %v2040_v37  ;;  %v1653_v22 = vld [vmem:[%s3609_s2 + $0x28] sm:$0xff] }
 0x102   :  { %1617 = vmatmul.bf16.gmra.mxu1 %v1976_v23  ;;  %1470 = vmatmul.bf16.gmra.mxu2 %v1964_v30  ;;  %v1371_v38 = vadd.f32 %v1370_v59, %v1322_v35  ;;  %v1657_v23 = vld [vmem:[%s3609_s2 + $0x48] sm:$0xff]  ;;  %v2033_v30 = vld [vmem:[%s3608_s0 + $0x154] sm:$0xf0] }
 0x103   :  { %1696 = vperm.xlu0 %2614, %v1654_v25   ;;  %1691 = vperm.xlu2 %2616, %v1653_v22  }
 0x104   :  { %v3321_v41 = vadd.f32 %v1419_v11, %v1371_v38  ;;  %v3324_v44 = vpop.f32.mrf.mxu3 }
 0x105   :  { %v1275_v42 = vpop.f32.mrf.mxu2 }
 0x106   :  { %v1276_v40 = vadd.f32 %v1275_v42, %v3160_v32  ;;  %v1375_v43 = vpop.f32.mrf.mxu0  ;;  %v2011_v32 = vld [vmem:[%s3608_s0 + $0xf8] sm:$0xf]  ;;  %v2111_v42 = vld [vmem:[%s3608_s0 + $0x1c8] sm:$0xf] }
 0x107   :  { %v1424_v13 = vpop.f32.mrf.mxu1 }
 0x108   :  { %v1325_v45 = vadd.f32 %v3246_v34, %v1276_v40  ;;  %v2480_v34 = vld [vmem:[%s3608_s0 + $0x118] sm:$0xf0]  ;;  %v2506_v40 = vld [vmem:[%s3608_s0 + $0x1e8] sm:$0xf0] }
 0x109   :  { %v2012_v58 = vor.u32 %v2480_v34, %v2011_v32  ;;  %v2112_v32 = vor.u32 %v2506_v40, %v2111_v42  ;;  %v1660_v34 = vld [vmem:[%s3609_s2 + $0x60] sm:$0xff]  ;;  %v2502_v42 = vld [vmem:[%s3608_s0 + $0x1cc] sm:$0xf]  ;;  %v2113_v40 = vld [vmem:[%s3608_s0 + $0x1ec] sm:$0xf0] }
 0x10a   :  { %v1374_v51 = vadd.f32 %v1373_v29, %v1325_v45  ;;  %v2483_v29 = vld [vmem:[%s3608_s0 + $0x134] sm:$0xf] }
 0x10b   :  { %1711 = vperm.xlu0 %2614, %v1657_v23   ;;  %v2036_v45 = vor.u32 %v2483_v29, %v2033_v30 }
 0x10c   :  { %v3348_v54 = vadd.f32 %v1422_v31, %v1374_v51  ;;  %v3357_v59 = vpop.f32.mrf.mxu3 }
 0x10d   :  { %v1277_v56 = vpop.f32.mrf.mxu2 }
 0x10e   :  { %v1278_v3 = vadd.f32 %v1277_v56, %v3165_v39  ;;  %v1378_v7 = vpop.f32.mrf.mxu0 }
 0x10f   :  { %v1427_v9 = vpop.f32.mrf.mxu1 }
 0x110   :  { %v1327_v11 = vadd.f32 %v3279_v63, %v1278_v3  ;;  %v2493_v3 = vld [vmem:[%s3608_s0 + $0x184] sm:$0xf] }
 0x111   :  { %1573 = vmatmul.bf16.gmra.mxu0 %v2008_v57  ;;  %1534 = vmatmul.bf16.gmra.mxu3 %v2076_v62 }
 0x112   :  { %1622 = vmatmul.bf16.gmra.mxu1 %v2012_v58  ;;  %1475 = vmatmul.bf16.gmra.mxu2 %v2000_v50  ;;  %v1376_v39 = vadd.f32 %v1375_v43, %v1327_v11  ;;  %v2069_v11 = vld [vmem:[%s3608_s0 + $0x19c] sm:$0xf0] }
 0x113   :  { %1726 = vperm.xlu0 %2614, %v1660_v34  }
 0x114   :  { %v3366_v16 = vadd.f32 %v1424_v13, %v1376_v39  ;;  %v3369_v18 = vpop.f32.mrf.mxu3 }
 0x115   :  { %v1280_v4 = vpop.f32.mrf.mxu2 }
 0x116   :  { %v1281_v63 = vadd.f32 %v1280_v4, %v3198_v61  ;;  %v1380_v17 = vpop.f32.mrf.mxu0  ;;  %v2041_v61 = vld [vmem:[%s3608_s0 + $0x15c] sm:$0xf0]  ;;  %v2147_v4 = vld [vmem:[%s3608_s0 + $0x210] sm:$0xf] }
 0x117   :  { %v1429_v47 = vpop.f32.mrf.mxu1  ;;  %v2044_v37 = vor.u32 %v2484_v24, %v2041_v61 }
 0x118   :  { %v1330_v20 = vadd.f32 %v3288_v12, %v1281_v63  ;;  %v2047_v12 = vld [vmem:[%s3608_s0 + $0x140] sm:$0xf]  ;;  %v2515_v63 = vld [vmem:[%s3608_s0 + $0x230] sm:$0xf0] }
 0x119   :  { %v2048_v38 = vor.u32 %v2489_v26, %v2047_v12  ;;  %v2148_v61 = vor.u32 %v2515_v63, %v2147_v4  ;;  %v1656_v12 = vld [vmem:[%s3609_s2 + $0x40] sm:$0xff]  ;;  %v1661_v26 = vld [vmem:[%s3609_s2 + $0x68] sm:$0xff]  ;;  %v2141_v4 = vld [vmem:[%s3608_s0 + $0x22c] sm:$0xf0] }
 0x11a   :  { %v1379_v28 = vadd.f32 %v1378_v7, %v1330_v20  ;;  %v2498_v7 = vld [vmem:[%s3608_s0 + $0x1a8] sm:$0xf0]  ;;  %1706 = vperm.xlu2 %2616, %v1656_v12   ;;  %1731 = vperm.xlu1 %2615, %v1661_v26  }
 0x11b   :  { %1741 = vperm.xlu0 %2614, %v1663_v2  }
 0x11c   :  { %v3396_v31 = vadd.f32 %v1427_v9, %v1379_v28  ;;  %v3405_v48 = vpop.f32.mrf.mxu3  ;;  %v2492_v9 = vld [vmem:[%s3608_s0 + $0x17c] sm:$0xf] }
 0x11d   :  { %v1282_v35 = vpop.f32.mrf.mxu2  ;;  %v2072_v20 = vor.u32 %v2492_v9, %v2069_v11  ;;  %v2511_v9 = vld [vmem:[%s3608_s0 + $0x214] sm:$0xf] }
 0x11e   :  { %v1283_v43 = vadd.f32 %v1282_v35, %v3207_v6  ;;  %v1383_v13 = vpop.f32.mrf.mxu0 }
 0x11f   :  { %v1432_v25 = vpop.f32.mrf.mxu1 }
 0x120   :  { %v1332_v49 = vadd.f32 %v3318_v33, %v1283_v43  ;;  %v2119_v43 = vld [vmem:[%s3608_s0 + $0x1d0] sm:$0xf] }
 0x121   :  { %1578 = vmatmul.bf16.gmra.mxu0 %v2044_v37  ;;  %1539 = vmatmul.bf16.gmra.mxu3 %v2112_v32  ;;  %v2116_v32 = vor.u32 %v2502_v42, %v2113_v40 }
 0x122   :  { %1627 = vmatmul.bf16.gmra.mxu1 %v2048_v38  ;;  %1480 = vmatmul.bf16.gmra.mxu2 %v2036_v45  ;;  %v1381_v51 = vadd.f32 %v1380_v17, %v1332_v49  ;;  %v2105_v45 = vld [vmem:[%s3608_s0 + $0x1e4] sm:$0xf0] }
 0x123   :  { %1721 = vperm.xlu2 %2616, %v1659_v0  }
 0x124   :  { %v3411_v52 = vadd.f32 %v1429_v47, %v1381_v51  ;;  %v3414_v58 = vpop.f32.mrf.mxu3 }
 0x125   :  { %v1285_v6 = vpop.f32.mrf.mxu2 }
 0x126   :  { %v1286_v53 = vadd.f32 %v1285_v6, %v3196_v60  ;;  %v1385_v56 = vpop.f32.mrf.mxu0  ;;  %v2077_v60 = vld [vmem:[%s3608_s0 + $0x1a4] sm:$0xf0] }
 0x127   :  { %v1434_v57 = vpop.f32.mrf.mxu1  ;;  %v2080_v15 = vor.u32 %v2493_v3, %v2077_v60 }
 0x128   :  { %v1335_v33 = vadd.f32 %v3324_v44, %v1286_v53  ;;  %v2083_v44 = vld [vmem:[%s3608_s0 + $0x188] sm:$0xf] }
 0x129   :  { %v2084_v39 = vor.u32 %v2498_v7, %v2083_v44 }
 0x12a   :  { %v1384_v50 = vadd.f32 %v1383_v13, %v1335_v33 }
 0x12c   :  { %v3441_v62 = vadd.f32 %v1432_v25, %v1384_v50  ;;  %v3450_v23 = vpop.f32.mrf.mxu3 }
 0x12d   :  { %v1287_v14 = vpop.f32.mrf.mxu2 }
 0x12e   :  { %v1288_v17 = vadd.f32 %v1287_v14, %v3205_v5  ;;  %v1388_v47 = vpop.f32.mrf.mxu0  ;;  %v2149_v14 = vld [vmem:[%s3608_s0 + $0x234] sm:$0xf0] }
 0x12f   :  { %v1437_v22 = vpop.f32.mrf.mxu1 }
 0x130   :  { %v1337_v24 = vadd.f32 %v3357_v59, %v1288_v17 }
 0x131   :  { %1583 = vmatmul.bf16.gmra.mxu0 %v2080_v15  ;;  %1544 = vmatmul.bf16.gmra.mxu3 %v2148_v61 }
 0x132   :  { %1632 = vmatmul.bf16.gmra.mxu1 %v2084_v39  ;;  %1485 = vmatmul.bf16.gmra.mxu2 %v2072_v20  ;;  %v1386_v5 = vadd.f32 %v1385_v56, %v1337_v24  ;;  %v2510_v39 = vld [vmem:[%s3608_s0 + $0x20c] sm:$0xf] }
 0x133   :  { %v2144_v61 = vor.u32 %v2510_v39, %v2141_v4 }
 0x134   :  { %v3459_v28 = vadd.f32 %v1434_v57, %v1386_v5  ;;  %v1349_v37 = vpop.f32.mrf.mxu3 }
 0x135   :  { %v1290_v29 = vpop.f32.mrf.mxu2 }
 0x136   :  { %v1291_v59 = vadd.f32 %v1290_v29, %v3123_v10  ;;  %v1390_v30 = vpop.f32.mrf.mxu0  ;;  %v2507_v10 = vld [vmem:[%s3608_s0 + $0x1f0] sm:$0xf0] }
 0x137   :  { %v1439_v35 = vpop.f32.mrf.mxu1  ;;  %v2120_v34 = vor.u32 %v2507_v10, %v2119_v43 }
 0x138   :  { %v1340_v38 = vadd.f32 %v3369_v18, %v1291_v59  ;;  %v2501_v18 = vld [vmem:[%s3608_s0 + $0x1c4] sm:$0xf] }
 0x139   :  { %v2108_v53 = vor.u32 %v2501_v18, %v2105_v45 }
 0x13a   :  { %v1389_v13 = vadd.f32 %v1388_v47, %v1340_v38  ;;  %v2152_v47 = vor.u32 %v2511_v9, %v2149_v14 }
 0x13c   :  { %v3481_v25 = vadd.f32 %v1437_v22, %v1389_v13  ;;  %v1351_v57 = vpop.f32.mrf.mxu3 }
 0x13d   :  { %v1292_v49 = vpop.f32.mrf.mxu2 }
 0x13e   :  { %v1293_v51 = vadd.f32 %v1292_v49, %v3155_v27  ;;  %v1393_v6 = vpop.f32.mrf.mxu0 }
 0x13f   :  { %v1442_v56 = vpop.f32.mrf.mxu1 }
 0x140   :  { %v1342_v33 = vadd.f32 %v3405_v48, %v1293_v51  ;;  %v1662_v48 = vld [vmem:[%s3609_s2 + $0x70] sm:$0xff] }
 0x141   :  { %1588 = vmatmul.bf16.gmra.mxu0 %v2116_v32  ;;  %1736 = vperm.xlu2 %2616, %v1662_v48  }
 0x142   :  { %1637 = vmatmul.bf16.gmra.mxu1 %v2120_v34  ;;  %1490 = vmatmul.bf16.gmra.mxu2 %v2108_v53  ;;  %v1391_v2 = vadd.f32 %v1390_v30, %v1342_v33  ;;  %v1667_v33 = vpop.permute.xlu0 %1666 }
 0x144   :  { %v3488_v3 = vadd.f32 %v1439_v35, %v1391_v2  ;;  %v1510_v11 = vpop.f32.mrf.mxu3 }
 0x145   :  { %v1295_v60 = vpop.f32.mrf.mxu2 }
 0x146   :  { %v1296_v27 = vadd.f32 %v1295_v60, %v3163_v36  ;;  %v1395_v44 = vpop.f32.mrf.mxu0  ;;  %v2155_v36 = vld [vmem:[%s3608_s0 + $0x218] sm:$0xf] }
 0x147   :  { %v1444_v7 = vpop.f32.mrf.mxu1 }
 0x148   :  { %v1345_v50 = vadd.f32 %v3414_v58, %v1296_v27  ;;  %v2516_v58 = vld [vmem:[%s3608_s0 + $0x238] sm:$0xf0] }
 0x149   :  { %v2156_v20 = vor.u32 %v2516_v58, %v2155_v36 }
 0x14a   :  { %v1394_v15 = vadd.f32 %v1393_v6, %v1345_v50 }
 0x14c   :  { %v3513_v63 = vadd.f32 %v1442_v56, %v1394_v15  ;;  %v1512_v29 = vpop.f32.mrf.mxu3 }
 0x14d   :  { %v1297_v17 = vpop.f32.mrf.mxu2 }
 0x14e   :  { %v1298_v22 = vadd.f32 %v1297_v17, %v3193_v55  ;;  %v1398_v24 = vpop.f32.mrf.mxu0 }
 0x14f   :  { %v1447_v12 = vpop.f32.mrf.mxu1 }
 0x150   :  { %v1347_v26 = vadd.f32 %v3450_v23, %v1298_v22 }
 0x151   :  { %1593 = vmatmul.bf16.gmra.mxu0 %v2152_v47  ;;  %v1677_v47 = vpop.permute.xlu1 %1676 }
 0x152   :  { %1642 = vmatmul.bf16.gmra.mxu1 %v2156_v20  ;;  %1495 = vmatmul.bf16.gmra.mxu2 %v2144_v61  ;;  %v1396_v5 = vadd.f32 %v1395_v44, %v1347_v26 }
 0x154   :  { %v3517_v59 = vadd.f32 %v1444_v7, %v1396_v5  ;;  %v1515_v13 = vpop.f32.mrf.mxu3 }
 0x155   :  { %v1300_v30 = vpop.f32.mrf.mxu2 }
 0x156   :  { %v1301_v35 = vadd.f32 %v1300_v30, %v3202_v1  ;;  %v1400_v38 = vpop.f32.mrf.mxu0 }
 0x157   :  { %v1449_v42 = vpop.f32.mrf.mxu1 }
 0x158   :  { %v1350_v40 = vadd.f32 %v1349_v37, %v1301_v35 }
 0x15a   :  { %v1399_v43 = vadd.f32 %v1398_v24, %v1350_v40  ;;  %v1682_v40 = vpop.permute.xlu1 %1681 }
 0x15c   :  { %v3520_v55 = vadd.f32 %v1447_v12, %v1399_v43  ;;  %v1517_v56 = vpop.f32.mrf.mxu3 }
 0x15d   :  { %v1302_v10 = vpop.f32.mrf.mxu2 }
 0x15e   :  { %v1303_v23 = vadd.f32 %v1302_v10, %v3238_v21  ;;  %v1559_v18 = vpop.f32.mrf.mxu0 }
 0x15f   :  { %v1608_v45 = vpop.f32.mrf.mxu1 }
 0x160   :  { %v1352_v49 = vadd.f32 %v1351_v57, %v1303_v23 }
 0x162   :  { %v1401_v32 = vadd.f32 %v1400_v38, %v1352_v49 }
 0x164   :  { %v3523_v34 = vadd.f32 %v1449_v42, %v1401_v32  ;;  %v1520_v48 = vpop.f32.mrf.mxu3 }
 0x165   :  { %v1461_v51 = vpop.f32.mrf.mxu2 }
 0x166   :  { %v1462_v6 = vadd.f32 %v1461_v51, %v3270_v46  ;;  %v1561_v1 = vpop.f32.mrf.mxu0  ;;  %v1672_v46 = vpop.permute.xlu0 %1671 }
 0x167   :  { %v1610_v53 = vpop.f32.mrf.mxu1  ;;  %v1687_v51 = vpop.permute.xlu2 %1686 }
 0x168   :  { %v1511_v37 = vadd.f32 %v1510_v11, %v1462_v6 }
 0x16a   :  { %v1560_v0 = vadd.f32 %v1559_v18, %v1511_v37 }
 0x16c   :  { %v1609_v2 = vadd.f32 %v1608_v45, %v1560_v0  ;;  %v1522_v24 = vpop.f32.mrf.mxu3 }
 0x16d   :  { %v1463_v60 = vpop.f32.mrf.mxu2 }
 0x16e   :  { %v1744_v27 = vadd.f32 %v1667_v33, %v1609_v2  ;;  %v1464_v21 = vadd.f32 %v1463_v60, %v3285_v8  ;;  %v1564_v44 = vpop.f32.mrf.mxu0 }
 0x16f   :  { %v1613_v7 = vpop.f32.mrf.mxu1 }
 0x170   :  { %v1760_v57 = vmax.f32 %v1744_v27, 0.0  ;;  %v1513_v50 = vadd.f32 %v1512_v29, %v1464_v21 }
 0x172   :  { %v1776_v9 = vpack.c.bf16 %v1760_v57, %v1760_v57  ;;  %v1562_v14 = vadd.f32 %v1561_v1, %v1513_v50 }
 0x174   :  { %1793 = vst.msk [vmem:[%s3610_s5] sm:$0xf] %vm1792_vm1, %v1776_v9  ;;  %v1611_v11 = vadd.f32 %v1610_v53, %v1562_v14 }
 0x175   :  { %v1466_v36 = vpop.f32.mrf.mxu2 }
 0x176   :  { %v1745_v58 = vadd.f32 %v1672_v46, %v1611_v11  ;;  %v1467_v15 = vadd.f32 %v1466_v36, %v3309_v19  ;;  %v1566_v8 = vpop.f32.mrf.mxu0 }
 0x177   :  { %v1615_v39 = vpop.f32.mrf.mxu1 }
 0x178   :  { %v1761_v4 = vmax.f32 %v1745_v58, 0.0  ;;  %v1516_v17 = vadd.f32 %v1515_v13, %v1467_v15  ;;  %v1525_v13 = vpop.f32.mrf.mxu3 }
 0x17a   :  { %v1777_v20 = vpack.c.bf16 %v1761_v4, %v1761_v4  ;;  %v1565_v22 = vadd.f32 %v1564_v44, %v1516_v17 }
 0x17c   :  { %1794 = vst.msk [vmem:[%s3610_s5 + $0x4] sm:$0xf] %vm1792_vm1, %v1777_v20  ;;  %v1614_v61 = vadd.f32 %v1613_v7, %v1565_v22  ;;  %v1692_v7 = vpop.permute.xlu2 %1691 }
 0x17d   :  { %v1468_v12 = vpop.f32.mrf.mxu2 }
 0x17e   :  { %v1746_v26 = vadd.f32 %v1677_v47, %v1614_v61  ;;  %v1469_v5 = vadd.f32 %v1468_v12, %v3321_v41  ;;  %v1569_v29 = vpop.f32.mrf.mxu0 }
 0x17f   :  { %v1618_v19 = vpop.f32.mrf.mxu1 }
 0x180   :  { %v1762_v30 = vmax.f32 %v1746_v26, 0.0  ;;  %v1518_v35 = vadd.f32 %v1517_v56, %v1469_v5  ;;  %v1702_v26 = vpop.permute.xlu1 %1701 }
 0x182   :  { %v1778_v38 = vpack.c.bf16 %v1762_v30, %v1762_v30  ;;  %v1567_v42 = vadd.f32 %v1566_v8, %v1518_v35  ;;  %v1697_v8 = vpop.permute.xlu0 %1696 }
 0x184   :  { %1795 = vst.msk [vmem:[%s3610_s5 + $0x8] sm:$0xf] %vm1792_vm1, %v1778_v38  ;;  %v1616_v43 = vadd.f32 %v1615_v39, %v1567_v42 }
 0x185   :  { %v1471_v10 = vpop.f32.mrf.mxu2 }
 0x186   :  { %v1747_v23 = vadd.f32 %v1682_v40, %v1616_v43  ;;  %v1472_v18 = vadd.f32 %v1471_v10, %v3348_v54  ;;  %v1571_v45 = vpop.f32.mrf.mxu0  ;;  %v1527_v54 = vpop.f32.mrf.mxu3 }
 0x187   :  { %v1620_v41 = vpop.f32.mrf.mxu1 }
 0x188   :  { %v1763_v49 = vmax.f32 %v1747_v23, 0.0  ;;  %v1521_v32 = vadd.f32 %v1520_v48, %v1472_v18 }
 0x18a   :  { %v1779_v6 = vpack.c.bf16 %v1763_v49, %v1763_v49  ;;  %v1570_v1 = vadd.f32 %v1569_v29, %v1521_v32 }
 0x18c   :  { %1796 = vst.msk [vmem:[%s3610_s5 + $0xc] sm:$0xf] %vm1792_vm1, %v1779_v6  ;;  %v1619_v53 = vadd.f32 %v1618_v19, %v1570_v1 }
 0x18d   :  { %v1473_v56 = vpop.f32.mrf.mxu2 }
 0x18e   :  { %v1748_v37 = vadd.f32 %v1687_v51, %v1619_v53  ;;  %v1474_v33 = vadd.f32 %v1473_v56, %v3366_v16  ;;  %v1574_v0 = vpop.f32.mrf.mxu0  ;;  %v1530_v36 = vpop.f32.mrf.mxu3 }
 0x18f   :  { %v1623_v2 = vpop.f32.mrf.mxu1 }
 0x190   :  { %v1764_v60 = vmax.f32 %v1748_v37, 0.0  ;;  %v1523_v27 = vadd.f32 %v1522_v24, %v1474_v33  ;;  %v1712_v37 = vpop.permute.xlu0 %1711 }
 0x192   :  { %v1780_v21 = vpack.c.bf16 %v1764_v60, %v1764_v60  ;;  %v1572_v44 = vadd.f32 %v1571_v45, %v1523_v27 }
 0x194   :  { %1797 = vst.msk [vmem:[%s3610_s5 + $0x10] sm:$0xf] %vm1792_vm1, %v1780_v21  ;;  %v1621_v57 = vadd.f32 %v1620_v41, %v1572_v44 }
 0x195   :  { %v1476_v50 = vpop.f32.mrf.mxu2 }
 0x196   :  { %v1749_v48 = vadd.f32 %v1692_v7, %v1621_v57  ;;  %v1477_v9 = vadd.f32 %v1476_v50, %v3396_v31  ;;  %v1576_v14 = vpop.f32.mrf.mxu0  ;;  %v1532_v5 = vpop.f32.mrf.mxu3 }
 0x197   :  { %v1625_v16 = vpop.f32.mrf.mxu1  ;;  %v1717_v57 = vpop.permute.xlu1 %1716 }
 0x198   :  { %v1765_v46 = vmax.f32 %v1749_v48, 0.0  ;;  %v1526_v11 = vadd.f32 %v1525_v13, %v1477_v9  ;;  %v1707_v13 = vpop.permute.xlu2 %1706 }
 0x19a   :  { %v1781_v58 = vpack.c.bf16 %v1765_v46, %v1765_v46  ;;  %v1575_v15 = vadd.f32 %v1574_v0, %v1526_v11 }
 0x19c   :  { %1798 = vst.msk [vmem:[%s3610_s5 + $0x14] sm:$0xf] %vm1792_vm1, %v1781_v58  ;;  %v1624_v39 = vadd.f32 %v1623_v2, %v1575_v15 }
 0x19d   :  { %v1478_v4 = vpop.f32.mrf.mxu2 }
 0x19e   :  { %v1750_v17 = vadd.f32 %v1697_v8, %v1624_v39  ;;  %v1479_v47 = vadd.f32 %v1478_v4, %v3411_v52  ;;  %v1579_v20 = vpop.f32.mrf.mxu0  ;;  %v1535_v45 = vpop.f32.mrf.mxu3 }
 0x19f   :  { %v1628_v31 = vpop.f32.mrf.mxu1 }
 0x1a0   :  { %v1766_v22 = vmax.f32 %v1750_v17, 0.0  ;;  %v1528_v24 = vadd.f32 %v1527_v54, %v1479_v47  ;;  %v1722_v15 = vpop.permute.xlu2 %1721 }
 0x1a2   :  { %v1782_v61 = vpack.c.bf16 %v1766_v22, %v1766_v22  ;;  %v1577_v12 = vadd.f32 %v1576_v14, %v1528_v24 }
 0x1a4   :  { %1799 = vst.msk [vmem:[%s3610_s5 + $0x18] sm:$0xf] %vm1792_vm1, %v1782_v61  ;;  %v1626_v29 = vadd.f32 %v1625_v16, %v1577_v12  ;;  %v1727_v61 = vpop.permute.xlu0 %1726 }
 0x1a5   :  { %v1481_v19 = vpop.f32.mrf.mxu2 }
 0x1a6   :  { %v1751_v30 = vadd.f32 %v1702_v26, %v1626_v29  ;;  %v1482_v35 = vadd.f32 %v1481_v19, %v3441_v62  ;;  %v1581_v38 = vpop.f32.mrf.mxu0  ;;  %v1537_v54 = vpop.f32.mrf.mxu3 }
 0x1a7   :  { %v1630_v52 = vpop.f32.mrf.mxu1 }
 0x1a8   :  { %v1767_v42 = vmax.f32 %v1751_v30, 0.0  ;;  %v1531_v40 = vadd.f32 %v1530_v36, %v1482_v35 }
 0x1aa   :  { %v1783_v43 = vpack.c.bf16 %v1767_v42, %v1767_v42  ;;  %v1580_v10 = vadd.f32 %v1579_v20, %v1531_v40  ;;  %v1732_v42 = vpop.permute.xlu1 %1731 }
 0x1ac   :  { %1800 = vst.msk [vmem:[%s3610_s5 + $0x1c] sm:$0xf] %vm1792_vm1, %v1783_v43  ;;  %v1629_v23 = vadd.f32 %v1628_v31, %v1580_v10 }
 0x1ad   :  { %v1483_v18 = vpop.f32.mrf.mxu2 }
 0x1ae   :  { %v1752_v41 = vadd.f32 %v1707_v13, %v1629_v23  ;;  %v1484_v49 = vadd.f32 %v1483_v18, %v3459_v28  ;;  %v1584_v32 = vpop.f32.mrf.mxu0  ;;  %v1540_v46 = vpop.f32.mrf.mxu3 }
 0x1af   :  { %v1633_v6 = vpop.f32.mrf.mxu1 }
 0x1b0   :  { %v1768_v62 = vmax.f32 %v1752_v41, 0.0  ;;  %v1533_v51 = vadd.f32 %v1532_v5, %v1484_v49 }
 0x1b2   :  { %v1784_v1 = vpack.c.bf16 %v1768_v62, %v1768_v62  ;;  %v1582_v53 = vadd.f32 %v1581_v38, %v1533_v51  ;;  %v1737_v51 = vpop.permute.xlu2 %1736 }
 0x1b4   :  { %1801 = vst.msk [vmem:[%s3610_s5 + $0x20] sm:$0xf] %vm1792_vm1, %v1784_v1  ;;  %v1631_v56 = vadd.f32 %v1630_v52, %v1582_v53 }
 0x1b5   :  { %v1486_v33 = vpop.f32.mrf.mxu2 }
 0x1b6   :  { %v1753_v0 = vadd.f32 %v1712_v37, %v1631_v56  ;;  %v1487_v2 = vadd.f32 %v1486_v33, %v3481_v25  ;;  %v1586_v27 = vpop.f32.mrf.mxu0  ;;  %v1542_v24 = vpop.f32.mrf.mxu3 }
 0x1b7   :  { %v1635_v7 = vpop.f32.mrf.mxu1 }
 0x1b8   :  { %v1769_v60 = vmax.f32 %v1753_v0, 0.0  ;;  %v1536_v28 = vadd.f32 %v1535_v45, %v1487_v2 }
 0x1ba   :  { %v1785_v21 = vpack.c.bf16 %v1769_v60, %v1769_v60  ;;  %v1585_v44 = vadd.f32 %v1584_v32, %v1536_v28  ;;  %v1742_v28 = vpop.permute.xlu0 %1741 }
 0x1bc   :  { %1802 = vst.msk [vmem:[%s3610_s5 + $0x24] sm:$0xf] %vm1792_vm1, %v1785_v21  ;;  %v1634_v50 = vadd.f32 %v1633_v6, %v1585_v44 }
 0x1bd   :  { %v1488_v48 = vpop.f32.mrf.mxu2 }
 0x1be   :  { %v1754_v9 = vadd.f32 %v1717_v57, %v1634_v50  ;;  %v1489_v14 = vadd.f32 %v1488_v48, %v3488_v3  ;;  %v1589_v58 = vpop.f32.mrf.mxu0  ;;  %v1545_v43 = vpop.f32.mrf.mxu3 }
 0x1bf   :  { %v1638_v39 = vpop.f32.mrf.mxu1 }
 0x1c0   :  { %v1770_v16 = vmax.f32 %v1754_v9, 0.0  ;;  %v1538_v25 = vadd.f32 %v1537_v54, %v1489_v14 }
 0x1c2   :  { %v1786_v11 = vpack.c.bf16 %v1770_v16, %v1770_v16  ;;  %v1587_v36 = vadd.f32 %v1586_v27, %v1538_v25 }
 0x1c4   :  { %1803 = vst.msk [vmem:[%s3610_s5 + $0x28] sm:$0xf] %vm1792_vm1, %v1786_v11  ;;  %v1636_v8 = vadd.f32 %v1635_v7, %v1587_v36 }
 0x1c5   :  { %v1491_v4 = vpop.f32.mrf.mxu2 }
 0x1c6   :  { %v1755_v17 = vadd.f32 %v1722_v15, %v1636_v8  ;;  %v1492_v47 = vadd.f32 %v1491_v4, %v3513_v63  ;;  %v1591_v26 = vpop.f32.mrf.mxu0  ;;  %v1547_v56 = vpop.f32.mrf.mxu3 }
 0x1c7   :  { %v1640_v30 = vpop.f32.mrf.mxu1 }
 0x1c8   :  { %v1771_v20 = vmax.f32 %v1755_v17, 0.0  ;;  %v1541_v3 = vadd.f32 %v1540_v46, %v1492_v47 }
 0x1ca   :  { %v1787_v31 = vpack.c.bf16 %v1771_v20, %v1771_v20  ;;  %v1590_v22 = vadd.f32 %v1589_v58, %v1541_v3 }
 0x1cc   :  { %1804 = vst.msk [vmem:[%s3610_s5 + $0x2c] sm:$0xf] %vm1792_vm1, %v1787_v31  ;;  %v1639_v12 = vadd.f32 %v1638_v39, %v1590_v22 }
 0x1cd   :  { %v1493_v5 = vpop.f32.mrf.mxu2 }
 0x1ce   :  { %v1756_v29 = vadd.f32 %v1727_v61, %v1639_v12  ;;  %v1494_v19 = vadd.f32 %v1493_v5, %v3517_v59  ;;  %v1594_v18 = vpop.f32.mrf.mxu0 }
 0x1cf   :  { %v1643_v41 = vpop.f32.mrf.mxu1 }
 0x1d0   :  { %v1772_v35 = vmax.f32 %v1756_v29, 0.0  ;;  %v1543_v63 = vadd.f32 %v1542_v24, %v1494_v19 }
 0x1d2   :  { %v1788_v38 = vpack.c.bf16 %v1772_v35, %v1772_v35  ;;  %v1592_v52 = vadd.f32 %v1591_v26, %v1543_v63 }
 0x1d4   :  { %1805 = vst.msk [vmem:[%s3610_s5 + $0x30] sm:$0xf] %vm1792_vm1, %v1788_v38  ;;  %v1641_v40 = vadd.f32 %v1640_v30, %v1592_v52 }
 0x1d5   :  { %v1496_v10 = vpop.f32.mrf.mxu2 }
 0x1d6   :  { %v1757_v13 = vadd.f32 %v1732_v42, %v1641_v40  ;;  %v1497_v23 = vadd.f32 %v1496_v10, %v3520_v55  ;;  %v1596_v33 = vpop.f32.mrf.mxu0 }
 0x1d7   :  { %v1645_v54 = vpop.f32.mrf.mxu1 }
 0x1d8   :  { %v1773_v45 = vmax.f32 %v1757_v13, 0.0  ;;  %v1546_v59 = vadd.f32 %v1545_v43, %v1497_v23 }
 0x1da   :  { %v1789_v49 = vpack.c.bf16 %v1773_v45, %v1773_v45  ;;  %v1595_v32 = vadd.f32 %v1594_v18, %v1546_v59 }
 0x1dc   :  { %1806 = vst.msk [vmem:[%s3610_s5 + $0x34] sm:$0xf] %vm1792_vm1, %v1789_v49  ;;  %v1644_v62 = vadd.f32 %v1643_v41, %v1595_v32 }
 0x1dd   :  { %v1498_v6 = vpop.f32.mrf.mxu2 }
 0x1de   :  { %v1758_v1 = vadd.f32 %v1737_v51, %v1644_v62  ;;  %v1499_v53 = vadd.f32 %v1498_v6, %v3523_v34 }
 0x1e0   :  { %v1774_v37 = vmax.f32 %v1758_v1, 0.0  ;;  %v1548_v55 = vadd.f32 %v1547_v56, %v1499_v53 }
 0x1e2   :  { %v1790_v0 = vpack.c.bf16 %v1774_v37, %v1774_v37  ;;  %v1597_v2 = vadd.f32 %v1596_v33, %v1548_v55 }
 0x1e4   :  { %1807 = vst.msk [vmem:[%s3610_s5 + $0x38] sm:$0xf] %vm1792_vm1, %v1790_v0  ;;  %v1646_v60 = vadd.f32 %v1645_v54, %v1597_v2 }
 0x1e6   :  { %v1759_v27 = vadd.f32 %v1742_v28, %v1646_v60 }
 0x1e8   :  { %v1775_v21 = vmax.f32 %v1759_v27, 0.0 }
 0x1ea   :  { %v1791_v44 = vpack.c.bf16 %v1775_v21, %v1775_v21 }
 0x1ec   :  { %1808 = vst.msk [vmem:[%s3610_s5 + $0x3c] sm:$0xf] %vm1792_vm1, %v1791_v44 }

</bundles_post_ra>
